<compile_context>
chip_gen: v5e
topology: v5e:2x2
jax: 0.10.0
libtpu: 0.0.40
codegen_flags: <defaults>
</compile_context>

<pallas_src>
import functools
import numpy as np
import jax
import jax.numpy as jnp
from jax.experimental import pallas as pl
from jax.experimental.pallas import tpu as pltpu

KH, KW, KZ = 5, 5, 3        # depthwise kernel_size = (5, 5, 3) -> plain dwconv branch
BN_EPS = 1e-5               # nn.BatchNorm3d default eps


# ---------------------------------------------------------------------------
# exact GELU (PyTorch nn.GELU default = erf form); erf via Abramowitz-Stegun
# 7.1.26 (|err| < 1.5e-7).  Divide = EUP approx reciprocal + 1 Newton step,
# exp also on the EUP slot -> the saturated VALU slot stays free.
# ---------------------------------------------------------------------------
def _gelu_erf(x):
    a1, a2, a3, a4, a5 = 0.254829592, -0.284496736, 1.421413741, -1.453152027, 1.061405429
    p = 0.3275911
    ax = jnp.abs(x) * np.float32(1.0 / np.sqrt(2.0))
    d = 1.0 + p * ax
    t0 = pl.reciprocal(d, approx=True)        # EUP seed
    t = t0 * (2.0 - d * t0)                   # one Newton step -> ~f32 accuracy
    poly = ((((a5 * t + a4) * t + a3) * t + a2) * t + a1) * t
    erf_ax = 1.0 - poly * jnp.exp(-ax * ax)   # exp on EUP
    erf_x = jnp.where(x >= 0, erf_ax, -erf_ax)
    return 0.5 * x * (1.0 + erf_x)


# ---------------------------------------------------------------------------
# Fused kernel: the whole batch in one invocation.
# Layout: rows = (h, w) on sublanes, lanes = (n, z, c) / (n, z, f)  (n major).
# ---------------------------------------------------------------------------
def _block_kernel(xsh_ref, xres_ref, wk_ref, vc_ref, sed_ref, seu_ref,
                  vf_ref, w1_ref, tmat_ref, w2_ref, o_ref, *, n_batch, zf):
    # xsh_ref : (KZ, Hp, Wp, L)   z-staged, lane-folded padded input, L = N*Z*C
    # xres_ref: (HW, L)           residual input
    # wk_ref  : (KH*KW*KZ, L)     per-tap depthwise weights (tiled over n, z)
    # vc_ref  : (5, L)            [bn1_scale, bn1_shift, se_up_b, bn2_shift*gamma, se_down_b(pad)]
    # vf_ref  : (3, LF)           [pwconv1 bias, grn_gamma, grn_beta]
    _, Hp, Wp, L = xsh_ref.shape
    H = Hp - (KH - 1)
    W = Wp - (KW - 1)

    s1 = vc_ref[0:1, :]
    b1 = vc_ref[1:2, :]
    seub = vc_ref[2:3, :]
    b2 = vc_ref[3:4, :]
    sedb = vc_ref[4:5, 0:sed_ref.shape[1]]

    # ---- depthwise 5x5x3 conv (shift-and-accumulate, 75 taps) + fused BN1 ----
    # one (H, Wp, L) load per (k, i); the 5 W-shifts are value slices of that slab.
    acc = jnp.zeros((H, W, L), jnp.float32)
    for k in range(KZ):
        for i in range(KH):
            slab = xsh_ref[k, i:i + H, :, :]                    # (H, Wp, L)
            for j in range(KW):
                t = (i * KW + j) * KZ + k
                acc = acc + slab[:, j:j + W, :] * wk_ref[t:t + 1, :]
    y = acc * s1 + b1                                           # (H, W, L)
    yf = y.reshape(H * W, L)                                    # layout-preserving collapse

    # ---- SE: per-batch global avg-pool + down(ReLU) + up (no sigmoid in this SEBlock) ----
    # 1/(H*W*Z), the z-group sum and the batch block-structure are folded into `sed`.
    pooled = jnp.sum(yf, axis=0, keepdims=True)                                   # (1, L)
    d = jnp.dot(pooled, sed_ref[...], preferred_element_type=jnp.float32) + sedb
    d = jnp.maximum(d, 0.0)
    u = jnp.dot(d, seu_ref[...], preferred_element_type=jnp.float32) + seub       # (1, L)
    ys = yf * u

    # ---- pwconv1 (block-diagonal over n,z) + exact GELU ----
    h = jnp.dot(ys, w1_ref[...], preferred_element_type=jnp.float32) + vf_ref[0:1, :]  # (HW, LF)
    h = _gelu_erf(h)

    # ---- GRN (global response norm over H,W,Z per FFN channel, per batch) ----
    sq = jnp.sum(h * h, axis=0, keepdims=True)                                    # (1, LF)
    gx = jnp.sqrt(jnp.dot(sq, tmat_ref[...], preferred_element_type=jnp.float32)) # z-summed, tiled
    parts = []
    for n in range(n_batch):                      # batch-major lanes -> aligned 256-lane slices
        g_n = gx[:, n * zf:(n + 1) * zf]
        inv = 1.0 / (jnp.mean(g_n, axis=-1, keepdims=True) + 1e-6)
        parts.append(g_n * inv)
    nx = jnp.concatenate(parts, axis=-1) if n_batch > 1 else parts[0]
    h = (vf_ref[1:2, :] * nx + 1.0) * h + vf_ref[2:3, :]

    # ---- pwconv2 (block-diagonal, BN2 + layer-scale gamma folded) + residual ----
    zz = jnp.dot(h, w2_ref[...], preferred_element_type=jnp.float32) + b2         # (HW, L)
    o_ref[...] = xres_ref[...] + zz


# ---------------------------------------------------------------------------
# Wrapper: layout plumbing + parameter folding (plain XLA, outside the kernel)
# ---------------------------------------------------------------------------
def unireplknet_block(x_nchwz, p):
    N, C, H, W, Z = x_nchwz.shape
    F = p["w1"].shape[0]
    C4 = p["se_down_w"].shape[0]
    C4P = max(C4, 8)
    NZ = N * Z
    HW, L, LF = H * W, NZ * C, NZ * F
    Hp, Wp = H + KH - 1, W + KW - 1
    NT = KH * KW * KZ

    xf = x_nchwz.astype(jnp.float32)
    xhw = jnp.transpose(xf, (2, 3, 0, 4, 1))                      # (H, W, N, Z, C)
    xres = xhw.reshape(HW, L)

    # pad H/W/Z, stage the KZ z-shifts on a leading axis, fuse N*Z*C on lanes
    xpad = jnp.pad(xhw, ((KH // 2,) * 2, (KW // 2,) * 2, (0, 0), (KZ // 2,) * 2, (0, 0)))
    xsh = jnp.stack([xpad[:, :, :, k:k + Z, :].reshape(Hp, Wp, L) for k in range(KZ)], axis=0)

    # depthwise taps -> packed (75, L) table, per-channel weights tiled over (n, z)
    wtap = jnp.transpose(p["dw_w"][:, 0], (1, 2, 3, 0)).reshape(NT, C)
    wk = jnp.tile(wtap, (1, NZ))

    # fold BN1 / BN2 (inference, running stats)
    s1 = p["bn1_w"] / jnp.sqrt(p["bn1_v"] + BN_EPS)
    b1 = p["bn1_b"] - p["bn1_m"] * s1
    s2 = p["bn2_w"] / jnp.sqrt(p["bn2_v"] + BN_EPS)
    t2 = p["bn2_b"] - p["bn2_m"] * s2

    # SE (C -> C/4 -> C): pooling mean + z-tiling + batch block-diag folded into the matrices
    dwn = p["se_down_w"].reshape(C4, C)
    upw = p["se_up_w"].reshape(C, C4)
    eyeN = jnp.eye(N, dtype=jnp.float32)
    sed_blk = jnp.tile(jnp.pad(dwn.T, ((0, 0), (0, C4P - C4))), (Z, 1)) / float(H * W * Z)
    sed = jnp.kron(eyeN, sed_blk)                                 # (L, N*C4P)
    seu_blk = jnp.tile(jnp.pad(upw.T, ((0, C4P - C4), (0, 0))), (1, Z))
    seu = jnp.kron(eyeN, seu_blk)                                 # (N*C4P, L)
    sedb = jnp.tile(jnp.pad(p["se_down_b"], (0, C4P - C4)), N)    # (N*C4P,)

    # pwconv1 / GRN / pwconv2(+BN2+layer-scale) in block-diagonal (over n, z) lane-folded form
    eyeNZ = jnp.eye(NZ, dtype=jnp.float32)
    w1z = jnp.kron(eyeNZ, p["w1"].T)                              # (L, LF)
    w2fold = p["w2"] * (s2 * p["gamma"])[:, None]                 # BN2 scale + layer-scale folded
    w2z = jnp.kron(eyeNZ, w2fold.T)                               # (LF, L)
    tmat = jnp.kron(eyeN, jnp.kron(jnp.ones((Z, Z), jnp.float32),
                                   jnp.eye(F, dtype=jnp.float32)))  # (LF, LF) GRN z-group sum

    # packed per-lane scale/shift vectors (one DMA stream each instead of nine)
    vecC = jnp.stack([
        jnp.tile(s1, NZ),
        jnp.tile(b1, NZ),
        jnp.tile(p["se_up_b"], NZ),
        jnp.tile(t2 * p["gamma"], NZ),
        jnp.pad(sedb, (0, L - N * C4P)),
    ], axis=0)                                                    # (5, L)
    vecF = jnp.stack([
        jnp.tile(p["b1"], NZ),
        jnp.tile(p["grn_gamma"].reshape(F), NZ),
        jnp.tile(p["grn_beta"].reshape(F), NZ),
    ], axis=0)                                                    # (3, LF)

    kern = functools.partial(_block_kernel, n_batch=N, zf=Z * F)
    full2 = lambda i: (0, 0)
    out = pl.pallas_call(
        kern,
        out_shape=jax.ShapeDtypeStruct((HW, L), jnp.float32),
        grid=(1,),
        in_specs=[
            pl.BlockSpec((KZ, Hp, Wp, L), lambda i: (0, 0, 0, 0)),   # xsh
            pl.BlockSpec((HW, L), full2),                            # xres
            pl.BlockSpec((NT, L), full2),                            # wk
            pl.BlockSpec((5, L), full2),                             # vecC
            pl.BlockSpec((L, N * C4P), full2),                       # sed
            pl.BlockSpec((N * C4P, L), full2),                       # seu
            pl.BlockSpec((3, LF), full2),                            # vecF
            pl.BlockSpec((L, LF), full2),                            # w1z
            pl.BlockSpec((LF, LF), full2),                           # tmat
            pl.BlockSpec((LF, L), full2),                            # w2z
        ],
        out_specs=pl.BlockSpec((HW, L), full2),                      # lane-dense (last dim 128)
        compiler_params=pltpu.CompilerParams(
            dimension_semantics=("arbitrary",),
            vmem_limit_bytes=64 * 1024 * 1024),
    )(xsh, xres, wk, vecC, sed, seu, vecF, w1z, tmat, w2z)

    return jnp.transpose(out.reshape(H, W, N, Z, C), (2, 4, 0, 1, 3))


# ---------------------------------------------------------------------------
# Pure-JAX reference (same semantics, exact erf GELU) for verification
# ---------------------------------------------------------------------------
def reference_forward(x_nchwz, p):
    N, C, H, W, Z = x_nchwz.shape
    C4 = p["se_down_w"].shape[0]
    xcl = jnp.transpose(x_nchwz, (0, 2, 3, 4, 1)).astype(jnp.float32)
    xpad = jnp.pad(xcl, ((0, 0), (2, 2), (2, 2), (1, 1), (0, 0)))
    w = jnp.transpose(p["dw_w"][:, 0], (1, 2, 3, 0))
    y = jnp.zeros_like(xcl)
    for i in range(KH):
        for j in range(KW):
            for k in range(KZ):
                y = y + xpad[:, i:i + H, j:j + W, k:k + Z, :] * w[i, j, k]
    s1 = p["bn1_w"] / jnp.sqrt(p["bn1_v"] + BN_EPS)
    y = y * s1 + (p["bn1_b"] - p["bn1_m"] * s1)
    pooled = jnp.mean(y, axis=(1, 2, 3))
    d = jnp.maximum(pooled @ p["se_down_w"].reshape(C4, C).T + p["se_down_b"], 0.0)
    u = d @ p["se_up_w"].reshape(C, C4).T + p["se_up_b"]
    y = y * u[:, None, None, None, :]
    h = y @ p["w1"].T + p["b1"]
    h = 0.5 * h * (1.0 + jax.scipy.special.erf(h / np.sqrt(2.0)))
    gx = jnp.sqrt(jnp.sum(h * h, axis=(1, 2, 3), keepdims=True))
    nx = gx / (jnp.mean(gx, axis=-1, keepdims=True) + 1e-6)
    h = (p["grn_gamma"] * nx + 1.0) * h + p["grn_beta"]
    z = h @ p["w2"].T
    s2 = p["bn2_w"] / jnp.sqrt(p["bn2_v"] + BN_EPS)
    z = z * s2 + (p["bn2_b"] - p["bn2_m"] * s2)
    z = z * p["gamma"]
    return jnp.transpose(xcl + z, (0, 4, 1, 2, 3))


if __name__ == "__main__":
    N, C, H, W, Z = 2, 16, 8, 8, 4
    FFN = 4 * C
    C4 = C // 4

    key = jax.random.PRNGKey(0)
    ks = jax.random.split(key, 24)

    def nrm(k, shape, scale=0.2):
        return (scale * jax.random.normal(k, shape)).astype(jnp.float32)

    # NOTE: BatchNorm3d layers are evaluated with running stats (inference mode).
    params = dict(
        dw_w=nrm(ks[0], (C, 1, KH, KW, KZ)),                   # depthwise conv weight, bias=False
        bn1_w=1.0 + nrm(ks[1], (C,), 0.1), bn1_b=nrm(ks[2], (C,), 0.1),
        bn1_m=nrm(ks[3], (C,), 0.1),
        bn1_v=0.5 + jax.random.uniform(ks[4], (C,), dtype=jnp.float32),
        se_down_w=nrm(ks[5], (C4, C, 1, 1, 1)), se_down_b=nrm(ks[6], (C4,), 0.1),
        se_up_w=nrm(ks[7], (C, C4, 1, 1, 1)), se_up_b=nrm(ks[8], (C,), 0.1),
        w1=nrm(ks[9], (FFN, C)), b1=nrm(ks[10], (FFN,), 0.1),
        grn_gamma=nrm(ks[11], (1, 1, 1, 1, FFN), 0.1),
        grn_beta=nrm(ks[12], (1, 1, 1, 1, FFN), 0.1),
        w2=nrm(ks[13], (C, FFN)),                              # pwconv2 Linear, bias=False
        bn2_w=1.0 + nrm(ks[14], (C,), 0.1), bn2_b=nrm(ks[15], (C,), 0.1),
        bn2_m=nrm(ks[16], (C,), 0.1),
        bn2_v=0.5 + jax.random.uniform(ks[17], (C,), dtype=jnp.float32),
        gamma=0.5 + nrm(ks[18], (C,), 0.1),                    # layer-scale (init is 1e-6*ones)
    )
    x = jax.random.normal(ks[19], (N, C, H, W, Z), dtype=jnp.float32)

    out = jax.jit(unireplknet_block)(x, params)
    out = jax.block_until_ready(out)

    ref = reference_forward(x, params)
    np.testing.assert_allclose(np.asarray(out), np.asarray(ref), rtol=1e-3, atol=2e-4)
    assert out.shape == x.shape and out.dtype == jnp.float32

    print("KERNEL_OK")
</pallas_src>

<mosaic_0001>
module attributes {stable_mosaic.version = 11 : i64} {
  func.func @_block_kernel(%arg0: i32, %arg1: memref<3x12x12x128xf32, #tpu.memory_space<vmem>>, %arg2: memref<64x128xf32, #tpu.memory_space<vmem>>, %arg3: memref<75x128xf32, #tpu.memory_space<vmem>>, %arg4: memref<5x128xf32, #tpu.memory_space<vmem>>, %arg5: memref<128x16xf32, #tpu.memory_space<vmem>>, %arg6: memref<16x128xf32, #tpu.memory_space<vmem>>, %arg7: memref<3x512xf32, #tpu.memory_space<vmem>>, %arg8: memref<128x512xf32, #tpu.memory_space<vmem>>, %arg9: memref<512x512xf32, #tpu.memory_space<vmem>>, %arg10: memref<512x128xf32, #tpu.memory_space<vmem>>, %arg11: memref<64x128xf32, #tpu.memory_space<vmem>>) attributes {dimension_semantics = [#tpu.dimension_semantics<arbitrary>], iteration_bounds = array<i64: 1>, scalar_prefetch = 0 : i64, scratch_operands = 0 : i64, tpu.core_type = #tpu.core_type<tc>, window_params = [{pipeline_mode = #tpu.pipeline_mode<synchronous>, transform_indices = @transform_0, window_bounds = array<i64: 3, 12, 12, 128>}, {pipeline_mode = #tpu.pipeline_mode<synchronous>, transform_indices = @transform_1, window_bounds = array<i64: 64, 128>}, {pipeline_mode = #tpu.pipeline_mode<synchronous>, transform_indices = @transform_2, window_bounds = array<i64: 75, 128>}, {pipeline_mode = #tpu.pipeline_mode<synchronous>, transform_indices = @transform_3, window_bounds = array<i64: 5, 128>}, {pipeline_mode = #tpu.pipeline_mode<synchronous>, transform_indices = @transform_4, window_bounds = array<i64: 128, 16>}, {pipeline_mode = #tpu.pipeline_mode<synchronous>, transform_indices = @transform_5, window_bounds = array<i64: 16, 128>}, {pipeline_mode = #tpu.pipeline_mode<synchronous>, transform_indices = @transform_6, window_bounds = array<i64: 3, 512>}, {pipeline_mode = #tpu.pipeline_mode<synchronous>, transform_indices = @transform_7, window_bounds = array<i64: 128, 512>}, {pipeline_mode = #tpu.pipeline_mode<synchronous>, transform_indices = @transform_8, window_bounds = array<i64: 512, 512>}, {pipeline_mode = #tpu.pipeline_mode<synchronous>, transform_indices = @transform_9, window_bounds = array<i64: 512, 128>}, {pipeline_mode = #tpu.pipeline_mode<synchronous>, transform_indices = @transform_10, window_bounds = array<i64: 64, 128>}]} {
    %c0 = arith.constant 0 : index
    %c0_0 = arith.constant 0 : index
    %0 = vector.load %arg4[%c0, %c0_0] : memref<5x128xf32, #tpu.memory_space<vmem>>, vector<1x128xf32>
    %c1 = arith.constant 1 : index
    %c0_1 = arith.constant 0 : index
    %1 = vector.load %arg4[%c1, %c0_1] : memref<5x128xf32, #tpu.memory_space<vmem>>, vector<1x128xf32>
    %c2 = arith.constant 2 : index
    %c0_2 = arith.constant 0 : index
    %2 = vector.load %arg4[%c2, %c0_2] : memref<5x128xf32, #tpu.memory_space<vmem>>, vector<1x128xf32>
    %c3 = arith.constant 3 : index
    %c0_3 = arith.constant 0 : index
    %3 = vector.load %arg4[%c3, %c0_3] : memref<5x128xf32, #tpu.memory_space<vmem>>, vector<1x128xf32>
    %c4 = arith.constant 4 : index
    %c0_4 = arith.constant 0 : index
    %4 = vector.load %arg4[%c4, %c0_4] : memref<5x128xf32, #tpu.memory_space<vmem>>, vector<1x16xf32>
    %cst = arith.constant 0.000000e+00 : f32
    %5 = vector.broadcast %cst : f32 to vector<8x8x128xf32>
    %c0_5 = arith.constant 0 : index
    %c0_6 = arith.constant 0 : index
    %c0_7 = arith.constant 0 : index
    %c0_8 = arith.constant 0 : index
    %6 = vector.load %arg1[%c0_5, %c0_6, %c0_7, %c0_8] : memref<3x12x12x128xf32, #tpu.memory_space<vmem>>, vector<1x8x12x128xf32>
    %7 = vector.shape_cast %6 : vector<1x8x12x128xf32> to vector<8x12x128xf32>
    %8 = vector.extract_strided_slice %7 {offsets = [0, 0, 0], sizes = [8, 8, 128], strides = [1, 1, 1]} : vector<8x12x128xf32> to vector<8x8x128xf32>
    %c0_9 = arith.constant 0 : index
    %c0_10 = arith.constant 0 : index
    %9 = vector.load %arg3[%c0_9, %c0_10] : memref<75x128xf32, #tpu.memory_space<vmem>>, vector<1x128xf32>
    %10 = vector.shape_cast %9 : vector<1x128xf32> to vector<1x1x128xf32>
    %11 = vector.broadcast %10 : vector<1x1x128xf32> to vector<8x8x128xf32>
    %12 = arith.mulf %8, %11 : vector<8x8x128xf32>
    %13 = arith.addf %5, %12 : vector<8x8x128xf32>
    %14 = vector.extract_strided_slice %7 {offsets = [0, 1, 0], sizes = [8, 8, 128], strides = [1, 1, 1]} : vector<8x12x128xf32> to vector<8x8x128xf32>
    %c3_11 = arith.constant 3 : index
    %c0_12 = arith.constant 0 : index
    %15 = vector.load %arg3[%c3_11, %c0_12] : memref<75x128xf32, #tpu.memory_space<vmem>>, vector<1x128xf32>
    %16 = vector.shape_cast %15 : vector<1x128xf32> to vector<1x1x128xf32>
    %17 = vector.broadcast %16 : vector<1x1x128xf32> to vector<8x8x128xf32>
    %18 = arith.mulf %14, %17 : vector<8x8x128xf32>
    %19 = arith.addf %13, %18 : vector<8x8x128xf32>
    %20 = vector.extract_strided_slice %7 {offsets = [0, 2, 0], sizes = [8, 8, 128], strides = [1, 1, 1]} : vector<8x12x128xf32> to vector<8x8x128xf32>
    %c6 = arith.constant 6 : index
    %c0_13 = arith.constant 0 : index
    %21 = vector.load %arg3[%c6, %c0_13] : memref<75x128xf32, #tpu.memory_space<vmem>>, vector<1x128xf32>
    %22 = vector.shape_cast %21 : vector<1x128xf32> to vector<1x1x128xf32>
    %23 = vector.broadcast %22 : vector<1x1x128xf32> to vector<8x8x128xf32>
    %24 = arith.mulf %20, %23 : vector<8x8x128xf32>
    %25 = arith.addf %19, %24 : vector<8x8x128xf32>
    %26 = vector.extract_strided_slice %7 {offsets = [0, 3, 0], sizes = [8, 8, 128], strides = [1, 1, 1]} : vector<8x12x128xf32> to vector<8x8x128xf32>
    %c9 = arith.constant 9 : index
    %c0_14 = arith.constant 0 : index
    %27 = vector.load %arg3[%c9, %c0_14] : memref<75x128xf32, #tpu.memory_space<vmem>>, vector<1x128xf32>
    %28 = vector.shape_cast %27 : vector<1x128xf32> to vector<1x1x128xf32>
    %29 = vector.broadcast %28 : vector<1x1x128xf32> to vector<8x8x128xf32>
    %30 = arith.mulf %26, %29 : vector<8x8x128xf32>
    %31 = arith.addf %25, %30 : vector<8x8x128xf32>
    %32 = vector.extract_strided_slice %7 {offsets = [0, 4, 0], sizes = [8, 8, 128], strides = [1, 1, 1]} : vector<8x12x128xf32> to vector<8x8x128xf32>
    %c12 = arith.constant 12 : index
    %c0_15 = arith.constant 0 : index
    %33 = vector.load %arg3[%c12, %c0_15] : memref<75x128xf32, #tpu.memory_space<vmem>>, vector<1x128xf32>
    %34 = vector.shape_cast %33 : vector<1x128xf32> to vector<1x1x128xf32>
    %35 = vector.broadcast %34 : vector<1x1x128xf32> to vector<8x8x128xf32>
    %36 = arith.mulf %32, %35 : vector<8x8x128xf32>
    %37 = arith.addf %31, %36 : vector<8x8x128xf32>
    %c0_16 = arith.constant 0 : index
    %c1_17 = arith.constant 1 : index
    %c0_18 = arith.constant 0 : index
    %c0_19 = arith.constant 0 : index
    %38 = vector.load %arg1[%c0_16, %c1_17, %c0_18, %c0_19] : memref<3x12x12x128xf32, #tpu.memory_space<vmem>>, vector<1x8x12x128xf32>
    %39 = vector.shape_cast %38 : vector<1x8x12x128xf32> to vector<8x12x128xf32>
    %40 = vector.extract_strided_slice %39 {offsets = [0, 0, 0], sizes = [8, 8, 128], strides = [1, 1, 1]} : vector<8x12x128xf32> to vector<8x8x128xf32>
    %c15 = arith.constant 15 : index
    %c0_20 = arith.constant 0 : index
    %41 = vector.load %arg3[%c15, %c0_20] : memref<75x128xf32, #tpu.memory_space<vmem>>, vector<1x128xf32>
    %42 = vector.shape_cast %41 : vector<1x128xf32> to vector<1x1x128xf32>
    %43 = vector.broadcast %42 : vector<1x1x128xf32> to vector<8x8x128xf32>
    %44 = arith.mulf %40, %43 : vector<8x8x128xf32>
    %45 = arith.addf %37, %44 : vector<8x8x128xf32>
    %46 = vector.extract_strided_slice %39 {offsets = [0, 1, 0], sizes = [8, 8, 128], strides = [1, 1, 1]} : vector<8x12x128xf32> to vector<8x8x128xf32>
    %c18 = arith.constant 18 : index
    %c0_21 = arith.constant 0 : index
    %47 = vector.load %arg3[%c18, %c0_21] : memref<75x128xf32, #tpu.memory_space<vmem>>, vector<1x128xf32>
    %48 = vector.shape_cast %47 : vector<1x128xf32> to vector<1x1x128xf32>
    %49 = vector.broadcast %48 : vector<1x1x128xf32> to vector<8x8x128xf32>
    %50 = arith.mulf %46, %49 : vector<8x8x128xf32>
    %51 = arith.addf %45, %50 : vector<8x8x128xf32>
    %52 = vector.extract_strided_slice %39 {offsets = [0, 2, 0], sizes = [8, 8, 128], strides = [1, 1, 1]} : vector<8x12x128xf32> to vector<8x8x128xf32>
    %c21 = arith.constant 21 : index
    %c0_22 = arith.constant 0 : index
    %53 = vector.load %arg3[%c21, %c0_22] : memref<75x128xf32, #tpu.memory_space<vmem>>, vector<1x128xf32>
    %54 = vector.shape_cast %53 : vector<1x128xf32> to vector<1x1x128xf32>
    %55 = vector.broadcast %54 : vector<1x1x128xf32> to vector<8x8x128xf32>
    %56 = arith.mulf %52, %55 : vector<8x8x128xf32>
    %57 = arith.addf %51, %56 : vector<8x8x128xf32>
    %58 = vector.extract_strided_slice %39 {offsets = [0, 3, 0], sizes = [8, 8, 128], strides = [1, 1, 1]} : vector<8x12x128xf32> to vector<8x8x128xf32>
    %c24 = arith.constant 24 : index
    %c0_23 = arith.constant 0 : index
    %59 = vector.load %arg3[%c24, %c0_23] : memref<75x128xf32, #tpu.memory_space<vmem>>, vector<1x128xf32>
    %60 = vector.shape_cast %59 : vector<1x128xf32> to vector<1x1x128xf32>
    %61 = vector.broadcast %60 : vector<1x1x128xf32> to vector<8x8x128xf32>
    %62 = arith.mulf %58, %61 : vector<8x8x128xf32>
    %63 = arith.addf %57, %62 : vector<8x8x128xf32>
    %64 = vector.extract_strided_slice %39 {offsets = [0, 4, 0], sizes = [8, 8, 128], strides = [1, 1, 1]} : vector<8x12x128xf32> to vector<8x8x128xf32>
    %c27 = arith.constant 27 : index
    %c0_24 = arith.constant 0 : index
    %65 = vector.load %arg3[%c27, %c0_24] : memref<75x128xf32, #tpu.memory_space<vmem>>, vector<1x128xf32>
    %66 = vector.shape_cast %65 : vector<1x128xf32> to vector<1x1x128xf32>
    %67 = vector.broadcast %66 : vector<1x1x128xf32> to vector<8x8x128xf32>
    %68 = arith.mulf %64, %67 : vector<8x8x128xf32>
    %69 = arith.addf %63, %68 : vector<8x8x128xf32>
    %c0_25 = arith.constant 0 : index
    %c2_26 = arith.constant 2 : index
    %c0_27 = arith.constant 0 : index
    %c0_28 = arith.constant 0 : index
    %70 = vector.load %arg1[%c0_25, %c2_26, %c0_27, %c0_28] : memref<3x12x12x128xf32, #tpu.memory_space<vmem>>, vector<1x8x12x128xf32>
    %71 = vector.shape_cast %70 : vector<1x8x12x128xf32> to vector<8x12x128xf32>
    %72 = vector.extract_strided_slice %71 {offsets = [0, 0, 0], sizes = [8, 8, 128], strides = [1, 1, 1]} : vector<8x12x128xf32> to vector<8x8x128xf32>
    %c30 = arith.constant 30 : index
    %c0_29 = arith.constant 0 : index
    %73 = vector.load %arg3[%c30, %c0_29] : memref<75x128xf32, #tpu.memory_space<vmem>>, vector<1x128xf32>
    %74 = vector.shape_cast %73 : vector<1x128xf32> to vector<1x1x128xf32>
    %75 = vector.broadcast %74 : vector<1x1x128xf32> to vector<8x8x128xf32>
    %76 = arith.mulf %72, %75 : vector<8x8x128xf32>
    %77 = arith.addf %69, %76 : vector<8x8x128xf32>
    %78 = vector.extract_strided_slice %71 {offsets = [0, 1, 0], sizes = [8, 8, 128], strides = [1, 1, 1]} : vector<8x12x128xf32> to vector<8x8x128xf32>
    %c33 = arith.constant 33 : index
    %c0_30 = arith.constant 0 : index
    %79 = vector.load %arg3[%c33, %c0_30] : memref<75x128xf32, #tpu.memory_space<vmem>>, vector<1x128xf32>
    %80 = vector.shape_cast %79 : vector<1x128xf32> to vector<1x1x128xf32>
    %81 = vector.broadcast %80 : vector<1x1x128xf32> to vector<8x8x128xf32>
    %82 = arith.mulf %78, %81 : vector<8x8x128xf32>
    %83 = arith.addf %77, %82 : vector<8x8x128xf32>
    %84 = vector.extract_strided_slice %71 {offsets = [0, 2, 0], sizes = [8, 8, 128], strides = [1, 1, 1]} : vector<8x12x128xf32> to vector<8x8x128xf32>
    %c36 = arith.constant 36 : index
    %c0_31 = arith.constant 0 : index
    %85 = vector.load %arg3[%c36, %c0_31] : memref<75x128xf32, #tpu.memory_space<vmem>>, vector<1x128xf32>
    %86 = vector.shape_cast %85 : vector<1x128xf32> to vector<1x1x128xf32>
    %87 = vector.broadcast %86 : vector<1x1x128xf32> to vector<8x8x128xf32>
    %88 = arith.mulf %84, %87 : vector<8x8x128xf32>
    %89 = arith.addf %83, %88 : vector<8x8x128xf32>
    %90 = vector.extract_strided_slice %71 {offsets = [0, 3, 0], sizes = [8, 8, 128], strides = [1, 1, 1]} : vector<8x12x128xf32> to vector<8x8x128xf32>
    %c39 = arith.constant 39 : index
    %c0_32 = arith.constant 0 : index
    %91 = vector.load %arg3[%c39, %c0_32] : memref<75x128xf32, #tpu.memory_space<vmem>>, vector<1x128xf32>
    %92 = vector.shape_cast %91 : vector<1x128xf32> to vector<1x1x128xf32>
    %93 = vector.broadcast %92 : vector<1x1x128xf32> to vector<8x8x128xf32>
    %94 = arith.mulf %90, %93 : vector<8x8x128xf32>
    %95 = arith.addf %89, %94 : vector<8x8x128xf32>
    %96 = vector.extract_strided_slice %71 {offsets = [0, 4, 0], sizes = [8, 8, 128], strides = [1, 1, 1]} : vector<8x12x128xf32> to vector<8x8x128xf32>
    %c42 = arith.constant 42 : index
    %c0_33 = arith.constant 0 : index
    %97 = vector.load %arg3[%c42, %c0_33] : memref<75x128xf32, #tpu.memory_space<vmem>>, vector<1x128xf32>
    %98 = vector.shape_cast %97 : vector<1x128xf32> to vector<1x1x128xf32>
    %99 = vector.broadcast %98 : vector<1x1x128xf32> to vector<8x8x128xf32>
    %100 = arith.mulf %96, %99 : vector<8x8x128xf32>
    %101 = arith.addf %95, %100 : vector<8x8x128xf32>
    %c0_34 = arith.constant 0 : index
    %c3_35 = arith.constant 3 : index
    %c0_36 = arith.constant 0 : index
    %c0_37 = arith.constant 0 : index
    %102 = vector.load %arg1[%c0_34, %c3_35, %c0_36, %c0_37] : memref<3x12x12x128xf32, #tpu.memory_space<vmem>>, vector<1x8x12x128xf32>
    %103 = vector.shape_cast %102 : vector<1x8x12x128xf32> to vector<8x12x128xf32>
    %104 = vector.extract_strided_slice %103 {offsets = [0, 0, 0], sizes = [8, 8, 128], strides = [1, 1, 1]} : vector<8x12x128xf32> to vector<8x8x128xf32>
    %c45 = arith.constant 45 : index
    %c0_38 = arith.constant 0 : index
    %105 = vector.load %arg3[%c45, %c0_38] : memref<75x128xf32, #tpu.memory_space<vmem>>, vector<1x128xf32>
    %106 = vector.shape_cast %105 : vector<1x128xf32> to vector<1x1x128xf32>
    %107 = vector.broadcast %106 : vector<1x1x128xf32> to vector<8x8x128xf32>
    %108 = arith.mulf %104, %107 : vector<8x8x128xf32>
    %109 = arith.addf %101, %108 : vector<8x8x128xf32>
    %110 = vector.extract_strided_slice %103 {offsets = [0, 1, 0], sizes = [8, 8, 128], strides = [1, 1, 1]} : vector<8x12x128xf32> to vector<8x8x128xf32>
    %c48 = arith.constant 48 : index
    %c0_39 = arith.constant 0 : index
    %111 = vector.load %arg3[%c48, %c0_39] : memref<75x128xf32, #tpu.memory_space<vmem>>, vector<1x128xf32>
    %112 = vector.shape_cast %111 : vector<1x128xf32> to vector<1x1x128xf32>
    %113 = vector.broadcast %112 : vector<1x1x128xf32> to vector<8x8x128xf32>
    %114 = arith.mulf %110, %113 : vector<8x8x128xf32>
    %115 = arith.addf %109, %114 : vector<8x8x128xf32>
    %116 = vector.extract_strided_slice %103 {offsets = [0, 2, 0], sizes = [8, 8, 128], strides = [1, 1, 1]} : vector<8x12x128xf32> to vector<8x8x128xf32>
    %c51 = arith.constant 51 : index
    %c0_40 = arith.constant 0 : index
    %117 = vector.load %arg3[%c51, %c0_40] : memref<75x128xf32, #tpu.memory_space<vmem>>, vector<1x128xf32>
    %118 = vector.shape_cast %117 : vector<1x128xf32> to vector<1x1x128xf32>
    %119 = vector.broadcast %118 : vector<1x1x128xf32> to vector<8x8x128xf32>
    %120 = arith.mulf %116, %119 : vector<8x8x128xf32>
    %121 = arith.addf %115, %120 : vector<8x8x128xf32>
    %122 = vector.extract_strided_slice %103 {offsets = [0, 3, 0], sizes = [8, 8, 128], strides = [1, 1, 1]} : vector<8x12x128xf32> to vector<8x8x128xf32>
    %c54 = arith.constant 54 : index
    %c0_41 = arith.constant 0 : index
    %123 = vector.load %arg3[%c54, %c0_41] : memref<75x128xf32, #tpu.memory_space<vmem>>, vector<1x128xf32>
    %124 = vector.shape_cast %123 : vector<1x128xf32> to vector<1x1x128xf32>
    %125 = vector.broadcast %124 : vector<1x1x128xf32> to vector<8x8x128xf32>
    %126 = arith.mulf %122, %125 : vector<8x8x128xf32>
    %127 = arith.addf %121, %126 : vector<8x8x128xf32>
    %128 = vector.extract_strided_slice %103 {offsets = [0, 4, 0], sizes = [8, 8, 128], strides = [1, 1, 1]} : vector<8x12x128xf32> to vector<8x8x128xf32>
    %c57 = arith.constant 57 : index
    %c0_42 = arith.constant 0 : index
    %129 = vector.load %arg3[%c57, %c0_42] : memref<75x128xf32, #tpu.memory_space<vmem>>, vector<1x128xf32>
    %130 = vector.shape_cast %129 : vector<1x128xf32> to vector<1x1x128xf32>
    %131 = vector.broadcast %130 : vector<1x1x128xf32> to vector<8x8x128xf32>
    %132 = arith.mulf %128, %131 : vector<8x8x128xf32>
    %133 = arith.addf %127, %132 : vector<8x8x128xf32>
    %c0_43 = arith.constant 0 : index
    %c4_44 = arith.constant 4 : index
    %c0_45 = arith.constant 0 : index
    %c0_46 = arith.constant 0 : index
    %134 = vector.load %arg1[%c0_43, %c4_44, %c0_45, %c0_46] : memref<3x12x12x128xf32, #tpu.memory_space<vmem>>, vector<1x8x12x128xf32>
    %135 = vector.shape_cast %134 : vector<1x8x12x128xf32> to vector<8x12x128xf32>
    %136 = vector.extract_strided_slice %135 {offsets = [0, 0, 0], sizes = [8, 8, 128], strides = [1, 1, 1]} : vector<8x12x128xf32> to vector<8x8x128xf32>
    %c60 = arith.constant 60 : index
    %c0_47 = arith.constant 0 : index
    %137 = vector.load %arg3[%c60, %c0_47] : memref<75x128xf32, #tpu.memory_space<vmem>>, vector<1x128xf32>
    %138 = vector.shape_cast %137 : vector<1x128xf32> to vector<1x1x128xf32>
    %139 = vector.broadcast %138 : vector<1x1x128xf32> to vector<8x8x128xf32>
    %140 = arith.mulf %136, %139 : vector<8x8x128xf32>
    %141 = arith.addf %133, %140 : vector<8x8x128xf32>
    %142 = vector.extract_strided_slice %135 {offsets = [0, 1, 0], sizes = [8, 8, 128], strides = [1, 1, 1]} : vector<8x12x128xf32> to vector<8x8x128xf32>
    %c63 = arith.constant 63 : index
    %c0_48 = arith.constant 0 : index
    %143 = vector.load %arg3[%c63, %c0_48] : memref<75x128xf32, #tpu.memory_space<vmem>>, vector<1x128xf32>
    %144 = vector.shape_cast %143 : vector<1x128xf32> to vector<1x1x128xf32>
    %145 = vector.broadcast %144 : vector<1x1x128xf32> to vector<8x8x128xf32>
    %146 = arith.mulf %142, %145 : vector<8x8x128xf32>
    %147 = arith.addf %141, %146 : vector<8x8x128xf32>
    %148 = vector.extract_strided_slice %135 {offsets = [0, 2, 0], sizes = [8, 8, 128], strides = [1, 1, 1]} : vector<8x12x128xf32> to vector<8x8x128xf32>
    %c66 = arith.constant 66 : index
    %c0_49 = arith.constant 0 : index
    %149 = vector.load %arg3[%c66, %c0_49] : memref<75x128xf32, #tpu.memory_space<vmem>>, vector<1x128xf32>
    %150 = vector.shape_cast %149 : vector<1x128xf32> to vector<1x1x128xf32>
    %151 = vector.broadcast %150 : vector<1x1x128xf32> to vector<8x8x128xf32>
    %152 = arith.mulf %148, %151 : vector<8x8x128xf32>
    %153 = arith.addf %147, %152 : vector<8x8x128xf32>
    %154 = vector.extract_strided_slice %135 {offsets = [0, 3, 0], sizes = [8, 8, 128], strides = [1, 1, 1]} : vector<8x12x128xf32> to vector<8x8x128xf32>
    %c69 = arith.constant 69 : index
    %c0_50 = arith.constant 0 : index
    %155 = vector.load %arg3[%c69, %c0_50] : memref<75x128xf32, #tpu.memory_space<vmem>>, vector<1x128xf32>
    %156 = vector.shape_cast %155 : vector<1x128xf32> to vector<1x1x128xf32>
    %157 = vector.broadcast %156 : vector<1x1x128xf32> to vector<8x8x128xf32>
    %158 = arith.mulf %154, %157 : vector<8x8x128xf32>
    %159 = arith.addf %153, %158 : vector<8x8x128xf32>
    %160 = vector.extract_strided_slice %135 {offsets = [0, 4, 0], sizes = [8, 8, 128], strides = [1, 1, 1]} : vector<8x12x128xf32> to vector<8x8x128xf32>
    %c72 = arith.constant 72 : index
    %c0_51 = arith.constant 0 : index
    %161 = vector.load %arg3[%c72, %c0_51] : memref<75x128xf32, #tpu.memory_space<vmem>>, vector<1x128xf32>
    %162 = vector.shape_cast %161 : vector<1x128xf32> to vector<1x1x128xf32>
    %163 = vector.broadcast %162 : vector<1x1x128xf32> to vector<8x8x128xf32>
    %164 = arith.mulf %160, %163 : vector<8x8x128xf32>
    %165 = arith.addf %159, %164 : vector<8x8x128xf32>
    %c1_52 = arith.constant 1 : index
    %c0_53 = arith.constant 0 : index
    %c0_54 = arith.constant 0 : index
    %c0_55 = arith.constant 0 : index
    %166 = vector.load %arg1[%c1_52, %c0_53, %c0_54, %c0_55] : memref<3x12x12x128xf32, #tpu.memory_space<vmem>>, vector<1x8x12x128xf32>
    %167 = vector.shape_cast %166 : vector<1x8x12x128xf32> to vector<8x12x128xf32>
    %168 = vector.extract_strided_slice %167 {offsets = [0, 0, 0], sizes = [8, 8, 128], strides = [1, 1, 1]} : vector<8x12x128xf32> to vector<8x8x128xf32>
    %c1_56 = arith.constant 1 : index
    %c0_57 = arith.constant 0 : index
    %169 = vector.load %arg3[%c1_56, %c0_57] : memref<75x128xf32, #tpu.memory_space<vmem>>, vector<1x128xf32>
    %170 = vector.shape_cast %169 : vector<1x128xf32> to vector<1x1x128xf32>
    %171 = vector.broadcast %170 : vector<1x1x128xf32> to vector<8x8x128xf32>
    %172 = arith.mulf %168, %171 : vector<8x8x128xf32>
    %173 = arith.addf %165, %172 : vector<8x8x128xf32>
    %174 = vector.extract_strided_slice %167 {offsets = [0, 1, 0], sizes = [8, 8, 128], strides = [1, 1, 1]} : vector<8x12x128xf32> to vector<8x8x128xf32>
    %c4_58 = arith.constant 4 : index
    %c0_59 = arith.constant 0 : index
    %175 = vector.load %arg3[%c4_58, %c0_59] : memref<75x128xf32, #tpu.memory_space<vmem>>, vector<1x128xf32>
    %176 = vector.shape_cast %175 : vector<1x128xf32> to vector<1x1x128xf32>
    %177 = vector.broadcast %176 : vector<1x1x128xf32> to vector<8x8x128xf32>
    %178 = arith.mulf %174, %177 : vector<8x8x128xf32>
    %179 = arith.addf %173, %178 : vector<8x8x128xf32>
    %180 = vector.extract_strided_slice %167 {offsets = [0, 2, 0], sizes = [8, 8, 128], strides = [1, 1, 1]} : vector<8x12x128xf32> to vector<8x8x128xf32>
    %c7 = arith.constant 7 : index
    %c0_60 = arith.constant 0 : index
    %181 = vector.load %arg3[%c7, %c0_60] : memref<75x128xf32, #tpu.memory_space<vmem>>, vector<1x128xf32>
    %182 = vector.shape_cast %181 : vector<1x128xf32> to vector<1x1x128xf32>
    %183 = vector.broadcast %182 : vector<1x1x128xf32> to vector<8x8x128xf32>
    %184 = arith.mulf %180, %183 : vector<8x8x128xf32>
    %185 = arith.addf %179, %184 : vector<8x8x128xf32>
    %186 = vector.extract_strided_slice %167 {offsets = [0, 3, 0], sizes = [8, 8, 128], strides = [1, 1, 1]} : vector<8x12x128xf32> to vector<8x8x128xf32>
    %c10 = arith.constant 10 : index
    %c0_61 = arith.constant 0 : index
    %187 = vector.load %arg3[%c10, %c0_61] : memref<75x128xf32, #tpu.memory_space<vmem>>, vector<1x128xf32>
    %188 = vector.shape_cast %187 : vector<1x128xf32> to vector<1x1x128xf32>
    %189 = vector.broadcast %188 : vector<1x1x128xf32> to vector<8x8x128xf32>
    %190 = arith.mulf %186, %189 : vector<8x8x128xf32>
    %191 = arith.addf %185, %190 : vector<8x8x128xf32>
    %192 = vector.extract_strided_slice %167 {offsets = [0, 4, 0], sizes = [8, 8, 128], strides = [1, 1, 1]} : vector<8x12x128xf32> to vector<8x8x128xf32>
    %c13 = arith.constant 13 : index
    %c0_62 = arith.constant 0 : index
    %193 = vector.load %arg3[%c13, %c0_62] : memref<75x128xf32, #tpu.memory_space<vmem>>, vector<1x128xf32>
    %194 = vector.shape_cast %193 : vector<1x128xf32> to vector<1x1x128xf32>
    %195 = vector.broadcast %194 : vector<1x1x128xf32> to vector<8x8x128xf32>
    %196 = arith.mulf %192, %195 : vector<8x8x128xf32>
    %197 = arith.addf %191, %196 : vector<8x8x128xf32>
    %c1_63 = arith.constant 1 : index
    %c1_64 = arith.constant 1 : index
    %c0_65 = arith.constant 0 : index
    %c0_66 = arith.constant 0 : index
    %198 = vector.load %arg1[%c1_63, %c1_64, %c0_65, %c0_66] : memref<3x12x12x128xf32, #tpu.memory_space<vmem>>, vector<1x8x12x128xf32>
    %199 = vector.shape_cast %198 : vector<1x8x12x128xf32> to vector<8x12x128xf32>
    %200 = vector.extract_strided_slice %199 {offsets = [0, 0, 0], sizes = [8, 8, 128], strides = [1, 1, 1]} : vector<8x12x128xf32> to vector<8x8x128xf32>
    %c16 = arith.constant 16 : index
    %c0_67 = arith.constant 0 : index
    %201 = vector.load %arg3[%c16, %c0_67] : memref<75x128xf32, #tpu.memory_space<vmem>>, vector<1x128xf32>
    %202 = vector.shape_cast %201 : vector<1x128xf32> to vector<1x1x128xf32>
    %203 = vector.broadcast %202 : vector<1x1x128xf32> to vector<8x8x128xf32>
    %204 = arith.mulf %200, %203 : vector<8x8x128xf32>
    %205 = arith.addf %197, %204 : vector<8x8x128xf32>
    %206 = vector.extract_strided_slice %199 {offsets = [0, 1, 0], sizes = [8, 8, 128], strides = [1, 1, 1]} : vector<8x12x128xf32> to vector<8x8x128xf32>
    %c19 = arith.constant 19 : index
    %c0_68 = arith.constant 0 : index
    %207 = vector.load %arg3[%c19, %c0_68] : memref<75x128xf32, #tpu.memory_space<vmem>>, vector<1x128xf32>
    %208 = vector.shape_cast %207 : vector<1x128xf32> to vector<1x1x128xf32>
    %209 = vector.broadcast %208 : vector<1x1x128xf32> to vector<8x8x128xf32>
    %210 = arith.mulf %206, %209 : vector<8x8x128xf32>
    %211 = arith.addf %205, %210 : vector<8x8x128xf32>
    %212 = vector.extract_strided_slice %199 {offsets = [0, 2, 0], sizes = [8, 8, 128], strides = [1, 1, 1]} : vector<8x12x128xf32> to vector<8x8x128xf32>
    %c22 = arith.constant 22 : index
    %c0_69 = arith.constant 0 : index
    %213 = vector.load %arg3[%c22, %c0_69] : memref<75x128xf32, #tpu.memory_space<vmem>>, vector<1x128xf32>
    %214 = vector.shape_cast %213 : vector<1x128xf32> to vector<1x1x128xf32>
    %215 = vector.broadcast %214 : vector<1x1x128xf32> to vector<8x8x128xf32>
    %216 = arith.mulf %212, %215 : vector<8x8x128xf32>
    %217 = arith.addf %211, %216 : vector<8x8x128xf32>
    %218 = vector.extract_strided_slice %199 {offsets = [0, 3, 0], sizes = [8, 8, 128], strides = [1, 1, 1]} : vector<8x12x128xf32> to vector<8x8x128xf32>
    %c25 = arith.constant 25 : index
    %c0_70 = arith.constant 0 : index
    %219 = vector.load %arg3[%c25, %c0_70] : memref<75x128xf32, #tpu.memory_space<vmem>>, vector<1x128xf32>
    %220 = vector.shape_cast %219 : vector<1x128xf32> to vector<1x1x128xf32>
    %221 = vector.broadcast %220 : vector<1x1x128xf32> to vector<8x8x128xf32>
    %222 = arith.mulf %218, %221 : vector<8x8x128xf32>
    %223 = arith.addf %217, %222 : vector<8x8x128xf32>
    %224 = vector.extract_strided_slice %199 {offsets = [0, 4, 0], sizes = [8, 8, 128], strides = [1, 1, 1]} : vector<8x12x128xf32> to vector<8x8x128xf32>
    %c28 = arith.constant 28 : index
    %c0_71 = arith.constant 0 : index
    %225 = vector.load %arg3[%c28, %c0_71] : memref<75x128xf32, #tpu.memory_space<vmem>>, vector<1x128xf32>
    %226 = vector.shape_cast %225 : vector<1x128xf32> to vector<1x1x128xf32>
    %227 = vector.broadcast %226 : vector<1x1x128xf32> to vector<8x8x128xf32>
    %228 = arith.mulf %224, %227 : vector<8x8x128xf32>
    %229 = arith.addf %223, %228 : vector<8x8x128xf32>
    %c1_72 = arith.constant 1 : index
    %c2_73 = arith.constant 2 : index
    %c0_74 = arith.constant 0 : index
    %c0_75 = arith.constant 0 : index
    %230 = vector.load %arg1[%c1_72, %c2_73, %c0_74, %c0_75] : memref<3x12x12x128xf32, #tpu.memory_space<vmem>>, vector<1x8x12x128xf32>
    %231 = vector.shape_cast %230 : vector<1x8x12x128xf32> to vector<8x12x128xf32>
    %232 = vector.extract_strided_slice %231 {offsets = [0, 0, 0], sizes = [8, 8, 128], strides = [1, 1, 1]} : vector<8x12x128xf32> to vector<8x8x128xf32>
    %c31 = arith.constant 31 : index
    %c0_76 = arith.constant 0 : index
    %233 = vector.load %arg3[%c31, %c0_76] : memref<75x128xf32, #tpu.memory_space<vmem>>, vector<1x128xf32>
    %234 = vector.shape_cast %233 : vector<1x128xf32> to vector<1x1x128xf32>
    %235 = vector.broadcast %234 : vector<1x1x128xf32> to vector<8x8x128xf32>
    %236 = arith.mulf %232, %235 : vector<8x8x128xf32>
    %237 = arith.addf %229, %236 : vector<8x8x128xf32>
    %238 = vector.extract_strided_slice %231 {offsets = [0, 1, 0], sizes = [8, 8, 128], strides = [1, 1, 1]} : vector<8x12x128xf32> to vector<8x8x128xf32>
    %c34 = arith.constant 34 : index
    %c0_77 = arith.constant 0 : index
    %239 = vector.load %arg3[%c34, %c0_77] : memref<75x128xf32, #tpu.memory_space<vmem>>, vector<1x128xf32>
    %240 = vector.shape_cast %239 : vector<1x128xf32> to vector<1x1x128xf32>
    %241 = vector.broadcast %240 : vector<1x1x128xf32> to vector<8x8x128xf32>
    %242 = arith.mulf %238, %241 : vector<8x8x128xf32>
    %243 = arith.addf %237, %242 : vector<8x8x128xf32>
    %244 = vector.extract_strided_slice %231 {offsets = [0, 2, 0], sizes = [8, 8, 128], strides = [1, 1, 1]} : vector<8x12x128xf32> to vector<8x8x128xf32>
    %c37 = arith.constant 37 : index
    %c0_78 = arith.constant 0 : index
    %245 = vector.load %arg3[%c37, %c0_78] : memref<75x128xf32, #tpu.memory_space<vmem>>, vector<1x128xf32>
    %246 = vector.shape_cast %245 : vector<1x128xf32> to vector<1x1x128xf32>
    %247 = vector.broadcast %246 : vector<1x1x128xf32> to vector<8x8x128xf32>
    %248 = arith.mulf %244, %247 : vector<8x8x128xf32>
    %249 = arith.addf %243, %248 : vector<8x8x128xf32>
    %250 = vector.extract_strided_slice %231 {offsets = [0, 3, 0], sizes = [8, 8, 128], strides = [1, 1, 1]} : vector<8x12x128xf32> to vector<8x8x128xf32>
    %c40 = arith.constant 40 : index
    %c0_79 = arith.constant 0 : index
    %251 = vector.load %arg3[%c40, %c0_79] : memref<75x128xf32, #tpu.memory_space<vmem>>, vector<1x128xf32>
    %252 = vector.shape_cast %251 : vector<1x128xf32> to vector<1x1x128xf32>
    %253 = vector.broadcast %252 : vector<1x1x128xf32> to vector<8x8x128xf32>
    %254 = arith.mulf %250, %253 : vector<8x8x128xf32>
    %255 = arith.addf %249, %254 : vector<8x8x128xf32>
    %256 = vector.extract_strided_slice %231 {offsets = [0, 4, 0], sizes = [8, 8, 128], strides = [1, 1, 1]} : vector<8x12x128xf32> to vector<8x8x128xf32>
    %c43 = arith.constant 43 : index
    %c0_80 = arith.constant 0 : index
    %257 = vector.load %arg3[%c43, %c0_80] : memref<75x128xf32, #tpu.memory_space<vmem>>, vector<1x128xf32>
    %258 = vector.shape_cast %257 : vector<1x128xf32> to vector<1x1x128xf32>
    %259 = vector.broadcast %258 : vector<1x1x128xf32> to vector<8x8x128xf32>
    %260 = arith.mulf %256, %259 : vector<8x8x128xf32>
    %261 = arith.addf %255, %260 : vector<8x8x128xf32>
    %c1_81 = arith.constant 1 : index
    %c3_82 = arith.constant 3 : index
    %c0_83 = arith.constant 0 : index
    %c0_84 = arith.constant 0 : index
    %262 = vector.load %arg1[%c1_81, %c3_82, %c0_83, %c0_84] : memref<3x12x12x128xf32, #tpu.memory_space<vmem>>, vector<1x8x12x128xf32>
    %263 = vector.shape_cast %262 : vector<1x8x12x128xf32> to vector<8x12x128xf32>
    %264 = vector.extract_strided_slice %263 {offsets = [0, 0, 0], sizes = [8, 8, 128], strides = [1, 1, 1]} : vector<8x12x128xf32> to vector<8x8x128xf32>
    %c46 = arith.constant 46 : index
    %c0_85 = arith.constant 0 : index
    %265 = vector.load %arg3[%c46, %c0_85] : memref<75x128xf32, #tpu.memory_space<vmem>>, vector<1x128xf32>
    %266 = vector.shape_cast %265 : vector<1x128xf32> to vector<1x1x128xf32>
    %267 = vector.broadcast %266 : vector<1x1x128xf32> to vector<8x8x128xf32>
    %268 = arith.mulf %264, %267 : vector<8x8x128xf32>
    %269 = arith.addf %261, %268 : vector<8x8x128xf32>
    %270 = vector.extract_strided_slice %263 {offsets = [0, 1, 0], sizes = [8, 8, 128], strides = [1, 1, 1]} : vector<8x12x128xf32> to vector<8x8x128xf32>
    %c49 = arith.constant 49 : index
    %c0_86 = arith.constant 0 : index
    %271 = vector.load %arg3[%c49, %c0_86] : memref<75x128xf32, #tpu.memory_space<vmem>>, vector<1x128xf32>
    %272 = vector.shape_cast %271 : vector<1x128xf32> to vector<1x1x128xf32>
    %273 = vector.broadcast %272 : vector<1x1x128xf32> to vector<8x8x128xf32>
    %274 = arith.mulf %270, %273 : vector<8x8x128xf32>
    %275 = arith.addf %269, %274 : vector<8x8x128xf32>
    %276 = vector.extract_strided_slice %263 {offsets = [0, 2, 0], sizes = [8, 8, 128], strides = [1, 1, 1]} : vector<8x12x128xf32> to vector<8x8x128xf32>
    %c52 = arith.constant 52 : index
    %c0_87 = arith.constant 0 : index
    %277 = vector.load %arg3[%c52, %c0_87] : memref<75x128xf32, #tpu.memory_space<vmem>>, vector<1x128xf32>
    %278 = vector.shape_cast %277 : vector<1x128xf32> to vector<1x1x128xf32>
    %279 = vector.broadcast %278 : vector<1x1x128xf32> to vector<8x8x128xf32>
    %280 = arith.mulf %276, %279 : vector<8x8x128xf32>
    %281 = arith.addf %275, %280 : vector<8x8x128xf32>
    %282 = vector.extract_strided_slice %263 {offsets = [0, 3, 0], sizes = [8, 8, 128], strides = [1, 1, 1]} : vector<8x12x128xf32> to vector<8x8x128xf32>
    %c55 = arith.constant 55 : index
    %c0_88 = arith.constant 0 : index
    %283 = vector.load %arg3[%c55, %c0_88] : memref<75x128xf32, #tpu.memory_space<vmem>>, vector<1x128xf32>
    %284 = vector.shape_cast %283 : vector<1x128xf32> to vector<1x1x128xf32>
    %285 = vector.broadcast %284 : vector<1x1x128xf32> to vector<8x8x128xf32>
    %286 = arith.mulf %282, %285 : vector<8x8x128xf32>
    %287 = arith.addf %281, %286 : vector<8x8x128xf32>
    %288 = vector.extract_strided_slice %263 {offsets = [0, 4, 0], sizes = [8, 8, 128], strides = [1, 1, 1]} : vector<8x12x128xf32> to vector<8x8x128xf32>
    %c58 = arith.constant 58 : index
    %c0_89 = arith.constant 0 : index
    %289 = vector.load %arg3[%c58, %c0_89] : memref<75x128xf32, #tpu.memory_space<vmem>>, vector<1x128xf32>
    %290 = vector.shape_cast %289 : vector<1x128xf32> to vector<1x1x128xf32>
    %291 = vector.broadcast %290 : vector<1x1x128xf32> to vector<8x8x128xf32>
    %292 = arith.mulf %288, %291 : vector<8x8x128xf32>
    %293 = arith.addf %287, %292 : vector<8x8x128xf32>
    %c1_90 = arith.constant 1 : index
    %c4_91 = arith.constant 4 : index
    %c0_92 = arith.constant 0 : index
    %c0_93 = arith.constant 0 : index
    %294 = vector.load %arg1[%c1_90, %c4_91, %c0_92, %c0_93] : memref<3x12x12x128xf32, #tpu.memory_space<vmem>>, vector<1x8x12x128xf32>
    %295 = vector.shape_cast %294 : vector<1x8x12x128xf32> to vector<8x12x128xf32>
    %296 = vector.extract_strided_slice %295 {offsets = [0, 0, 0], sizes = [8, 8, 128], strides = [1, 1, 1]} : vector<8x12x128xf32> to vector<8x8x128xf32>
    %c61 = arith.constant 61 : index
    %c0_94 = arith.constant 0 : index
    %297 = vector.load %arg3[%c61, %c0_94] : memref<75x128xf32, #tpu.memory_space<vmem>>, vector<1x128xf32>
    %298 = vector.shape_cast %297 : vector<1x128xf32> to vector<1x1x128xf32>
    %299 = vector.broadcast %298 : vector<1x1x128xf32> to vector<8x8x128xf32>
    %300 = arith.mulf %296, %299 : vector<8x8x128xf32>
    %301 = arith.addf %293, %300 : vector<8x8x128xf32>
    %302 = vector.extract_strided_slice %295 {offsets = [0, 1, 0], sizes = [8, 8, 128], strides = [1, 1, 1]} : vector<8x12x128xf32> to vector<8x8x128xf32>
    %c64 = arith.constant 64 : index
    %c0_95 = arith.constant 0 : index
    %303 = vector.load %arg3[%c64, %c0_95] : memref<75x128xf32, #tpu.memory_space<vmem>>, vector<1x128xf32>
    %304 = vector.shape_cast %303 : vector<1x128xf32> to vector<1x1x128xf32>
    %305 = vector.broadcast %304 : vector<1x1x128xf32> to vector<8x8x128xf32>
    %306 = arith.mulf %302, %305 : vector<8x8x128xf32>
    %307 = arith.addf %301, %306 : vector<8x8x128xf32>
    %308 = vector.extract_strided_slice %295 {offsets = [0, 2, 0], sizes = [8, 8, 128], strides = [1, 1, 1]} : vector<8x12x128xf32> to vector<8x8x128xf32>
    %c67 = arith.constant 67 : index
    %c0_96 = arith.constant 0 : index
    %309 = vector.load %arg3[%c67, %c0_96] : memref<75x128xf32, #tpu.memory_space<vmem>>, vector<1x128xf32>
    %310 = vector.shape_cast %309 : vector<1x128xf32> to vector<1x1x128xf32>
    %311 = vector.broadcast %310 : vector<1x1x128xf32> to vector<8x8x128xf32>
    %312 = arith.mulf %308, %311 : vector<8x8x128xf32>
    %313 = arith.addf %307, %312 : vector<8x8x128xf32>
    %314 = vector.extract_strided_slice %295 {offsets = [0, 3, 0], sizes = [8, 8, 128], strides = [1, 1, 1]} : vector<8x12x128xf32> to vector<8x8x128xf32>
    %c70 = arith.constant 70 : index
    %c0_97 = arith.constant 0 : index
    %315 = vector.load %arg3[%c70, %c0_97] : memref<75x128xf32, #tpu.memory_space<vmem>>, vector<1x128xf32>
    %316 = vector.shape_cast %315 : vector<1x128xf32> to vector<1x1x128xf32>
    %317 = vector.broadcast %316 : vector<1x1x128xf32> to vector<8x8x128xf32>
    %318 = arith.mulf %314, %317 : vector<8x8x128xf32>
    %319 = arith.addf %313, %318 : vector<8x8x128xf32>
    %320 = vector.extract_strided_slice %295 {offsets = [0, 4, 0], sizes = [8, 8, 128], strides = [1, 1, 1]} : vector<8x12x128xf32> to vector<8x8x128xf32>
    %c73 = arith.constant 73 : index
    %c0_98 = arith.constant 0 : index
    %321 = vector.load %arg3[%c73, %c0_98] : memref<75x128xf32, #tpu.memory_space<vmem>>, vector<1x128xf32>
    %322 = vector.shape_cast %321 : vector<1x128xf32> to vector<1x1x128xf32>
    %323 = vector.broadcast %322 : vector<1x1x128xf32> to vector<8x8x128xf32>
    %324 = arith.mulf %320, %323 : vector<8x8x128xf32>
    %325 = arith.addf %319, %324 : vector<8x8x128xf32>
    %c2_99 = arith.constant 2 : index
    %c0_100 = arith.constant 0 : index
    %c0_101 = arith.constant 0 : index
    %c0_102 = arith.constant 0 : index
    %326 = vector.load %arg1[%c2_99, %c0_100, %c0_101, %c0_102] : memref<3x12x12x128xf32, #tpu.memory_space<vmem>>, vector<1x8x12x128xf32>
    %327 = vector.shape_cast %326 : vector<1x8x12x128xf32> to vector<8x12x128xf32>
    %328 = vector.extract_strided_slice %327 {offsets = [0, 0, 0], sizes = [8, 8, 128], strides = [1, 1, 1]} : vector<8x12x128xf32> to vector<8x8x128xf32>
    %c2_103 = arith.constant 2 : index
    %c0_104 = arith.constant 0 : index
    %329 = vector.load %arg3[%c2_103, %c0_104] : memref<75x128xf32, #tpu.memory_space<vmem>>, vector<1x128xf32>
    %330 = vector.shape_cast %329 : vector<1x128xf32> to vector<1x1x128xf32>
    %331 = vector.broadcast %330 : vector<1x1x128xf32> to vector<8x8x128xf32>
    %332 = arith.mulf %328, %331 : vector<8x8x128xf32>
    %333 = arith.addf %325, %332 : vector<8x8x128xf32>
    %334 = vector.extract_strided_slice %327 {offsets = [0, 1, 0], sizes = [8, 8, 128], strides = [1, 1, 1]} : vector<8x12x128xf32> to vector<8x8x128xf32>
    %c5 = arith.constant 5 : index
    %c0_105 = arith.constant 0 : index
    %335 = vector.load %arg3[%c5, %c0_105] : memref<75x128xf32, #tpu.memory_space<vmem>>, vector<1x128xf32>
    %336 = vector.shape_cast %335 : vector<1x128xf32> to vector<1x1x128xf32>
    %337 = vector.broadcast %336 : vector<1x1x128xf32> to vector<8x8x128xf32>
    %338 = arith.mulf %334, %337 : vector<8x8x128xf32>
    %339 = arith.addf %333, %338 : vector<8x8x128xf32>
    %340 = vector.extract_strided_slice %327 {offsets = [0, 2, 0], sizes = [8, 8, 128], strides = [1, 1, 1]} : vector<8x12x128xf32> to vector<8x8x128xf32>
    %c8 = arith.constant 8 : index
    %c0_106 = arith.constant 0 : index
    %341 = vector.load %arg3[%c8, %c0_106] : memref<75x128xf32, #tpu.memory_space<vmem>>, vector<1x128xf32>
    %342 = vector.shape_cast %341 : vector<1x128xf32> to vector<1x1x128xf32>
    %343 = vector.broadcast %342 : vector<1x1x128xf32> to vector<8x8x128xf32>
    %344 = arith.mulf %340, %343 : vector<8x8x128xf32>
    %345 = arith.addf %339, %344 : vector<8x8x128xf32>
    %346 = vector.extract_strided_slice %327 {offsets = [0, 3, 0], sizes = [8, 8, 128], strides = [1, 1, 1]} : vector<8x12x128xf32> to vector<8x8x128xf32>
    %c11 = arith.constant 11 : index
    %c0_107 = arith.constant 0 : index
    %347 = vector.load %arg3[%c11, %c0_107] : memref<75x128xf32, #tpu.memory_space<vmem>>, vector<1x128xf32>
    %348 = vector.shape_cast %347 : vector<1x128xf32> to vector<1x1x128xf32>
    %349 = vector.broadcast %348 : vector<1x1x128xf32> to vector<8x8x128xf32>
    %350 = arith.mulf %346, %349 : vector<8x8x128xf32>
    %351 = arith.addf %345, %350 : vector<8x8x128xf32>
    %352 = vector.extract_strided_slice %327 {offsets = [0, 4, 0], sizes = [8, 8, 128], strides = [1, 1, 1]} : vector<8x12x128xf32> to vector<8x8x128xf32>
    %c14 = arith.constant 14 : index
    %c0_108 = arith.constant 0 : index
    %353 = vector.load %arg3[%c14, %c0_108] : memref<75x128xf32, #tpu.memory_space<vmem>>, vector<1x128xf32>
    %354 = vector.shape_cast %353 : vector<1x128xf32> to vector<1x1x128xf32>
    %355 = vector.broadcast %354 : vector<1x1x128xf32> to vector<8x8x128xf32>
    %356 = arith.mulf %352, %355 : vector<8x8x128xf32>
    %357 = arith.addf %351, %356 : vector<8x8x128xf32>
    %c2_109 = arith.constant 2 : index
    %c1_110 = arith.constant 1 : index
    %c0_111 = arith.constant 0 : index
    %c0_112 = arith.constant 0 : index
    %358 = vector.load %arg1[%c2_109, %c1_110, %c0_111, %c0_112] : memref<3x12x12x128xf32, #tpu.memory_space<vmem>>, vector<1x8x12x128xf32>
    %359 = vector.shape_cast %358 : vector<1x8x12x128xf32> to vector<8x12x128xf32>
    %360 = vector.extract_strided_slice %359 {offsets = [0, 0, 0], sizes = [8, 8, 128], strides = [1, 1, 1]} : vector<8x12x128xf32> to vector<8x8x128xf32>
    %c17 = arith.constant 17 : index
    %c0_113 = arith.constant 0 : index
    %361 = vector.load %arg3[%c17, %c0_113] : memref<75x128xf32, #tpu.memory_space<vmem>>, vector<1x128xf32>
    %362 = vector.shape_cast %361 : vector<1x128xf32> to vector<1x1x128xf32>
    %363 = vector.broadcast %362 : vector<1x1x128xf32> to vector<8x8x128xf32>
    %364 = arith.mulf %360, %363 : vector<8x8x128xf32>
    %365 = arith.addf %357, %364 : vector<8x8x128xf32>
    %366 = vector.extract_strided_slice %359 {offsets = [0, 1, 0], sizes = [8, 8, 128], strides = [1, 1, 1]} : vector<8x12x128xf32> to vector<8x8x128xf32>
    %c20 = arith.constant 20 : index
    %c0_114 = arith.constant 0 : index
    %367 = vector.load %arg3[%c20, %c0_114] : memref<75x128xf32, #tpu.memory_space<vmem>>, vector<1x128xf32>
    %368 = vector.shape_cast %367 : vector<1x128xf32> to vector<1x1x128xf32>
    %369 = vector.broadcast %368 : vector<1x1x128xf32> to vector<8x8x128xf32>
    %370 = arith.mulf %366, %369 : vector<8x8x128xf32>
    %371 = arith.addf %365, %370 : vector<8x8x128xf32>
    %372 = vector.extract_strided_slice %359 {offsets = [0, 2, 0], sizes = [8, 8, 128], strides = [1, 1, 1]} : vector<8x12x128xf32> to vector<8x8x128xf32>
    %c23 = arith.constant 23 : index
    %c0_115 = arith.constant 0 : index
    %373 = vector.load %arg3[%c23, %c0_115] : memref<75x128xf32, #tpu.memory_space<vmem>>, vector<1x128xf32>
    %374 = vector.shape_cast %373 : vector<1x128xf32> to vector<1x1x128xf32>
    %375 = vector.broadcast %374 : vector<1x1x128xf32> to vector<8x8x128xf32>
    %376 = arith.mulf %372, %375 : vector<8x8x128xf32>
    %377 = arith.addf %371, %376 : vector<8x8x128xf32>
    %378 = vector.extract_strided_slice %359 {offsets = [0, 3, 0], sizes = [8, 8, 128], strides = [1, 1, 1]} : vector<8x12x128xf32> to vector<8x8x128xf32>
    %c26 = arith.constant 26 : index
    %c0_116 = arith.constant 0 : index
    %379 = vector.load %arg3[%c26, %c0_116] : memref<75x128xf32, #tpu.memory_space<vmem>>, vector<1x128xf32>
    %380 = vector.shape_cast %379 : vector<1x128xf32> to vector<1x1x128xf32>
    %381 = vector.broadcast %380 : vector<1x1x128xf32> to vector<8x8x128xf32>
    %382 = arith.mulf %378, %381 : vector<8x8x128xf32>
    %383 = arith.addf %377, %382 : vector<8x8x128xf32>
    %384 = vector.extract_strided_slice %359 {offsets = [0, 4, 0], sizes = [8, 8, 128], strides = [1, 1, 1]} : vector<8x12x128xf32> to vector<8x8x128xf32>
    %c29 = arith.constant 29 : index
    %c0_117 = arith.constant 0 : index
    %385 = vector.load %arg3[%c29, %c0_117] : memref<75x128xf32, #tpu.memory_space<vmem>>, vector<1x128xf32>
    %386 = vector.shape_cast %385 : vector<1x128xf32> to vector<1x1x128xf32>
    %387 = vector.broadcast %386 : vector<1x1x128xf32> to vector<8x8x128xf32>
    %388 = arith.mulf %384, %387 : vector<8x8x128xf32>
    %389 = arith.addf %383, %388 : vector<8x8x128xf32>
    %c2_118 = arith.constant 2 : index
    %c2_119 = arith.constant 2 : index
    %c0_120 = arith.constant 0 : index
    %c0_121 = arith.constant 0 : index
    %390 = vector.load %arg1[%c2_118, %c2_119, %c0_120, %c0_121] : memref<3x12x12x128xf32, #tpu.memory_space<vmem>>, vector<1x8x12x128xf32>
    %391 = vector.shape_cast %390 : vector<1x8x12x128xf32> to vector<8x12x128xf32>
    %392 = vector.extract_strided_slice %391 {offsets = [0, 0, 0], sizes = [8, 8, 128], strides = [1, 1, 1]} : vector<8x12x128xf32> to vector<8x8x128xf32>
    %c32 = arith.constant 32 : index
    %c0_122 = arith.constant 0 : index
    %393 = vector.load %arg3[%c32, %c0_122] : memref<75x128xf32, #tpu.memory_space<vmem>>, vector<1x128xf32>
    %394 = vector.shape_cast %393 : vector<1x128xf32> to vector<1x1x128xf32>
    %395 = vector.broadcast %394 : vector<1x1x128xf32> to vector<8x8x128xf32>
    %396 = arith.mulf %392, %395 : vector<8x8x128xf32>
    %397 = arith.addf %389, %396 : vector<8x8x128xf32>
    %398 = vector.extract_strided_slice %391 {offsets = [0, 1, 0], sizes = [8, 8, 128], strides = [1, 1, 1]} : vector<8x12x128xf32> to vector<8x8x128xf32>
    %c35 = arith.constant 35 : index
    %c0_123 = arith.constant 0 : index
    %399 = vector.load %arg3[%c35, %c0_123] : memref<75x128xf32, #tpu.memory_space<vmem>>, vector<1x128xf32>
    %400 = vector.shape_cast %399 : vector<1x128xf32> to vector<1x1x128xf32>
    %401 = vector.broadcast %400 : vector<1x1x128xf32> to vector<8x8x128xf32>
    %402 = arith.mulf %398, %401 : vector<8x8x128xf32>
    %403 = arith.addf %397, %402 : vector<8x8x128xf32>
    %404 = vector.extract_strided_slice %391 {offsets = [0, 2, 0], sizes = [8, 8, 128], strides = [1, 1, 1]} : vector<8x12x128xf32> to vector<8x8x128xf32>
    %c38 = arith.constant 38 : index
    %c0_124 = arith.constant 0 : index
    %405 = vector.load %arg3[%c38, %c0_124] : memref<75x128xf32, #tpu.memory_space<vmem>>, vector<1x128xf32>
    %406 = vector.shape_cast %405 : vector<1x128xf32> to vector<1x1x128xf32>
    %407 = vector.broadcast %406 : vector<1x1x128xf32> to vector<8x8x128xf32>
    %408 = arith.mulf %404, %407 : vector<8x8x128xf32>
    %409 = arith.addf %403, %408 : vector<8x8x128xf32>
    %410 = vector.extract_strided_slice %391 {offsets = [0, 3, 0], sizes = [8, 8, 128], strides = [1, 1, 1]} : vector<8x12x128xf32> to vector<8x8x128xf32>
    %c41 = arith.constant 41 : index
    %c0_125 = arith.constant 0 : index
    %411 = vector.load %arg3[%c41, %c0_125] : memref<75x128xf32, #tpu.memory_space<vmem>>, vector<1x128xf32>
    %412 = vector.shape_cast %411 : vector<1x128xf32> to vector<1x1x128xf32>
    %413 = vector.broadcast %412 : vector<1x1x128xf32> to vector<8x8x128xf32>
    %414 = arith.mulf %410, %413 : vector<8x8x128xf32>
    %415 = arith.addf %409, %414 : vector<8x8x128xf32>
    %416 = vector.extract_strided_slice %391 {offsets = [0, 4, 0], sizes = [8, 8, 128], strides = [1, 1, 1]} : vector<8x12x128xf32> to vector<8x8x128xf32>
    %c44 = arith.constant 44 : index
    %c0_126 = arith.constant 0 : index
    %417 = vector.load %arg3[%c44, %c0_126] : memref<75x128xf32, #tpu.memory_space<vmem>>, vector<1x128xf32>
    %418 = vector.shape_cast %417 : vector<1x128xf32> to vector<1x1x128xf32>
    %419 = vector.broadcast %418 : vector<1x1x128xf32> to vector<8x8x128xf32>
    %420 = arith.mulf %416, %419 : vector<8x8x128xf32>
    %421 = arith.addf %415, %420 : vector<8x8x128xf32>
    %c2_127 = arith.constant 2 : index
    %c3_128 = arith.constant 3 : index
    %c0_129 = arith.constant 0 : index
    %c0_130 = arith.constant 0 : index
    %422 = vector.load %arg1[%c2_127, %c3_128, %c0_129, %c0_130] : memref<3x12x12x128xf32, #tpu.memory_space<vmem>>, vector<1x8x12x128xf32>
    %423 = vector.shape_cast %422 : vector<1x8x12x128xf32> to vector<8x12x128xf32>
    %424 = vector.extract_strided_slice %423 {offsets = [0, 0, 0], sizes = [8, 8, 128], strides = [1, 1, 1]} : vector<8x12x128xf32> to vector<8x8x128xf32>
    %c47 = arith.constant 47 : index
    %c0_131 = arith.constant 0 : index
    %425 = vector.load %arg3[%c47, %c0_131] : memref<75x128xf32, #tpu.memory_space<vmem>>, vector<1x128xf32>
    %426 = vector.shape_cast %425 : vector<1x128xf32> to vector<1x1x128xf32>
    %427 = vector.broadcast %426 : vector<1x1x128xf32> to vector<8x8x128xf32>
    %428 = arith.mulf %424, %427 : vector<8x8x128xf32>
    %429 = arith.addf %421, %428 : vector<8x8x128xf32>
    %430 = vector.extract_strided_slice %423 {offsets = [0, 1, 0], sizes = [8, 8, 128], strides = [1, 1, 1]} : vector<8x12x128xf32> to vector<8x8x128xf32>
    %c50 = arith.constant 50 : index
    %c0_132 = arith.constant 0 : index
    %431 = vector.load %arg3[%c50, %c0_132] : memref<75x128xf32, #tpu.memory_space<vmem>>, vector<1x128xf32>
    %432 = vector.shape_cast %431 : vector<1x128xf32> to vector<1x1x128xf32>
    %433 = vector.broadcast %432 : vector<1x1x128xf32> to vector<8x8x128xf32>
    %434 = arith.mulf %430, %433 : vector<8x8x128xf32>
    %435 = arith.addf %429, %434 : vector<8x8x128xf32>
    %436 = vector.extract_strided_slice %423 {offsets = [0, 2, 0], sizes = [8, 8, 128], strides = [1, 1, 1]} : vector<8x12x128xf32> to vector<8x8x128xf32>
    %c53 = arith.constant 53 : index
    %c0_133 = arith.constant 0 : index
    %437 = vector.load %arg3[%c53, %c0_133] : memref<75x128xf32, #tpu.memory_space<vmem>>, vector<1x128xf32>
    %438 = vector.shape_cast %437 : vector<1x128xf32> to vector<1x1x128xf32>
    %439 = vector.broadcast %438 : vector<1x1x128xf32> to vector<8x8x128xf32>
    %440 = arith.mulf %436, %439 : vector<8x8x128xf32>
    %441 = arith.addf %435, %440 : vector<8x8x128xf32>
    %442 = vector.extract_strided_slice %423 {offsets = [0, 3, 0], sizes = [8, 8, 128], strides = [1, 1, 1]} : vector<8x12x128xf32> to vector<8x8x128xf32>
    %c56 = arith.constant 56 : index
    %c0_134 = arith.constant 0 : index
    %443 = vector.load %arg3[%c56, %c0_134] : memref<75x128xf32, #tpu.memory_space<vmem>>, vector<1x128xf32>
    %444 = vector.shape_cast %443 : vector<1x128xf32> to vector<1x1x128xf32>
    %445 = vector.broadcast %444 : vector<1x1x128xf32> to vector<8x8x128xf32>
    %446 = arith.mulf %442, %445 : vector<8x8x128xf32>
    %447 = arith.addf %441, %446 : vector<8x8x128xf32>
    %448 = vector.extract_strided_slice %423 {offsets = [0, 4, 0], sizes = [8, 8, 128], strides = [1, 1, 1]} : vector<8x12x128xf32> to vector<8x8x128xf32>
    %c59 = arith.constant 59 : index
    %c0_135 = arith.constant 0 : index
    %449 = vector.load %arg3[%c59, %c0_135] : memref<75x128xf32, #tpu.memory_space<vmem>>, vector<1x128xf32>
    %450 = vector.shape_cast %449 : vector<1x128xf32> to vector<1x1x128xf32>
    %451 = vector.broadcast %450 : vector<1x1x128xf32> to vector<8x8x128xf32>
    %452 = arith.mulf %448, %451 : vector<8x8x128xf32>
    %453 = arith.addf %447, %452 : vector<8x8x128xf32>
    %c2_136 = arith.constant 2 : index
    %c4_137 = arith.constant 4 : index
    %c0_138 = arith.constant 0 : index
    %c0_139 = arith.constant 0 : index
    %454 = vector.load %arg1[%c2_136, %c4_137, %c0_138, %c0_139] : memref<3x12x12x128xf32, #tpu.memory_space<vmem>>, vector<1x8x12x128xf32>
    %455 = vector.shape_cast %454 : vector<1x8x12x128xf32> to vector<8x12x128xf32>
    %456 = vector.extract_strided_slice %455 {offsets = [0, 0, 0], sizes = [8, 8, 128], strides = [1, 1, 1]} : vector<8x12x128xf32> to vector<8x8x128xf32>
    %c62 = arith.constant 62 : index
    %c0_140 = arith.constant 0 : index
    %457 = vector.load %arg3[%c62, %c0_140] : memref<75x128xf32, #tpu.memory_space<vmem>>, vector<1x128xf32>
    %458 = vector.shape_cast %457 : vector<1x128xf32> to vector<1x1x128xf32>
    %459 = vector.broadcast %458 : vector<1x1x128xf32> to vector<8x8x128xf32>
    %460 = arith.mulf %456, %459 : vector<8x8x128xf32>
    %461 = arith.addf %453, %460 : vector<8x8x128xf32>
    %462 = vector.extract_strided_slice %455 {offsets = [0, 1, 0], sizes = [8, 8, 128], strides = [1, 1, 1]} : vector<8x12x128xf32> to vector<8x8x128xf32>
    %c65 = arith.constant 65 : index
    %c0_141 = arith.constant 0 : index
    %463 = vector.load %arg3[%c65, %c0_141] : memref<75x128xf32, #tpu.memory_space<vmem>>, vector<1x128xf32>
    %464 = vector.shape_cast %463 : vector<1x128xf32> to vector<1x1x128xf32>
    %465 = vector.broadcast %464 : vector<1x1x128xf32> to vector<8x8x128xf32>
    %466 = arith.mulf %462, %465 : vector<8x8x128xf32>
    %467 = arith.addf %461, %466 : vector<8x8x128xf32>
    %468 = vector.extract_strided_slice %455 {offsets = [0, 2, 0], sizes = [8, 8, 128], strides = [1, 1, 1]} : vector<8x12x128xf32> to vector<8x8x128xf32>
    %c68 = arith.constant 68 : index
    %c0_142 = arith.constant 0 : index
    %469 = vector.load %arg3[%c68, %c0_142] : memref<75x128xf32, #tpu.memory_space<vmem>>, vector<1x128xf32>
    %470 = vector.shape_cast %469 : vector<1x128xf32> to vector<1x1x128xf32>
    %471 = vector.broadcast %470 : vector<1x1x128xf32> to vector<8x8x128xf32>
    %472 = arith.mulf %468, %471 : vector<8x8x128xf32>
    %473 = arith.addf %467, %472 : vector<8x8x128xf32>
    %474 = vector.extract_strided_slice %455 {offsets = [0, 3, 0], sizes = [8, 8, 128], strides = [1, 1, 1]} : vector<8x12x128xf32> to vector<8x8x128xf32>
    %c71 = arith.constant 71 : index
    %c0_143 = arith.constant 0 : index
    %475 = vector.load %arg3[%c71, %c0_143] : memref<75x128xf32, #tpu.memory_space<vmem>>, vector<1x128xf32>
    %476 = vector.shape_cast %475 : vector<1x128xf32> to vector<1x1x128xf32>
    %477 = vector.broadcast %476 : vector<1x1x128xf32> to vector<8x8x128xf32>
    %478 = arith.mulf %474, %477 : vector<8x8x128xf32>
    %479 = arith.addf %473, %478 : vector<8x8x128xf32>
    %480 = vector.extract_strided_slice %455 {offsets = [0, 4, 0], sizes = [8, 8, 128], strides = [1, 1, 1]} : vector<8x12x128xf32> to vector<8x8x128xf32>
    %c74 = arith.constant 74 : index
    %c0_144 = arith.constant 0 : index
    %481 = vector.load %arg3[%c74, %c0_144] : memref<75x128xf32, #tpu.memory_space<vmem>>, vector<1x128xf32>
    %482 = vector.shape_cast %481 : vector<1x128xf32> to vector<1x1x128xf32>
    %483 = vector.broadcast %482 : vector<1x1x128xf32> to vector<8x8x128xf32>
    %484 = arith.mulf %480, %483 : vector<8x8x128xf32>
    %485 = arith.addf %479, %484 : vector<8x8x128xf32>
    %486 = vector.shape_cast %0 : vector<1x128xf32> to vector<1x1x128xf32>
    %487 = vector.broadcast %486 : vector<1x1x128xf32> to vector<8x8x128xf32>
    %488 = arith.mulf %485, %487 : vector<8x8x128xf32>
    %489 = vector.shape_cast %1 : vector<1x128xf32> to vector<1x1x128xf32>
    %490 = vector.broadcast %489 : vector<1x1x128xf32> to vector<8x8x128xf32>
    %491 = arith.addf %488, %490 : vector<8x8x128xf32>
    %492 = vector.shape_cast %491 : vector<8x8x128xf32> to vector<64x128xf32>
    %cst_145 = arith.constant dense<0.000000e+00> : vector<128xf32>
    %493 = vector.multi_reduction <add>, %492, %cst_145 [0] : vector<64x128xf32> to vector<128xf32>
    %494 = vector.shape_cast %493 : vector<128xf32> to vector<1x128xf32>
    %c0_146 = arith.constant 0 : index
    %c0_147 = arith.constant 0 : index
    %495 = vector.load %arg5[%c0_146, %c0_147] : memref<128x16xf32, #tpu.memory_space<vmem>>, vector<128x16xf32>
    %cst_148 = arith.constant dense<0.000000e+00> : vector<1x16xf32>
    %496 = tpu.matmul %494, %495, %cst_148 {dimension_numbers = #tpu.dot_dimension_numbers<[1], [0], [0], [1], [0, 0, 1, 1], [], []>} : vector<1x128xf32>, vector<128x16xf32>, vector<1x16xf32> -> vector<1x16xf32>
    %497 = arith.addf %496, %4 : vector<1x16xf32>
    %cst_149 = arith.constant 0.000000e+00 : f32
    %498 = vector.broadcast %cst_149 : f32 to vector<1x16xf32>
    %499 = arith.maximumf %497, %498 : vector<1x16xf32>
    %c0_150 = arith.constant 0 : index
    %c0_151 = arith.constant 0 : index
    %500 = vector.load %arg6[%c0_150, %c0_151] : memref<16x128xf32, #tpu.memory_space<vmem>>, vector<16x128xf32>
    %cst_152 = arith.constant dense<0.000000e+00> : vector<1x128xf32>
    %501 = tpu.matmul %499, %500, %cst_152 {dimension_numbers = #tpu.dot_dimension_numbers<[1], [0], [0], [1], [0, 0, 1, 1], [], []>} : vector<1x16xf32>, vector<16x128xf32>, vector<1x128xf32> -> vector<1x128xf32>
    %502 = arith.addf %501, %2 : vector<1x128xf32>
    %503 = vector.broadcast %502 : vector<1x128xf32> to vector<64x128xf32>
    %504 = arith.mulf %492, %503 : vector<64x128xf32>
    %c0_153 = arith.constant 0 : index
    %c0_154 = arith.constant 0 : index
    %505 = vector.load %arg8[%c0_153, %c0_154] : memref<128x512xf32, #tpu.memory_space<vmem>>, vector<128x512xf32>
    %cst_155 = arith.constant dense<0.000000e+00> : vector<64x512xf32>
    %506 = tpu.matmul %504, %505, %cst_155 {dimension_numbers = #tpu.dot_dimension_numbers<[1], [0], [0], [1], [0, 0, 1, 1], [], []>} : vector<64x128xf32>, vector<128x512xf32>, vector<64x512xf32> -> vector<64x512xf32>
    %c0_156 = arith.constant 0 : index
    %c0_157 = arith.constant 0 : index
    %507 = vector.load %arg7[%c0_156, %c0_157] : memref<3x512xf32, #tpu.memory_space<vmem>>, vector<1x512xf32>
    %508 = vector.broadcast %507 : vector<1x512xf32> to vector<64x512xf32>
    %509 = arith.addf %506, %508 : vector<64x512xf32>
    %510 = math.absf %509 : vector<64x512xf32>
    %cst_158 = arith.constant 0.707106769 : f32
    %511 = vector.broadcast %cst_158 : f32 to vector<64x512xf32>
    %512 = arith.mulf %510, %511 : vector<64x512xf32>
    %cst_159 = arith.constant 0.327591091 : f32
    %513 = vector.broadcast %cst_159 : f32 to vector<64x512xf32>
    %514 = arith.mulf %513, %512 : vector<64x512xf32>
    %cst_160 = arith.constant 1.000000e+00 : f32
    %515 = vector.broadcast %cst_160 : f32 to vector<64x512xf32>
    %516 = arith.addf %515, %514 : vector<64x512xf32>
    %517 = tpu.reciprocal %516 {approx = true} : vector<64x512xf32> -> vector<64x512xf32>
    %518 = arith.mulf %516, %517 : vector<64x512xf32>
    %cst_161 = arith.constant 2.000000e+00 : f32
    %519 = vector.broadcast %cst_161 : f32 to vector<64x512xf32>
    %520 = arith.subf %519, %518 : vector<64x512xf32>
    %521 = arith.mulf %517, %520 : vector<64x512xf32>
    %cst_162 = arith.constant 1.06140542 : f32
    %522 = vector.broadcast %cst_162 : f32 to vector<64x512xf32>
    %523 = arith.mulf %522, %521 : vector<64x512xf32>
    %cst_163 = arith.constant -1.45315206 : f32
    %524 = vector.broadcast %cst_163 : f32 to vector<64x512xf32>
    %525 = arith.addf %523, %524 : vector<64x512xf32>
    %526 = arith.mulf %525, %521 : vector<64x512xf32>
    %cst_164 = arith.constant 1.42141378 : f32
    %527 = vector.broadcast %cst_164 : f32 to vector<64x512xf32>
    %528 = arith.addf %526, %527 : vector<64x512xf32>
    %529 = arith.mulf %528, %521 : vector<64x512xf32>
    %cst_165 = arith.constant -0.284496725 : f32
    %530 = vector.broadcast %cst_165 : f32 to vector<64x512xf32>
    %531 = arith.addf %529, %530 : vector<64x512xf32>
    %532 = arith.mulf %531, %521 : vector<64x512xf32>
    %cst_166 = arith.constant 0.254829586 : f32
    %533 = vector.broadcast %cst_166 : f32 to vector<64x512xf32>
    %534 = arith.addf %532, %533 : vector<64x512xf32>
    %535 = arith.mulf %534, %521 : vector<64x512xf32>
    %cst_167 = arith.constant 0.000000e+00 : f32
    %536 = vector.broadcast %cst_167 : f32 to vector<64x512xf32>
    %537 = arith.subf %536, %512 : vector<64x512xf32>
    %538 = arith.mulf %537, %512 : vector<64x512xf32>
    %539 = math.exp %538 : vector<64x512xf32>
    %540 = arith.mulf %535, %539 : vector<64x512xf32>
    %cst_168 = arith.constant 1.000000e+00 : f32
    %541 = vector.broadcast %cst_168 : f32 to vector<64x512xf32>
    %542 = arith.subf %541, %540 : vector<64x512xf32>
    %cst_169 = arith.constant 0.000000e+00 : f32
    %543 = vector.broadcast %cst_169 : f32 to vector<64x512xf32>
    %544 = arith.cmpf oge, %509, %543 : vector<64x512xf32>
    %cst_170 = arith.constant 0.000000e+00 : f32
    %545 = vector.broadcast %cst_170 : f32 to vector<64x512xf32>
    %546 = arith.subf %545, %542 : vector<64x512xf32>
    %547 = arith.select %544, %542, %546 : vector<64x512xi1>, vector<64x512xf32>
    %cst_171 = arith.constant 5.000000e-01 : f32
    %548 = vector.broadcast %cst_171 : f32 to vector<64x512xf32>
    %549 = arith.mulf %548, %509 : vector<64x512xf32>
    %cst_172 = arith.constant 1.000000e+00 : f32
    %550 = vector.broadcast %cst_172 : f32 to vector<64x512xf32>
    %551 = arith.addf %550, %547 : vector<64x512xf32>
    %552 = arith.mulf %549, %551 : vector<64x512xf32>
    %553 = arith.mulf %552, %552 : vector<64x512xf32>
    %cst_173 = arith.constant dense<0.000000e+00> : vector<512xf32>
    %554 = vector.multi_reduction <add>, %553, %cst_173 [0] : vector<64x512xf32> to vector<512xf32>
    %555 = vector.shape_cast %554 : vector<512xf32> to vector<1x512xf32>
    %c0_174 = arith.constant 0 : index
    %c0_175 = arith.constant 0 : index
    %556 = vector.load %arg9[%c0_174, %c0_175] : memref<512x512xf32, #tpu.memory_space<vmem>>, vector<512x512xf32>
    %cst_176 = arith.constant dense<0.000000e+00> : vector<1x512xf32>
    %557 = tpu.matmul %555, %556, %cst_176 {dimension_numbers = #tpu.dot_dimension_numbers<[1], [0], [0], [1], [0, 0, 1, 1], [], []>} : vector<1x512xf32>, vector<512x512xf32>, vector<1x512xf32> -> vector<1x512xf32>
    %558 = math.sqrt %557 : vector<1x512xf32>
    %559 = vector.extract_strided_slice %558 {offsets = [0, 0], sizes = [1, 256], strides = [1, 1]} : vector<1x512xf32> to vector<1x256xf32>
    %cst_177 = arith.constant dense<0.000000e+00> : vector<1xf32>
    %560 = vector.multi_reduction <add>, %559, %cst_177 [1] : vector<1x256xf32> to vector<1xf32>
    %561 = vector.shape_cast %560 : vector<1xf32> to vector<1x1xf32>
    %cst_178 = arith.constant 2.560000e+02 : f32
    %562 = vector.broadcast %cst_178 : f32 to vector<1x1xf32>
    %563 = arith.divf %561, %562 : vector<1x1xf32>
    %cst_179 = arith.constant 9.99999997E-7 : f32
    %564 = vector.broadcast %cst_179 : f32 to vector<1x1xf32>
    %565 = arith.addf %563, %564 : vector<1x1xf32>
    %cst_180 = arith.constant 1.000000e+00 : f32
    %566 = vector.broadcast %cst_180 : f32 to vector<1x1xf32>
    %567 = arith.divf %566, %565 : vector<1x1xf32>
    %568 = vector.broadcast %567 : vector<1x1xf32> to vector<1x256xf32>
    %569 = arith.mulf %559, %568 : vector<1x256xf32>
    %570 = vector.extract_strided_slice %558 {offsets = [0, 256], sizes = [1, 256], strides = [1, 1]} : vector<1x512xf32> to vector<1x256xf32>
    %cst_181 = arith.constant dense<0.000000e+00> : vector<1xf32>
    %571 = vector.multi_reduction <add>, %570, %cst_181 [1] : vector<1x256xf32> to vector<1xf32>
    %572 = vector.shape_cast %571 : vector<1xf32> to vector<1x1xf32>
    %cst_182 = arith.constant 2.560000e+02 : f32
    %573 = vector.broadcast %cst_182 : f32 to vector<1x1xf32>
    %574 = arith.divf %572, %573 : vector<1x1xf32>
    %cst_183 = arith.constant 9.99999997E-7 : f32
    %575 = vector.broadcast %cst_183 : f32 to vector<1x1xf32>
    %576 = arith.addf %574, %575 : vector<1x1xf32>
    %cst_184 = arith.constant 1.000000e+00 : f32
    %577 = vector.broadcast %cst_184 : f32 to vector<1x1xf32>
    %578 = arith.divf %577, %576 : vector<1x1xf32>
    %579 = vector.broadcast %578 : vector<1x1xf32> to vector<1x256xf32>
    %580 = arith.mulf %570, %579 : vector<1x256xf32>
    %581 = tpu.concatenate %569, %580 in 1 : vector<1x256xf32>, vector<1x256xf32> -> vector<1x512xf32>
    %c1_185 = arith.constant 1 : index
    %c0_186 = arith.constant 0 : index
    %582 = vector.load %arg7[%c1_185, %c0_186] : memref<3x512xf32, #tpu.memory_space<vmem>>, vector<1x512xf32>
    %583 = arith.mulf %582, %581 : vector<1x512xf32>
    %cst_187 = arith.constant 1.000000e+00 : f32
    %584 = vector.broadcast %cst_187 : f32 to vector<1x512xf32>
    %585 = arith.addf %583, %584 : vector<1x512xf32>
    %586 = vector.broadcast %585 : vector<1x512xf32> to vector<64x512xf32>
    %587 = arith.mulf %586, %552 : vector<64x512xf32>
    %c2_188 = arith.constant 2 : index
    %c0_189 = arith.constant 0 : index
    %588 = vector.load %arg7[%c2_188, %c0_189] : memref<3x512xf32, #tpu.memory_space<vmem>>, vector<1x512xf32>
    %589 = vector.broadcast %588 : vector<1x512xf32> to vector<64x512xf32>
    %590 = arith.addf %587, %589 : vector<64x512xf32>
    %c0_190 = arith.constant 0 : index
    %c0_191 = arith.constant 0 : index
    %591 = vector.load %arg10[%c0_190, %c0_191] : memref<512x128xf32, #tpu.memory_space<vmem>>, vector<512x128xf32>
    %cst_192 = arith.constant dense<0.000000e+00> : vector<64x128xf32>
    %592 = tpu.matmul %590, %591, %cst_192 {dimension_numbers = #tpu.dot_dimension_numbers<[1], [0], [0], [1], [0, 0, 1, 1], [], []>} : vector<64x512xf32>, vector<512x128xf32>, vector<64x128xf32> -> vector<64x128xf32>
    %593 = vector.broadcast %3 : vector<1x128xf32> to vector<64x128xf32>
    %594 = arith.addf %592, %593 : vector<64x128xf32>
    %c0_193 = arith.constant 0 : index
    %c0_194 = arith.constant 0 : index
    %595 = vector.load %arg2[%c0_193, %c0_194] : memref<64x128xf32, #tpu.memory_space<vmem>>, vector<64x128xf32>
    %596 = arith.addf %595, %594 : vector<64x128xf32>
    %c0_195 = arith.constant 0 : index
    %c0_196 = arith.constant 0 : index
    %597 = vector.load %arg11[%c0_195, %c0_196] : memref<64x128xf32, #tpu.memory_space<vmem>>, vector<64x128xf32>
    tpu.vector_store %arg11[%c0_195, %c0_196], %596 {strides = array<i32>} : memref<64x128xf32, #tpu.memory_space<vmem>>, vector<64x128xf32>,
    return
  }
  func.func @transform_0(%arg0: i32) -> (i32, i32, i32, i32) {
    %c0_i32 = arith.constant 0 : i32
    %c0_i32_0 = arith.constant 0 : i32
    %c0_i32_1 = arith.constant 0 : i32
    %c0_i32_2 = arith.constant 0 : i32
    %c0_i32_3 = arith.constant 0 : i32
    return %c0_i32, %c0_i32_0, %c0_i32_1, %c0_i32_2 : i32, i32, i32, i32
  }
  func.func @transform_1(%arg0: i32) -> (i32, i32) {
    %c0_i32 = arith.constant 0 : i32
    %c0_i32_0 = arith.constant 0 : i32
    %c0_i32_1 = arith.constant 0 : i32
    return %c0_i32, %c0_i32_0 : i32, i32
  }
  func.func @transform_2(%arg0: i32) -> (i32, i32) {
    %c0_i32 = arith.constant 0 : i32
    %c0_i32_0 = arith.constant 0 : i32
    %c0_i32_1 = arith.constant 0 : i32
    return %c0_i32, %c0_i32_0 : i32, i32
  }
  func.func @transform_3(%arg0: i32) -> (i32, i32) {
    %c0_i32 = arith.constant 0 : i32
    %c0_i32_0 = arith.constant 0 : i32
    %c0_i32_1 = arith.constant 0 : i32
    return %c0_i32, %c0_i32_0 : i32, i32
  }
  func.func @transform_4(%arg0: i32) -> (i32, i32) {
    %c0_i32 = arith.constant 0 : i32
    %c0_i32_0 = arith.constant 0 : i32
    %c0_i32_1 = arith.constant 0 : i32
    return %c0_i32, %c0_i32_0 : i32, i32
  }
  func.func @transform_5(%arg0: i32) -> (i32, i32) {
    %c0_i32 = arith.constant 0 : i32
    %c0_i32_0 = arith.constant 0 : i32
    %c0_i32_1 = arith.constant 0 : i32
    return %c0_i32, %c0_i32_0 : i32, i32
  }
  func.func @transform_6(%arg0: i32) -> (i32, i32) {
    %c0_i32 = arith.constant 0 : i32
    %c0_i32_0 = arith.constant 0 : i32
    %c0_i32_1 = arith.constant 0 : i32
    return %c0_i32, %c0_i32_0 : i32, i32
  }
  func.func @transform_7(%arg0: i32) -> (i32, i32) {
    %c0_i32 = arith.constant 0 : i32
    %c0_i32_0 = arith.constant 0 : i32
    %c0_i32_1 = arith.constant 0 : i32
    return %c0_i32, %c0_i32_0 : i32, i32
  }
  func.func @transform_8(%arg0: i32) -> (i32, i32) {
    %c0_i32 = arith.constant 0 : i32
    %c0_i32_0 = arith.constant 0 : i32
    %c0_i32_1 = arith.constant 0 : i32
    return %c0_i32, %c0_i32_0 : i32, i32
  }
  func.func @transform_9(%arg0: i32) -> (i32, i32) {
    %c0_i32 = arith.constant 0 : i32
    %c0_i32_0 = arith.constant 0 : i32
    %c0_i32_1 = arith.constant 0 : i32
    return %c0_i32, %c0_i32_0 : i32, i32
  }
  func.func @transform_10(%arg0: i32) -> (i32, i32) {
    %c0_i32 = arith.constant 0 : i32
    %c0_i32_0 = arith.constant 0 : i32
    %c0_i32_1 = arith.constant 0 : i32
    return %c0_i32, %c0_i32_0 : i32, i32
  }
}

</mosaic_0001>

<bundles_post_ra>
// kernel: tile.74
= control target key start
LH: loop header
LB: loop body
LE: loop exit
PB: predicated region body
PF: predicated region fallthrough
CT: control target
= control target key end

     0   :  { %s22_s0 = inlined_call_operand.vmem [shape: f32[16], index: 0, kind: input, shape index: {}]   ;;  %s23_s1 = inlined_call_operand.vmem [shape: f32[8,16], index: 1, kind: output, shape index: {}]  }
   0x1   :  { %v4_v0 = vld [vmem:[%s22_s0] ss:$0 sm:$0xff] }
   0x2   :  { %5 = vst [vmem:[%s23_s1] sm:$0xff] %v4_v0 }

// kernel: tile.87
= control target key start
LH: loop header
LB: loop body
LE: loop exit
PB: predicated region body
PF: predicated region fallthrough
CT: control target
= control target key end

     0   :  { %s67_s10 = smov 112   ;;  %s68_s11 = smov 80   ;;  %vm3_vm0 = vcmask 130048   ;;  %vm9_vm1 = vcmask 1048448   ;;  %vm15_vm2 = vcmask 917248   ;;  %vm21_vm3 = vcmask 786048   ;;  %s111_s0 = inlined_call_operand.vmem [shape: f32[8,16], index: 0, kind: input, shape index: {}]   ;;  %s112_s1 = inlined_call_operand.vmem [shape: f32[1,128], index: 1, kind: output, shape index: {}]  }
   0x1   :  { %v53_v0 = vld [vmem:[%s111_s0 + $0x7] sm:$0x1]   ;;  %v55_v1 = vld [vmem:[%s111_s0 + $0x5] sm:$0x1]   ;;  %v57_v2 = vld [vmem:[%s111_s0 + $0x3] sm:$0x1]  }
   0x2   :  { %7 = vrot.lane.b32.xlu0 %v53_v0, %s67_s10  ;;  %19 = vrot.lane.b32.xlu1 %v55_v1, %s68_s11  ;;  %s69_s14 = smov 48   ;;  %v54_v3 = vld [vmem:[%s111_s0 + $0x6] sm:$0x1]   ;;  %v56_v4 = vld [vmem:[%s111_s0 + $0x4] sm:$0x1]   ;;  %s70_s21 = smov 96  }
   0x3   :  { %31 = vrot.lane.b32.xlu2 %v57_v2, %s69_s14  ;;  %v58_v5 = vld [vmem:[%s111_s0 + $0x2] sm:$0x1]   ;;  %s71_s22 = smov 64   ;;  %s72_s23 = smov 32   ;;  %v59_v6 = vld [vmem:[%s111_s0 + $0x1] sm:$0x1]  }
   0x4   :  { %s73_s26 = smov 16   ;;  %v2_v7 = vld [vmem:[%s111_s0] sm:$0x1]   ;;  %vm27_vm4 = vcmask 654848   ;;  %vm33_vm5 = vcmask 523648   ;;  %vm39_vm6 = vcmask 392448  }
   0x5   :  { %4 = vst.msk [vmem:[#allocation0] sm:$0x1] %vm3_vm0, %v2_v7   ;;  %vm45_vm7 = vcmask 261248  }
   0xa   :  { %13 = vrot.lane.b32.xlu0 %v54_v3, %s70_s21  ;;  %25 = vrot.lane.b32.xlu1 %v56_v4, %s71_s22 }
   0xb   :  { %37 = vrot.lane.b32.xlu2 %v58_v5, %s72_s23 }
  0x12   :  { %43 = vrot.lane.b32.xlu0 %v59_v6, %s73_s26 }
  0x5d   :  { %v32_v8 = vpop.permute.xlu2 %31  }
  0x65   :  { %v38_v9 = vpop.permute.xlu2 %37  }
  0x74   :  { %v8_v10 = vpop.permute.xlu0 %7   ;;  %v20_v11 = vpop.permute.xlu1 %19  }
  0x75   :  { %10 = vst.msk [vmem:[#allocation0] sm:$0x1] %vm9_vm1, %v8_v10  }
  0x7c   :  { %v14_v12 = vpop.permute.xlu0 %13   ;;  %v26_v13 = vpop.permute.xlu1 %25  }
  0x7d   :  { %16 = vst.msk [vmem:[#allocation0] sm:$0x1] %vm15_vm2, %v14_v12  }
  0x7e   :  { %22 = vst.msk [vmem:[#allocation0] sm:$0x1] %vm21_vm3, %v20_v11  }
  0x7f   :  { %28 = vst.msk [vmem:[#allocation0] sm:$0x1] %vm27_vm4, %v26_v13  }
  0x80   :  { %34 = vst.msk [vmem:[#allocation0] sm:$0x1] %vm33_vm5, %v32_v8  }
  0x81   :  { %40 = vst.msk [vmem:[#allocation0] sm:$0x1] %vm39_vm6, %v38_v9  }
  0x84   :  { %v44_v14 = vpop.permute.xlu0 %43  }
  0x85   :  { %46 = vst.msk [vmem:[#allocation0] sm:$0x1] %vm45_vm7, %v44_v14  }
  0x8c   :  { %v49_v15 = vld [vmem:[#allocation0] sm:$0x1] }
  0x8d   :  { %52 = vst [vmem:[%s112_s1] sm:$0x1] %v49_v15 }

// kernel: tile.69
= control target key start
LH: loop header
LB: loop body
LE: loop exit
PB: predicated region body
PF: predicated region fallthrough
CT: control target
= control target key end

     0   :  { %s22_s0 = inlined_call_operand.vmem [shape: f32[8], index: 0, kind: input, shape index: {}]   ;;  %s23_s1 = inlined_call_operand.vmem [shape: f32[2,8], index: 1, kind: output, shape index: {}]  }
   0x1   :  { %v4_v0 = vld [vmem:[%s22_s0] ss:$0 sm:$0xff] }
   0x2   :  { %5 = vst [vmem:[%s23_s1] sm:$0x3] %v4_v0 }

// kernel: tile.70
= control target key start
LH: loop header
LB: loop body
LE: loop exit
PB: predicated region body
PF: predicated region fallthrough
CT: control target
= control target key end

     0   :  { %vm7_vm0 = vcmask 64512   ;;  %vm13_vm1 = vcmask 130112   ;;  %s39_s0 = inlined_call_operand.vmem [shape: f32[2,8], index: 0, kind: input, shape index: {}]   ;;  %s40_s1 = inlined_call_operand.vmem [shape: f32[16], index: 1, kind: output, shape index: {}]  }
   0x1   :  { %v4_v0 = vld [vmem:[%s39_s0] sm:$0x3]  ;;  %s22_s0 = smov 8  }
   0x2   :  { %5 = vst [vmem:[#allocation1] sm:$0x3] %v4_v0 }
   0x9   :  { %v10_v1 = vld [vmem:[#allocation1 + $0x1] sm:$0x1]   ;;  %v6_v2 = vld [vmem:[#allocation1] sm:$0x1]  }
   0xa   :  { %11 = vrot.lane.b32.xlu0 %v10_v1, %s22_s0  ;;  %8 = vst.msk [vmem:[#allocation0] sm:$0x1] %vm7_vm0, %v6_v2  }
  0x7c   :  { %v12_v3 = vpop.permute.xlu0 %11  }
  0x7d   :  { %14 = vst.msk [vmem:[#allocation0] sm:$0x1] %vm13_vm1, %v12_v3  }
  0x84   :  { %v17_v4 = vld [vmem:[#allocation0] sm:$0x1] }
  0x85   :  { %20 = vst [vmem:[%s40_s1] sm:$0x1] %v17_v4 }

// kernel: tile.94
= control target key start
LH: loop header
LB: loop body
LE: loop exit
PB: predicated region body
PF: predicated region fallthrough
CT: control target
= control target key end

     0   :  { %s22_s0 = inlined_call_operand.vmem [shape: f32[64], index: 0, kind: input, shape index: {}]   ;;  %s23_s1 = inlined_call_operand.vmem [shape: f32[8,64], index: 1, kind: output, shape index: {}]  }
   0x1   :  { %v4_v0 = vld [vmem:[%s22_s0] ss:$0 sm:$0xff] }
   0x2   :  { %5 = vst [vmem:[%s23_s1] sm:$0xff] %v4_v0 }

// kernel: tile.101
= control target key start
LH: loop header
LB: loop body
LE: loop exit
PB: predicated region body
PF: predicated region fallthrough
CT: control target
= control target key end

     0   :  { %vm3_vm0 = vcmask 523264   ;;  %s40_s8 = smov 64   ;;  %vm9_vm1 = vcmask 1048064   ;;  %s69_s0 = inlined_call_operand.vmem [shape: f32[8,64], index: 0, kind: input, shape index: {}]   ;;  %s70_s1 = inlined_call_operand.vmem [shape: f32[1,512], index: 1, kind: output, shape index: {}]  }
   0x1   :  { %v35_v0 = vld [vmem:[%s69_s0 + $0x1] ss:$2 sm:$0xf]   ;;  %v2_v1 = vld [vmem:[%s69_s0] ss:$2 sm:$0xf]  }
   0x2   :  { %7 = vrot.lane.b32.xlu0 %v35_v0, %s40_s8  ;;  %4 = vst.msk [vmem:[#allocation0] ss:$8 sm:$0xf] %vm3_vm0, %v2_v1  }
  0x74   :  { %v8_v2 = vpop.permute.xlu0 %7  }
  0x75   :  { %10 = vst.msk [vmem:[#allocation0] ss:$8 sm:$0xf] %vm9_vm1, %v8_v2  }
  0x7c   :  { %v13_v3 = vld [vmem:[#allocation0] sm:$0x1]  ;;  %v18_v4 = vld [vmem:[#allocation0 + $0x8] sm:$0x1]  ;;  %v24_v5 = vld [vmem:[#allocation0 + $0x10] sm:$0x1] }
  0x7d   :  { %16 = vst [vmem:[%s70_s1] sm:$0x1] %v13_v3  ;;  %v30_v6 = vld [vmem:[#allocation0 + $0x18] sm:$0x1] }
  0x7e   :  { %36 = vst [vmem:[%s70_s1 + $0x1] sm:$0x1] %v18_v4 }
  0x7f   :  { %37 = vst [vmem:[%s70_s1 + $0x2] sm:$0x1] %v24_v5 }
  0x80   :  { %38 = vst [vmem:[%s70_s1 + $0x3] sm:$0x1] %v30_v6 }

// kernel: unireplknet_block.1
= control target key start
LH: loop header
LB: loop body
LE: loop exit
PB: predicated region body
PF: predicated region fallthrough
CT: control target
= control target key end

     0   :  { %vm108_vm0 = vcmask 1046528   ;;  %vm183_vm1 = vcmask 1045504   ;;  %vm258_vm2 = vcmask 1044480   ;;  %vm333_vm3 = vcmask 1043456   ;;  %s13344_s4 = inlined_call_operand.vmem [shape: f32[128,16], index: 4, kind: input, shape index: {}]   ;;  %s13345_s3 = inlined_call_operand.vmem [shape: f32[5,128], index: 3, kind: input, shape index: {}]   ;;  %s13346_s0 = inlined_call_operand.vmem [shape: f32[3,12,12,128], index: 0, kind: input, shape index: {}]   ;;  %s13347_s2 = inlined_call_operand.vmem [shape: f32[75,128], index: 2, kind: input, shape index: {}]   ;;  %s13348_s5 = inlined_call_operand.vmem [shape: f32[16,128], index: 5, kind: input, shape index: {}]   ;;  %s13349_s7 = inlined_call_operand.vmem [shape: f32[128,512], index: 7, kind: input, shape index: {}]   ;;  %s13350_s6 = inlined_call_operand.vmem [shape: f32[3,512], index: 6, kind: input, shape index: {}]   ;;  %s13351_s8 = inlined_call_operand.vmem [shape: f32[512,512], index: 8, kind: input, shape index: {}]   ;;  %s13352_s9 = inlined_call_operand.vmem [shape: f32[512,128], index: 9, kind: input, shape index: {}]   ;;  %s13353_s1 = inlined_call_operand.vmem [shape: f32[64,128], index: 1, kind: input, shape index: {}]   ;;  %s13354_s10 = inlined_call_operand.vmem [shape: f32[64,128], index: 10, kind: output, shape index: {}]  }
   0x1   :  { %v5054_v0 = vld [vmem:[%s13344_s4 + $0x78] sm:$0xff]  ;;  %v5053_v1 = vld [vmem:[%s13344_s4 + $0x70] sm:$0xff]  ;;  %v5052_v2 = vld [vmem:[%s13344_s4 + $0x68] sm:$0xff]  ;;  %vm5078_vm4 = vcmask 130048  }
   0x2   :  { %5055 = vmatpush.msra.mxu0 %v5054_v0  ;;  %v5051_v3 = vld [vmem:[%s13344_s4 + $0x60] sm:$0xff]  ;;  %v5050_v4 = vld [vmem:[%s13344_s4 + $0x58] sm:$0xff]  ;;  %v5049_v5 = vld [vmem:[%s13344_s4 + $0x50] sm:$0xff] }
   0x3   :  { %v5048_v6 = vld [vmem:[%s13344_s4 + $0x48] sm:$0xff]  ;;  %v5047_v7 = vld [vmem:[%s13344_s4 + $0x40] sm:$0xff]  ;;  %v7980_v10 = vld [vmem:[%s13346_s0 + $0x10] sm:$0xff] }
   0x4   :  { %5056 = vmatpush.msra.mxu0 %v5053_v1  ;;  %v7970_v8 = vld [vmem:[%s13346_s0] sm:$0xff]  ;;  %v7975_v9 = vld [vmem:[%s13346_s0 + $0x8] sm:$0xf]  ;;  %v7985_v11 = vld [vmem:[%s13346_s0 + $0x18] sm:$0xf] }
   0x5   :  { %v7990_v12 = vld [vmem:[%s13346_s0 + $0x20] sm:$0xff]  ;;  %v7995_v13 = vld [vmem:[%s13346_s0 + $0x28] sm:$0xf]  ;;  %v8000_v14 = vld [vmem:[%s13346_s0 + $0x30] sm:$0xff] }
   0x6   :  { %5057 = vmatpush.msra.mxu0 %v5052_v2  ;;  %v8005_v15 = vld [vmem:[%s13346_s0 + $0x38] sm:$0xf]  ;;  %v8010_v16 = vld [vmem:[%s13346_s0 + $0x40] sm:$0xff]  ;;  %v8015_v17 = vld [vmem:[%s13346_s0 + $0x50] sm:$0xff] }
   0x7   :  { %v8020_v18 = vld [vmem:[%s13346_s0 + $0x60] sm:$0xff]  ;;  %v5046_v20 = vld [vmem:[%s13344_s4 + $0x38] sm:$0xff]  ;;  %v8033_v21 = vld [vmem:[%s13346_s0 + $0x48] sm:$0xf] }
   0x8   :  { %5058 = vmatpush.msra.mxu0 %v5051_v3  ;;  %v8025_v19 = vld [vmem:[%s13347_s2] ss:$0 sm:$0xff]  ;;  %v8038_v22 = vld [vmem:[%s13346_s0 + $0x58] sm:$0xf]  ;;  %v7644_v23 = vld [vmem:[%s13347_s2 + $0x3] ss:$0 sm:$0xff] }
   0x9   :  { %v8046_v24 = vld [vmem:[%s13346_s0 + $0x68] sm:$0xf]  ;;  %v8051_v25 = vld [vmem:[%s13346_s0 + $0x70] sm:$0xff]  ;;  %v58_v26 = vmul.f32 %v8025_v19, %v7970_v8  ;;  %v8057_v27 = vmul.f32 %v8025_v19, %v7980_v10  ;;  %v8061_v28 = vmul.f32 %v8025_v19, %v7990_v12  ;;  %v8069_v30 = vld [vmem:[%s13346_s0 + $0x78] sm:$0xf]  ;;  %v61_v31 = vmul.f32 %v8025_v19, %v8000_v14 }
   0xa   :  { %5059 = vmatpush.msra.mxu0 %v5050_v4  ;;  %v5045_v29 = vld [vmem:[%s13344_s4 + $0x30] sm:$0xff]  ;;  %v62_v32 = vmul.f32 %v8025_v19, %v8010_v16  ;;  %v63_v33 = vmul.f32 %v8025_v19, %v8015_v17  ;;  %v64_v34 = vmul.f32 %v8025_v19, %v8020_v18  ;;  %v76_v35 = vmul.f32 %v7644_v23, %v7970_v8  ;;  %v5044_v39 = vld [vmem:[%s13344_s4 + $0x28] sm:$0xff]  ;;  %v5043_v48 = vld [vmem:[%s13344_s4 + $0x20] sm:$0xff] }
   0xb   :  { %v77_v36 = vmul.f32 %v7644_v23, %v7975_v9  ;;  %v78_v37 = vmul.f32 %v7644_v23, %v7980_v10  ;;  %v79_v38 = vmul.f32 %v7644_v23, %v7985_v11  ;;  %v80_v40 = vmul.f32 %v7644_v23, %v7990_v12  ;;  %v5042_v57 = vld [vmem:[%s13344_s4 + $0x18] sm:$0xff]  ;;  %v7645_v2 = vld [vmem:[%s13347_s2 + $0x6] ss:$0 sm:$0xff] }
   0xc   :  { %5060 = vmatpush.msra.mxu0 %v5049_v5  ;;  %v81_v41 = vmul.f32 %v7644_v23, %v7995_v13  ;;  %v82_v42 = vmul.f32 %v7644_v23, %v8000_v14  ;;  %v83_v43 = vmul.f32 %v7644_v23, %v8005_v15  ;;  %v84_v44 = vmul.f32 %v7644_v23, %v8010_v16 }
   0xd   :  { %v85_v45 = vmul.f32 %v7644_v23, %v8033_v21  ;;  %v86_v46 = vmul.f32 %v7644_v23, %v8015_v17  ;;  %v87_v47 = vmul.f32 %v7644_v23, %v8038_v22  ;;  %v88_v49 = vmul.f32 %v7644_v23, %v8020_v18 }
   0xe   :  { %5061 = vmatpush.msra.mxu0 %v5048_v6  ;;  %v89_v50 = vmul.f32 %v7644_v23, %v8046_v24  ;;  %v90_v51 = vmul.f32 %v7644_v23, %v8051_v25  ;;  %v91_v52 = vmul.f32 %v7644_v23, %v8069_v30  ;;  %v109_v53 = vrot.slane %v76_v35, 1 }
   0xf   :  { %v110_v54 = vrot.slane %v77_v36, 1  ;;  %v112_v55 = vrot.slane %v78_v37, 1  ;;  %v113_v56 = vrot.slane %v79_v38, 1  ;;  %v115_v58 = vrot.slane %v80_v40, 1  ;;  %v5040_v36 = vld [vmem:[%s13344_s4 + $0x8] sm:$0xff] }
  0x10   :  { %5062 = vmatpush.msra.mxu0 %v5047_v7  ;;  %v116_v59 = vrot.slane %v81_v41, 1  ;;  %v118_v60 = vrot.slane %v82_v42, 1  ;;  %v119_v61 = vrot.slane %v83_v43, 1  ;;  %v121_v0 = vrot.slane %v84_v44, 1  ;;  %v5041_v7 = vld [vmem:[%s13344_s4 + $0x10] sm:$0xff] }
  0x11   :  { %v111_v62 = vsel %vm108_vm0, %v109_v53, %v110_v54  ;;  %v114_v63 = vsel %vm108_vm0, %v112_v55, %v113_v56  ;;  %v122_v1 = vrot.slane %v85_v45, 1  ;;  %v124_v5 = vrot.slane %v86_v46, 1 }
  0x12   :  { %5063 = vmatpush.msra.mxu0 %v5046_v20  ;;  %v117_v3 = vsel %vm108_vm0, %v115_v58, %v116_v59  ;;  %v120_v4 = vsel %vm108_vm0, %v118_v60, %v119_v61  ;;  %v125_v6 = vrot.slane %v87_v47, 1  ;;  %v127_v23 = vrot.slane %v88_v49, 1 }
  0x13   :  { %v123_v20 = vsel %vm108_vm0, %v121_v0, %v122_v1  ;;  %v130_v35 = vrot.slane %v90_v51, 1  ;;  %v65_v37 = vmul.f32 %v8025_v19, %v8051_v25  ;;  %v141_v40 = vadd.f32 %v111_v62, %v58_v26 }
  0x14   :  { %5064 = vmatpush.msra.mxu0 %v5045_v29  ;;  %v128_v29 = vrot.slane %v89_v50, 1  ;;  %v126_v38 = vsel %vm108_vm0, %v124_v5, %v125_v6  ;;  %v142_v42 = vadd.f32 %v114_v63, %v8057_v27  ;;  %v143_v43 = vadd.f32 %v117_v3, %v8061_v28  ;;  %v5039_v27 = vld [vmem:[%s13344_s4] sm:$0xff] }
  0x15   :  { %v144_v44 = vadd.f32 %v120_v4, %v61_v31  ;;  %v145_v46 = vadd.f32 %v123_v20, %v62_v32  ;;  %v146_v47 = vadd.f32 %v126_v38, %v63_v33  ;;  %v151_v19 = vmul.f32 %v7645_v2, %v7970_v8 }
  0x16   :  { %5065 = vmatpush.msra.mxu0 %v5044_v39  ;;  %v131_v39 = vrot.slane %v91_v52, 1  ;;  %v129_v41 = vsel %vm108_vm0, %v127_v23, %v128_v29  ;;  %v152_v49 = vmul.f32 %v7645_v2, %v7975_v9  ;;  %v153_v26 = vmul.f32 %v7645_v2, %v7980_v10  ;;  %v7646_v29 = vld [vmem:[%s13347_s2 + $0x9] ss:$0 sm:$0xff] }
  0x17   :  { %v154_v50 = vmul.f32 %v7645_v2, %v7985_v11  ;;  %v155_v28 = vmul.f32 %v7645_v2, %v7990_v12  ;;  %v156_v31 = vmul.f32 %v7645_v2, %v7995_v13  ;;  %v157_v32 = vmul.f32 %v7645_v2, %v8000_v14 }
  0x18   :  { %5066 = vmatpush.msra.mxu0 %v5043_v48  ;;  %v132_v45 = vsel %vm108_vm0, %v130_v35, %v131_v39  ;;  %v147_v48 = vadd.f32 %v129_v41, %v64_v34  ;;  %v158_v33 = vmul.f32 %v7645_v2, %v8005_v15  ;;  %v159_v34 = vmul.f32 %v7645_v2, %v8010_v16 }
  0x19   :  { %v160_v51 = vmul.f32 %v7645_v2, %v8033_v21  ;;  %v161_v52 = vmul.f32 %v7645_v2, %v8015_v17  ;;  %v162_v53 = vmul.f32 %v7645_v2, %v8038_v22  ;;  %v163_v54 = vmul.f32 %v7645_v2, %v8020_v18 }
  0x1a   :  { %5067 = vmatpush.msra.mxu0 %v5042_v57  ;;  %v164_v55 = vmul.f32 %v7645_v2, %v8046_v24  ;;  %v165_v56 = vmul.f32 %v7645_v2, %v8051_v25  ;;  %v166_v57 = vmul.f32 %v7645_v2, %v8069_v30  ;;  %v184_v58 = vrot.slane %v151_v19, 2 }
  0x1b   :  { %v185_v59 = vrot.slane %v152_v49, 2  ;;  %v187_v60 = vrot.slane %v153_v26, 2  ;;  %v188_v61 = vrot.slane %v154_v50, 2  ;;  %v190_v62 = vrot.slane %v155_v28, 2 }
  0x1c   :  { %5068 = vmatpush.msra.mxu0 %v5041_v7  ;;  %v191_v63 = vrot.slane %v156_v31, 2  ;;  %v193_v0 = vrot.slane %v157_v32, 2  ;;  %v194_v1 = vrot.slane %v158_v33, 2  ;;  %v196_v5 = vrot.slane %v159_v34, 2 }
  0x1d   :  { %v186_v3 = vsel %vm183_vm1, %v184_v58, %v185_v59  ;;  %v189_v4 = vsel %vm183_vm1, %v187_v60, %v188_v61  ;;  %v197_v6 = vrot.slane %v160_v51, 2  ;;  %v199_v2 = vrot.slane %v161_v52, 2 }
  0x1e   :  { %5069 = vmatpush.msra.mxu0 %v5040_v36  ;;  %v192_v7 = vsel %vm183_vm1, %v190_v62, %v191_v63  ;;  %v195_v20 = vsel %vm183_vm1, %v193_v0, %v194_v1  ;;  %v200_v23 = vrot.slane %v162_v53, 2  ;;  %v202_v36 = vrot.slane %v163_v54, 2 }
  0x1f   :  { %v198_v35 = vsel %vm183_vm1, %v196_v5, %v197_v6  ;;  %v203_v38 = vrot.slane %v164_v55, 2  ;;  %v205_v39 = vrot.slane %v165_v56, 2  ;;  %v148_v41 = vadd.f32 %v132_v45, %v65_v37 }
  0x20   :  { %5070 = vmatpush.msra.mxu0 %v5039_v27  ;;  %v201_v19 = vsel %vm183_vm1, %v199_v2, %v200_v23  ;;  %v206_v49 = vrot.slane %v166_v57, 2  ;;  %v216_v26 = vadd.f32 %v186_v3, %v141_v40  ;;  %v217_v27 = vadd.f32 %v189_v4, %v142_v42 }
  0x21   :  { %v204_v50 = vsel %vm183_vm1, %v202_v36, %v203_v38  ;;  %v218_v28 = vadd.f32 %v192_v7, %v143_v43  ;;  %v219_v31 = vadd.f32 %v195_v20, %v144_v44  ;;  %v220_v33 = vadd.f32 %v198_v35, %v145_v46  ;;  %v7647_v20 = vld [vmem:[%s13347_s2 + $0xc] ss:$0 sm:$0xff] }
  0x22   :  { %v207_v32 = vsel %vm183_vm1, %v205_v39, %v206_v49  ;;  %v221_v34 = vadd.f32 %v201_v19, %v146_v47  ;;  %v222_v51 = vadd.f32 %v204_v50, %v147_v48  ;;  %v226_v52 = vmul.f32 %v7646_v29, %v7970_v8 }
  0x23   :  { %v227_v53 = vmul.f32 %v7646_v29, %v7975_v9  ;;  %v228_v37 = vmul.f32 %v7646_v29, %v7980_v10  ;;  %v229_v45 = vmul.f32 %v7646_v29, %v7985_v11  ;;  %v230_v40 = vmul.f32 %v7646_v29, %v7990_v12 }
  0x24   :  { %v231_v54 = vmul.f32 %v7646_v29, %v7995_v13  ;;  %v232_v42 = vmul.f32 %v7646_v29, %v8000_v14  ;;  %v233_v43 = vmul.f32 %v7646_v29, %v8005_v15  ;;  %v234_v44 = vmul.f32 %v7646_v29, %v8010_v16 }
  0x25   :  { %v235_v46 = vmul.f32 %v7646_v29, %v8033_v21  ;;  %v236_v47 = vmul.f32 %v7646_v29, %v8015_v17  ;;  %v237_v48 = vmul.f32 %v7646_v29, %v8038_v22  ;;  %v238_v55 = vmul.f32 %v7646_v29, %v8020_v18 }
  0x26   :  { %v239_v56 = vmul.f32 %v7646_v29, %v8046_v24  ;;  %v240_v57 = vmul.f32 %v7646_v29, %v8051_v25  ;;  %v241_v58 = vmul.f32 %v7646_v29, %v8069_v30  ;;  %v259_v59 = vrot.slane %v226_v52, 3 }
  0x27   :  { %v260_v60 = vrot.slane %v227_v53, 3  ;;  %v262_v61 = vrot.slane %v228_v37, 3  ;;  %v263_v62 = vrot.slane %v229_v45, 3  ;;  %v265_v63 = vrot.slane %v230_v40, 3 }
  0x28   :  { %v266_v0 = vrot.slane %v231_v54, 3  ;;  %v268_v1 = vrot.slane %v232_v42, 3  ;;  %v269_v3 = vrot.slane %v233_v43, 3  ;;  %v271_v6 = vrot.slane %v234_v44, 3 }
  0x29   :  { %v261_v4 = vsel %vm258_vm2, %v259_v59, %v260_v60  ;;  %v264_v5 = vsel %vm258_vm2, %v262_v61, %v263_v62  ;;  %v272_v7 = vrot.slane %v235_v46, 3  ;;  %v274_v29 = vrot.slane %v236_v47, 3 }
  0x2a   :  { %v267_v2 = vsel %vm258_vm2, %v265_v63, %v266_v0  ;;  %v270_v23 = vsel %vm258_vm2, %v268_v1, %v269_v3  ;;  %v275_v35 = vrot.slane %v237_v48, 3  ;;  %v277_v38 = vrot.slane %v238_v55, 3 }
  0x2b   :  { %v273_v36 = vsel %vm258_vm2, %v271_v6, %v272_v7  ;;  %v278_v39 = vrot.slane %v239_v56, 3  ;;  %v280_v19 = vrot.slane %v240_v57, 3  ;;  %v223_v49 = vadd.f32 %v207_v32, %v148_v41  ;;  %v7648_v7 = vld [vmem:[%s13347_s2 + $0xf] ss:$0 sm:$0xff] }
  0x2c   :  { %v276_v50 = vsel %vm258_vm2, %v274_v29, %v275_v35  ;;  %v281_v52 = vrot.slane %v241_v58, 3  ;;  %v291_v53 = vadd.f32 %v261_v4, %v216_v26  ;;  %v292_v45 = vadd.f32 %v264_v5, %v217_v27 }
  0x2d   :  { %v279_v37 = vsel %vm258_vm2, %v277_v38, %v278_v39  ;;  %v293_v40 = vadd.f32 %v267_v2, %v218_v28  ;;  %v294_v54 = vadd.f32 %v270_v23, %v219_v31  ;;  %v295_v43 = vadd.f32 %v273_v36, %v220_v33 }
  0x2e   :  { %v282_v42 = vsel %vm258_vm2, %v280_v19, %v281_v52  ;;  %v296_v44 = vadd.f32 %v276_v50, %v221_v34  ;;  %v297_v46 = vadd.f32 %v279_v37, %v222_v51  ;;  %v301_v47 = vmul.f32 %v7647_v20, %v7970_v8 }
  0x2f   :  { %v302_v48 = vmul.f32 %v7647_v20, %v7975_v9  ;;  %v303_v41 = vmul.f32 %v7647_v20, %v7980_v10  ;;  %v304_v32 = vmul.f32 %v7647_v20, %v7985_v11  ;;  %v305_v26 = vmul.f32 %v7647_v20, %v7990_v12 }
  0x30   :  { %v306_v55 = vmul.f32 %v7647_v20, %v7995_v13  ;;  %v307_v27 = vmul.f32 %v7647_v20, %v8000_v14  ;;  %v308_v28 = vmul.f32 %v7647_v20, %v8005_v15  ;;  %v309_v31 = vmul.f32 %v7647_v20, %v8010_v16 }
  0x31   :  { %v310_v33 = vmul.f32 %v7647_v20, %v8033_v21  ;;  %v311_v8 = vmul.f32 %v7647_v20, %v8015_v17  ;;  %v312_v9 = vmul.f32 %v7647_v20, %v8038_v22  ;;  %v313_v34 = vmul.f32 %v7647_v20, %v8020_v18 }
  0x32   :  { %v314_v11 = vmul.f32 %v7647_v20, %v8046_v24  ;;  %v315_v51 = vmul.f32 %v7647_v20, %v8051_v25  ;;  %v316_v13 = vmul.f32 %v7647_v20, %v8069_v30  ;;  %v334_v56 = vrot.slane %v301_v47, 4  ;;  %v8212_v47 = vld [vmem:[%s13346_s0 + $0x80] sm:$0xff] }
  0x33   :  { %v335_v57 = vrot.slane %v302_v48, 4  ;;  %v337_v15 = vrot.slane %v303_v41, 4  ;;  %v338_v58 = vrot.slane %v304_v32, 4  ;;  %v340_v59 = vrot.slane %v305_v26, 4  ;;  %v8232_v32 = vld [vmem:[%s13346_s0 + $0x28] sm:$0xf] }
  0x34   :  { %v341_v60 = vrot.slane %v306_v55, 4  ;;  %v343_v21 = vrot.slane %v307_v27, 4  ;;  %v344_v62 = vrot.slane %v308_v28, 4  ;;  %v346_v22 = vrot.slane %v309_v31, 4  ;;  %v8237_v26 = vld [vmem:[%s13346_s0 + $0x38] sm:$0xf] }
  0x35   :  { %v336_v61 = vsel %vm333_vm3, %v334_v56, %v335_v57  ;;  %v347_v63 = vrot.slane %v310_v33, 4  ;;  %v339_v0 = vsel %vm333_vm3, %v337_v15, %v338_v58  ;;  %v349_v1 = vrot.slane %v311_v8, 4  ;;  %v8243_v31 = vld [vmem:[%s13346_s0 + $0x48] sm:$0xf]  ;;  %v8248_v33 = vld [vmem:[%s13346_s0 + $0x58] sm:$0xf] }
  0x36   :  { %v342_v24 = vsel %vm333_vm3, %v340_v59, %v341_v60  ;;  %v350_v3 = vrot.slane %v312_v9, 4  ;;  %v345_v30 = vsel %vm333_vm3, %v343_v21, %v344_v62  ;;  %v352_v5 = vrot.slane %v313_v34, 4  ;;  %v8266_v59 = vld [vmem:[%s13346_s0 + $0x88] sm:$0xf] }
  0x37   :  { %v348_v4 = vsel %vm333_vm3, %v346_v22, %v347_v63  ;;  %v353_v6 = vrot.slane %v314_v11, 4  ;;  %v298_v20 = vadd.f32 %v282_v42, %v223_v49  ;;  %v355_v23 = vrot.slane %v315_v51, 4  ;;  %v8253_v51 = vld [vmem:[%s13346_s0 + $0x68] sm:$0xf] }
  0x38   :  { %v351_v2 = vsel %vm333_vm3, %v349_v1, %v350_v3  ;;  %v356_v29 = vrot.slane %v316_v13, 4  ;;  %v366_v36 = vadd.f32 %v336_v61, %v291_v53  ;;  %v367_v38 = vadd.f32 %v339_v0, %v292_v45  ;;  %v7649_v53 = vld [vmem:[%s13347_s2 + $0x12] ss:$0 sm:$0xff]  ;;  %v8223_v45 = vld [vmem:[%s13346_s0 + $0x18] sm:$0xf] }
  0x39   :  { %v354_v35 = vsel %vm333_vm3, %v352_v5, %v353_v6  ;;  %v368_v39 = vadd.f32 %v342_v24, %v293_v40  ;;  %v369_v50 = vadd.f32 %v345_v30, %v294_v54  ;;  %v370_v52 = vadd.f32 %v348_v4, %v295_v43  ;;  %v8258_v13 = vld [vmem:[%s13346_s0 + $0x78] sm:$0xf] }
  0x3a   :  { %v357_v19 = vsel %vm333_vm3, %v355_v23, %v356_v29  ;;  %v371_v37 = vadd.f32 %v351_v2, %v296_v44  ;;  %v372_v49 = vadd.f32 %v354_v35, %v297_v46  ;;  %v393_v42 = vmul.f32 %v7648_v7, %v7980_v10 }
  0x3b   :  { %v394_v48 = vmul.f32 %v7648_v7, %v7990_v12  ;;  %v395_v41 = vmul.f32 %v7648_v7, %v8000_v14  ;;  %v396_v40 = vmul.f32 %v7648_v7, %v8010_v16  ;;  %v397_v54 = vmul.f32 %v7648_v7, %v8015_v17 }
  0x3c   :  { %v398_v43 = vmul.f32 %v7648_v7, %v8020_v18  ;;  %v399_v44 = vmul.f32 %v7648_v7, %v8051_v25  ;;  %v373_v46 = vadd.f32 %v357_v19, %v298_v20  ;;  %v400_v55 = vmul.f32 %v7648_v7, %v8212_v47 }
  0x3d   :  { %v401_v27 = vadd.f32 %v393_v42, %v366_v36  ;;  %v402_v28 = vadd.f32 %v394_v48, %v367_v38  ;;  %v403_v8 = vadd.f32 %v395_v41, %v368_v39  ;;  %v404_v9 = vadd.f32 %v396_v40, %v369_v50  ;;  %v7650_v40 = vld [vmem:[%s13347_s2 + $0x15] ss:$0 sm:$0xff] }
  0x3e   :  { %v405_v34 = vadd.f32 %v397_v54, %v370_v52  ;;  %v406_v11 = vadd.f32 %v398_v43, %v371_v37  ;;  %v407_v56 = vadd.f32 %v399_v44, %v372_v49  ;;  %v411_v57 = vmul.f32 %v7649_v53, %v7980_v10 }
  0x3f   :  { %v412_v15 = vmul.f32 %v7649_v53, %v8223_v45  ;;  %v413_v58 = vmul.f32 %v7649_v53, %v7990_v12  ;;  %v414_v60 = vmul.f32 %v7649_v53, %v8232_v32  ;;  %v415_v21 = vmul.f32 %v7649_v53, %v8000_v14 }
  0x40   :  { %v416_v61 = vmul.f32 %v7649_v53, %v8237_v26  ;;  %v417_v62 = vmul.f32 %v7649_v53, %v8010_v16  ;;  %v418_v22 = vmul.f32 %v7649_v53, %v8243_v31  ;;  %v419_v63 = vmul.f32 %v7649_v53, %v8015_v17 }
  0x41   :  { %v420_v0 = vmul.f32 %v7649_v53, %v8248_v33  ;;  %v421_v24 = vmul.f32 %v7649_v53, %v8020_v18  ;;  %v422_v1 = vmul.f32 %v7649_v53, %v8253_v51  ;;  %v423_v3 = vmul.f32 %v7649_v53, %v8051_v25 }
  0x42   :  { %v424_v30 = vmul.f32 %v7649_v53, %v8258_v13  ;;  %v425_v4 = vmul.f32 %v7649_v53, %v8212_v47  ;;  %v426_v5 = vmul.f32 %v7649_v53, %v8266_v59  ;;  %v443_v6 = vrot.slane %v411_v57, 1 }
  0x43   :  { %v444_v7 = vrot.slane %v412_v15, 1  ;;  %v446_v20 = vrot.slane %v413_v58, 1  ;;  %v447_v2 = vrot.slane %v414_v60, 1  ;;  %v449_v23 = vrot.slane %v415_v21, 1 }
  0x44   :  { %v450_v29 = vrot.slane %v416_v61, 1  ;;  %v452_v35 = vrot.slane %v417_v62, 1  ;;  %v453_v38 = vrot.slane %v418_v22, 1  ;;  %v455_v39 = vrot.slane %v419_v63, 1 }
  0x45   :  { %v445_v36 = vsel %vm108_vm0, %v443_v6, %v444_v7  ;;  %v456_v19 = vrot.slane %v420_v0, 1  ;;  %v448_v50 = vsel %vm108_vm0, %v446_v20, %v447_v2  ;;  %v458_v37 = vrot.slane %v421_v24, 1 }
  0x46   :  { %v451_v52 = vsel %vm108_vm0, %v449_v23, %v450_v29  ;;  %v459_v49 = vrot.slane %v422_v1, 1  ;;  %v454_v42 = vsel %vm108_vm0, %v452_v35, %v453_v38  ;;  %v461_v41 = vrot.slane %v423_v3, 1 }
  0x47   :  { %v457_v48 = vsel %vm108_vm0, %v455_v39, %v456_v19  ;;  %v462_v53 = vrot.slane %v424_v30, 1  ;;  %v408_v54 = vadd.f32 %v400_v55, %v373_v46  ;;  %v464_v44 = vrot.slane %v425_v4, 1 }
  0x48   :  { %v460_v43 = vsel %vm108_vm0, %v458_v37, %v459_v49  ;;  %v465_v57 = vrot.slane %v426_v5, 1  ;;  %v475_v58 = vadd.f32 %v445_v36, %v401_v27  ;;  %v476_v60 = vadd.f32 %v448_v50, %v402_v28 }
  0x49   :  { %v463_v15 = vsel %vm108_vm0, %v461_v41, %v462_v53  ;;  %v477_v21 = vadd.f32 %v451_v52, %v403_v8  ;;  %v478_v62 = vadd.f32 %v454_v42, %v404_v9  ;;  %v479_v22 = vadd.f32 %v457_v48, %v405_v34 }
  0x4a   :  { %v466_v61 = vsel %vm108_vm0, %v464_v44, %v465_v57  ;;  %v480_v63 = vadd.f32 %v460_v43, %v406_v11  ;;  %v481_v0 = vadd.f32 %v463_v15, %v407_v56  ;;  %v485_v24 = vmul.f32 %v7650_v40, %v7980_v10  ;;  %v7651_v43 = vld [vmem:[%s13347_s2 + $0x18] ss:$0 sm:$0xff] }
  0x4b   :  { %v486_v1 = vmul.f32 %v7650_v40, %v8223_v45  ;;  %v487_v46 = vmul.f32 %v7650_v40, %v7990_v12  ;;  %v488_v55 = vmul.f32 %v7650_v40, %v8232_v32  ;;  %v489_v3 = vmul.f32 %v7650_v40, %v8000_v14 }
  0x4c   :  { %v490_v27 = vmul.f32 %v7650_v40, %v8237_v26  ;;  %v491_v28 = vmul.f32 %v7650_v40, %v8010_v16  ;;  %v492_v8 = vmul.f32 %v7650_v40, %v8243_v31  ;;  %v493_v9 = vmul.f32 %v7650_v40, %v8015_v17 }
  0x4d   :  { %v494_v34 = vmul.f32 %v7650_v40, %v8248_v33  ;;  %v495_v11 = vmul.f32 %v7650_v40, %v8020_v18  ;;  %v496_v56 = vmul.f32 %v7650_v40, %v8253_v51  ;;  %v497_v30 = vmul.f32 %v7650_v40, %v8051_v25 }
  0x4e   :  { %v498_v4 = vmul.f32 %v7650_v40, %v8258_v13  ;;  %v499_v5 = vmul.f32 %v7650_v40, %v8212_v47  ;;  %v500_v6 = vmul.f32 %v7650_v40, %v8266_v59  ;;  %v517_v7 = vrot.slane %v485_v24, 2 }
  0x4f   :  { %v518_v20 = vrot.slane %v486_v1, 2  ;;  %v520_v2 = vrot.slane %v487_v46, 2  ;;  %v521_v23 = vrot.slane %v488_v55, 2  ;;  %v523_v29 = vrot.slane %v489_v3, 2 }
  0x50   :  { %v524_v35 = vrot.slane %v490_v27, 2  ;;  %v526_v36 = vrot.slane %v491_v28, 2  ;;  %v527_v39 = vrot.slane %v492_v8, 2  ;;  %v529_v19 = vrot.slane %v493_v9, 2 }
  0x51   :  { %v519_v38 = vsel %vm183_vm1, %v517_v7, %v518_v20  ;;  %v530_v50 = vrot.slane %v494_v34, 2  ;;  %v522_v52 = vsel %vm183_vm1, %v520_v2, %v521_v23  ;;  %v532_v49 = vrot.slane %v495_v11, 2 }
  0x52   :  { %v525_v37 = vsel %vm183_vm1, %v523_v29, %v524_v35  ;;  %v533_v42 = vrot.slane %v496_v56, 2  ;;  %v528_v48 = vsel %vm183_vm1, %v526_v36, %v527_v39  ;;  %v535_v53 = vrot.slane %v497_v30, 2 }
  0x53   :  { %v531_v41 = vsel %vm183_vm1, %v529_v19, %v530_v50  ;;  %v536_v40 = vrot.slane %v498_v4, 2  ;;  %v482_v44 = vadd.f32 %v466_v61, %v408_v54  ;;  %v538_v15 = vrot.slane %v499_v5, 2 }
  0x54   :  { %v534_v57 = vsel %vm183_vm1, %v532_v49, %v533_v42  ;;  %v539_v24 = vrot.slane %v500_v6, 2  ;;  %v549_v46 = vadd.f32 %v519_v38, %v475_v58  ;;  %v550_v55 = vadd.f32 %v522_v52, %v476_v60 }
  0x55   :  { %v537_v1 = vsel %vm183_vm1, %v535_v53, %v536_v40  ;;  %v551_v3 = vadd.f32 %v525_v37, %v477_v21  ;;  %v552_v28 = vadd.f32 %v528_v48, %v478_v62  ;;  %v553_v8 = vadd.f32 %v531_v41, %v479_v22 }
  0x56   :  { %v540_v27 = vsel %vm183_vm1, %v538_v15, %v539_v24  ;;  %v554_v9 = vadd.f32 %v534_v57, %v480_v63  ;;  %v555_v34 = vadd.f32 %v537_v1, %v481_v0  ;;  %v559_v11 = vmul.f32 %v7651_v43, %v7980_v10  ;;  %v7652_v57 = vld [vmem:[%s13347_s2 + $0x1b] ss:$0 sm:$0xff] }
  0x57   :  { %v560_v56 = vmul.f32 %v7651_v43, %v8223_v45  ;;  %v561_v54 = vmul.f32 %v7651_v43, %v7990_v12  ;;  %v562_v61 = vmul.f32 %v7651_v43, %v8232_v32  ;;  %v563_v30 = vmul.f32 %v7651_v43, %v8000_v14 }
  0x58   :  { %v564_v58 = vmul.f32 %v7651_v43, %v8237_v26  ;;  %v565_v60 = vmul.f32 %v7651_v43, %v8010_v16  ;;  %v566_v21 = vmul.f32 %v7651_v43, %v8243_v31  ;;  %v567_v62 = vmul.f32 %v7651_v43, %v8015_v17 }
  0x59   :  { %v568_v22 = vmul.f32 %v7651_v43, %v8248_v33  ;;  %v569_v63 = vmul.f32 %v7651_v43, %v8020_v18  ;;  %v570_v0 = vmul.f32 %v7651_v43, %v8253_v51  ;;  %v571_v4 = vmul.f32 %v7651_v43, %v8051_v25 }
  0x5a   :  { %v572_v5 = vmul.f32 %v7651_v43, %v8258_v13  ;;  %v573_v6 = vmul.f32 %v7651_v43, %v8212_v47  ;;  %v574_v7 = vmul.f32 %v7651_v43, %v8266_v59  ;;  %v591_v20 = vrot.slane %v559_v11, 3 }
  0x5b   :  { %v592_v2 = vrot.slane %v560_v56, 3  ;;  %v594_v23 = vrot.slane %v561_v54, 3  ;;  %v595_v29 = vrot.slane %v562_v61, 3  ;;  %v597_v35 = vrot.slane %v563_v30, 3 }
  0x5c   :  { %v598_v36 = vrot.slane %v564_v58, 3  ;;  %v600_v38 = vrot.slane %v565_v60, 3  ;;  %v601_v19 = vrot.slane %v566_v21, 3  ;;  %v603_v50 = vrot.slane %v567_v62, 3 }
  0x5d   :  { %v593_v39 = vsel %vm258_vm2, %v591_v20, %v592_v2  ;;  %v604_v52 = vrot.slane %v568_v22, 3  ;;  %v596_v37 = vsel %vm258_vm2, %v594_v23, %v595_v29  ;;  %v606_v42 = vrot.slane %v569_v63, 3 }
  0x5e   :  { %v599_v49 = vsel %vm258_vm2, %v597_v35, %v598_v36  ;;  %v607_v48 = vrot.slane %v570_v0, 3  ;;  %v602_v41 = vsel %vm258_vm2, %v600_v38, %v601_v19  ;;  %v609_v40 = vrot.slane %v571_v4, 3  ;;  %v7653_v36 = vld [vmem:[%s13347_s2 + $0x1e] ss:$0 sm:$0xff] }
  0x5f   :  { %v605_v53 = vsel %vm258_vm2, %v603_v50, %v604_v52  ;;  %v610_v43 = vrot.slane %v572_v5, 3  ;;  %v556_v15 = vadd.f32 %v540_v27, %v482_v44  ;;  %v612_v1 = vrot.slane %v573_v6, 3 }
  0x60   :  { %v608_v24 = vsel %vm258_vm2, %v606_v42, %v607_v48  ;;  %v613_v11 = vrot.slane %v574_v7, 3  ;;  %v623_v54 = vadd.f32 %v593_v39, %v549_v46  ;;  %v624_v61 = vadd.f32 %v596_v37, %v550_v55 }
  0x61   :  { %v611_v56 = vsel %vm258_vm2, %v609_v40, %v610_v43  ;;  %v625_v30 = vadd.f32 %v599_v49, %v551_v3  ;;  %v626_v60 = vadd.f32 %v602_v41, %v552_v28  ;;  %v627_v21 = vadd.f32 %v605_v53, %v553_v8  ;;  %v8376_v43 = vld [vmem:[%s13346_s0 + $0x90] sm:$0xff] }
  0x62   :  { %v614_v58 = vsel %vm258_vm2, %v612_v1, %v613_v11  ;;  %v628_v62 = vadd.f32 %v608_v24, %v554_v9  ;;  %v629_v22 = vadd.f32 %v611_v56, %v555_v34  ;;  %v633_v63 = vmul.f32 %v7652_v57, %v7980_v10  ;;  %v8387_v1 = vld [vmem:[%s13346_s0 + $0x30] sm:$0xff]  ;;  %v8393_v56 = vld [vmem:[%s13346_s0 + $0x40] sm:$0xff] }
  0x63   :  { %v634_v0 = vmul.f32 %v7652_v57, %v8223_v45  ;;  %v635_v44 = vmul.f32 %v7652_v57, %v7990_v12  ;;  %v636_v27 = vmul.f32 %v7652_v57, %v8232_v32  ;;  %v637_v4 = vmul.f32 %v7652_v57, %v8000_v14 }
  0x64   :  { %v638_v46 = vmul.f32 %v7652_v57, %v8237_v26  ;;  %v639_v55 = vmul.f32 %v7652_v57, %v8010_v16  ;;  %v640_v3 = vmul.f32 %v7652_v57, %v8243_v31  ;;  %v641_v28 = vmul.f32 %v7652_v57, %v8015_v17 }
  0x65   :  { %v642_v8 = vmul.f32 %v7652_v57, %v8248_v33  ;;  %v643_v10 = vmul.f32 %v7652_v57, %v8020_v18  ;;  %v644_v45 = vmul.f32 %v7652_v57, %v8253_v51  ;;  %v645_v12 = vmul.f32 %v7652_v57, %v8051_v25 }
  0x66   :  { %v646_v32 = vmul.f32 %v7652_v57, %v8258_v13  ;;  %v647_v14 = vmul.f32 %v7652_v57, %v8212_v47  ;;  %v648_v26 = vmul.f32 %v7652_v57, %v8266_v59  ;;  %v665_v9 = vrot.slane %v633_v63, 4 }
  0x67   :  { %v666_v16 = vrot.slane %v634_v0, 4  ;;  %v668_v34 = vrot.slane %v635_v44, 4  ;;  %v669_v31 = vrot.slane %v636_v27, 4  ;;  %v671_v5 = vrot.slane %v637_v4, 4  ;;  %v8426_v27 = vld [vmem:[%s13346_s0 + $0x38] sm:$0xf] }
  0x68   :  { %v672_v17 = vrot.slane %v638_v46, 4  ;;  %v674_v6 = vrot.slane %v639_v55, 4  ;;  %v675_v18 = vrot.slane %v640_v3, 4  ;;  %v677_v7 = vrot.slane %v641_v28, 4  ;;  %v8431_v4 = vld [vmem:[%s13346_s0 + $0x48] sm:$0xf] }
  0x69   :  { %v667_v33 = vsel %vm333_vm3, %v665_v9, %v666_v16  ;;  %v678_v51 = vrot.slane %v642_v8, 4  ;;  %v670_v25 = vsel %vm333_vm3, %v668_v34, %v669_v31  ;;  %v680_v20 = vrot.slane %v643_v10, 4  ;;  %v8437_v28 = vld [vmem:[%s13346_s0 + $0x58] sm:$0xf]  ;;  %v8442_v8 = vld [vmem:[%s13346_s0 + $0x68] sm:$0xf] }
  0x6a   :  { %v673_v13 = vsel %vm333_vm3, %v671_v5, %v672_v17  ;;  %v681_v2 = vrot.slane %v644_v45, 4  ;;  %v676_v59 = vsel %vm333_vm3, %v674_v6, %v675_v18  ;;  %v683_v29 = vrot.slane %v645_v12, 4  ;;  %v8460_v5 = vld [vmem:[%s13346_s0 + $0x98] sm:$0xf] }
  0x6b   :  { %v679_v23 = vsel %vm333_vm3, %v677_v7, %v678_v51  ;;  %v684_v35 = vrot.slane %v646_v32, 4  ;;  %v630_v38 = vadd.f32 %v614_v58, %v556_v15  ;;  %v686_v19 = vrot.slane %v647_v14, 4  ;;  %v8381_v15 = vld [vmem:[%s13346_s0 + $0x20] sm:$0xff]  ;;  %v8407_v58 = vld [vmem:[%s13346_s0 + $0x50] sm:$0xff]  ;;  %v8447_v14 = vld [vmem:[%s13346_s0 + $0x78] sm:$0xf] }
  0x6c   :  { %v682_v39 = vsel %vm333_vm3, %v680_v20, %v681_v2  ;;  %v687_v50 = vrot.slane %v648_v26, 4  ;;  %v697_v37 = vadd.f32 %v667_v33, %v623_v54  ;;  %v698_v49 = vadd.f32 %v670_v25, %v624_v61  ;;  %v7654_v61 = vld [vmem:[%s13347_s2 + $0x21] ss:$0 sm:$0xff]  ;;  %v8452_v26 = vld [vmem:[%s13346_s0 + $0x88] sm:$0xf] }
  0x6d   :  { %v685_v52 = vsel %vm333_vm3, %v683_v29, %v684_v35  ;;  %v699_v42 = vadd.f32 %v673_v13, %v625_v30  ;;  %v700_v41 = vadd.f32 %v676_v59, %v626_v60  ;;  %v701_v53 = vadd.f32 %v679_v23, %v627_v21  ;;  %v8402_v30 = vld [vmem:[%s13346_s0 + $0x28] sm:$0xf]  ;;  %v8413_v21 = vld [vmem:[%s13346_s0 + $0x60] sm:$0xff] }
  0x6e   :  { %v688_v48 = vsel %vm333_vm3, %v686_v19, %v687_v50  ;;  %v702_v40 = vadd.f32 %v682_v39, %v628_v62  ;;  %v703_v57 = vadd.f32 %v685_v52, %v629_v22  ;;  %v724_v24 = vmul.f32 %v8381_v15, %v7653_v36  ;;  %v8419_v22 = vld [vmem:[%s13346_s0 + $0x70] sm:$0xff] }
  0x6f   :  { %v725_v11 = vmul.f32 %v8387_v1, %v7653_v36  ;;  %v726_v54 = vmul.f32 %v8393_v56, %v7653_v36  ;;  %v727_v60 = vmul.f32 %v8407_v58, %v7653_v36  ;;  %v728_v62 = vmul.f32 %v8413_v21, %v7653_v36 }
  0x70   :  { %v729_v63 = vmul.f32 %v8419_v22, %v7653_v36  ;;  %v730_v0 = vmul.f32 %v7653_v36, %v8212_v47  ;;  %v704_v44 = vadd.f32 %v688_v48, %v630_v38  ;;  %v731_v46 = vmul.f32 %v7653_v36, %v8376_v43 }
  0x71   :  { %v732_v55 = vadd.f32 %v724_v24, %v697_v37  ;;  %v733_v3 = vadd.f32 %v725_v11, %v698_v49  ;;  %v734_v10 = vadd.f32 %v726_v54, %v699_v42  ;;  %v735_v45 = vadd.f32 %v727_v60, %v700_v41  ;;  %v7655_v60 = vld [vmem:[%s13347_s2 + $0x24] ss:$0 sm:$0xff] }
  0x72   :  { %v736_v12 = vadd.f32 %v728_v62, %v701_v53  ;;  %v737_v32 = vadd.f32 %v729_v63, %v702_v40  ;;  %v738_v9 = vadd.f32 %v730_v0, %v703_v57  ;;  %v742_v16 = vmul.f32 %v8381_v15, %v7654_v61 }
  0x73   :  { %v743_v34 = vmul.f32 %v7654_v61, %v8402_v30  ;;  %v744_v31 = vmul.f32 %v8387_v1, %v7654_v61  ;;  %v745_v17 = vmul.f32 %v7654_v61, %v8426_v27  ;;  %v746_v6 = vmul.f32 %v8393_v56, %v7654_v61 }
  0x74   :  { %v747_v33 = vmul.f32 %v7654_v61, %v8431_v4  ;;  %v748_v18 = vmul.f32 %v8407_v58, %v7654_v61  ;;  %v749_v7 = vmul.f32 %v7654_v61, %v8437_v28  ;;  %v750_v51 = vmul.f32 %v8413_v21, %v7654_v61 }
  0x75   :  { %v751_v25 = vmul.f32 %v7654_v61, %v8442_v8  ;;  %v752_v13 = vmul.f32 %v8419_v22, %v7654_v61  ;;  %v753_v20 = vmul.f32 %v7654_v61, %v8447_v14  ;;  %v754_v2 = vmul.f32 %v7654_v61, %v8212_v47 }
  0x76   :  { %v755_v59 = vmul.f32 %v7654_v61, %v8452_v26  ;;  %v756_v23 = vmul.f32 %v7654_v61, %v8376_v43  ;;  %v757_v29 = vmul.f32 %v7654_v61, %v8460_v5  ;;  %v774_v35 = vrot.slane %v742_v16, 1 }
  0x77   :  { %v775_v36 = vrot.slane %v743_v34, 1  ;;  %v777_v38 = vrot.slane %v744_v31, 1  ;;  %v778_v39 = vrot.slane %v745_v17, 1  ;;  %v780_v19 = vrot.slane %v746_v6, 1 }
  0x78   :  { %v781_v50 = vrot.slane %v747_v33, 1  ;;  %v783_v52 = vrot.slane %v748_v18, 1  ;;  %v784_v49 = vrot.slane %v749_v7, 1  ;;  %v786_v42 = vrot.slane %v750_v51, 1 }
  0x79   :  { %v776_v37 = vsel %vm108_vm0, %v774_v35, %v775_v36  ;;  %v787_v48 = vrot.slane %v751_v25, 1  ;;  %v779_v41 = vsel %vm108_vm0, %v777_v38, %v778_v39  ;;  %v789_v40 = vrot.slane %v752_v13, 1 }
  0x7a   :  { %v782_v53 = vsel %vm108_vm0, %v780_v19, %v781_v50  ;;  %v790_v57 = vrot.slane %v753_v20, 1  ;;  %v785_v24 = vsel %vm108_vm0, %v783_v52, %v784_v49  ;;  %v792_v54 = vrot.slane %v754_v2, 1 }
  0x7b   :  { %v788_v11 = vsel %vm108_vm0, %v786_v42, %v787_v48  ;;  %v793_v61 = vrot.slane %v755_v59, 1  ;;  %v739_v62 = vadd.f32 %v731_v46, %v704_v44  ;;  %v795_v0 = vrot.slane %v756_v23, 1 }
  0x7c   :  { %v791_v63 = vsel %vm108_vm0, %v789_v40, %v790_v57  ;;  %v796_v16 = vrot.slane %v757_v29, 1  ;;  %v806_v31 = vadd.f32 %v776_v37, %v732_v55  ;;  %v807_v17 = vadd.f32 %v779_v41, %v733_v3 }
  0x7d   :  { %v794_v34 = vsel %vm108_vm0, %v792_v54, %v793_v61  ;;  %v808_v6 = vadd.f32 %v782_v53, %v734_v10  ;;  %v809_v18 = vadd.f32 %v785_v24, %v735_v45  ;;  %v810_v7 = vadd.f32 %v788_v11, %v736_v12 }
  0x7e   :  { %v797_v33 = vsel %vm108_vm0, %v795_v0, %v796_v16  ;;  %v811_v51 = vadd.f32 %v791_v63, %v737_v32  ;;  %v812_v25 = vadd.f32 %v794_v34, %v738_v9  ;;  %v816_v13 = vmul.f32 %v8381_v15, %v7655_v60  ;;  %v7656_v63 = vld [vmem:[%s13347_s2 + $0x27] ss:$0 sm:$0xff] }
  0x7f   :  { %v817_v20 = vmul.f32 %v7655_v60, %v8402_v30  ;;  %v818_v44 = vmul.f32 %v8387_v1, %v7655_v60  ;;  %v819_v46 = vmul.f32 %v7655_v60, %v8426_v27  ;;  %v820_v2 = vmul.f32 %v8393_v56, %v7655_v60 }
  0x80   :  { %v821_v55 = vmul.f32 %v7655_v60, %v8431_v4  ;;  %v822_v3 = vmul.f32 %v8407_v58, %v7655_v60  ;;  %v823_v10 = vmul.f32 %v7655_v60, %v8437_v28  ;;  %v824_v45 = vmul.f32 %v8413_v21, %v7655_v60 }
  0x81   :  { %v825_v12 = vmul.f32 %v7655_v60, %v8442_v8  ;;  %v826_v32 = vmul.f32 %v8419_v22, %v7655_v60  ;;  %v827_v9 = vmul.f32 %v7655_v60, %v8447_v14  ;;  %v828_v59 = vmul.f32 %v7655_v60, %v8212_v47 }
  0x82   :  { %v829_v23 = vmul.f32 %v7655_v60, %v8452_v26  ;;  %v830_v29 = vmul.f32 %v7655_v60, %v8376_v43  ;;  %v831_v35 = vmul.f32 %v7655_v60, %v8460_v5  ;;  %v848_v36 = vrot.slane %v816_v13, 2 }
  0x83   :  { %v849_v38 = vrot.slane %v817_v20, 2  ;;  %v851_v39 = vrot.slane %v818_v44, 2  ;;  %v852_v19 = vrot.slane %v819_v46, 2  ;;  %v854_v50 = vrot.slane %v820_v2, 2 }
  0x84   :  { %v855_v52 = vrot.slane %v821_v55, 2  ;;  %v857_v37 = vrot.slane %v822_v3, 2  ;;  %v858_v42 = vrot.slane %v823_v10, 2  ;;  %v860_v48 = vrot.slane %v824_v45, 2 }
  0x85   :  { %v850_v49 = vsel %vm183_vm1, %v848_v36, %v849_v38  ;;  %v861_v41 = vrot.slane %v825_v12, 2  ;;  %v853_v53 = vsel %vm183_vm1, %v851_v39, %v852_v19  ;;  %v863_v57 = vrot.slane %v826_v32, 2 }
  0x86   :  { %v856_v40 = vsel %vm183_vm1, %v854_v50, %v855_v52  ;;  %v864_v24 = vrot.slane %v827_v9, 2  ;;  %v859_v11 = vsel %vm183_vm1, %v857_v37, %v858_v42  ;;  %v866_v61 = vrot.slane %v828_v59, 2 }
  0x87   :  { %v862_v54 = vsel %vm183_vm1, %v860_v48, %v861_v41  ;;  %v867_v60 = vrot.slane %v829_v23, 2  ;;  %v813_v0 = vadd.f32 %v797_v33, %v739_v62  ;;  %v869_v34 = vrot.slane %v830_v29, 2 }
  0x88   :  { %v865_v16 = vsel %vm183_vm1, %v863_v57, %v864_v24  ;;  %v870_v13 = vrot.slane %v831_v35, 2  ;;  %v880_v44 = vadd.f32 %v850_v49, %v806_v31  ;;  %v881_v46 = vadd.f32 %v853_v53, %v807_v17 }
  0x89   :  { %v868_v20 = vsel %vm183_vm1, %v866_v61, %v867_v60  ;;  %v882_v2 = vadd.f32 %v856_v40, %v808_v6  ;;  %v883_v3 = vadd.f32 %v859_v11, %v809_v18  ;;  %v884_v10 = vadd.f32 %v862_v54, %v810_v7 }
  0x8a   :  { %v871_v55 = vsel %vm183_vm1, %v869_v34, %v870_v13  ;;  %v885_v45 = vadd.f32 %v865_v16, %v811_v51  ;;  %v886_v12 = vadd.f32 %v868_v20, %v812_v25  ;;  %v890_v32 = vmul.f32 %v8381_v15, %v7656_v63  ;;  %v7657_v16 = vld [vmem:[%s13347_s2 + $0x2a] ss:$0 sm:$0xff] }
  0x8b   :  { %v891_v9 = vmul.f32 %v7656_v63, %v8402_v30  ;;  %v892_v62 = vmul.f32 %v8387_v1, %v7656_v63  ;;  %v893_v33 = vmul.f32 %v7656_v63, %v8426_v27  ;;  %v894_v59 = vmul.f32 %v8393_v56, %v7656_v63 }
  0x8c   :  { %v895_v31 = vmul.f32 %v7656_v63, %v8431_v4  ;;  %v896_v17 = vmul.f32 %v8407_v58, %v7656_v63  ;;  %v897_v6 = vmul.f32 %v7656_v63, %v8437_v28  ;;  %v898_v18 = vmul.f32 %v8413_v21, %v7656_v63 }
  0x8d   :  { %v899_v7 = vmul.f32 %v7656_v63, %v8442_v8  ;;  %v900_v51 = vmul.f32 %v8419_v22, %v7656_v63  ;;  %v901_v25 = vmul.f32 %v7656_v63, %v8447_v14  ;;  %v902_v23 = vmul.f32 %v7656_v63, %v8212_v47 }
  0x8e   :  { %v903_v29 = vmul.f32 %v7656_v63, %v8452_v26  ;;  %v904_v35 = vmul.f32 %v7656_v63, %v8376_v43  ;;  %v905_v36 = vmul.f32 %v7656_v63, %v8460_v5  ;;  %v922_v38 = vrot.slane %v890_v32, 3 }
  0x8f   :  { %v923_v39 = vrot.slane %v891_v9, 3  ;;  %v925_v19 = vrot.slane %v892_v62, 3  ;;  %v926_v50 = vrot.slane %v893_v33, 3  ;;  %v928_v52 = vrot.slane %v894_v59, 3 }
  0x90   :  { %v929_v37 = vrot.slane %v895_v31, 3  ;;  %v931_v49 = vrot.slane %v896_v17, 3  ;;  %v932_v48 = vrot.slane %v897_v6, 3  ;;  %v934_v41 = vrot.slane %v898_v18, 3 }
  0x91   :  { %v924_v42 = vsel %vm258_vm2, %v922_v38, %v923_v39  ;;  %v935_v53 = vrot.slane %v899_v7, 3  ;;  %v927_v40 = vsel %vm258_vm2, %v925_v19, %v926_v50  ;;  %v937_v24 = vrot.slane %v900_v51, 3 }
  0x92   :  { %v930_v57 = vsel %vm258_vm2, %v928_v52, %v929_v37  ;;  %v938_v11 = vrot.slane %v901_v25, 3  ;;  %v933_v54 = vsel %vm258_vm2, %v931_v49, %v932_v48  ;;  %v940_v60 = vrot.slane %v902_v23, 3  ;;  %v7658_v49 = vld [vmem:[%s13347_s2 + $0x2d] ss:$0 sm:$0xff] }
  0x93   :  { %v936_v61 = vsel %vm258_vm2, %v934_v41, %v935_v53  ;;  %v941_v63 = vrot.slane %v903_v29, 3  ;;  %v887_v34 = vadd.f32 %v871_v55, %v813_v0  ;;  %v943_v20 = vrot.slane %v904_v35, 3 }
  0x94   :  { %v939_v13 = vsel %vm258_vm2, %v937_v24, %v938_v11  ;;  %v944_v32 = vrot.slane %v905_v36, 3  ;;  %v954_v62 = vadd.f32 %v924_v42, %v880_v44  ;;  %v955_v33 = vadd.f32 %v927_v40, %v881_v46  ;;  %v8568_v40 = vld [vmem:[%s13346_s0 + $0x30] sm:$0xff] }
  0x95   :  { %v942_v9 = vsel %vm258_vm2, %v940_v60, %v941_v63  ;;  %v956_v59 = vadd.f32 %v930_v57, %v882_v2  ;;  %v957_v17 = vadd.f32 %v933_v54, %v883_v3  ;;  %v958_v6 = vadd.f32 %v936_v61, %v884_v10  ;;  %v8573_v57 = vld [vmem:[%s13346_s0 + $0x40] sm:$0xff]  ;;  %v8578_v24 = vld [vmem:[%s13346_s0 + $0x50] sm:$0xff] }
  0x96   :  { %v945_v31 = vsel %vm258_vm2, %v943_v20, %v944_v32  ;;  %v959_v18 = vadd.f32 %v939_v13, %v885_v45  ;;  %v960_v7 = vadd.f32 %v942_v9, %v886_v12  ;;  %v964_v51 = vmul.f32 %v8381_v15, %v7657_v16  ;;  %v8584_v63 = vld [vmem:[%s13346_s0 + $0x60] sm:$0xff] }
  0x97   :  { %v965_v25 = vmul.f32 %v7657_v16, %v8402_v30  ;;  %v966_v0 = vmul.f32 %v8387_v1, %v7657_v16  ;;  %v967_v55 = vmul.f32 %v7657_v16, %v8426_v27  ;;  %v968_v23 = vmul.f32 %v8393_v56, %v7657_v16  ;;  %v8595_v9 = vld [vmem:[%s13346_s0 + $0xa0] sm:$0xff] }
  0x98   :  { %v969_v44 = vmul.f32 %v7657_v16, %v8431_v4  ;;  %v970_v46 = vmul.f32 %v8407_v58, %v7657_v16  ;;  %v971_v2 = vmul.f32 %v7657_v16, %v8437_v28  ;;  %v972_v3 = vmul.f32 %v8413_v21, %v7657_v16 }
  0x99   :  { %v973_v10 = vmul.f32 %v7657_v16, %v8442_v8  ;;  %v974_v15 = vmul.f32 %v8419_v22, %v7657_v16  ;;  %v975_v30 = vmul.f32 %v7657_v16, %v8447_v14  ;;  %v976_v1 = vmul.f32 %v7657_v16, %v8212_v47 }
  0x9a   :  { %v977_v27 = vmul.f32 %v7657_v16, %v8452_v26  ;;  %v978_v56 = vmul.f32 %v7657_v16, %v8376_v43  ;;  %v979_v4 = vmul.f32 %v7657_v16, %v8460_v5  ;;  %v996_v45 = vrot.slane %v964_v51, 4  ;;  %v8589_v16 = vld [vmem:[%s13346_s0 + $0x70] sm:$0xff] }
  0x9b   :  { %v997_v58 = vrot.slane %v965_v25, 4  ;;  %v999_v12 = vrot.slane %v966_v0, 4  ;;  %v1000_v28 = vrot.slane %v967_v55, 4  ;;  %v1002_v29 = vrot.slane %v968_v23, 4  ;;  %v7659_v51 = vld [vmem:[%s13347_s2 + $0x30] ss:$0 sm:$0xff] }
  0x9c   :  { %v1003_v21 = vrot.slane %v969_v44, 4  ;;  %v1005_v35 = vrot.slane %v970_v46, 4  ;;  %v1006_v22 = vrot.slane %v971_v2, 4  ;;  %v1008_v36 = vrot.slane %v972_v3, 4  ;;  %v8615_v55 = vld [vmem:[%s13346_s0 + $0x48] sm:$0xf] }
  0x9d   :  { %v998_v8 = vsel %vm333_vm3, %v996_v45, %v997_v58  ;;  %v1009_v14 = vrot.slane %v973_v10, 4  ;;  %v1001_v38 = vsel %vm333_vm3, %v999_v12, %v1000_v28  ;;  %v1011_v39 = vrot.slane %v974_v15, 4  ;;  %v8620_v23 = vld [vmem:[%s13346_s0 + $0x58] sm:$0xf]  ;;  %v8626_v3 = vld [vmem:[%s13346_s0 + $0x68] sm:$0xf] }
  0x9e   :  { %v1004_v26 = vsel %vm333_vm3, %v1002_v29, %v1003_v21  ;;  %v1012_v19 = vrot.slane %v975_v30, 4  ;;  %v1007_v5 = vsel %vm333_vm3, %v1005_v35, %v1006_v22  ;;  %v1014_v52 = vrot.slane %v976_v1, 4  ;;  %v8631_v10 = vld [vmem:[%s13346_s0 + $0x78] sm:$0xf]  ;;  %v8649_v29 = vld [vmem:[%s13346_s0 + $0xa8] sm:$0xf] }
  0x9f   :  { %v1010_v50 = vsel %vm333_vm3, %v1008_v36, %v1009_v14  ;;  %v1015_v37 = vrot.slane %v977_v27, 4  ;;  %v961_v42 = vadd.f32 %v945_v31, %v887_v34  ;;  %v1017_v41 = vrot.slane %v978_v56, 4  ;;  %v8636_v56 = vld [vmem:[%s13346_s0 + $0x88] sm:$0xf] }
  0xa0   :  { %v1013_v48 = vsel %vm333_vm3, %v1011_v39, %v1012_v19  ;;  %v1018_v53 = vrot.slane %v979_v4, 4  ;;  %v1028_v54 = vadd.f32 %v998_v8, %v954_v62  ;;  %v1029_v61 = vadd.f32 %v1001_v38, %v955_v33  ;;  %v8641_v4 = vld [vmem:[%s13346_s0 + $0x98] sm:$0xf] }
  0xa1   :  { %v1016_v11 = vsel %vm333_vm3, %v1014_v52, %v1015_v37  ;;  %v1030_v60 = vadd.f32 %v1004_v26, %v956_v59  ;;  %v1031_v13 = vadd.f32 %v1007_v5, %v957_v17  ;;  %v1032_v20 = vadd.f32 %v1010_v50, %v958_v6  ;;  %v8606_v17 = vld [vmem:[%s13346_s0 + $0x38] sm:$0xf] }
  0xa2   :  { %v1019_v34 = vsel %vm333_vm3, %v1017_v41, %v1018_v53  ;;  %v1033_v32 = vadd.f32 %v1013_v48, %v959_v18  ;;  %v1034_v62 = vadd.f32 %v1016_v11, %v960_v7  ;;  %v1055_v33 = vmul.f32 %v7658_v49, %v8568_v40 }
  0xa3   :  { %v1056_v59 = vmul.f32 %v7658_v49, %v8573_v57  ;;  %v1057_v31 = vmul.f32 %v7658_v49, %v8578_v24  ;;  %v1058_v6 = vmul.f32 %v7658_v49, %v8584_v63  ;;  %v1059_v18 = vmul.f32 %v7658_v49, %v8589_v16 }
  0xa4   :  { %v1060_v7 = vmul.f32 %v7658_v49, %v8212_v47  ;;  %v1061_v25 = vmul.f32 %v7658_v49, %v8376_v43  ;;  %v1035_v0 = vadd.f32 %v1019_v34, %v961_v42  ;;  %v1062_v44 = vmul.f32 %v7658_v49, %v8595_v9 }
  0xa5   :  { %v1063_v46 = vadd.f32 %v1055_v33, %v1028_v54  ;;  %v1064_v2 = vadd.f32 %v1056_v59, %v1029_v61  ;;  %v1065_v15 = vadd.f32 %v1057_v31, %v1030_v60  ;;  %v1066_v30 = vadd.f32 %v1058_v6, %v1031_v13 }
  0xa6   :  { %v1067_v1 = vadd.f32 %v1059_v18, %v1032_v20  ;;  %v1068_v27 = vadd.f32 %v1060_v7, %v1033_v32  ;;  %v1069_v45 = vadd.f32 %v1061_v25, %v1034_v62  ;;  %v1073_v58 = vmul.f32 %v7659_v51, %v8568_v40 }
  0xa7   :  { %v1074_v12 = vmul.f32 %v7659_v51, %v8606_v17  ;;  %v1075_v28 = vmul.f32 %v7659_v51, %v8573_v57  ;;  %v1076_v21 = vmul.f32 %v7659_v51, %v8615_v55  ;;  %v1077_v35 = vmul.f32 %v7659_v51, %v8578_v24 }
  0xa8   :  { %v1078_v8 = vmul.f32 %v7659_v51, %v8620_v23  ;;  %v1079_v22 = vmul.f32 %v7659_v51, %v8584_v63  ;;  %v1080_v36 = vmul.f32 %v7659_v51, %v8626_v3  ;;  %v1081_v14 = vmul.f32 %v7659_v51, %v8589_v16 }
  0xa9   :  { %v1082_v38 = vmul.f32 %v7659_v51, %v8631_v10  ;;  %v1083_v26 = vmul.f32 %v7659_v51, %v8212_v47  ;;  %v1084_v39 = vmul.f32 %v7659_v51, %v8636_v56  ;;  %v1085_v19 = vmul.f32 %v7659_v51, %v8376_v43 }
  0xaa   :  { %v1086_v5 = vmul.f32 %v7659_v51, %v8641_v4  ;;  %v1087_v50 = vmul.f32 %v7659_v51, %v8595_v9  ;;  %v1088_v52 = vmul.f32 %v7659_v51, %v8649_v29  ;;  %v1105_v37 = vrot.slane %v1073_v58, 1  ;;  %v7660_v51 = vld [vmem:[%s13347_s2 + $0x33] ss:$0 sm:$0xff] }
  0xab   :  { %v1106_v49 = vrot.slane %v1074_v12, 1  ;;  %v1108_v42 = vrot.slane %v1075_v28, 1  ;;  %v1109_v48 = vrot.slane %v1076_v21, 1  ;;  %v1111_v41 = vrot.slane %v1077_v35, 1 }
  0xac   :  { %v1112_v53 = vrot.slane %v1078_v8, 1  ;;  %v1114_v11 = vrot.slane %v1079_v22, 1  ;;  %v1115_v47 = vrot.slane %v1080_v36, 1  ;;  %v1117_v61 = vrot.slane %v1081_v14, 1 }
  0xad   :  { %v1107_v54 = vsel %vm108_vm0, %v1105_v37, %v1106_v49  ;;  %v1118_v60 = vrot.slane %v1082_v38, 1  ;;  %v1110_v34 = vsel %vm108_vm0, %v1108_v42, %v1109_v48  ;;  %v1120_v20 = vrot.slane %v1083_v26, 1 }
  0xae   :  { %v1113_v13 = vsel %vm108_vm0, %v1111_v41, %v1112_v53  ;;  %v1121_v32 = vrot.slane %v1084_v39, 1  ;;  %v1116_v62 = vsel %vm108_vm0, %v1114_v11, %v1115_v47  ;;  %v1123_v59 = vrot.slane %v1085_v19, 1 }
  0xaf   :  { %v1119_v33 = vsel %vm108_vm0, %v1117_v61, %v1118_v60  ;;  %v1124_v31 = vrot.slane %v1086_v5, 1  ;;  %v1070_v6 = vadd.f32 %v1062_v44, %v1035_v0  ;;  %v1126_v7 = vrot.slane %v1087_v50, 1 }
  0xb0   :  { %v1122_v18 = vsel %vm108_vm0, %v1120_v20, %v1121_v32  ;;  %v1127_v25 = vrot.slane %v1088_v52, 1  ;;  %v1137_v12 = vadd.f32 %v1107_v54, %v1063_v46  ;;  %v1138_v28 = vadd.f32 %v1110_v34, %v1064_v2 }
  0xb1   :  { %v1125_v58 = vsel %vm108_vm0, %v1123_v59, %v1124_v31  ;;  %v1139_v21 = vadd.f32 %v1113_v13, %v1065_v15  ;;  %v1140_v8 = vadd.f32 %v1116_v62, %v1066_v30  ;;  %v1141_v22 = vadd.f32 %v1119_v33, %v1067_v1 }
  0xb2   :  { %v1128_v35 = vsel %vm108_vm0, %v1126_v7, %v1127_v25  ;;  %v1142_v36 = vadd.f32 %v1122_v18, %v1068_v27  ;;  %v1143_v14 = vadd.f32 %v1125_v58, %v1069_v45  ;;  %v1147_v38 = vmul.f32 %v7660_v51, %v8568_v40  ;;  %v8688_v27 = vld [vmem:[%s13346_s0 + $0x80] sm:$0xff]  ;;  %v7661_v18 = vld [vmem:[%s13347_s2 + $0x36] ss:$0 sm:$0xff] }
  0xb3   :  { %v1148_v26 = vmul.f32 %v7660_v51, %v8606_v17  ;;  %v1149_v0 = vmul.f32 %v7660_v51, %v8573_v57  ;;  %v1150_v44 = vmul.f32 %v7660_v51, %v8615_v55  ;;  %v1151_v39 = vmul.f32 %v7660_v51, %v8578_v24 }
  0xb4   :  { %v1152_v46 = vmul.f32 %v7660_v51, %v8620_v23  ;;  %v1153_v2 = vmul.f32 %v7660_v51, %v8584_v63  ;;  %v1154_v15 = vmul.f32 %v7660_v51, %v8626_v3  ;;  %v1155_v30 = vmul.f32 %v7660_v51, %v8589_v16 }
  0xb5   :  { %v1156_v1 = vmul.f32 %v7660_v51, %v8631_v10  ;;  %v1157_v45 = vmul.f32 %v8688_v27, %v7660_v51  ;;  %v1158_v19 = vmul.f32 %v7660_v51, %v8636_v56  ;;  %v1159_v5 = vmul.f32 %v7660_v51, %v8376_v43 }
  0xb6   :  { %v1160_v50 = vmul.f32 %v7660_v51, %v8641_v4  ;;  %v1161_v52 = vmul.f32 %v7660_v51, %v8595_v9  ;;  %v1162_v37 = vmul.f32 %v7660_v51, %v8649_v29  ;;  %v1179_v49 = vrot.slane %v1147_v38, 2 }
  0xb7   :  { %v1180_v42 = vrot.slane %v1148_v26, 2  ;;  %v1182_v48 = vrot.slane %v1149_v0, 2  ;;  %v1183_v41 = vrot.slane %v1150_v44, 2  ;;  %v1185_v53 = vrot.slane %v1151_v39, 2 }
  0xb8   :  { %v1186_v11 = vrot.slane %v1152_v46, 2  ;;  %v1188_v54 = vrot.slane %v1153_v2, 2  ;;  %v1189_v61 = vrot.slane %v1154_v15, 2  ;;  %v1191_v60 = vrot.slane %v1155_v30, 2 }
  0xb9   :  { %v1181_v47 = vsel %vm183_vm1, %v1179_v49, %v1180_v42  ;;  %v1192_v34 = vrot.slane %v1156_v1, 2  ;;  %v1184_v13 = vsel %vm183_vm1, %v1182_v48, %v1183_v41  ;;  %v1194_v32 = vrot.slane %v1157_v45, 2 }
  0xba   :  { %v1187_v20 = vsel %vm183_vm1, %v1185_v53, %v1186_v11  ;;  %v1195_v62 = vrot.slane %v1158_v19, 2  ;;  %v1190_v33 = vsel %vm183_vm1, %v1188_v54, %v1189_v61  ;;  %v1197_v31 = vrot.slane %v1159_v5, 2 }
  0xbb   :  { %v1193_v59 = vsel %vm183_vm1, %v1191_v60, %v1192_v34  ;;  %v1198_v51 = vrot.slane %v1160_v50, 2  ;;  %v1144_v7 = vadd.f32 %v1128_v35, %v1070_v6  ;;  %v1200_v58 = vrot.slane %v1161_v52, 2 }
  0xbc   :  { %v1196_v25 = vsel %vm183_vm1, %v1194_v32, %v1195_v62  ;;  %v1201_v38 = vrot.slane %v1162_v37, 2  ;;  %v1211_v0 = vadd.f32 %v1181_v47, %v1137_v12  ;;  %v1212_v44 = vadd.f32 %v1184_v13, %v1138_v28 }
  0xbd   :  { %v1199_v26 = vsel %vm183_vm1, %v1197_v31, %v1198_v51  ;;  %v1213_v39 = vadd.f32 %v1187_v20, %v1139_v21  ;;  %v1214_v2 = vadd.f32 %v1190_v33, %v1140_v8  ;;  %v1215_v15 = vadd.f32 %v1193_v59, %v1141_v22 }
  0xbe   :  { %v1202_v46 = vsel %vm183_vm1, %v1200_v58, %v1201_v38  ;;  %v1216_v30 = vadd.f32 %v1196_v25, %v1142_v36  ;;  %v1217_v1 = vadd.f32 %v1199_v26, %v1143_v14  ;;  %v1221_v45 = vmul.f32 %v7661_v18, %v8568_v40  ;;  %v7662_v25 = vld [vmem:[%s13347_s2 + $0x39] ss:$0 sm:$0xff] }
  0xbf   :  { %v1222_v19 = vmul.f32 %v7661_v18, %v8606_v17  ;;  %v1223_v6 = vmul.f32 %v7661_v18, %v8573_v57  ;;  %v1224_v35 = vmul.f32 %v7661_v18, %v8615_v55  ;;  %v1225_v5 = vmul.f32 %v7661_v18, %v8578_v24 }
  0xc0   :  { %v1226_v12 = vmul.f32 %v7661_v18, %v8620_v23  ;;  %v1227_v28 = vmul.f32 %v7661_v18, %v8584_v63  ;;  %v1228_v21 = vmul.f32 %v7661_v18, %v8626_v3  ;;  %v1229_v8 = vmul.f32 %v7661_v18, %v8589_v16 }
  0xc1   :  { %v1230_v22 = vmul.f32 %v7661_v18, %v8631_v10  ;;  %v1231_v36 = vmul.f32 %v8688_v27, %v7661_v18  ;;  %v1232_v14 = vmul.f32 %v7661_v18, %v8636_v56  ;;  %v1233_v50 = vmul.f32 %v7661_v18, %v8376_v43 }
  0xc2   :  { %v1234_v52 = vmul.f32 %v7661_v18, %v8641_v4  ;;  %v1235_v37 = vmul.f32 %v7661_v18, %v8595_v9  ;;  %v1236_v49 = vmul.f32 %v7661_v18, %v8649_v29  ;;  %v1253_v42 = vrot.slane %v1221_v45, 3 }
  0xc3   :  { %v1254_v48 = vrot.slane %v1222_v19, 3  ;;  %v1256_v41 = vrot.slane %v1223_v6, 3  ;;  %v1257_v53 = vrot.slane %v1224_v35, 3  ;;  %v1259_v11 = vrot.slane %v1225_v5, 3 }
  0xc4   :  { %v1260_v54 = vrot.slane %v1226_v12, 3  ;;  %v1262_v47 = vrot.slane %v1227_v28, 3  ;;  %v1263_v60 = vrot.slane %v1228_v21, 3  ;;  %v1265_v34 = vrot.slane %v1229_v8, 3 }
  0xc5   :  { %v1255_v61 = vsel %vm258_vm2, %v1253_v42, %v1254_v48  ;;  %v1266_v13 = vrot.slane %v1230_v22, 3  ;;  %v1258_v20 = vsel %vm258_vm2, %v1256_v41, %v1257_v53  ;;  %v1268_v62 = vrot.slane %v1231_v36, 3 }
  0xc6   :  { %v1261_v32 = vsel %vm258_vm2, %v1259_v11, %v1260_v54  ;;  %v1269_v33 = vrot.slane %v1232_v14, 3  ;;  %v1264_v59 = vsel %vm258_vm2, %v1262_v47, %v1263_v60  ;;  %v1271_v51 = vrot.slane %v1233_v50, 3 }
  0xc7   :  { %v1267_v31 = vsel %vm258_vm2, %v1265_v34, %v1266_v13  ;;  %v1272_v18 = vrot.slane %v1234_v52, 3  ;;  %v1218_v58 = vadd.f32 %v1202_v46, %v1144_v7  ;;  %v1274_v26 = vrot.slane %v1235_v37, 3  ;;  %v7663_v13 = vld [vmem:[%s13347_s2 + $0x3c] ss:$0 sm:$0xff] }
  0xc8   :  { %v1270_v38 = vsel %vm258_vm2, %v1268_v62, %v1269_v33  ;;  %v1275_v45 = vrot.slane %v1236_v49, 3  ;;  %v1285_v6 = vadd.f32 %v1255_v61, %v1211_v0  ;;  %v1286_v35 = vadd.f32 %v1258_v20, %v1212_v44 }
  0xc9   :  { %v1273_v19 = vsel %vm258_vm2, %v1271_v51, %v1272_v18  ;;  %v1287_v5 = vadd.f32 %v1261_v32, %v1213_v39  ;;  %v1288_v28 = vadd.f32 %v1264_v59, %v1214_v2  ;;  %v1289_v21 = vadd.f32 %v1267_v31, %v1215_v15 }
  0xca   :  { %v1276_v12 = vsel %vm258_vm2, %v1274_v26, %v1275_v45  ;;  %v1290_v8 = vadd.f32 %v1270_v38, %v1216_v30  ;;  %v1291_v22 = vadd.f32 %v1273_v19, %v1217_v1  ;;  %v1295_v36 = vmul.f32 %v7662_v25, %v8568_v40 }
  0xcb   :  { %v1296_v14 = vmul.f32 %v7662_v25, %v8606_v17  ;;  %v1297_v7 = vmul.f32 %v7662_v25, %v8573_v57  ;;  %v1298_v46 = vmul.f32 %v7662_v25, %v8615_v55  ;;  %v1299_v50 = vmul.f32 %v7662_v25, %v8578_v24 }
  0xcc   :  { %v1300_v0 = vmul.f32 %v7662_v25, %v8620_v23  ;;  %v1301_v44 = vmul.f32 %v7662_v25, %v8584_v63  ;;  %v1302_v39 = vmul.f32 %v7662_v25, %v8626_v3  ;;  %v1303_v2 = vmul.f32 %v7662_v25, %v8589_v16 }
  0xcd   :  { %v1304_v15 = vmul.f32 %v7662_v25, %v8631_v10  ;;  %v1305_v40 = vmul.f32 %v8688_v27, %v7662_v25  ;;  %v1306_v17 = vmul.f32 %v7662_v25, %v8636_v56  ;;  %v1307_v30 = vmul.f32 %v7662_v25, %v8376_v43 }
  0xce   :  { %v1308_v55 = vmul.f32 %v7662_v25, %v8641_v4  ;;  %v1309_v1 = vmul.f32 %v7662_v25, %v8595_v9  ;;  %v1310_v23 = vmul.f32 %v7662_v25, %v8649_v29  ;;  %v1327_v52 = vrot.slane %v1295_v36, 4  ;;  %v8763_v25 = vld [vmem:[%s13346_s0 + $0x80] sm:$0xff]  ;;  %v7664_v36 = vld [vmem:[%s13347_s2 + $0x3f] ss:$0 sm:$0xff] }
  0xcf   :  { %v1328_v37 = vrot.slane %v1296_v14, 4  ;;  %v1330_v49 = vrot.slane %v1297_v7, 4  ;;  %v1331_v3 = vrot.slane %v1298_v46, 4  ;;  %v1333_v42 = vrot.slane %v1299_v50, 4  ;;  %v8789_v46 = vld [vmem:[%s13346_s0 + $0x58] sm:$0xf] }
  0xd0   :  { %v1334_v48 = vrot.slane %v1300_v0, 4  ;;  %v1336_v41 = vrot.slane %v1301_v44, 4  ;;  %v1337_v27 = vrot.slane %v1302_v39, 4  ;;  %v1339_v53 = vrot.slane %v1303_v2, 4  ;;  %v8794_v50 = vld [vmem:[%s13346_s0 + $0x68] sm:$0xf] }
  0xd1   :  { %v1329_v10 = vsel %vm333_vm3, %v1327_v52, %v1328_v37  ;;  %v1340_v56 = vrot.slane %v1304_v15, 4  ;;  %v1332_v11 = vsel %vm333_vm3, %v1330_v49, %v1331_v3  ;;  %v1342_v54 = vrot.slane %v1305_v40, 4  ;;  %v8800_v2 = vld [vmem:[%s13346_s0 + $0x78] sm:$0xf]  ;;  %v8805_v15 = vld [vmem:[%s13346_s0 + $0x88] sm:$0xf] }
  0xd2   :  { %v1335_v4 = vsel %vm333_vm3, %v1333_v42, %v1334_v48  ;;  %v1343_v47 = vrot.slane %v1306_v17, 4  ;;  %v1338_v29 = vsel %vm333_vm3, %v1336_v41, %v1337_v27  ;;  %v1345_v60 = vrot.slane %v1307_v30, 4  ;;  %v8823_v42 = vld [vmem:[%s13346_s0 + $0xb8] sm:$0xf] }
  0xd3   :  { %v1341_v61 = vsel %vm333_vm3, %v1339_v53, %v1340_v56  ;;  %v1346_v34 = vrot.slane %v1308_v55, 4  ;;  %v1292_v20 = vadd.f32 %v1276_v12, %v1218_v58  ;;  %v1348_v62 = vrot.slane %v1309_v1, 4  ;;  %v8769_v58 = vld [vmem:[%s13346_s0 + $0xb0] sm:$0xff]  ;;  %v8810_v1 = vld [vmem:[%s13346_s0 + $0x98] sm:$0xf] }
  0xd4   :  { %v1344_v32 = vsel %vm333_vm3, %v1342_v54, %v1343_v47  ;;  %v1349_v33 = vrot.slane %v1310_v23, 4  ;;  %v1359_v31 = vadd.f32 %v1329_v10, %v1285_v6  ;;  %v1360_v51 = vadd.f32 %v1332_v11, %v1286_v35  ;;  %v8815_v23 = vld [vmem:[%s13346_s0 + $0xa8] sm:$0xf] }
  0xd5   :  { %v1347_v59 = vsel %vm333_vm3, %v1345_v60, %v1346_v34  ;;  %v1361_v18 = vadd.f32 %v1335_v4, %v1287_v5  ;;  %v1362_v26 = vadd.f32 %v1338_v29, %v1288_v28  ;;  %v1363_v45 = vadd.f32 %v1341_v61, %v1289_v21  ;;  %v8780_v28 = vld [vmem:[%s13346_s0 + $0x48] sm:$0xf] }
  0xd6   :  { %v1350_v38 = vsel %vm333_vm3, %v1348_v62, %v1349_v33  ;;  %v1364_v19 = vadd.f32 %v1344_v32, %v1290_v8  ;;  %v1365_v12 = vadd.f32 %v1347_v59, %v1291_v22  ;;  %v1386_v6 = vmul.f32 %v7663_v13, %v8573_v57 }
  0xd7   :  { %v1387_v35 = vmul.f32 %v7663_v13, %v8578_v24  ;;  %v1388_v5 = vmul.f32 %v7663_v13, %v8584_v63  ;;  %v1389_v21 = vmul.f32 %v7663_v13, %v8589_v16  ;;  %v1390_v8 = vmul.f32 %v7663_v13, %v8763_v25 }
  0xd8   :  { %v1391_v22 = vmul.f32 %v7663_v13, %v8376_v43  ;;  %v1392_v14 = vmul.f32 %v7663_v13, %v8595_v9  ;;  %v1366_v7 = vadd.f32 %v1350_v38, %v1292_v20  ;;  %v1393_v0 = vmul.f32 %v7663_v13, %v8769_v58 }
  0xd9   :  { %v1394_v44 = vadd.f32 %v1386_v6, %v1359_v31  ;;  %v1395_v39 = vadd.f32 %v1387_v35, %v1360_v51  ;;  %v1396_v40 = vadd.f32 %v1388_v5, %v1361_v18  ;;  %v1397_v17 = vadd.f32 %v1389_v21, %v1362_v26 }
  0xda   :  { %v1398_v30 = vadd.f32 %v1390_v8, %v1363_v45  ;;  %v1399_v55 = vadd.f32 %v1391_v22, %v1364_v19  ;;  %v1400_v52 = vadd.f32 %v1392_v14, %v1365_v12  ;;  %v1404_v37 = vmul.f32 %v7664_v36, %v8573_v57 }
  0xdb   :  { %v1405_v49 = vmul.f32 %v7664_v36, %v8780_v28  ;;  %v1406_v3 = vmul.f32 %v7664_v36, %v8578_v24  ;;  %v1407_v48 = vmul.f32 %v7664_v36, %v8789_v46  ;;  %v1408_v41 = vmul.f32 %v7664_v36, %v8584_v63 }
  0xdc   :  { %v1409_v10 = vmul.f32 %v7664_v36, %v8794_v50  ;;  %v1410_v27 = vmul.f32 %v7664_v36, %v8589_v16  ;;  %v1411_v53 = vmul.f32 %v7664_v36, %v8800_v2  ;;  %v1412_v56 = vmul.f32 %v7664_v36, %v8763_v25 }
  0xdd   :  { %v1413_v11 = vmul.f32 %v7664_v36, %v8805_v15  ;;  %v1414_v4 = vmul.f32 %v7664_v36, %v8376_v43  ;;  %v1415_v54 = vmul.f32 %v7664_v36, %v8810_v1  ;;  %v1416_v47 = vmul.f32 %v7664_v36, %v8595_v9 }
  0xde   :  { %v1417_v29 = vmul.f32 %v7664_v36, %v8815_v23  ;;  %v1418_v61 = vmul.f32 %v7664_v36, %v8769_v58  ;;  %v1419_v60 = vmul.f32 %v7664_v36, %v8823_v42  ;;  %v1436_v34 = vrot.slane %v1404_v37, 1  ;;  %v7665_v36 = vld [vmem:[%s13347_s2 + $0x42] ss:$0 sm:$0xff] }
  0xdf   :  { %v1437_v13 = vrot.slane %v1405_v49, 1  ;;  %v1439_v20 = vrot.slane %v1406_v3, 1  ;;  %v1440_v32 = vrot.slane %v1407_v48, 1  ;;  %v1442_v62 = vrot.slane %v1408_v41, 1 }
  0xe0   :  { %v1443_v33 = vrot.slane %v1409_v10, 1  ;;  %v1445_v59 = vrot.slane %v1410_v27, 1  ;;  %v1446_v43 = vrot.slane %v1411_v53, 1  ;;  %v1448_v51 = vrot.slane %v1412_v56, 1 }
  0xe1   :  { %v1438_v31 = vsel %vm108_vm0, %v1436_v34, %v1437_v13  ;;  %v1449_v18 = vrot.slane %v1413_v11, 1  ;;  %v1441_v38 = vsel %vm108_vm0, %v1439_v20, %v1440_v32  ;;  %v1451_v45 = vrot.slane %v1414_v4, 1 }
  0xe2   :  { %v1444_v26 = vsel %vm108_vm0, %v1442_v62, %v1443_v33  ;;  %v1452_v19 = vrot.slane %v1415_v54, 1  ;;  %v1447_v12 = vsel %vm108_vm0, %v1445_v59, %v1446_v43  ;;  %v1454_v35 = vrot.slane %v1416_v47, 1 }
  0xe3   :  { %v1450_v6 = vsel %vm108_vm0, %v1448_v51, %v1449_v18  ;;  %v1455_v5 = vrot.slane %v1417_v29, 1  ;;  %v1401_v21 = vadd.f32 %v1393_v0, %v1366_v7  ;;  %v1457_v22 = vrot.slane %v1418_v61, 1 }
  0xe4   :  { %v1453_v8 = vsel %vm108_vm0, %v1451_v45, %v1452_v19  ;;  %v1458_v14 = vrot.slane %v1419_v60, 1  ;;  %v1468_v49 = vadd.f32 %v1438_v31, %v1394_v44  ;;  %v1469_v3 = vadd.f32 %v1441_v38, %v1395_v39 }
  0xe5   :  { %v1456_v37 = vsel %vm108_vm0, %v1454_v35, %v1455_v5  ;;  %v1470_v48 = vadd.f32 %v1444_v26, %v1396_v40  ;;  %v1471_v10 = vadd.f32 %v1447_v12, %v1397_v17  ;;  %v1472_v27 = vadd.f32 %v1450_v6, %v1398_v30 }
  0xe6   :  { %v1459_v41 = vsel %vm108_vm0, %v1457_v22, %v1458_v14  ;;  %v1473_v53 = vadd.f32 %v1453_v8, %v1399_v55  ;;  %v1474_v56 = vadd.f32 %v1456_v37, %v1400_v52  ;;  %v1478_v11 = vmul.f32 %v7665_v36, %v8573_v57  ;;  %v8862_v55 = vld [vmem:[%s13346_s0 + $0x90] sm:$0xff]  ;;  %v7666_v8 = vld [vmem:[%s13347_s2 + $0x45] ss:$0 sm:$0xff] }
  0xe7   :  { %v1479_v4 = vmul.f32 %v7665_v36, %v8780_v28  ;;  %v1480_v7 = vmul.f32 %v7665_v36, %v8578_v24  ;;  %v1481_v0 = vmul.f32 %v7665_v36, %v8789_v46  ;;  %v1482_v54 = vmul.f32 %v7665_v36, %v8584_v63 }
  0xe8   :  { %v1483_v44 = vmul.f32 %v7665_v36, %v8794_v50  ;;  %v1484_v39 = vmul.f32 %v7665_v36, %v8589_v16  ;;  %v1485_v40 = vmul.f32 %v7665_v36, %v8800_v2  ;;  %v1486_v17 = vmul.f32 %v7665_v36, %v8763_v25 }
  0xe9   :  { %v1487_v30 = vmul.f32 %v7665_v36, %v8805_v15  ;;  %v1488_v52 = vmul.f32 %v8862_v55, %v7665_v36  ;;  %v1489_v47 = vmul.f32 %v7665_v36, %v8810_v1  ;;  %v1490_v29 = vmul.f32 %v7665_v36, %v8595_v9 }
  0xea   :  { %v1491_v61 = vmul.f32 %v7665_v36, %v8815_v23  ;;  %v1492_v60 = vmul.f32 %v7665_v36, %v8769_v58  ;;  %v1493_v34 = vmul.f32 %v7665_v36, %v8823_v42  ;;  %v1510_v13 = vrot.slane %v1478_v11, 2 }
  0xeb   :  { %v1511_v20 = vrot.slane %v1479_v4, 2  ;;  %v1513_v32 = vrot.slane %v1480_v7, 2  ;;  %v1514_v62 = vrot.slane %v1481_v0, 2  ;;  %v1516_v33 = vrot.slane %v1482_v54, 2 }
  0xec   :  { %v1517_v59 = vrot.slane %v1483_v44, 2  ;;  %v1519_v31 = vrot.slane %v1484_v39, 2  ;;  %v1520_v51 = vrot.slane %v1485_v40, 2  ;;  %v1522_v18 = vrot.slane %v1486_v17, 2 }
  0xed   :  { %v1512_v43 = vsel %vm183_vm1, %v1510_v13, %v1511_v20  ;;  %v1523_v38 = vrot.slane %v1487_v30, 2  ;;  %v1515_v26 = vsel %vm183_vm1, %v1513_v32, %v1514_v62  ;;  %v1525_v19 = vrot.slane %v1488_v52, 2 }
  0xee   :  { %v1518_v45 = vsel %vm183_vm1, %v1516_v33, %v1517_v59  ;;  %v1526_v12 = vrot.slane %v1489_v47, 2  ;;  %v1521_v6 = vsel %vm183_vm1, %v1519_v31, %v1520_v51  ;;  %v1528_v5 = vrot.slane %v1490_v29, 2 }
  0xef   :  { %v1524_v35 = vsel %vm183_vm1, %v1522_v18, %v1523_v38  ;;  %v1529_v36 = vrot.slane %v1491_v61, 2  ;;  %v1475_v22 = vadd.f32 %v1459_v41, %v1401_v21  ;;  %v1531_v37 = vrot.slane %v1492_v60, 2 }
  0xf0   :  { %v1527_v14 = vsel %vm183_vm1, %v1525_v19, %v1526_v12  ;;  %v1532_v11 = vrot.slane %v1493_v34, 2  ;;  %v1542_v7 = vadd.f32 %v1512_v43, %v1468_v49  ;;  %v1543_v0 = vadd.f32 %v1515_v26, %v1469_v3 }
  0xf1   :  { %v1530_v4 = vsel %vm183_vm1, %v1528_v5, %v1529_v36  ;;  %v1544_v54 = vadd.f32 %v1518_v45, %v1470_v48  ;;  %v1545_v39 = vadd.f32 %v1521_v6, %v1471_v10  ;;  %v1546_v40 = vadd.f32 %v1524_v35, %v1472_v27 }
  0xf2   :  { %v1533_v44 = vsel %vm183_vm1, %v1531_v37, %v1532_v11  ;;  %v1547_v17 = vadd.f32 %v1527_v14, %v1473_v53  ;;  %v1548_v30 = vadd.f32 %v1530_v4, %v1474_v56  ;;  %v1552_v52 = vmul.f32 %v7666_v8, %v8573_v57  ;;  %v7667_v14 = vld [vmem:[%s13347_s2 + $0x48] ss:$0 sm:$0xff] }
  0xf3   :  { %v1553_v47 = vmul.f32 %v7666_v8, %v8780_v28  ;;  %v1554_v21 = vmul.f32 %v7666_v8, %v8578_v24  ;;  %v1555_v41 = vmul.f32 %v7666_v8, %v8789_v46  ;;  %v1556_v29 = vmul.f32 %v7666_v8, %v8584_v63 }
  0xf4   :  { %v1557_v49 = vmul.f32 %v7666_v8, %v8794_v50  ;;  %v1558_v3 = vmul.f32 %v7666_v8, %v8589_v16  ;;  %v1559_v48 = vmul.f32 %v7666_v8, %v8800_v2  ;;  %v1560_v10 = vmul.f32 %v7666_v8, %v8763_v25 }
  0xf5   :  { %v1561_v27 = vmul.f32 %v7666_v8, %v8805_v15  ;;  %v1562_v53 = vmul.f32 %v8862_v55, %v7666_v8  ;;  %v1563_v56 = vmul.f32 %v7666_v8, %v8810_v1  ;;  %v1564_v61 = vmul.f32 %v7666_v8, %v8595_v9 }
  0xf6   :  { %v1565_v60 = vmul.f32 %v7666_v8, %v8815_v23  ;;  %v1566_v34 = vmul.f32 %v7666_v8, %v8769_v58  ;;  %v1567_v13 = vmul.f32 %v7666_v8, %v8823_v42  ;;  %v1584_v20 = vrot.slane %v1552_v52, 3 }
  0xf7   :  { %v1585_v32 = vrot.slane %v1553_v47, 3  ;;  %v1587_v62 = vrot.slane %v1554_v21, 3  ;;  %v1588_v33 = vrot.slane %v1555_v41, 3  ;;  %v1590_v59 = vrot.slane %v1556_v29, 3 }
  0xf8   :  { %v1591_v31 = vrot.slane %v1557_v49, 3  ;;  %v1593_v43 = vrot.slane %v1558_v3, 3  ;;  %v1594_v18 = vrot.slane %v1559_v48, 3  ;;  %v1596_v38 = vrot.slane %v1560_v10, 3 }
  0xf9   :  { %v1586_v51 = vsel %vm258_vm2, %v1584_v20, %v1585_v32  ;;  %v1597_v26 = vrot.slane %v1561_v27, 3  ;;  %v1589_v45 = vsel %vm258_vm2, %v1587_v62, %v1588_v33  ;;  %v1599_v12 = vrot.slane %v1562_v53, 3 }
  0xfa   :  { %v1592_v19 = vsel %vm258_vm2, %v1590_v59, %v1591_v31  ;;  %v1600_v6 = vrot.slane %v1563_v56, 3  ;;  %v1595_v35 = vsel %vm258_vm2, %v1593_v43, %v1594_v18  ;;  %v1602_v36 = vrot.slane %v1564_v61, 3  ;;  %v8932_v59 = vld [vmem:[%s13346_s0 + $0xc0] sm:$0xff] }
  0xfb   :  { %v1598_v5 = vsel %vm258_vm2, %v1596_v38, %v1597_v26  ;;  %v1603_v8 = vrot.slane %v1565_v60, 3  ;;  %v1549_v37 = vadd.f32 %v1533_v44, %v1475_v22  ;;  %v1605_v4 = vrot.slane %v1566_v34, 3  ;;  %v7668_v31 = vld [vmem:[%s13347_s2 + $0x1] ss:$0 sm:$0xff]  ;;  %v8941_v26 = vld [vmem:[%s13346_s0 + $0xd0] sm:$0xff] }
  0xfc   :  { %v1601_v11 = vsel %vm258_vm2, %v1599_v12, %v1600_v6  ;;  %v1606_v52 = vrot.slane %v1567_v13, 3  ;;  %v1616_v21 = vadd.f32 %v1586_v51, %v1542_v7  ;;  %v1617_v41 = vadd.f32 %v1589_v45, %v1543_v0  ;;  %v8946_v45 = vld [vmem:[%s13346_s0 + $0xe0] sm:$0xff] }
  0xfd   :  { %v1604_v47 = vsel %vm258_vm2, %v1602_v36, %v1603_v8  ;;  %v1618_v29 = vadd.f32 %v1592_v19, %v1544_v54  ;;  %v1619_v3 = vadd.f32 %v1595_v35, %v1545_v39  ;;  %v1620_v48 = vadd.f32 %v1598_v5, %v1546_v40  ;;  %v8951_v19 = vld [vmem:[%s13346_s0 + $0xf0] sm:$0xff]  ;;  %v8957_v36 = vld [vmem:[%s13346_s0 + $0x100] sm:$0xff] }
  0xfe   :  { %v1607_v49 = vsel %vm258_vm2, %v1605_v4, %v1606_v52  ;;  %v1621_v10 = vadd.f32 %v1601_v11, %v1547_v17  ;;  %v1622_v27 = vadd.f32 %v1604_v47, %v1548_v30  ;;  %v1626_v53 = vmul.f32 %v7667_v14, %v8573_v57  ;;  %v8962_v8 = vld [vmem:[%s13346_s0 + $0x110] sm:$0xff] }
  0xff   :  { %v1627_v56 = vmul.f32 %v7667_v14, %v8780_v28  ;;  %v1628_v22 = vmul.f32 %v7667_v14, %v8578_v24  ;;  %v1629_v44 = vmul.f32 %v7667_v14, %v8789_v46  ;;  %v1630_v61 = vmul.f32 %v7667_v14, %v8584_v63  ;;  %v8973_v47 = vld [vmem:[%s13346_s0 + $0x130] sm:$0xff] }
 0x100   :  { %v1631_v7 = vmul.f32 %v7667_v14, %v8794_v50  ;;  %v1632_v0 = vmul.f32 %v7667_v14, %v8589_v16  ;;  %v1633_v54 = vmul.f32 %v7667_v14, %v8800_v2  ;;  %v1634_v39 = vmul.f32 %v7667_v14, %v8763_v25 }
 0x101   :  { %v1635_v40 = vmul.f32 %v7667_v14, %v8805_v15  ;;  %v1636_v57 = vmul.f32 %v8862_v55, %v7667_v14  ;;  %v1637_v28 = vmul.f32 %v7667_v14, %v8810_v1  ;;  %v1638_v24 = vmul.f32 %v7667_v14, %v8595_v9 }
 0x102   :  { %v1639_v46 = vmul.f32 %v7667_v14, %v8815_v23  ;;  %v1640_v63 = vmul.f32 %v7667_v14, %v8769_v58  ;;  %v1641_v50 = vmul.f32 %v7667_v14, %v8823_v42  ;;  %v1658_v17 = vrot.slane %v1626_v53, 4  ;;  %v8967_v14 = vld [vmem:[%s13346_s0 + $0x120] sm:$0xff] }
 0x103   :  { %v1659_v16 = vrot.slane %v1627_v56, 4  ;;  %v1661_v30 = vrot.slane %v1628_v22, 4  ;;  %v1662_v2 = vrot.slane %v1629_v44, 4  ;;  %v1664_v60 = vrot.slane %v1630_v61, 4  ;;  %v7669_v53 = vld [vmem:[%s13347_s2 + $0x4] ss:$0 sm:$0xff] }
 0x104   :  { %v1665_v25 = vrot.slane %v1631_v7, 4  ;;  %v1667_v34 = vrot.slane %v1632_v0, 4  ;;  %v1668_v55 = vrot.slane %v1633_v54, 4  ;;  %v1670_v13 = vrot.slane %v1634_v39, 4  ;;  %v8993_v44 = vld [vmem:[%s13346_s0 + $0xd8] sm:$0xf] }
 0x105   :  { %v1660_v15 = vsel %vm333_vm3, %v1658_v17, %v1659_v16  ;;  %v1671_v1 = vrot.slane %v1635_v40, 4  ;;  %v1663_v9 = vsel %vm333_vm3, %v1661_v30, %v1662_v2  ;;  %v1673_v20 = vrot.slane %v1636_v57, 4  ;;  %v8998_v61 = vld [vmem:[%s13346_s0 + $0xe8] sm:$0xf]  ;;  %v9004_v39 = vld [vmem:[%s13346_s0 + $0xf8] sm:$0xf] }
 0x106   :  { %v1666_v23 = vsel %vm333_vm3, %v1664_v60, %v1665_v25  ;;  %v1674_v58 = vrot.slane %v1637_v28, 4  ;;  %v1669_v42 = vsel %vm333_vm3, %v1667_v34, %v1668_v55  ;;  %v1676_v62 = vrot.slane %v1638_v24, 4  ;;  %v9009_v40 = vld [vmem:[%s13346_s0 + $0x108] sm:$0xf]  ;;  %v9027_v60 = vld [vmem:[%s13346_s0 + $0x138] sm:$0xf] }
 0x107   :  { %v1672_v32 = vsel %vm333_vm3, %v1670_v13, %v1671_v1  ;;  %v1677_v33 = vrot.slane %v1639_v46, 4  ;;  %v1623_v43 = vadd.f32 %v1607_v49, %v1549_v37  ;;  %v1679_v18 = vrot.slane %v1640_v63, 4  ;;  %v9014_v63 = vld [vmem:[%s13346_s0 + $0x118] sm:$0xf] }
 0x108   :  { %v1675_v51 = vsel %vm333_vm3, %v1673_v20, %v1674_v58  ;;  %v1680_v38 = vrot.slane %v1641_v50, 4  ;;  %v1690_v6 = vadd.f32 %v1660_v15, %v1616_v21  ;;  %v1691_v35 = vadd.f32 %v1663_v9, %v1617_v41  ;;  %v9019_v50 = vld [vmem:[%s13346_s0 + $0x128] sm:$0xf] }
 0x109   :  { %v1678_v12 = vsel %vm333_vm3, %v1676_v62, %v1677_v33  ;;  %v1692_v5 = vadd.f32 %v1666_v23, %v1618_v29  ;;  %v1693_v11 = vadd.f32 %v1669_v42, %v1619_v3  ;;  %v1694_v4 = vadd.f32 %v1672_v32, %v1620_v48  ;;  %v8984_v3 = vld [vmem:[%s13346_s0 + $0xc8] sm:$0xf] }
 0x10a   :  { %v1681_v37 = vsel %vm333_vm3, %v1679_v18, %v1680_v38  ;;  %v1695_v52 = vadd.f32 %v1675_v51, %v1621_v10  ;;  %v1696_v21 = vadd.f32 %v1678_v12, %v1622_v27  ;;  %v1717_v41 = vmul.f32 %v7668_v31, %v8932_v59 }
 0x10b   :  { %v1718_v29 = vmul.f32 %v7668_v31, %v8941_v26  ;;  %v1719_v49 = vmul.f32 %v7668_v31, %v8946_v45  ;;  %v1720_v48 = vmul.f32 %v7668_v31, %v8951_v19  ;;  %v1721_v10 = vmul.f32 %v7668_v31, %v8957_v36 }
 0x10c   :  { %v1722_v27 = vmul.f32 %v7668_v31, %v8962_v8  ;;  %v1723_v56 = vmul.f32 %v7668_v31, %v8967_v14  ;;  %v1697_v22 = vadd.f32 %v1681_v37, %v1623_v43  ;;  %v1724_v7 = vmul.f32 %v7668_v31, %v8973_v47 }
 0x10d   :  { %v1725_v0 = vadd.f32 %v1717_v41, %v1690_v6  ;;  %v1726_v54 = vadd.f32 %v1718_v29, %v1691_v35  ;;  %v1727_v57 = vadd.f32 %v1719_v49, %v1692_v5  ;;  %v1728_v28 = vadd.f32 %v1720_v48, %v1693_v11  ;;  %v7670_v48 = vld [vmem:[%s13347_s2 + $0x7] ss:$0 sm:$0xff] }
 0x10e   :  { %v1729_v24 = vadd.f32 %v1721_v10, %v1694_v4  ;;  %v1730_v46 = vadd.f32 %v1722_v27, %v1695_v52  ;;  %v1731_v17 = vadd.f32 %v1723_v56, %v1696_v21  ;;  %v1735_v16 = vmul.f32 %v7669_v53, %v8932_v59 }
 0x10f   :  { %v1736_v30 = vmul.f32 %v7669_v53, %v8984_v3  ;;  %v1737_v2 = vmul.f32 %v7669_v53, %v8941_v26  ;;  %v1738_v25 = vmul.f32 %v7669_v53, %v8993_v44  ;;  %v1739_v34 = vmul.f32 %v7669_v53, %v8946_v45 }
 0x110   :  { %v1740_v15 = vmul.f32 %v7669_v53, %v8998_v61  ;;  %v1741_v55 = vmul.f32 %v7669_v53, %v8951_v19  ;;  %v1742_v13 = vmul.f32 %v7669_v53, %v9004_v39  ;;  %v1743_v1 = vmul.f32 %v7669_v53, %v8957_v36 }
 0x111   :  { %v1744_v9 = vmul.f32 %v7669_v53, %v9009_v40  ;;  %v1745_v23 = vmul.f32 %v7669_v53, %v8962_v8  ;;  %v1746_v20 = vmul.f32 %v7669_v53, %v9014_v63  ;;  %v1747_v58 = vmul.f32 %v7669_v53, %v8967_v14 }
 0x112   :  { %v1748_v42 = vmul.f32 %v7669_v53, %v9019_v50  ;;  %v1749_v32 = vmul.f32 %v7669_v53, %v8973_v47  ;;  %v1750_v62 = vmul.f32 %v7669_v53, %v9027_v60  ;;  %v1767_v33 = vrot.slane %v1735_v16, 1 }
 0x113   :  { %v1768_v31 = vrot.slane %v1736_v30, 1  ;;  %v1770_v43 = vrot.slane %v1737_v2, 1  ;;  %v1771_v51 = vrot.slane %v1738_v25, 1  ;;  %v1773_v18 = vrot.slane %v1739_v34, 1 }
 0x114   :  { %v1774_v38 = vrot.slane %v1740_v15, 1  ;;  %v1776_v12 = vrot.slane %v1741_v55, 1  ;;  %v1777_v35 = vrot.slane %v1742_v13, 1  ;;  %v1779_v5 = vrot.slane %v1743_v1, 1 }
 0x115   :  { %v1769_v6 = vsel %vm108_vm0, %v1767_v33, %v1768_v31  ;;  %v1780_v37 = vrot.slane %v1744_v9, 1  ;;  %v1772_v11 = vsel %vm108_vm0, %v1770_v43, %v1771_v51  ;;  %v1782_v52 = vrot.slane %v1745_v23, 1 }
 0x116   :  { %v1775_v4 = vsel %vm108_vm0, %v1773_v18, %v1774_v38  ;;  %v1783_v21 = vrot.slane %v1746_v20, 1  ;;  %v1778_v41 = vsel %vm108_vm0, %v1776_v12, %v1777_v35  ;;  %v1785_v49 = vrot.slane %v1747_v58, 1 }
 0x117   :  { %v1781_v29 = vsel %vm108_vm0, %v1779_v5, %v1780_v37  ;;  %v1786_v53 = vrot.slane %v1748_v42, 1  ;;  %v1732_v10 = vadd.f32 %v1724_v7, %v1697_v22  ;;  %v1788_v56 = vrot.slane %v1749_v32, 1 }
 0x118   :  { %v1784_v27 = vsel %vm108_vm0, %v1782_v52, %v1783_v21  ;;  %v1789_v16 = vrot.slane %v1750_v62, 1  ;;  %v1799_v2 = vadd.f32 %v1769_v6, %v1725_v0  ;;  %v1800_v25 = vadd.f32 %v1772_v11, %v1726_v54 }
 0x119   :  { %v1787_v30 = vsel %vm108_vm0, %v1785_v49, %v1786_v53  ;;  %v1801_v34 = vadd.f32 %v1775_v4, %v1727_v57  ;;  %v1802_v55 = vadd.f32 %v1778_v41, %v1728_v28  ;;  %v1803_v13 = vadd.f32 %v1781_v29, %v1729_v24 }
 0x11a   :  { %v1790_v15 = vsel %vm108_vm0, %v1788_v56, %v1789_v16  ;;  %v1804_v1 = vadd.f32 %v1784_v27, %v1730_v46  ;;  %v1805_v9 = vadd.f32 %v1787_v30, %v1731_v17  ;;  %v1809_v23 = vmul.f32 %v7670_v48, %v8932_v59  ;;  %v7671_v27 = vld [vmem:[%s13347_s2 + $0xa] ss:$0 sm:$0xff] }
 0x11b   :  { %v1810_v20 = vmul.f32 %v7670_v48, %v8984_v3  ;;  %v1811_v22 = vmul.f32 %v7670_v48, %v8941_v26  ;;  %v1812_v7 = vmul.f32 %v7670_v48, %v8993_v44  ;;  %v1813_v58 = vmul.f32 %v7670_v48, %v8946_v45 }
 0x11c   :  { %v1814_v0 = vmul.f32 %v7670_v48, %v8998_v61  ;;  %v1815_v54 = vmul.f32 %v7670_v48, %v8951_v19  ;;  %v1816_v57 = vmul.f32 %v7670_v48, %v9004_v39  ;;  %v1817_v28 = vmul.f32 %v7670_v48, %v8957_v36 }
 0x11d   :  { %v1818_v24 = vmul.f32 %v7670_v48, %v9009_v40  ;;  %v1819_v46 = vmul.f32 %v7670_v48, %v8962_v8  ;;  %v1820_v17 = vmul.f32 %v7670_v48, %v9014_v63  ;;  %v1821_v42 = vmul.f32 %v7670_v48, %v8967_v14 }
 0x11e   :  { %v1822_v32 = vmul.f32 %v7670_v48, %v9019_v50  ;;  %v1823_v62 = vmul.f32 %v7670_v48, %v8973_v47  ;;  %v1824_v33 = vmul.f32 %v7670_v48, %v9027_v60  ;;  %v1841_v31 = vrot.slane %v1809_v23, 2 }
 0x11f   :  { %v1842_v43 = vrot.slane %v1810_v20, 2  ;;  %v1844_v51 = vrot.slane %v1811_v22, 2  ;;  %v1845_v18 = vrot.slane %v1812_v7, 2  ;;  %v1847_v38 = vrot.slane %v1813_v58, 2 }
 0x120   :  { %v1848_v12 = vrot.slane %v1814_v0, 2  ;;  %v1850_v6 = vrot.slane %v1815_v54, 2  ;;  %v1851_v5 = vrot.slane %v1816_v57, 2  ;;  %v1853_v37 = vrot.slane %v1817_v28, 2 }
 0x121   :  { %v1843_v35 = vsel %vm183_vm1, %v1841_v31, %v1842_v43  ;;  %v1854_v11 = vrot.slane %v1818_v24, 2  ;;  %v1846_v4 = vsel %vm183_vm1, %v1844_v51, %v1845_v18  ;;  %v1856_v21 = vrot.slane %v1819_v46, 2 }
 0x122   :  { %v1849_v52 = vsel %vm183_vm1, %v1847_v38, %v1848_v12  ;;  %v1857_v41 = vrot.slane %v1820_v17, 2  ;;  %v1852_v29 = vsel %vm183_vm1, %v1850_v6, %v1851_v5  ;;  %v1859_v53 = vrot.slane %v1821_v42, 2 }
 0x123   :  { %v1855_v49 = vsel %vm183_vm1, %v1853_v37, %v1854_v11  ;;  %v1860_v48 = vrot.slane %v1822_v32, 2  ;;  %v1806_v56 = vadd.f32 %v1790_v15, %v1732_v10  ;;  %v1862_v30 = vrot.slane %v1823_v62, 2 }
 0x124   :  { %v1858_v16 = vsel %vm183_vm1, %v1856_v21, %v1857_v41  ;;  %v1863_v23 = vrot.slane %v1824_v33, 2  ;;  %v1873_v22 = vadd.f32 %v1843_v35, %v1799_v2  ;;  %v1874_v7 = vadd.f32 %v1846_v4, %v1800_v25 }
 0x125   :  { %v1861_v20 = vsel %vm183_vm1, %v1859_v53, %v1860_v48  ;;  %v1875_v58 = vadd.f32 %v1849_v52, %v1801_v34  ;;  %v1876_v54 = vadd.f32 %v1852_v29, %v1802_v55  ;;  %v1877_v57 = vadd.f32 %v1855_v49, %v1803_v13 }
 0x126   :  { %v1864_v0 = vsel %vm183_vm1, %v1862_v30, %v1863_v23  ;;  %v1878_v28 = vadd.f32 %v1858_v16, %v1804_v1  ;;  %v1879_v24 = vadd.f32 %v1861_v20, %v1805_v9  ;;  %v1883_v46 = vmul.f32 %v7671_v27, %v8932_v59  ;;  %v7672_v16 = vld [vmem:[%s13347_s2 + $0xd] ss:$0 sm:$0xff] }
 0x127   :  { %v1884_v17 = vmul.f32 %v7671_v27, %v8984_v3  ;;  %v1885_v10 = vmul.f32 %v7671_v27, %v8941_v26  ;;  %v1886_v15 = vmul.f32 %v7671_v27, %v8993_v44  ;;  %v1887_v42 = vmul.f32 %v7671_v27, %v8946_v45 }
 0x128   :  { %v1888_v2 = vmul.f32 %v7671_v27, %v8998_v61  ;;  %v1889_v25 = vmul.f32 %v7671_v27, %v8951_v19  ;;  %v1890_v34 = vmul.f32 %v7671_v27, %v9004_v39  ;;  %v1891_v55 = vmul.f32 %v7671_v27, %v8957_v36 }
 0x129   :  { %v1892_v13 = vmul.f32 %v7671_v27, %v9009_v40  ;;  %v1893_v1 = vmul.f32 %v7671_v27, %v8962_v8  ;;  %v1894_v9 = vmul.f32 %v7671_v27, %v9014_v63  ;;  %v1895_v32 = vmul.f32 %v7671_v27, %v8967_v14 }
 0x12a   :  { %v1896_v62 = vmul.f32 %v7671_v27, %v9019_v50  ;;  %v1897_v33 = vmul.f32 %v7671_v27, %v8973_v47  ;;  %v1898_v31 = vmul.f32 %v7671_v27, %v9027_v60  ;;  %v1915_v43 = vrot.slane %v1883_v46, 3 }
 0x12b   :  { %v1916_v51 = vrot.slane %v1884_v17, 3  ;;  %v1918_v18 = vrot.slane %v1885_v10, 3  ;;  %v1919_v38 = vrot.slane %v1886_v15, 3  ;;  %v1921_v12 = vrot.slane %v1887_v42, 3 }
 0x12c   :  { %v1922_v6 = vrot.slane %v1888_v2, 3  ;;  %v1924_v35 = vrot.slane %v1889_v25, 3  ;;  %v1925_v37 = vrot.slane %v1890_v34, 3  ;;  %v1927_v11 = vrot.slane %v1891_v55, 3 }
 0x12d   :  { %v1917_v5 = vsel %vm258_vm2, %v1915_v43, %v1916_v51  ;;  %v1928_v4 = vrot.slane %v1892_v13, 3  ;;  %v1920_v52 = vsel %vm258_vm2, %v1918_v18, %v1919_v38  ;;  %v1930_v41 = vrot.slane %v1893_v1, 3 }
 0x12e   :  { %v1923_v21 = vsel %vm258_vm2, %v1921_v12, %v1922_v6  ;;  %v1931_v29 = vrot.slane %v1894_v9, 3  ;;  %v1926_v49 = vsel %vm258_vm2, %v1924_v35, %v1925_v37  ;;  %v1933_v48 = vrot.slane %v1895_v32, 3 }
 0x12f   :  { %v1929_v53 = vsel %vm258_vm2, %v1927_v11, %v1928_v4  ;;  %v1934_v27 = vrot.slane %v1896_v62, 3  ;;  %v1880_v30 = vadd.f32 %v1864_v0, %v1806_v56  ;;  %v1936_v20 = vrot.slane %v1897_v33, 3 }
 0x130   :  { %v1932_v23 = vsel %vm258_vm2, %v1930_v41, %v1931_v29  ;;  %v1937_v46 = vrot.slane %v1898_v31, 3  ;;  %v1947_v10 = vadd.f32 %v1917_v5, %v1873_v22  ;;  %v1948_v15 = vadd.f32 %v1920_v52, %v1874_v7  ;;  %v7673_v52 = vld [vmem:[%s13347_s2 + $0x10] ss:$0 sm:$0xff] }
 0x131   :  { %v1935_v17 = vsel %vm258_vm2, %v1933_v48, %v1934_v27  ;;  %v1949_v42 = vadd.f32 %v1923_v21, %v1875_v58  ;;  %v1950_v25 = vadd.f32 %v1926_v49, %v1876_v54  ;;  %v1951_v34 = vadd.f32 %v1929_v53, %v1877_v57 }
 0x132   :  { %v1938_v2 = vsel %vm258_vm2, %v1936_v20, %v1937_v46  ;;  %v1952_v55 = vadd.f32 %v1932_v23, %v1878_v28  ;;  %v1953_v13 = vadd.f32 %v1935_v17, %v1879_v24  ;;  %v1957_v1 = vmul.f32 %v7672_v16, %v8932_v59 }
 0x133   :  { %v1958_v9 = vmul.f32 %v7672_v16, %v8984_v3  ;;  %v1959_v56 = vmul.f32 %v7672_v16, %v8941_v26  ;;  %v1960_v0 = vmul.f32 %v7672_v16, %v8993_v44  ;;  %v1961_v32 = vmul.f32 %v7672_v16, %v8946_v45 }
 0x134   :  { %v1962_v22 = vmul.f32 %v7672_v16, %v8998_v61  ;;  %v1963_v7 = vmul.f32 %v7672_v16, %v8951_v19  ;;  %v1964_v58 = vmul.f32 %v7672_v16, %v9004_v39  ;;  %v1965_v54 = vmul.f32 %v7672_v16, %v8957_v36 }
 0x135   :  { %v1966_v57 = vmul.f32 %v7672_v16, %v9009_v40  ;;  %v1967_v59 = vmul.f32 %v7672_v16, %v8962_v8  ;;  %v1968_v3 = vmul.f32 %v7672_v16, %v9014_v63  ;;  %v1969_v28 = vmul.f32 %v7672_v16, %v8967_v14 }
 0x136   :  { %v1970_v44 = vmul.f32 %v7672_v16, %v9019_v50  ;;  %v1971_v24 = vmul.f32 %v7672_v16, %v8973_v47  ;;  %v1972_v61 = vmul.f32 %v7672_v16, %v9027_v60  ;;  %v1989_v62 = vrot.slane %v1957_v1, 4  ;;  %v9137_v1 = vld [vmem:[%s13346_s0 + $0x140] sm:$0xff] }
 0x137   :  { %v1990_v33 = vrot.slane %v1958_v9, 4  ;;  %v1992_v31 = vrot.slane %v1959_v56, 4  ;;  %v1993_v39 = vrot.slane %v1960_v0, 4  ;;  %v1995_v43 = vrot.slane %v1961_v32, 4  ;;  %v9157_v0 = vld [vmem:[%s13346_s0 + $0xe8] sm:$0xf] }
 0x138   :  { %v1996_v51 = vrot.slane %v1962_v22, 4  ;;  %v1998_v18 = vrot.slane %v1963_v7, 4  ;;  %v1999_v38 = vrot.slane %v1964_v58, 4  ;;  %v2001_v12 = vrot.slane %v1965_v54, 4  ;;  %v9162_v32 = vld [vmem:[%s13346_s0 + $0xf8] sm:$0xf] }
 0x139   :  { %v1991_v40 = vsel %vm333_vm3, %v1989_v62, %v1990_v33  ;;  %v2002_v63 = vrot.slane %v1966_v57, 4  ;;  %v1994_v6 = vsel %vm333_vm3, %v1992_v31, %v1993_v39  ;;  %v2004_v35 = vrot.slane %v1967_v59, 4  ;;  %v9168_v54 = vld [vmem:[%s13346_s0 + $0x108] sm:$0xf]  ;;  %v9173_v57 = vld [vmem:[%s13346_s0 + $0x118] sm:$0xf] }
 0x13a   :  { %v1997_v50 = vsel %vm333_vm3, %v1995_v43, %v1996_v51  ;;  %v2005_v5 = vrot.slane %v1968_v3, 4  ;;  %v2000_v60 = vsel %vm333_vm3, %v1998_v18, %v1999_v38  ;;  %v2007_v11 = vrot.slane %v1969_v28, 4  ;;  %v9191_v43 = vld [vmem:[%s13346_s0 + $0x148] sm:$0xf] }
 0x13b   :  { %v2003_v37 = vsel %vm333_vm3, %v2001_v12, %v2002_v63  ;;  %v2008_v4 = vrot.slane %v1970_v44, 4  ;;  %v1954_v21 = vadd.f32 %v1938_v2, %v1880_v30  ;;  %v2010_v29 = vrot.slane %v1971_v24, 4  ;;  %v9178_v24 = vld [vmem:[%s13346_s0 + $0x128] sm:$0xf] }
 0x13c   :  { %v2006_v41 = vsel %vm333_vm3, %v2004_v35, %v2005_v5  ;;  %v2011_v49 = vrot.slane %v1972_v61, 4  ;;  %v2021_v48 = vadd.f32 %v1991_v40, %v1947_v10  ;;  %v2022_v27 = vadd.f32 %v1994_v6, %v1948_v15  ;;  %v7674_v10 = vld [vmem:[%s13347_s2 + $0x13] ss:$0 sm:$0xff]  ;;  %v9148_v15 = vld [vmem:[%s13346_s0 + $0xd8] sm:$0xf] }
 0x13d   :  { %v2009_v53 = vsel %vm333_vm3, %v2007_v11, %v2008_v4  ;;  %v2023_v16 = vadd.f32 %v1997_v50, %v1949_v42  ;;  %v2024_v20 = vadd.f32 %v2000_v60, %v1950_v25  ;;  %v2025_v46 = vadd.f32 %v2003_v37, %v1951_v34  ;;  %v9183_v61 = vld [vmem:[%s13346_s0 + $0x138] sm:$0xf] }
 0x13e   :  { %v2012_v23 = vsel %vm333_vm3, %v2010_v29, %v2011_v49  ;;  %v2026_v17 = vadd.f32 %v2006_v41, %v1952_v55  ;;  %v2027_v30 = vadd.f32 %v2009_v53, %v1953_v13  ;;  %v2048_v2 = vmul.f32 %v7673_v52, %v8941_v26 }
 0x13f   :  { %v2049_v9 = vmul.f32 %v7673_v52, %v8946_v45  ;;  %v2050_v56 = vmul.f32 %v7673_v52, %v8951_v19  ;;  %v2051_v42 = vmul.f32 %v7673_v52, %v8957_v36  ;;  %v2052_v25 = vmul.f32 %v7673_v52, %v8962_v8 }
 0x140   :  { %v2053_v34 = vmul.f32 %v7673_v52, %v8967_v14  ;;  %v2054_v55 = vmul.f32 %v7673_v52, %v8973_v47  ;;  %v2028_v13 = vadd.f32 %v2012_v23, %v1954_v21  ;;  %v2055_v22 = vmul.f32 %v7673_v52, %v9137_v1 }
 0x141   :  { %v2056_v7 = vadd.f32 %v2048_v2, %v2021_v48  ;;  %v2057_v58 = vadd.f32 %v2049_v9, %v2022_v27  ;;  %v2058_v59 = vadd.f32 %v2050_v56, %v2023_v16  ;;  %v2059_v3 = vadd.f32 %v2051_v42, %v2024_v20  ;;  %v7675_v42 = vld [vmem:[%s13347_s2 + $0x16] ss:$0 sm:$0xff] }
 0x142   :  { %v2060_v28 = vadd.f32 %v2052_v25, %v2025_v46  ;;  %v2061_v44 = vadd.f32 %v2053_v34, %v2026_v17  ;;  %v2062_v62 = vadd.f32 %v2054_v55, %v2027_v30  ;;  %v2066_v33 = vmul.f32 %v7674_v10, %v8941_v26 }
 0x143   :  { %v2067_v31 = vmul.f32 %v7674_v10, %v9148_v15  ;;  %v2068_v39 = vmul.f32 %v7674_v10, %v8946_v45  ;;  %v2069_v51 = vmul.f32 %v7674_v10, %v9157_v0  ;;  %v2070_v18 = vmul.f32 %v7674_v10, %v8951_v19 }
 0x144   :  { %v2071_v40 = vmul.f32 %v7674_v10, %v9162_v32  ;;  %v2072_v38 = vmul.f32 %v7674_v10, %v8957_v36  ;;  %v2073_v12 = vmul.f32 %v7674_v10, %v9168_v54  ;;  %v2074_v63 = vmul.f32 %v7674_v10, %v8962_v8 }
 0x145   :  { %v2075_v6 = vmul.f32 %v7674_v10, %v9173_v57  ;;  %v2076_v50 = vmul.f32 %v7674_v10, %v8967_v14  ;;  %v2077_v35 = vmul.f32 %v7674_v10, %v9178_v24  ;;  %v2078_v5 = vmul.f32 %v7674_v10, %v8973_v47 }
 0x146   :  { %v2079_v60 = vmul.f32 %v7674_v10, %v9183_v61  ;;  %v2080_v37 = vmul.f32 %v7674_v10, %v9137_v1  ;;  %v2081_v11 = vmul.f32 %v7674_v10, %v9191_v43  ;;  %v2098_v4 = vrot.slane %v2066_v33, 1 }
 0x147   :  { %v2099_v52 = vrot.slane %v2067_v31, 1  ;;  %v2101_v21 = vrot.slane %v2068_v39, 1  ;;  %v2102_v41 = vrot.slane %v2069_v51, 1  ;;  %v2104_v29 = vrot.slane %v2070_v18, 1 }
 0x148   :  { %v2105_v49 = vrot.slane %v2071_v40, 1  ;;  %v2107_v53 = vrot.slane %v2072_v38, 1  ;;  %v2108_v27 = vrot.slane %v2073_v12, 1  ;;  %v2110_v16 = vrot.slane %v2074_v63, 1 }
 0x149   :  { %v2100_v48 = vsel %vm108_vm0, %v2098_v4, %v2099_v52  ;;  %v2111_v23 = vrot.slane %v2075_v6, 1  ;;  %v2103_v20 = vsel %vm108_vm0, %v2101_v21, %v2102_v41  ;;  %v2113_v17 = vrot.slane %v2076_v50, 1 }
 0x14a   :  { %v2106_v46 = vsel %vm108_vm0, %v2104_v29, %v2105_v49  ;;  %v2114_v30 = vrot.slane %v2077_v35, 1  ;;  %v2109_v2 = vsel %vm108_vm0, %v2107_v53, %v2108_v27  ;;  %v2116_v56 = vrot.slane %v2078_v5, 1 }
 0x14b   :  { %v2112_v9 = vsel %vm108_vm0, %v2110_v16, %v2111_v23  ;;  %v2117_v10 = vrot.slane %v2079_v60, 1  ;;  %v2063_v25 = vadd.f32 %v2055_v22, %v2028_v13  ;;  %v2119_v55 = vrot.slane %v2080_v37, 1 }
 0x14c   :  { %v2115_v34 = vsel %vm108_vm0, %v2113_v17, %v2114_v30  ;;  %v2120_v33 = vrot.slane %v2081_v11, 1  ;;  %v2130_v39 = vadd.f32 %v2100_v48, %v2056_v7  ;;  %v2131_v51 = vadd.f32 %v2103_v20, %v2057_v58 }
 0x14d   :  { %v2118_v31 = vsel %vm108_vm0, %v2116_v56, %v2117_v10  ;;  %v2132_v18 = vadd.f32 %v2106_v46, %v2058_v59  ;;  %v2133_v38 = vadd.f32 %v2109_v2, %v2059_v3  ;;  %v2134_v12 = vadd.f32 %v2112_v9, %v2060_v28 }
 0x14e   :  { %v2121_v40 = vsel %vm108_vm0, %v2119_v55, %v2120_v33  ;;  %v2135_v63 = vadd.f32 %v2115_v34, %v2061_v44  ;;  %v2136_v6 = vadd.f32 %v2118_v31, %v2062_v62  ;;  %v2140_v50 = vmul.f32 %v7675_v42, %v8941_v26  ;;  %v7676_v34 = vld [vmem:[%s13347_s2 + $0x19] ss:$0 sm:$0xff] }
 0x14f   :  { %v2141_v35 = vmul.f32 %v7675_v42, %v9148_v15  ;;  %v2142_v13 = vmul.f32 %v7675_v42, %v8946_v45  ;;  %v2143_v22 = vmul.f32 %v7675_v42, %v9157_v0  ;;  %v2144_v5 = vmul.f32 %v7675_v42, %v8951_v19 }
 0x150   :  { %v2145_v7 = vmul.f32 %v7675_v42, %v9162_v32  ;;  %v2146_v58 = vmul.f32 %v7675_v42, %v8957_v36  ;;  %v2147_v59 = vmul.f32 %v7675_v42, %v9168_v54  ;;  %v2148_v3 = vmul.f32 %v7675_v42, %v8962_v8 }
 0x151   :  { %v2149_v28 = vmul.f32 %v7675_v42, %v9173_v57  ;;  %v2150_v44 = vmul.f32 %v7675_v42, %v8967_v14  ;;  %v2151_v62 = vmul.f32 %v7675_v42, %v9178_v24  ;;  %v2152_v60 = vmul.f32 %v7675_v42, %v8973_v47 }
 0x152   :  { %v2153_v37 = vmul.f32 %v7675_v42, %v9183_v61  ;;  %v2154_v11 = vmul.f32 %v7675_v42, %v9137_v1  ;;  %v2155_v4 = vmul.f32 %v7675_v42, %v9191_v43  ;;  %v2172_v52 = vrot.slane %v2140_v50, 2 }
 0x153   :  { %v2173_v21 = vrot.slane %v2141_v35, 2  ;;  %v2175_v41 = vrot.slane %v2142_v13, 2  ;;  %v2176_v29 = vrot.slane %v2143_v22, 2  ;;  %v2178_v49 = vrot.slane %v2144_v5, 2 }
 0x154   :  { %v2179_v53 = vrot.slane %v2145_v7, 2  ;;  %v2181_v48 = vrot.slane %v2146_v58, 2  ;;  %v2182_v16 = vrot.slane %v2147_v59, 2  ;;  %v2184_v23 = vrot.slane %v2148_v3, 2 }
 0x155   :  { %v2174_v27 = vsel %vm183_vm1, %v2172_v52, %v2173_v21  ;;  %v2185_v20 = vrot.slane %v2149_v28, 2  ;;  %v2177_v46 = vsel %vm183_vm1, %v2175_v41, %v2176_v29  ;;  %v2187_v30 = vrot.slane %v2150_v44, 2 }
 0x156   :  { %v2180_v17 = vsel %vm183_vm1, %v2178_v49, %v2179_v53  ;;  %v2188_v2 = vrot.slane %v2151_v62, 2  ;;  %v2183_v9 = vsel %vm183_vm1, %v2181_v48, %v2182_v16  ;;  %v2190_v10 = vrot.slane %v2152_v60, 2 }
 0x157   :  { %v2186_v56 = vsel %vm183_vm1, %v2184_v23, %v2185_v20  ;;  %v2191_v42 = vrot.slane %v2153_v37, 2  ;;  %v2137_v55 = vadd.f32 %v2121_v40, %v2063_v25  ;;  %v2193_v31 = vrot.slane %v2154_v11, 2 }
 0x158   :  { %v2189_v33 = vsel %vm183_vm1, %v2187_v30, %v2188_v2  ;;  %v2194_v50 = vrot.slane %v2155_v4, 2  ;;  %v2204_v13 = vadd.f32 %v2174_v27, %v2130_v39  ;;  %v2205_v22 = vadd.f32 %v2177_v46, %v2131_v51 }
 0x159   :  { %v2192_v35 = vsel %vm183_vm1, %v2190_v10, %v2191_v42  ;;  %v2206_v5 = vadd.f32 %v2180_v17, %v2132_v18  ;;  %v2207_v58 = vadd.f32 %v2183_v9, %v2133_v38  ;;  %v2208_v59 = vadd.f32 %v2186_v56, %v2134_v12 }
 0x15a   :  { %v2195_v7 = vsel %vm183_vm1, %v2193_v31, %v2194_v50  ;;  %v2209_v3 = vadd.f32 %v2189_v33, %v2135_v63  ;;  %v2210_v28 = vadd.f32 %v2192_v35, %v2136_v6  ;;  %v2214_v44 = vmul.f32 %v7676_v34, %v8941_v26  ;;  %v7677_v33 = vld [vmem:[%s13347_s2 + $0x1c] ss:$0 sm:$0xff] }
 0x15b   :  { %v2215_v62 = vmul.f32 %v7676_v34, %v9148_v15  ;;  %v2216_v25 = vmul.f32 %v7676_v34, %v8946_v45  ;;  %v2217_v40 = vmul.f32 %v7676_v34, %v9157_v0  ;;  %v2218_v60 = vmul.f32 %v7676_v34, %v8951_v19 }
 0x15c   :  { %v2219_v39 = vmul.f32 %v7676_v34, %v9162_v32  ;;  %v2220_v51 = vmul.f32 %v7676_v34, %v8957_v36  ;;  %v2221_v18 = vmul.f32 %v7676_v34, %v9168_v54  ;;  %v2222_v38 = vmul.f32 %v7676_v34, %v8962_v8 }
 0x15d   :  { %v2223_v12 = vmul.f32 %v7676_v34, %v9173_v57  ;;  %v2224_v63 = vmul.f32 %v7676_v34, %v8967_v14  ;;  %v2225_v6 = vmul.f32 %v7676_v34, %v9178_v24  ;;  %v2226_v37 = vmul.f32 %v7676_v34, %v8973_v47 }
 0x15e   :  { %v2227_v11 = vmul.f32 %v7676_v34, %v9183_v61  ;;  %v2228_v4 = vmul.f32 %v7676_v34, %v9137_v1  ;;  %v2229_v52 = vmul.f32 %v7676_v34, %v9191_v43  ;;  %v2246_v21 = vrot.slane %v2214_v44, 3 }
 0x15f   :  { %v2247_v41 = vrot.slane %v2215_v62, 3  ;;  %v2249_v29 = vrot.slane %v2216_v25, 3  ;;  %v2250_v49 = vrot.slane %v2217_v40, 3  ;;  %v2252_v53 = vrot.slane %v2218_v60, 3 }
 0x160   :  { %v2253_v48 = vrot.slane %v2219_v39, 3  ;;  %v2255_v27 = vrot.slane %v2220_v51, 3  ;;  %v2256_v23 = vrot.slane %v2221_v18, 3  ;;  %v2258_v20 = vrot.slane %v2222_v38, 3 }
 0x161   :  { %v2248_v16 = vsel %vm258_vm2, %v2246_v21, %v2247_v41  ;;  %v2259_v46 = vrot.slane %v2223_v12, 3  ;;  %v2251_v17 = vsel %vm258_vm2, %v2249_v29, %v2250_v49  ;;  %v2261_v2 = vrot.slane %v2224_v63, 3 }
 0x162   :  { %v2254_v30 = vsel %vm258_vm2, %v2252_v53, %v2253_v48  ;;  %v2262_v9 = vrot.slane %v2225_v6, 3  ;;  %v2257_v56 = vsel %vm258_vm2, %v2255_v27, %v2256_v23  ;;  %v2264_v42 = vrot.slane %v2226_v37, 3 }
 0x163   :  { %v2260_v10 = vsel %vm258_vm2, %v2258_v20, %v2259_v46  ;;  %v2265_v34 = vrot.slane %v2227_v11, 3  ;;  %v2211_v31 = vadd.f32 %v2195_v7, %v2137_v55  ;;  %v2267_v35 = vrot.slane %v2228_v4, 3 }
 0x164   :  { %v2263_v50 = vsel %vm258_vm2, %v2261_v2, %v2262_v9  ;;  %v2268_v44 = vrot.slane %v2229_v52, 3  ;;  %v2278_v25 = vadd.f32 %v2248_v16, %v2204_v13  ;;  %v2279_v40 = vadd.f32 %v2251_v17, %v2205_v22  ;;  %v7678_v17 = vld [vmem:[%s13347_s2 + $0x1f] ss:$0 sm:$0xff] }
 0x165   :  { %v2266_v62 = vsel %vm258_vm2, %v2264_v42, %v2265_v34  ;;  %v2280_v60 = vadd.f32 %v2254_v30, %v2206_v5  ;;  %v2281_v51 = vadd.f32 %v2257_v56, %v2207_v58  ;;  %v2282_v18 = vadd.f32 %v2260_v10, %v2208_v59 }
 0x166   :  { %v2269_v39 = vsel %vm258_vm2, %v2267_v35, %v2268_v44  ;;  %v2283_v38 = vadd.f32 %v2263_v50, %v2209_v3  ;;  %v2284_v12 = vadd.f32 %v2266_v62, %v2210_v28  ;;  %v2288_v63 = vmul.f32 %v7677_v33, %v8941_v26 }
 0x167   :  { %v2289_v6 = vmul.f32 %v7677_v33, %v9148_v15  ;;  %v2290_v55 = vmul.f32 %v7677_v33, %v8946_v45  ;;  %v2291_v7 = vmul.f32 %v7677_v33, %v9157_v0  ;;  %v2292_v37 = vmul.f32 %v7677_v33, %v8951_v19 }
 0x168   :  { %v2293_v13 = vmul.f32 %v7677_v33, %v9162_v32  ;;  %v2294_v22 = vmul.f32 %v7677_v33, %v8957_v36  ;;  %v2295_v5 = vmul.f32 %v7677_v33, %v9168_v54  ;;  %v2296_v58 = vmul.f32 %v7677_v33, %v8962_v8 }
 0x169   :  { %v2297_v59 = vmul.f32 %v7677_v33, %v9173_v57  ;;  %v2298_v26 = vmul.f32 %v7677_v33, %v8967_v14  ;;  %v2299_v15 = vmul.f32 %v7677_v33, %v9178_v24  ;;  %v2300_v3 = vmul.f32 %v7677_v33, %v8973_v47 }
 0x16a   :  { %v2301_v0 = vmul.f32 %v7677_v33, %v9183_v61  ;;  %v2302_v28 = vmul.f32 %v7677_v33, %v9137_v1  ;;  %v2303_v32 = vmul.f32 %v7677_v33, %v9191_v43  ;;  %v2320_v11 = vrot.slane %v2288_v63, 4  ;;  %v9301_v63 = vld [vmem:[%s13346_s0 + $0x150] sm:$0xff] }
 0x16b   :  { %v2321_v4 = vrot.slane %v2289_v6, 4  ;;  %v2323_v52 = vrot.slane %v2290_v55, 4  ;;  %v2324_v54 = vrot.slane %v2291_v7, 4  ;;  %v2326_v21 = vrot.slane %v2292_v37, 4  ;;  %v9321_v7 = vld [vmem:[%s13346_s0 + $0xf8] sm:$0xf] }
 0x16c   :  { %v2327_v41 = vrot.slane %v2293_v13, 4  ;;  %v2329_v29 = vrot.slane %v2294_v22, 4  ;;  %v2330_v49 = vrot.slane %v2295_v5, 4  ;;  %v2332_v53 = vrot.slane %v2296_v58, 4  ;;  %v9326_v37 = vld [vmem:[%s13346_s0 + $0x108] sm:$0xf] }
 0x16d   :  { %v2322_v57 = vsel %vm333_vm3, %v2320_v11, %v2321_v4  ;;  %v2333_v24 = vrot.slane %v2297_v59, 4  ;;  %v2325_v48 = vsel %vm333_vm3, %v2323_v52, %v2324_v54  ;;  %v2335_v27 = vrot.slane %v2298_v26, 4  ;;  %v9332_v58 = vld [vmem:[%s13346_s0 + $0x118] sm:$0xf]  ;;  %v9337_v59 = vld [vmem:[%s13346_s0 + $0x128] sm:$0xf] }
 0x16e   :  { %v2328_v61 = vsel %vm333_vm3, %v2326_v21, %v2327_v41  ;;  %v2336_v16 = vrot.slane %v2299_v15, 4  ;;  %v2331_v43 = vsel %vm333_vm3, %v2329_v29, %v2330_v49  ;;  %v2338_v20 = vrot.slane %v2300_v3, 4  ;;  %v9355_v21 = vld [vmem:[%s13346_s0 + $0x158] sm:$0xf] }
 0x16f   :  { %v2334_v23 = vsel %vm333_vm3, %v2332_v53, %v2333_v24  ;;  %v2339_v46 = vrot.slane %v2301_v0, 4  ;;  %v2285_v30 = vadd.f32 %v2269_v39, %v2211_v31  ;;  %v2341_v9 = vrot.slane %v2302_v28, 4  ;;  %v9342_v28 = vld [vmem:[%s13346_s0 + $0x138] sm:$0xf] }
 0x170   :  { %v2337_v2 = vsel %vm333_vm3, %v2335_v27, %v2336_v16  ;;  %v2342_v56 = vrot.slane %v2303_v32, 4  ;;  %v2352_v42 = vadd.f32 %v2322_v57, %v2278_v25  ;;  %v2353_v34 = vadd.f32 %v2325_v48, %v2279_v40  ;;  %v7679_v25 = vld [vmem:[%s13347_s2 + $0x22] ss:$0 sm:$0xff]  ;;  %v9312_v40 = vld [vmem:[%s13346_s0 + $0xe8] sm:$0xf] }
 0x171   :  { %v2340_v10 = vsel %vm333_vm3, %v2338_v20, %v2339_v46  ;;  %v2354_v33 = vadd.f32 %v2328_v61, %v2280_v60  ;;  %v2355_v35 = vadd.f32 %v2331_v43, %v2281_v51  ;;  %v2356_v44 = vadd.f32 %v2334_v23, %v2282_v18  ;;  %v9347_v32 = vld [vmem:[%s13346_s0 + $0x148] sm:$0xf] }
 0x172   :  { %v2343_v50 = vsel %vm333_vm3, %v2341_v9, %v2342_v56  ;;  %v2357_v62 = vadd.f32 %v2337_v2, %v2283_v38  ;;  %v2358_v31 = vadd.f32 %v2340_v10, %v2284_v12  ;;  %v2379_v39 = vmul.f32 %v7678_v17, %v8946_v45 }
 0x173   :  { %v2380_v6 = vmul.f32 %v7678_v17, %v8951_v19  ;;  %v2381_v55 = vmul.f32 %v7678_v17, %v8957_v36  ;;  %v2382_v60 = vmul.f32 %v7678_v17, %v8962_v8  ;;  %v2383_v51 = vmul.f32 %v7678_v17, %v8967_v14 }
 0x174   :  { %v2384_v18 = vmul.f32 %v7678_v17, %v8973_v47  ;;  %v2385_v38 = vmul.f32 %v7678_v17, %v9137_v1  ;;  %v2359_v12 = vadd.f32 %v2343_v50, %v2285_v30  ;;  %v2386_v13 = vmul.f32 %v7678_v17, %v9301_v63 }
 0x175   :  { %v2387_v22 = vadd.f32 %v2379_v39, %v2352_v42  ;;  %v2388_v5 = vadd.f32 %v2380_v6, %v2353_v34  ;;  %v2389_v26 = vadd.f32 %v2381_v55, %v2354_v33  ;;  %v2390_v15 = vadd.f32 %v2382_v60, %v2355_v35 }
 0x176   :  { %v2391_v3 = vadd.f32 %v2383_v51, %v2356_v44  ;;  %v2392_v0 = vadd.f32 %v2384_v18, %v2357_v62  ;;  %v2393_v11 = vadd.f32 %v2385_v38, %v2358_v31  ;;  %v2397_v4 = vmul.f32 %v7679_v25, %v8946_v45  ;;  %v7680_v62 = vld [vmem:[%s13347_s2 + $0x25] ss:$0 sm:$0xff] }
 0x177   :  { %v2398_v52 = vmul.f32 %v7679_v25, %v9312_v40  ;;  %v2399_v54 = vmul.f32 %v7679_v25, %v8951_v19  ;;  %v2400_v41 = vmul.f32 %v7679_v25, %v9321_v7  ;;  %v2401_v29 = vmul.f32 %v7679_v25, %v8957_v36 }
 0x178   :  { %v2402_v57 = vmul.f32 %v7679_v25, %v9326_v37  ;;  %v2403_v49 = vmul.f32 %v7679_v25, %v8962_v8  ;;  %v2404_v53 = vmul.f32 %v7679_v25, %v9332_v58  ;;  %v2405_v45 = vmul.f32 %v7679_v25, %v8967_v14 }
 0x179   :  { %v2406_v24 = vmul.f32 %v7679_v25, %v9337_v59  ;;  %v2407_v19 = vmul.f32 %v7679_v25, %v8973_v47  ;;  %v2408_v48 = vmul.f32 %v7679_v25, %v9342_v28  ;;  %v2409_v61 = vmul.f32 %v7679_v25, %v9137_v1 }
 0x17a   :  { %v2410_v27 = vmul.f32 %v7679_v25, %v9347_v32  ;;  %v2411_v36 = vmul.f32 %v7679_v25, %v9301_v63  ;;  %v2412_v16 = vmul.f32 %v7679_v25, %v9355_v21  ;;  %v2429_v43 = vrot.slane %v2397_v4, 1 }
 0x17b   :  { %v2430_v8 = vrot.slane %v2398_v52, 1  ;;  %v2432_v23 = vrot.slane %v2399_v54, 1  ;;  %v2433_v20 = vrot.slane %v2400_v41, 1  ;;  %v2435_v46 = vrot.slane %v2401_v29, 1  ;;  %v9384_v29 = vld [vmem:[%s13346_s0 + $0xe0] sm:$0xff] }
 0x17c   :  { %v2436_v14 = vrot.slane %v2402_v57, 1  ;;  %v2438_v17 = vrot.slane %v2403_v49, 1  ;;  %v2439_v47 = vrot.slane %v2404_v53, 1  ;;  %v2441_v2 = vrot.slane %v2405_v45, 1  ;;  %v9412_v53 = vld [vmem:[%s13346_s0 + $0x120] sm:$0xff] }
 0x17d   :  { %v2431_v30 = vsel %vm108_vm0, %v2429_v43, %v2430_v8  ;;  %v2442_v9 = vrot.slane %v2406_v24, 1  ;;  %v2434_v56 = vsel %vm108_vm0, %v2432_v23, %v2433_v20  ;;  %v2444_v42 = vrot.slane %v2407_v19, 1  ;;  %v9419_v19 = vld [vmem:[%s13346_s0 + $0x130] sm:$0xff] }
 0x17e   :  { %v2437_v10 = vsel %vm108_vm0, %v2435_v46, %v2436_v14  ;;  %v2445_v34 = vrot.slane %v2408_v48, 1  ;;  %v2440_v33 = vsel %vm108_vm0, %v2438_v17, %v2439_v47  ;;  %v2447_v35 = vrot.slane %v2409_v61, 1 }
 0x17f   :  { %v2443_v50 = vsel %vm108_vm0, %v2441_v2, %v2442_v9  ;;  %v2448_v44 = vrot.slane %v2410_v27, 1  ;;  %v2394_v31 = vadd.f32 %v2386_v13, %v2359_v12  ;;  %v2450_v6 = vrot.slane %v2411_v36, 1 }
 0x180   :  { %v2446_v39 = vsel %vm108_vm0, %v2444_v42, %v2445_v34  ;;  %v2451_v55 = vrot.slane %v2412_v16, 1  ;;  %v2461_v60 = vadd.f32 %v2431_v30, %v2387_v22  ;;  %v2462_v51 = vadd.f32 %v2434_v56, %v2388_v5  ;;  %v9391_v22 = vld [vmem:[%s13346_s0 + $0xf0] sm:$0xff] }
 0x181   :  { %v2449_v25 = vsel %vm108_vm0, %v2447_v35, %v2448_v44  ;;  %v2463_v18 = vadd.f32 %v2437_v10, %v2389_v26  ;;  %v2464_v4 = vadd.f32 %v2440_v33, %v2390_v15  ;;  %v2465_v52 = vadd.f32 %v2443_v50, %v2391_v3  ;;  %v9398_v15 = vld [vmem:[%s13346_s0 + $0x100] sm:$0xff] }
 0x182   :  { %v2452_v38 = vsel %vm108_vm0, %v2450_v6, %v2451_v55  ;;  %v2466_v54 = vadd.f32 %v2446_v39, %v2392_v0  ;;  %v2467_v41 = vadd.f32 %v2449_v25, %v2393_v11  ;;  %v2471_v12 = vmul.f32 %v9384_v29, %v7680_v62  ;;  %v9405_v11 = vld [vmem:[%s13346_s0 + $0x110] sm:$0xff]  ;;  %v7681_v39 = vld [vmem:[%s13347_s2 + $0x28] ss:$0 sm:$0xff] }
 0x183   :  { %v2472_v13 = vmul.f32 %v7680_v62, %v9312_v40  ;;  %v2473_v5 = vmul.f32 %v9391_v22, %v7680_v62  ;;  %v2474_v26 = vmul.f32 %v7680_v62, %v9321_v7  ;;  %v2475_v3 = vmul.f32 %v9398_v15, %v7680_v62 }
 0x184   :  { %v2476_v0 = vmul.f32 %v7680_v62, %v9326_v37  ;;  %v2477_v57 = vmul.f32 %v9405_v11, %v7680_v62  ;;  %v2478_v49 = vmul.f32 %v7680_v62, %v9332_v58  ;;  %v2479_v45 = vmul.f32 %v9412_v53, %v7680_v62 }
 0x185   :  { %v2480_v24 = vmul.f32 %v7680_v62, %v9337_v59  ;;  %v2481_v48 = vmul.f32 %v9419_v19, %v7680_v62  ;;  %v2482_v61 = vmul.f32 %v7680_v62, %v9342_v28  ;;  %v2483_v27 = vmul.f32 %v7680_v62, %v9137_v1 }
 0x186   :  { %v2484_v36 = vmul.f32 %v7680_v62, %v9347_v32  ;;  %v2485_v16 = vmul.f32 %v7680_v62, %v9301_v63  ;;  %v2486_v43 = vmul.f32 %v7680_v62, %v9355_v21  ;;  %v2503_v8 = vrot.slane %v2471_v12, 2 }
 0x187   :  { %v2504_v23 = vrot.slane %v2472_v13, 2  ;;  %v2506_v20 = vrot.slane %v2473_v5, 2  ;;  %v2507_v46 = vrot.slane %v2474_v26, 2  ;;  %v2509_v14 = vrot.slane %v2475_v3, 2 }
 0x188   :  { %v2510_v17 = vrot.slane %v2476_v0, 2  ;;  %v2512_v30 = vrot.slane %v2477_v57, 2  ;;  %v2513_v2 = vrot.slane %v2478_v49, 2  ;;  %v2515_v9 = vrot.slane %v2479_v45, 2 }
 0x189   :  { %v2505_v47 = vsel %vm183_vm1, %v2503_v8, %v2504_v23  ;;  %v2516_v56 = vrot.slane %v2480_v24, 2  ;;  %v2508_v10 = vsel %vm183_vm1, %v2506_v20, %v2507_v46  ;;  %v2518_v34 = vrot.slane %v2481_v48, 2 }
 0x18a   :  { %v2511_v42 = vsel %vm183_vm1, %v2509_v14, %v2510_v17  ;;  %v2519_v33 = vrot.slane %v2482_v61, 2  ;;  %v2514_v50 = vsel %vm183_vm1, %v2512_v30, %v2513_v2  ;;  %v2521_v44 = vrot.slane %v2483_v27, 2 }
 0x18b   :  { %v2517_v35 = vsel %vm183_vm1, %v2515_v9, %v2516_v56  ;;  %v2522_v62 = vrot.slane %v2484_v36, 2  ;;  %v2468_v6 = vadd.f32 %v2452_v38, %v2394_v31  ;;  %v2524_v25 = vrot.slane %v2485_v16, 2 }
 0x18c   :  { %v2520_v55 = vsel %vm183_vm1, %v2518_v34, %v2519_v33  ;;  %v2525_v12 = vrot.slane %v2486_v43, 2  ;;  %v2535_v5 = vadd.f32 %v2505_v47, %v2461_v60  ;;  %v2536_v26 = vadd.f32 %v2508_v10, %v2462_v51 }
 0x18d   :  { %v2523_v13 = vsel %vm183_vm1, %v2521_v44, %v2522_v62  ;;  %v2537_v3 = vadd.f32 %v2511_v42, %v2463_v18  ;;  %v2538_v57 = vadd.f32 %v2514_v50, %v2464_v4  ;;  %v2539_v49 = vadd.f32 %v2517_v35, %v2465_v52 }
 0x18e   :  { %v2526_v0 = vsel %vm183_vm1, %v2524_v25, %v2525_v12  ;;  %v2540_v45 = vadd.f32 %v2520_v55, %v2466_v54  ;;  %v2541_v24 = vadd.f32 %v2523_v13, %v2467_v41  ;;  %v2545_v48 = vmul.f32 %v9384_v29, %v7681_v39  ;;  %v7682_v55 = vld [vmem:[%s13347_s2 + $0x2b] ss:$0 sm:$0xff] }
 0x18f   :  { %v2546_v61 = vmul.f32 %v7681_v39, %v9312_v40  ;;  %v2547_v31 = vmul.f32 %v9391_v22, %v7681_v39  ;;  %v2548_v38 = vmul.f32 %v7681_v39, %v9321_v7  ;;  %v2549_v27 = vmul.f32 %v9398_v15, %v7681_v39 }
 0x190   :  { %v2550_v60 = vmul.f32 %v7681_v39, %v9326_v37  ;;  %v2551_v51 = vmul.f32 %v9405_v11, %v7681_v39  ;;  %v2552_v18 = vmul.f32 %v7681_v39, %v9332_v58  ;;  %v2553_v4 = vmul.f32 %v9412_v53, %v7681_v39 }
 0x191   :  { %v2554_v52 = vmul.f32 %v7681_v39, %v9337_v59  ;;  %v2555_v54 = vmul.f32 %v9419_v19, %v7681_v39  ;;  %v2556_v41 = vmul.f32 %v7681_v39, %v9342_v28  ;;  %v2557_v36 = vmul.f32 %v7681_v39, %v9137_v1 }
 0x192   :  { %v2558_v16 = vmul.f32 %v7681_v39, %v9347_v32  ;;  %v2559_v43 = vmul.f32 %v7681_v39, %v9301_v63  ;;  %v2560_v8 = vmul.f32 %v7681_v39, %v9355_v21  ;;  %v2577_v23 = vrot.slane %v2545_v48, 3 }
 0x193   :  { %v2578_v20 = vrot.slane %v2546_v61, 3  ;;  %v2580_v46 = vrot.slane %v2547_v31, 3  ;;  %v2581_v14 = vrot.slane %v2548_v38, 3  ;;  %v2583_v17 = vrot.slane %v2549_v27, 3 }
 0x194   :  { %v2584_v30 = vrot.slane %v2550_v60, 3  ;;  %v2586_v47 = vrot.slane %v2551_v51, 3  ;;  %v2587_v9 = vrot.slane %v2552_v18, 3  ;;  %v2589_v56 = vrot.slane %v2553_v4, 3 }
 0x195   :  { %v2579_v2 = vsel %vm258_vm2, %v2577_v23, %v2578_v20  ;;  %v2590_v10 = vrot.slane %v2554_v52, 3  ;;  %v2582_v42 = vsel %vm258_vm2, %v2580_v46, %v2581_v14  ;;  %v2592_v33 = vrot.slane %v2555_v54, 3 }
 0x196   :  { %v2585_v34 = vsel %vm258_vm2, %v2583_v17, %v2584_v30  ;;  %v2593_v50 = vrot.slane %v2556_v41, 3  ;;  %v2588_v35 = vsel %vm258_vm2, %v2586_v47, %v2587_v9  ;;  %v2595_v62 = vrot.slane %v2557_v36, 3  ;;  %v7683_v47 = vld [vmem:[%s13347_s2 + $0x2e] ss:$0 sm:$0xff] }
 0x197   :  { %v2591_v44 = vsel %vm258_vm2, %v2589_v56, %v2590_v10  ;;  %v2596_v39 = vrot.slane %v2558_v16, 3  ;;  %v2542_v25 = vadd.f32 %v2526_v0, %v2468_v6  ;;  %v2598_v13 = vrot.slane %v2559_v43, 3 }
 0x198   :  { %v2594_v12 = vsel %vm258_vm2, %v2592_v33, %v2593_v50  ;;  %v2599_v48 = vrot.slane %v2560_v8, 3  ;;  %v2609_v31 = vadd.f32 %v2579_v2, %v2535_v5  ;;  %v2610_v38 = vadd.f32 %v2582_v42, %v2536_v26  ;;  %v9493_v42 = vld [vmem:[%s13346_s0 + $0xf0] sm:$0xff] }
 0x199   :  { %v2597_v61 = vsel %vm258_vm2, %v2595_v62, %v2596_v39  ;;  %v2611_v27 = vadd.f32 %v2585_v34, %v2537_v3  ;;  %v2612_v51 = vadd.f32 %v2588_v35, %v2538_v57  ;;  %v2613_v18 = vadd.f32 %v2591_v44, %v2539_v49  ;;  %v9498_v34 = vld [vmem:[%s13346_s0 + $0x100] sm:$0xff]  ;;  %v9503_v33 = vld [vmem:[%s13346_s0 + $0x110] sm:$0xff] }
 0x19a   :  { %v2600_v60 = vsel %vm258_vm2, %v2598_v13, %v2599_v48  ;;  %v2614_v4 = vadd.f32 %v2594_v12, %v2540_v45  ;;  %v2615_v52 = vadd.f32 %v2597_v61, %v2541_v24  ;;  %v2619_v54 = vmul.f32 %v9384_v29, %v7682_v55  ;;  %v9509_v39 = vld [vmem:[%s13346_s0 + $0x120] sm:$0xff] }
 0x19b   :  { %v2620_v41 = vmul.f32 %v7682_v55, %v9312_v40  ;;  %v2621_v6 = vmul.f32 %v9391_v22, %v7682_v55  ;;  %v2622_v0 = vmul.f32 %v7682_v55, %v9321_v7  ;;  %v2623_v36 = vmul.f32 %v9398_v15, %v7682_v55  ;;  %v9520_v61 = vld [vmem:[%s13346_s0 + $0x160] sm:$0xff] }
 0x19c   :  { %v2624_v5 = vmul.f32 %v7682_v55, %v9326_v37  ;;  %v2625_v26 = vmul.f32 %v9405_v11, %v7682_v55  ;;  %v2626_v3 = vmul.f32 %v7682_v55, %v9332_v58  ;;  %v2627_v57 = vmul.f32 %v9412_v53, %v7682_v55 }
 0x19d   :  { %v2628_v49 = vmul.f32 %v7682_v55, %v9337_v59  ;;  %v2629_v29 = vmul.f32 %v9419_v19, %v7682_v55  ;;  %v2630_v40 = vmul.f32 %v7682_v55, %v9342_v28  ;;  %v2631_v22 = vmul.f32 %v7682_v55, %v9137_v1 }
 0x19e   :  { %v2632_v7 = vmul.f32 %v7682_v55, %v9347_v32  ;;  %v2633_v15 = vmul.f32 %v7682_v55, %v9301_v63  ;;  %v2634_v37 = vmul.f32 %v7682_v55, %v9355_v21  ;;  %v2651_v45 = vrot.slane %v2619_v54, 4  ;;  %v9514_v55 = vld [vmem:[%s13346_s0 + $0x130] sm:$0xff] }
 0x19f   :  { %v2652_v11 = vrot.slane %v2620_v41, 4  ;;  %v2654_v24 = vrot.slane %v2621_v6, 4  ;;  %v2655_v58 = vrot.slane %v2622_v0, 4  ;;  %v2657_v16 = vrot.slane %v2623_v36, 4  ;;  %v7684_v54 = vld [vmem:[%s13347_s2 + $0x31] ss:$0 sm:$0xff] }
 0x1a0   :  { %v2658_v53 = vrot.slane %v2624_v5, 4  ;;  %v2660_v43 = vrot.slane %v2625_v26, 4  ;;  %v2661_v19 = vrot.slane %v2626_v3, 4  ;;  %v2663_v8 = vrot.slane %v2627_v57, 4  ;;  %v9540_v0 = vld [vmem:[%s13346_s0 + $0x108] sm:$0xf] }
 0x1a1   :  { %v2653_v59 = vsel %vm333_vm3, %v2651_v45, %v2652_v11  ;;  %v2664_v28 = vrot.slane %v2628_v49, 4  ;;  %v2656_v23 = vsel %vm333_vm3, %v2654_v24, %v2655_v58  ;;  %v2666_v20 = vrot.slane %v2629_v29, 4  ;;  %v9545_v36 = vld [vmem:[%s13346_s0 + $0x118] sm:$0xf]  ;;  %v9551_v57 = vld [vmem:[%s13346_s0 + $0x128] sm:$0xf] }
 0x1a2   :  { %v2659_v32 = vsel %vm333_vm3, %v2657_v16, %v2658_v53  ;;  %v2667_v46 = vrot.slane %v2630_v40, 4  ;;  %v2662_v21 = vsel %vm333_vm3, %v2660_v43, %v2661_v19  ;;  %v2669_v17 = vrot.slane %v2631_v22, 4  ;;  %v9556_v49 = vld [vmem:[%s13346_s0 + $0x138] sm:$0xf]  ;;  %v9574_v16 = vld [vmem:[%s13346_s0 + $0x168] sm:$0xf] }
 0x1a3   :  { %v2665_v14 = vsel %vm333_vm3, %v2663_v8, %v2664_v28  ;;  %v2670_v30 = vrot.slane %v2632_v7, 4  ;;  %v2616_v2 = vadd.f32 %v2600_v60, %v2542_v25  ;;  %v2672_v56 = vrot.slane %v2633_v15, 4  ;;  %v9561_v15 = vld [vmem:[%s13346_s0 + $0x148] sm:$0xf] }
 0x1a4   :  { %v2668_v9 = vsel %vm333_vm3, %v2666_v20, %v2667_v46  ;;  %v2673_v10 = vrot.slane %v2634_v37, 4  ;;  %v2683_v35 = vadd.f32 %v2653_v59, %v2609_v31  ;;  %v2684_v44 = vadd.f32 %v2656_v23, %v2610_v38  ;;  %v9566_v37 = vld [vmem:[%s13346_s0 + $0x158] sm:$0xf] }
 0x1a5   :  { %v2671_v50 = vsel %vm333_vm3, %v2669_v17, %v2670_v30  ;;  %v2685_v62 = vadd.f32 %v2659_v32, %v2611_v27  ;;  %v2686_v12 = vadd.f32 %v2662_v21, %v2612_v51  ;;  %v2687_v13 = vadd.f32 %v2665_v14, %v2613_v18  ;;  %v9531_v51 = vld [vmem:[%s13346_s0 + $0xf8] sm:$0xf] }
 0x1a6   :  { %v2674_v25 = vsel %vm333_vm3, %v2672_v56, %v2673_v10  ;;  %v2688_v48 = vadd.f32 %v2668_v9, %v2614_v4  ;;  %v2689_v31 = vadd.f32 %v2671_v50, %v2615_v52  ;;  %v2710_v38 = vmul.f32 %v7683_v47, %v9493_v42 }
 0x1a7   :  { %v2711_v27 = vmul.f32 %v7683_v47, %v9498_v34  ;;  %v2712_v60 = vmul.f32 %v7683_v47, %v9503_v33  ;;  %v2713_v18 = vmul.f32 %v7683_v47, %v9509_v39  ;;  %v2714_v4 = vmul.f32 %v7683_v47, %v9514_v55 }
 0x1a8   :  { %v2715_v52 = vmul.f32 %v7683_v47, %v9137_v1  ;;  %v2716_v41 = vmul.f32 %v7683_v47, %v9301_v63  ;;  %v2690_v6 = vadd.f32 %v2674_v25, %v2616_v2  ;;  %v2717_v5 = vmul.f32 %v7683_v47, %v9520_v61 }
 0x1a9   :  { %v2718_v26 = vadd.f32 %v2710_v38, %v2683_v35  ;;  %v2719_v3 = vadd.f32 %v2711_v27, %v2684_v44  ;;  %v2720_v29 = vadd.f32 %v2712_v60, %v2685_v62  ;;  %v2721_v40 = vadd.f32 %v2713_v18, %v2686_v12 }
 0x1aa   :  { %v2722_v22 = vadd.f32 %v2714_v4, %v2687_v13  ;;  %v2723_v7 = vadd.f32 %v2715_v52, %v2688_v48  ;;  %v2724_v45 = vadd.f32 %v2716_v41, %v2689_v31  ;;  %v2728_v11 = vmul.f32 %v7684_v54, %v9493_v42 }
 0x1ab   :  { %v2729_v24 = vmul.f32 %v7684_v54, %v9531_v51  ;;  %v2730_v58 = vmul.f32 %v7684_v54, %v9498_v34  ;;  %v2731_v53 = vmul.f32 %v7684_v54, %v9540_v0  ;;  %v2732_v43 = vmul.f32 %v7684_v54, %v9503_v33 }
 0x1ac   :  { %v2733_v59 = vmul.f32 %v7684_v54, %v9545_v36  ;;  %v2734_v19 = vmul.f32 %v7684_v54, %v9509_v39  ;;  %v2735_v8 = vmul.f32 %v7684_v54, %v9551_v57  ;;  %v2736_v28 = vmul.f32 %v7684_v54, %v9514_v55 }
 0x1ad   :  { %v2737_v23 = vmul.f32 %v7684_v54, %v9556_v49  ;;  %v2738_v32 = vmul.f32 %v7684_v54, %v9137_v1  ;;  %v2739_v20 = vmul.f32 %v7684_v54, %v9561_v15  ;;  %v2740_v46 = vmul.f32 %v7684_v54, %v9301_v63 }
 0x1ae   :  { %v2741_v21 = vmul.f32 %v7684_v54, %v9566_v37  ;;  %v2742_v14 = vmul.f32 %v7684_v54, %v9520_v61  ;;  %v2743_v17 = vmul.f32 %v7684_v54, %v9574_v16  ;;  %v2760_v30 = vrot.slane %v2728_v11, 1  ;;  %v7685_v54 = vld [vmem:[%s13347_s2 + $0x34] ss:$0 sm:$0xff] }
 0x1af   :  { %v2761_v47 = vrot.slane %v2729_v24, 1  ;;  %v2763_v2 = vrot.slane %v2730_v58, 1  ;;  %v2764_v9 = vrot.slane %v2731_v53, 1  ;;  %v2766_v56 = vrot.slane %v2732_v43, 1 }
 0x1b0   :  { %v2767_v10 = vrot.slane %v2733_v59, 1  ;;  %v2769_v50 = vrot.slane %v2734_v19, 1  ;;  %v2770_v1 = vrot.slane %v2735_v8, 1  ;;  %v2772_v44 = vrot.slane %v2736_v28, 1 }
 0x1b1   :  { %v2762_v35 = vsel %vm108_vm0, %v2760_v30, %v2761_v47  ;;  %v2773_v62 = vrot.slane %v2737_v23, 1  ;;  %v2765_v25 = vsel %vm108_vm0, %v2763_v2, %v2764_v9  ;;  %v2775_v13 = vrot.slane %v2738_v32, 1 }
 0x1b2   :  { %v2768_v12 = vsel %vm108_vm0, %v2766_v56, %v2767_v10  ;;  %v2776_v48 = vrot.slane %v2739_v20, 1  ;;  %v2771_v31 = vsel %vm108_vm0, %v2769_v50, %v2770_v1  ;;  %v2778_v27 = vrot.slane %v2740_v46, 1 }
 0x1b3   :  { %v2774_v38 = vsel %vm108_vm0, %v2772_v44, %v2773_v62  ;;  %v2779_v60 = vrot.slane %v2741_v21, 1  ;;  %v2725_v18 = vadd.f32 %v2717_v5, %v2690_v6  ;;  %v2781_v52 = vrot.slane %v2742_v14, 1 }
 0x1b4   :  { %v2777_v4 = vsel %vm108_vm0, %v2775_v13, %v2776_v48  ;;  %v2782_v41 = vrot.slane %v2743_v17, 1  ;;  %v2792_v24 = vadd.f32 %v2762_v35, %v2718_v26  ;;  %v2793_v58 = vadd.f32 %v2765_v25, %v2719_v3 }
 0x1b5   :  { %v2780_v11 = vsel %vm108_vm0, %v2778_v27, %v2779_v60  ;;  %v2794_v53 = vadd.f32 %v2768_v12, %v2720_v29  ;;  %v2795_v59 = vadd.f32 %v2771_v31, %v2721_v40  ;;  %v2796_v19 = vadd.f32 %v2774_v38, %v2722_v22 }
 0x1b6   :  { %v2783_v43 = vsel %vm108_vm0, %v2781_v52, %v2782_v41  ;;  %v2797_v8 = vadd.f32 %v2777_v4, %v2723_v7  ;;  %v2798_v28 = vadd.f32 %v2780_v11, %v2724_v45  ;;  %v2802_v23 = vmul.f32 %v7685_v54, %v9493_v42  ;;  %v9613_v7 = vld [vmem:[%s13346_s0 + $0x140] sm:$0xff]  ;;  %v7686_v4 = vld [vmem:[%s13347_s2 + $0x37] ss:$0 sm:$0xff] }
 0x1b7   :  { %v2803_v32 = vmul.f32 %v7685_v54, %v9531_v51  ;;  %v2804_v6 = vmul.f32 %v7685_v54, %v9498_v34  ;;  %v2805_v5 = vmul.f32 %v7685_v54, %v9540_v0  ;;  %v2806_v20 = vmul.f32 %v7685_v54, %v9503_v33 }
 0x1b8   :  { %v2807_v26 = vmul.f32 %v7685_v54, %v9545_v36  ;;  %v2808_v3 = vmul.f32 %v7685_v54, %v9509_v39  ;;  %v2809_v29 = vmul.f32 %v7685_v54, %v9551_v57  ;;  %v2810_v40 = vmul.f32 %v7685_v54, %v9514_v55 }
 0x1b9   :  { %v2811_v22 = vmul.f32 %v7685_v54, %v9556_v49  ;;  %v2812_v45 = vmul.f32 %v9613_v7, %v7685_v54  ;;  %v2813_v46 = vmul.f32 %v7685_v54, %v9561_v15  ;;  %v2814_v21 = vmul.f32 %v7685_v54, %v9301_v63 }
 0x1ba   :  { %v2815_v14 = vmul.f32 %v7685_v54, %v9566_v37  ;;  %v2816_v17 = vmul.f32 %v7685_v54, %v9520_v61  ;;  %v2817_v30 = vmul.f32 %v7685_v54, %v9574_v16  ;;  %v2834_v47 = vrot.slane %v2802_v23, 2 }
 0x1bb   :  { %v2835_v2 = vrot.slane %v2803_v32, 2  ;;  %v2837_v9 = vrot.slane %v2804_v6, 2  ;;  %v2838_v56 = vrot.slane %v2805_v5, 2  ;;  %v2840_v10 = vrot.slane %v2806_v20, 2 }
 0x1bc   :  { %v2841_v50 = vrot.slane %v2807_v26, 2  ;;  %v2843_v35 = vrot.slane %v2808_v3, 2  ;;  %v2844_v44 = vrot.slane %v2809_v29, 2  ;;  %v2846_v62 = vrot.slane %v2810_v40, 2 }
 0x1bd   :  { %v2836_v1 = vsel %vm183_vm1, %v2834_v47, %v2835_v2  ;;  %v2847_v25 = vrot.slane %v2811_v22, 2  ;;  %v2839_v12 = vsel %vm183_vm1, %v2837_v9, %v2838_v56  ;;  %v2849_v48 = vrot.slane %v2812_v45, 2 }
 0x1be   :  { %v2842_v13 = vsel %vm183_vm1, %v2840_v10, %v2841_v50  ;;  %v2850_v31 = vrot.slane %v2813_v46, 2  ;;  %v2845_v38 = vsel %vm183_vm1, %v2843_v35, %v2844_v44  ;;  %v2852_v60 = vrot.slane %v2814_v21, 2 }
 0x1bf   :  { %v2848_v27 = vsel %vm183_vm1, %v2846_v62, %v2847_v25  ;;  %v2853_v54 = vrot.slane %v2815_v14, 2  ;;  %v2799_v52 = vadd.f32 %v2783_v43, %v2725_v18  ;;  %v2855_v11 = vrot.slane %v2816_v17, 2 }
 0x1c0   :  { %v2851_v41 = vsel %vm183_vm1, %v2849_v48, %v2850_v31  ;;  %v2856_v23 = vrot.slane %v2817_v30, 2  ;;  %v2866_v6 = vadd.f32 %v2836_v1, %v2792_v24  ;;  %v2867_v5 = vadd.f32 %v2839_v12, %v2793_v58 }
 0x1c1   :  { %v2854_v32 = vsel %vm183_vm1, %v2852_v60, %v2853_v54  ;;  %v2868_v20 = vadd.f32 %v2842_v13, %v2794_v53  ;;  %v2869_v3 = vadd.f32 %v2845_v38, %v2795_v59  ;;  %v2870_v29 = vadd.f32 %v2848_v27, %v2796_v19 }
 0x1c2   :  { %v2857_v26 = vsel %vm183_vm1, %v2855_v11, %v2856_v23  ;;  %v2871_v40 = vadd.f32 %v2851_v41, %v2797_v8  ;;  %v2872_v22 = vadd.f32 %v2854_v32, %v2798_v28  ;;  %v2876_v45 = vmul.f32 %v7686_v4, %v9493_v42  ;;  %v7687_v41 = vld [vmem:[%s13347_s2 + $0x3a] ss:$0 sm:$0xff] }
 0x1c3   :  { %v2877_v46 = vmul.f32 %v7686_v4, %v9531_v51  ;;  %v2878_v18 = vmul.f32 %v7686_v4, %v9498_v34  ;;  %v2879_v43 = vmul.f32 %v7686_v4, %v9540_v0  ;;  %v2880_v21 = vmul.f32 %v7686_v4, %v9503_v33 }
 0x1c4   :  { %v2881_v24 = vmul.f32 %v7686_v4, %v9545_v36  ;;  %v2882_v58 = vmul.f32 %v7686_v4, %v9509_v39  ;;  %v2883_v53 = vmul.f32 %v7686_v4, %v9551_v57  ;;  %v2884_v59 = vmul.f32 %v7686_v4, %v9514_v55 }
 0x1c5   :  { %v2885_v19 = vmul.f32 %v7686_v4, %v9556_v49  ;;  %v2886_v8 = vmul.f32 %v9613_v7, %v7686_v4  ;;  %v2887_v28 = vmul.f32 %v7686_v4, %v9561_v15  ;;  %v2888_v14 = vmul.f32 %v7686_v4, %v9301_v63 }
 0x1c6   :  { %v2889_v17 = vmul.f32 %v7686_v4, %v9566_v37  ;;  %v2890_v30 = vmul.f32 %v7686_v4, %v9520_v61  ;;  %v2891_v47 = vmul.f32 %v7686_v4, %v9574_v16  ;;  %v2908_v2 = vrot.slane %v2876_v45, 3 }
 0x1c7   :  { %v2909_v9 = vrot.slane %v2877_v46, 3  ;;  %v2911_v56 = vrot.slane %v2878_v18, 3  ;;  %v2912_v10 = vrot.slane %v2879_v43, 3  ;;  %v2914_v50 = vrot.slane %v2880_v21, 3 }
 0x1c8   :  { %v2915_v35 = vrot.slane %v2881_v24, 3  ;;  %v2917_v1 = vrot.slane %v2882_v58, 3  ;;  %v2918_v62 = vrot.slane %v2883_v53, 3  ;;  %v2920_v25 = vrot.slane %v2884_v59, 3 }
 0x1c9   :  { %v2910_v44 = vsel %vm258_vm2, %v2908_v2, %v2909_v9  ;;  %v2921_v12 = vrot.slane %v2885_v19, 3  ;;  %v2913_v13 = vsel %vm258_vm2, %v2911_v56, %v2912_v10  ;;  %v2923_v31 = vrot.slane %v2886_v8, 3 }
 0x1ca   :  { %v2916_v48 = vsel %vm258_vm2, %v2914_v50, %v2915_v35  ;;  %v2924_v38 = vrot.slane %v2887_v28, 3  ;;  %v2919_v27 = vsel %vm258_vm2, %v2917_v1, %v2918_v62  ;;  %v2926_v54 = vrot.slane %v2888_v14, 3 }
 0x1cb   :  { %v2922_v60 = vsel %vm258_vm2, %v2920_v25, %v2921_v12  ;;  %v2927_v4 = vrot.slane %v2889_v17, 3  ;;  %v2873_v11 = vadd.f32 %v2857_v26, %v2799_v52  ;;  %v2929_v32 = vrot.slane %v2890_v30, 3  ;;  %v7688_v12 = vld [vmem:[%s13347_s2 + $0x3d] ss:$0 sm:$0xff] }
 0x1cc   :  { %v2925_v23 = vsel %vm258_vm2, %v2923_v31, %v2924_v38  ;;  %v2930_v45 = vrot.slane %v2891_v47, 3  ;;  %v2940_v18 = vadd.f32 %v2910_v44, %v2866_v6  ;;  %v2941_v43 = vadd.f32 %v2913_v13, %v2867_v5 }
 0x1cd   :  { %v2928_v46 = vsel %vm258_vm2, %v2926_v54, %v2927_v4  ;;  %v2942_v21 = vadd.f32 %v2916_v48, %v2868_v20  ;;  %v2943_v58 = vadd.f32 %v2919_v27, %v2869_v3  ;;  %v2944_v53 = vadd.f32 %v2922_v60, %v2870_v29 }
 0x1ce   :  { %v2931_v24 = vsel %vm258_vm2, %v2929_v32, %v2930_v45  ;;  %v2945_v59 = vadd.f32 %v2925_v23, %v2871_v40  ;;  %v2946_v19 = vadd.f32 %v2928_v46, %v2872_v22  ;;  %v2950_v8 = vmul.f32 %v7687_v41, %v9493_v42 }
 0x1cf   :  { %v2951_v28 = vmul.f32 %v7687_v41, %v9531_v51  ;;  %v2952_v52 = vmul.f32 %v7687_v41, %v9498_v34  ;;  %v2953_v26 = vmul.f32 %v7687_v41, %v9540_v0  ;;  %v2954_v14 = vmul.f32 %v7687_v41, %v9503_v33 }
 0x1d0   :  { %v2955_v6 = vmul.f32 %v7687_v41, %v9545_v36  ;;  %v2956_v5 = vmul.f32 %v7687_v41, %v9509_v39  ;;  %v2957_v20 = vmul.f32 %v7687_v41, %v9551_v57  ;;  %v2958_v3 = vmul.f32 %v7687_v41, %v9514_v55 }
 0x1d1   :  { %v2959_v29 = vmul.f32 %v7687_v41, %v9556_v49  ;;  %v2960_v42 = vmul.f32 %v9613_v7, %v7687_v41  ;;  %v2961_v51 = vmul.f32 %v7687_v41, %v9561_v15  ;;  %v2962_v40 = vmul.f32 %v7687_v41, %v9301_v63 }
 0x1d2   :  { %v2963_v0 = vmul.f32 %v7687_v41, %v9566_v37  ;;  %v2964_v22 = vmul.f32 %v7687_v41, %v9520_v61  ;;  %v2965_v36 = vmul.f32 %v7687_v41, %v9574_v16  ;;  %v2982_v17 = vrot.slane %v2950_v8, 4  ;;  %v9688_v41 = vld [vmem:[%s13346_s0 + $0x140] sm:$0xff] }
 0x1d3   :  { %v2983_v30 = vrot.slane %v2951_v28, 4  ;;  %v2985_v47 = vrot.slane %v2952_v52, 4  ;;  %v2986_v57 = vrot.slane %v2953_v26, 4  ;;  %v2988_v2 = vrot.slane %v2954_v14, 4  ;;  %v7689_v8 = vld [vmem:[%s13347_s2 + $0x40] ss:$0 sm:$0xff] }
 0x1d4   :  { %v2989_v9 = vrot.slane %v2955_v6, 4  ;;  %v2991_v56 = vrot.slane %v2956_v5, 4  ;;  %v2992_v7 = vrot.slane %v2957_v20, 4  ;;  %v2994_v10 = vrot.slane %v2958_v3, 4  ;;  %v9714_v26 = vld [vmem:[%s13346_s0 + $0x118] sm:$0xf] }
 0x1d5   :  { %v2984_v49 = vsel %vm333_vm3, %v2982_v17, %v2983_v30  ;;  %v2995_v15 = vrot.slane %v2959_v29, 4  ;;  %v2987_v50 = vsel %vm333_vm3, %v2985_v47, %v2986_v57  ;;  %v2997_v35 = vrot.slane %v2960_v42, 4  ;;  %v9719_v14 = vld [vmem:[%s13346_s0 + $0x128] sm:$0xf]  ;;  %v9725_v3 = vld [vmem:[%s13346_s0 + $0x138] sm:$0xf] }
 0x1d6   :  { %v2990_v37 = vsel %vm333_vm3, %v2988_v2, %v2989_v9  ;;  %v2998_v1 = vrot.slane %v2961_v51, 4  ;;  %v2993_v16 = vsel %vm333_vm3, %v2991_v56, %v2992_v7  ;;  %v3000_v62 = vrot.slane %v2962_v40, 4  ;;  %v9730_v29 = vld [vmem:[%s13346_s0 + $0x148] sm:$0xf]  ;;  %v9748_v2 = vld [vmem:[%s13346_s0 + $0x178] sm:$0xf] }
 0x1d7   :  { %v2996_v44 = vsel %vm333_vm3, %v2994_v10, %v2995_v15  ;;  %v3001_v25 = vrot.slane %v2963_v0, 4  ;;  %v2947_v13 = vadd.f32 %v2931_v24, %v2873_v11  ;;  %v3003_v31 = vrot.slane %v2964_v22, 4  ;;  %v9694_v11 = vld [vmem:[%s13346_s0 + $0x170] sm:$0xff]  ;;  %v9735_v22 = vld [vmem:[%s13346_s0 + $0x158] sm:$0xf] }
 0x1d8   :  { %v2999_v48 = vsel %vm333_vm3, %v2997_v35, %v2998_v1  ;;  %v3004_v38 = vrot.slane %v2965_v36, 4  ;;  %v3014_v60 = vadd.f32 %v2984_v49, %v2940_v18  ;;  %v3015_v54 = vadd.f32 %v2987_v50, %v2941_v43  ;;  %v9740_v36 = vld [vmem:[%s13346_s0 + $0x168] sm:$0xf] }
 0x1d9   :  { %v3002_v27 = vsel %vm333_vm3, %v3000_v62, %v3001_v25  ;;  %v3016_v4 = vadd.f32 %v2990_v37, %v2942_v21  ;;  %v3017_v32 = vadd.f32 %v2993_v16, %v2943_v58  ;;  %v3018_v45 = vadd.f32 %v2996_v44, %v2944_v53  ;;  %v9705_v58 = vld [vmem:[%s13346_s0 + $0x108] sm:$0xf] }
 0x1da   :  { %v3005_v23 = vsel %vm333_vm3, %v3003_v31, %v3004_v38  ;;  %v3019_v46 = vadd.f32 %v2999_v48, %v2945_v59  ;;  %v3020_v24 = vadd.f32 %v3002_v27, %v2946_v19  ;;  %v3041_v18 = vmul.f32 %v7688_v12, %v9498_v34 }
 0x1db   :  { %v3042_v43 = vmul.f32 %v7688_v12, %v9503_v33  ;;  %v3043_v21 = vmul.f32 %v7688_v12, %v9509_v39  ;;  %v3044_v53 = vmul.f32 %v7688_v12, %v9514_v55  ;;  %v3045_v59 = vmul.f32 %v7688_v12, %v9688_v41 }
 0x1dc   :  { %v3046_v19 = vmul.f32 %v7688_v12, %v9301_v63  ;;  %v3047_v28 = vmul.f32 %v7688_v12, %v9520_v61  ;;  %v3021_v52 = vadd.f32 %v3005_v23, %v2947_v13  ;;  %v3048_v6 = vmul.f32 %v7688_v12, %v9694_v11 }
 0x1dd   :  { %v3049_v5 = vadd.f32 %v3041_v18, %v3014_v60  ;;  %v3050_v20 = vadd.f32 %v3042_v43, %v3015_v54  ;;  %v3051_v42 = vadd.f32 %v3043_v21, %v3016_v4  ;;  %v3052_v51 = vadd.f32 %v3044_v53, %v3017_v32 }
 0x1de   :  { %v3053_v40 = vadd.f32 %v3045_v59, %v3018_v45  ;;  %v3054_v0 = vadd.f32 %v3046_v19, %v3019_v46  ;;  %v3055_v17 = vadd.f32 %v3047_v28, %v3020_v24  ;;  %v3059_v30 = vmul.f32 %v7689_v8, %v9498_v34 }
 0x1df   :  { %v3060_v47 = vmul.f32 %v7689_v8, %v9705_v58  ;;  %v3061_v57 = vmul.f32 %v7689_v8, %v9503_v33  ;;  %v3062_v9 = vmul.f32 %v7689_v8, %v9714_v26  ;;  %v3063_v56 = vmul.f32 %v7689_v8, %v9509_v39 }
 0x1e0   :  { %v3064_v49 = vmul.f32 %v7689_v8, %v9719_v14  ;;  %v3065_v7 = vmul.f32 %v7689_v8, %v9514_v55  ;;  %v3066_v10 = vmul.f32 %v7689_v8, %v9725_v3  ;;  %v3067_v15 = vmul.f32 %v7689_v8, %v9688_v41 }
 0x1e1   :  { %v3068_v50 = vmul.f32 %v7689_v8, %v9730_v29  ;;  %v3069_v37 = vmul.f32 %v7689_v8, %v9301_v63  ;;  %v3070_v35 = vmul.f32 %v7689_v8, %v9735_v22  ;;  %v3071_v1 = vmul.f32 %v7689_v8, %v9520_v61 }
 0x1e2   :  { %v3072_v16 = vmul.f32 %v7689_v8, %v9740_v36  ;;  %v3073_v44 = vmul.f32 %v7689_v8, %v9694_v11  ;;  %v3074_v62 = vmul.f32 %v7689_v8, %v9748_v2  ;;  %v3091_v25 = vrot.slane %v3059_v30, 1  ;;  %v7690_v8 = vld [vmem:[%s13347_s2 + $0x43] ss:$0 sm:$0xff] }
 0x1e3   :  { %v3092_v12 = vrot.slane %v3060_v47, 1  ;;  %v3094_v13 = vrot.slane %v3061_v57, 1  ;;  %v3095_v48 = vrot.slane %v3062_v9, 1  ;;  %v3097_v31 = vrot.slane %v3063_v56, 1 }
 0x1e4   :  { %v3098_v38 = vrot.slane %v3064_v49, 1  ;;  %v3100_v27 = vrot.slane %v3065_v7, 1  ;;  %v3101_v63 = vrot.slane %v3066_v10, 1  ;;  %v3103_v54 = vrot.slane %v3067_v15, 1 }
 0x1e5   :  { %v3093_v60 = vsel %vm108_vm0, %v3091_v25, %v3092_v12  ;;  %v3104_v4 = vrot.slane %v3068_v50, 1  ;;  %v3096_v23 = vsel %vm108_vm0, %v3094_v13, %v3095_v48  ;;  %v3106_v45 = vrot.slane %v3069_v37, 1 }
 0x1e6   :  { %v3099_v32 = vsel %vm108_vm0, %v3097_v31, %v3098_v38  ;;  %v3107_v46 = vrot.slane %v3070_v35, 1  ;;  %v3102_v24 = vsel %vm108_vm0, %v3100_v27, %v3101_v63  ;;  %v3109_v43 = vrot.slane %v3071_v1, 1 }
 0x1e7   :  { %v3105_v18 = vsel %vm108_vm0, %v3103_v54, %v3104_v4  ;;  %v3110_v21 = vrot.slane %v3072_v16, 1  ;;  %v3056_v53 = vadd.f32 %v3048_v6, %v3021_v52  ;;  %v3112_v19 = vrot.slane %v3073_v44, 1 }
 0x1e8   :  { %v3108_v59 = vsel %vm108_vm0, %v3106_v45, %v3107_v46  ;;  %v3113_v28 = vrot.slane %v3074_v62, 1  ;;  %v3123_v47 = vadd.f32 %v3093_v60, %v3049_v5  ;;  %v3124_v57 = vadd.f32 %v3096_v23, %v3050_v20 }
 0x1e9   :  { %v3111_v30 = vsel %vm108_vm0, %v3109_v43, %v3110_v21  ;;  %v3125_v9 = vadd.f32 %v3099_v32, %v3051_v42  ;;  %v3126_v49 = vadd.f32 %v3102_v24, %v3052_v51  ;;  %v3127_v7 = vadd.f32 %v3105_v18, %v3053_v40 }
 0x1ea   :  { %v3114_v56 = vsel %vm108_vm0, %v3112_v19, %v3113_v28  ;;  %v3128_v10 = vadd.f32 %v3108_v59, %v3054_v0  ;;  %v3129_v15 = vadd.f32 %v3111_v30, %v3055_v17  ;;  %v3133_v50 = vmul.f32 %v7690_v8, %v9498_v34  ;;  %v9787_v0 = vld [vmem:[%s13346_s0 + $0x150] sm:$0xff]  ;;  %v7691_v59 = vld [vmem:[%s13347_s2 + $0x46] ss:$0 sm:$0xff] }
 0x1eb   :  { %v3134_v37 = vmul.f32 %v7690_v8, %v9705_v58  ;;  %v3135_v52 = vmul.f32 %v7690_v8, %v9503_v33  ;;  %v3136_v6 = vmul.f32 %v7690_v8, %v9714_v26  ;;  %v3137_v35 = vmul.f32 %v7690_v8, %v9509_v39 }
 0x1ec   :  { %v3138_v5 = vmul.f32 %v7690_v8, %v9719_v14  ;;  %v3139_v20 = vmul.f32 %v7690_v8, %v9514_v55  ;;  %v3140_v42 = vmul.f32 %v7690_v8, %v9725_v3  ;;  %v3141_v51 = vmul.f32 %v7690_v8, %v9688_v41 }
 0x1ed   :  { %v3142_v40 = vmul.f32 %v7690_v8, %v9730_v29  ;;  %v3143_v17 = vmul.f32 %v9787_v0, %v7690_v8  ;;  %v3144_v1 = vmul.f32 %v7690_v8, %v9735_v22  ;;  %v3145_v16 = vmul.f32 %v7690_v8, %v9520_v61 }
 0x1ee   :  { %v3146_v44 = vmul.f32 %v7690_v8, %v9740_v36  ;;  %v3147_v62 = vmul.f32 %v7690_v8, %v9694_v11  ;;  %v3148_v25 = vmul.f32 %v7690_v8, %v9748_v2  ;;  %v3165_v12 = vrot.slane %v3133_v50, 2 }
 0x1ef   :  { %v3166_v13 = vrot.slane %v3134_v37, 2  ;;  %v3168_v48 = vrot.slane %v3135_v52, 2  ;;  %v3169_v31 = vrot.slane %v3136_v6, 2  ;;  %v3171_v38 = vrot.slane %v3137_v35, 2 }
 0x1f0   :  { %v3172_v27 = vrot.slane %v3138_v5, 2  ;;  %v3174_v60 = vrot.slane %v3139_v20, 2  ;;  %v3175_v54 = vrot.slane %v3140_v42, 2  ;;  %v3177_v4 = vrot.slane %v3141_v51, 2 }
 0x1f1   :  { %v3167_v63 = vsel %vm183_vm1, %v3165_v12, %v3166_v13  ;;  %v3178_v23 = vrot.slane %v3142_v40, 2  ;;  %v3170_v32 = vsel %vm183_vm1, %v3168_v48, %v3169_v31  ;;  %v3180_v46 = vrot.slane %v3143_v17, 2 }
 0x1f2   :  { %v3173_v45 = vsel %vm183_vm1, %v3171_v38, %v3172_v27  ;;  %v3181_v24 = vrot.slane %v3144_v1, 2  ;;  %v3176_v18 = vsel %vm183_vm1, %v3174_v60, %v3175_v54  ;;  %v3183_v21 = vrot.slane %v3145_v16, 2 }
 0x1f3   :  { %v3179_v43 = vsel %vm183_vm1, %v3177_v4, %v3178_v23  ;;  %v3184_v8 = vrot.slane %v3146_v44, 2  ;;  %v3130_v19 = vadd.f32 %v3114_v56, %v3056_v53  ;;  %v3186_v30 = vrot.slane %v3147_v62, 2 }
 0x1f4   :  { %v3182_v28 = vsel %vm183_vm1, %v3180_v46, %v3181_v24  ;;  %v3187_v50 = vrot.slane %v3148_v25, 2  ;;  %v3197_v52 = vadd.f32 %v3167_v63, %v3123_v47  ;;  %v3198_v6 = vadd.f32 %v3170_v32, %v3124_v57 }
 0x1f5   :  { %v3185_v37 = vsel %vm183_vm1, %v3183_v21, %v3184_v8  ;;  %v3199_v35 = vadd.f32 %v3173_v45, %v3125_v9  ;;  %v3200_v20 = vadd.f32 %v3176_v18, %v3126_v49  ;;  %v3201_v42 = vadd.f32 %v3179_v43, %v3127_v7 }
 0x1f6   :  { %v3188_v5 = vsel %vm183_vm1, %v3186_v30, %v3187_v50  ;;  %v3202_v51 = vadd.f32 %v3182_v28, %v3128_v10  ;;  %v3203_v40 = vadd.f32 %v3185_v37, %v3129_v15  ;;  %v3207_v17 = vmul.f32 %v7691_v59, %v9498_v34  ;;  %v7692_v28 = vld [vmem:[%s13347_s2 + $0x49] ss:$0 sm:$0xff] }
 0x1f7   :  { %v3208_v1 = vmul.f32 %v7691_v59, %v9705_v58  ;;  %v3209_v53 = vmul.f32 %v7691_v59, %v9503_v33  ;;  %v3210_v56 = vmul.f32 %v7691_v59, %v9714_v26  ;;  %v3211_v16 = vmul.f32 %v7691_v59, %v9509_v39 }
 0x1f8   :  { %v3212_v47 = vmul.f32 %v7691_v59, %v9719_v14  ;;  %v3213_v57 = vmul.f32 %v7691_v59, %v9514_v55  ;;  %v3214_v9 = vmul.f32 %v7691_v59, %v9725_v3  ;;  %v3215_v49 = vmul.f32 %v7691_v59, %v9688_v41 }
 0x1f9   :  { %v3216_v7 = vmul.f32 %v7691_v59, %v9730_v29  ;;  %v3217_v10 = vmul.f32 %v9787_v0, %v7691_v59  ;;  %v3218_v15 = vmul.f32 %v7691_v59, %v9735_v22  ;;  %v3219_v44 = vmul.f32 %v7691_v59, %v9520_v61 }
 0x1fa   :  { %v3220_v62 = vmul.f32 %v7691_v59, %v9740_v36  ;;  %v3221_v25 = vmul.f32 %v7691_v59, %v9694_v11  ;;  %v3222_v12 = vmul.f32 %v7691_v59, %v9748_v2  ;;  %v3239_v13 = vrot.slane %v3207_v17, 3 }
 0x1fb   :  { %v3240_v48 = vrot.slane %v3208_v1, 3  ;;  %v3242_v31 = vrot.slane %v3209_v53, 3  ;;  %v3243_v38 = vrot.slane %v3210_v56, 3  ;;  %v3245_v27 = vrot.slane %v3211_v16, 3 }
 0x1fc   :  { %v3246_v60 = vrot.slane %v3212_v47, 3  ;;  %v3248_v63 = vrot.slane %v3213_v57, 3  ;;  %v3249_v4 = vrot.slane %v3214_v9, 3  ;;  %v3251_v23 = vrot.slane %v3215_v49, 3 }
 0x1fd   :  { %v3241_v54 = vsel %vm258_vm2, %v3239_v13, %v3240_v48  ;;  %v3252_v32 = vrot.slane %v3216_v7, 3  ;;  %v3244_v45 = vsel %vm258_vm2, %v3242_v31, %v3243_v38  ;;  %v3254_v24 = vrot.slane %v3217_v10, 3 }
 0x1fe   :  { %v3247_v46 = vsel %vm258_vm2, %v3245_v27, %v3246_v60  ;;  %v3255_v18 = vrot.slane %v3218_v15, 3  ;;  %v3250_v43 = vsel %vm258_vm2, %v3248_v63, %v3249_v4  ;;  %v3257_v8 = vrot.slane %v3219_v44, 3  ;;  %v9857_v27 = vld [vmem:[%s13346_s0 + $0x180] sm:$0xff] }
 0x1ff   :  { %v3253_v21 = vsel %vm258_vm2, %v3251_v23, %v3252_v32  ;;  %v3258_v59 = vrot.slane %v3220_v62, 3  ;;  %v3204_v30 = vadd.f32 %v3188_v5, %v3130_v19  ;;  %v3260_v37 = vrot.slane %v3221_v25, 3  ;;  %v7693_v60 = vld [vmem:[%s13347_s2 + $0x2] ss:$0 sm:$0xff]  ;;  %v9866_v32 = vld [vmem:[%s13346_s0 + $0x190] sm:$0xff] }
 0x200   :  { %v3256_v50 = vsel %vm258_vm2, %v3254_v24, %v3255_v18  ;;  %v3261_v17 = vrot.slane %v3222_v12, 3  ;;  %v3271_v53 = vadd.f32 %v3241_v54, %v3197_v52  ;;  %v3272_v56 = vadd.f32 %v3244_v45, %v3198_v6  ;;  %v9871_v45 = vld [vmem:[%s13346_s0 + $0x1a0] sm:$0xff] }
 0x201   :  { %v3259_v1 = vsel %vm258_vm2, %v3257_v8, %v3258_v59  ;;  %v3273_v16 = vadd.f32 %v3247_v46, %v3199_v35  ;;  %v3274_v57 = vadd.f32 %v3250_v43, %v3200_v20  ;;  %v3275_v9 = vadd.f32 %v3253_v21, %v3201_v42  ;;  %v9876_v46 = vld [vmem:[%s13346_s0 + $0x1b0] sm:$0xff]  ;;  %v9882_v8 = vld [vmem:[%s13346_s0 + $0x1c0] sm:$0xff] }
 0x202   :  { %v3262_v47 = vsel %vm258_vm2, %v3260_v37, %v3261_v17  ;;  %v3276_v49 = vadd.f32 %v3256_v50, %v3202_v51  ;;  %v3277_v7 = vadd.f32 %v3259_v1, %v3203_v40  ;;  %v3281_v10 = vmul.f32 %v7692_v28, %v9498_v34  ;;  %v9887_v59 = vld [vmem:[%s13346_s0 + $0x1d0] sm:$0xff] }
 0x203   :  { %v3282_v15 = vmul.f32 %v7692_v28, %v9705_v58  ;;  %v3283_v19 = vmul.f32 %v7692_v28, %v9503_v33  ;;  %v3284_v5 = vmul.f32 %v7692_v28, %v9714_v26  ;;  %v3285_v44 = vmul.f32 %v7692_v28, %v9509_v39  ;;  %v9898_v1 = vld [vmem:[%s13346_s0 + $0x1f0] sm:$0xff] }
 0x204   :  { %v3286_v52 = vmul.f32 %v7692_v28, %v9719_v14  ;;  %v3287_v6 = vmul.f32 %v7692_v28, %v9514_v55  ;;  %v3288_v35 = vmul.f32 %v7692_v28, %v9725_v3  ;;  %v3289_v20 = vmul.f32 %v7692_v28, %v9688_v41 }
 0x205   :  { %v3290_v42 = vmul.f32 %v7692_v28, %v9730_v29  ;;  %v3291_v34 = vmul.f32 %v9787_v0, %v7692_v28  ;;  %v3292_v58 = vmul.f32 %v7692_v28, %v9735_v22  ;;  %v3293_v33 = vmul.f32 %v7692_v28, %v9520_v61 }
 0x206   :  { %v3294_v26 = vmul.f32 %v7692_v28, %v9740_v36  ;;  %v3295_v39 = vmul.f32 %v7692_v28, %v9694_v11  ;;  %v3296_v14 = vmul.f32 %v7692_v28, %v9748_v2  ;;  %v3313_v51 = vrot.slane %v3281_v10, 4  ;;  %v9892_v28 = vld [vmem:[%s13346_s0 + $0x1e0] sm:$0xff] }
 0x207   :  { %v3314_v55 = vrot.slane %v3282_v15, 4  ;;  %v3316_v40 = vrot.slane %v3283_v19, 4  ;;  %v3317_v3 = vrot.slane %v3284_v5, 4  ;;  %v3319_v62 = vrot.slane %v3285_v44, 4  ;;  %v7694_v10 = vld [vmem:[%s13347_s2 + $0x5] ss:$0 sm:$0xff] }
 0x208   :  { %v3320_v41 = vrot.slane %v3286_v52, 4  ;;  %v3322_v25 = vrot.slane %v3287_v6, 4  ;;  %v3323_v0 = vrot.slane %v3288_v35, 4  ;;  %v3325_v12 = vrot.slane %v3289_v20, 4  ;;  %v9918_v5 = vld [vmem:[%s13346_s0 + $0x198] sm:$0xf] }
 0x209   :  { %v3315_v29 = vsel %vm333_vm3, %v3313_v51, %v3314_v55  ;;  %v3326_v22 = vrot.slane %v3290_v42, 4  ;;  %v3318_v61 = vsel %vm333_vm3, %v3316_v40, %v3317_v3  ;;  %v3328_v13 = vrot.slane %v3291_v34, 4  ;;  %v9923_v44 = vld [vmem:[%s13346_s0 + $0x1a8] sm:$0xf]  ;;  %v9929_v20 = vld [vmem:[%s13346_s0 + $0x1b8] sm:$0xf] }
 0x20a   :  { %v3321_v36 = vsel %vm333_vm3, %v3319_v62, %v3320_v41  ;;  %v3329_v11 = vrot.slane %v3292_v58, 4  ;;  %v3324_v2 = vsel %vm333_vm3, %v3322_v25, %v3323_v0  ;;  %v3331_v31 = vrot.slane %v3293_v33, 4  ;;  %v9934_v42 = vld [vmem:[%s13346_s0 + $0x1c8] sm:$0xf]  ;;  %v9952_v62 = vld [vmem:[%s13346_s0 + $0x1f8] sm:$0xf] }
 0x20b   :  { %v3327_v48 = vsel %vm333_vm3, %v3325_v12, %v3326_v22  ;;  %v3332_v38 = vrot.slane %v3294_v26, 4  ;;  %v3278_v63 = vadd.f32 %v3262_v47, %v3204_v30  ;;  %v3334_v4 = vrot.slane %v3295_v39, 4  ;;  %v9939_v39 = vld [vmem:[%s13346_s0 + $0x1d8] sm:$0xf] }
 0x20c   :  { %v3330_v54 = vsel %vm333_vm3, %v3328_v13, %v3329_v11  ;;  %v3335_v23 = vrot.slane %v3296_v14, 4  ;;  %v3345_v18 = vadd.f32 %v3315_v29, %v3271_v53  ;;  %v3346_v43 = vadd.f32 %v3318_v61, %v3272_v56  ;;  %v9944_v14 = vld [vmem:[%s13346_s0 + $0x1e8] sm:$0xf] }
 0x20d   :  { %v3333_v24 = vsel %vm333_vm3, %v3331_v31, %v3332_v38  ;;  %v3347_v21 = vadd.f32 %v3321_v36, %v3273_v16  ;;  %v3348_v50 = vadd.f32 %v3324_v2, %v3274_v57  ;;  %v3349_v37 = vadd.f32 %v3327_v48, %v3275_v9  ;;  %v9909_v57 = vld [vmem:[%s13346_s0 + $0x188] sm:$0xf] }
 0x20e   :  { %v3336_v30 = vsel %vm333_vm3, %v3334_v4, %v3335_v23  ;;  %v3350_v17 = vadd.f32 %v3330_v54, %v3276_v49  ;;  %v3351_v53 = vadd.f32 %v3333_v24, %v3277_v7  ;;  %v3372_v56 = vmul.f32 %v7693_v60, %v9857_v27 }
 0x20f   :  { %v3373_v16 = vmul.f32 %v7693_v60, %v9866_v32  ;;  %v3374_v47 = vmul.f32 %v7693_v60, %v9871_v45  ;;  %v3375_v9 = vmul.f32 %v7693_v60, %v9876_v46  ;;  %v3376_v49 = vmul.f32 %v7693_v60, %v9882_v8 }
 0x210   :  { %v3377_v7 = vmul.f32 %v7693_v60, %v9887_v59  ;;  %v3378_v15 = vmul.f32 %v7693_v60, %v9892_v28  ;;  %v3352_v19 = vadd.f32 %v3336_v30, %v3278_v63  ;;  %v3379_v52 = vmul.f32 %v7693_v60, %v9898_v1 }
 0x211   :  { %v3380_v6 = vadd.f32 %v3372_v56, %v3345_v18  ;;  %v3381_v35 = vadd.f32 %v3373_v16, %v3346_v43  ;;  %v3382_v34 = vadd.f32 %v3374_v47, %v3347_v21  ;;  %v3383_v58 = vadd.f32 %v3375_v9, %v3348_v50  ;;  %v7695_v9 = vld [vmem:[%s13347_s2 + $0x8] ss:$0 sm:$0xff] }
 0x212   :  { %v3384_v33 = vadd.f32 %v3376_v49, %v3349_v37  ;;  %v3385_v26 = vadd.f32 %v3377_v7, %v3350_v17  ;;  %v3386_v51 = vadd.f32 %v3378_v15, %v3351_v53  ;;  %v3390_v55 = vmul.f32 %v7694_v10, %v9857_v27 }
 0x213   :  { %v3391_v40 = vmul.f32 %v7694_v10, %v9909_v57  ;;  %v3392_v3 = vmul.f32 %v7694_v10, %v9866_v32  ;;  %v3393_v41 = vmul.f32 %v7694_v10, %v9918_v5  ;;  %v3394_v25 = vmul.f32 %v7694_v10, %v9871_v45 }
 0x214   :  { %v3395_v29 = vmul.f32 %v7694_v10, %v9923_v44  ;;  %v3396_v0 = vmul.f32 %v7694_v10, %v9876_v46  ;;  %v3397_v12 = vmul.f32 %v7694_v10, %v9929_v20  ;;  %v3398_v22 = vmul.f32 %v7694_v10, %v9882_v8 }
 0x215   :  { %v3399_v61 = vmul.f32 %v7694_v10, %v9934_v42  ;;  %v3400_v36 = vmul.f32 %v7694_v10, %v9887_v59  ;;  %v3401_v13 = vmul.f32 %v7694_v10, %v9939_v39  ;;  %v3402_v11 = vmul.f32 %v7694_v10, %v9892_v28 }
 0x216   :  { %v3403_v2 = vmul.f32 %v7694_v10, %v9944_v14  ;;  %v3404_v48 = vmul.f32 %v7694_v10, %v9898_v1  ;;  %v3405_v31 = vmul.f32 %v7694_v10, %v9952_v62  ;;  %v3422_v38 = vrot.slane %v3390_v55, 1 }
 0x217   :  { %v3423_v60 = vrot.slane %v3391_v40, 1  ;;  %v3425_v63 = vrot.slane %v3392_v3, 1  ;;  %v3426_v54 = vrot.slane %v3393_v41, 1  ;;  %v3428_v4 = vrot.slane %v3394_v25, 1 }
 0x218   :  { %v3429_v23 = vrot.slane %v3395_v29, 1  ;;  %v3431_v24 = vrot.slane %v3396_v0, 1  ;;  %v3432_v43 = vrot.slane %v3397_v12, 1  ;;  %v3434_v21 = vrot.slane %v3398_v22, 1 }
 0x219   :  { %v3424_v18 = vsel %vm108_vm0, %v3422_v38, %v3423_v60  ;;  %v3435_v30 = vrot.slane %v3399_v61, 1  ;;  %v3427_v50 = vsel %vm108_vm0, %v3425_v63, %v3426_v54  ;;  %v3437_v17 = vrot.slane %v3400_v36, 1 }
 0x21a   :  { %v3430_v37 = vsel %vm108_vm0, %v3428_v4, %v3429_v23  ;;  %v3438_v53 = vrot.slane %v3401_v13, 1  ;;  %v3433_v56 = vsel %vm108_vm0, %v3431_v24, %v3432_v43  ;;  %v3440_v47 = vrot.slane %v3402_v11, 1 }
 0x21b   :  { %v3436_v16 = vsel %vm108_vm0, %v3434_v21, %v3435_v30  ;;  %v3441_v10 = vrot.slane %v3403_v2, 1  ;;  %v3387_v49 = vadd.f32 %v3379_v52, %v3352_v19  ;;  %v3443_v15 = vrot.slane %v3404_v48, 1 }
 0x21c   :  { %v3439_v7 = vsel %vm108_vm0, %v3437_v17, %v3438_v53  ;;  %v3444_v55 = vrot.slane %v3405_v31, 1  ;;  %v3454_v3 = vadd.f32 %v3424_v18, %v3380_v6  ;;  %v3455_v41 = vadd.f32 %v3427_v50, %v3381_v35 }
 0x21d   :  { %v3442_v40 = vsel %vm108_vm0, %v3440_v47, %v3441_v10  ;;  %v3456_v25 = vadd.f32 %v3430_v37, %v3382_v34  ;;  %v3457_v0 = vadd.f32 %v3433_v56, %v3383_v58  ;;  %v3458_v12 = vadd.f32 %v3436_v16, %v3384_v33 }
 0x21e   :  { %v3445_v29 = vsel %vm108_vm0, %v3443_v15, %v3444_v55  ;;  %v3459_v22 = vadd.f32 %v3439_v7, %v3385_v26  ;;  %v3460_v61 = vadd.f32 %v3442_v40, %v3386_v51  ;;  %v3464_v36 = vmul.f32 %v7695_v9, %v9857_v27  ;;  %v7696_v7 = vld [vmem:[%s13347_s2 + $0xb] ss:$0 sm:$0xff] }
 0x21f   :  { %v3465_v13 = vmul.f32 %v7695_v9, %v9909_v57  ;;  %v3466_v19 = vmul.f32 %v7695_v9, %v9866_v32  ;;  %v3467_v52 = vmul.f32 %v7695_v9, %v9918_v5  ;;  %v3468_v11 = vmul.f32 %v7695_v9, %v9871_v45 }
 0x220   :  { %v3469_v6 = vmul.f32 %v7695_v9, %v9923_v44  ;;  %v3470_v35 = vmul.f32 %v7695_v9, %v9876_v46  ;;  %v3471_v34 = vmul.f32 %v7695_v9, %v9929_v20  ;;  %v3472_v58 = vmul.f32 %v7695_v9, %v9882_v8 }
 0x221   :  { %v3473_v33 = vmul.f32 %v7695_v9, %v9934_v42  ;;  %v3474_v26 = vmul.f32 %v7695_v9, %v9887_v59  ;;  %v3475_v51 = vmul.f32 %v7695_v9, %v9939_v39  ;;  %v3476_v2 = vmul.f32 %v7695_v9, %v9892_v28 }
 0x222   :  { %v3477_v48 = vmul.f32 %v7695_v9, %v9944_v14  ;;  %v3478_v31 = vmul.f32 %v7695_v9, %v9898_v1  ;;  %v3479_v38 = vmul.f32 %v7695_v9, %v9952_v62  ;;  %v3496_v60 = vrot.slane %v3464_v36, 2 }
 0x223   :  { %v3497_v63 = vrot.slane %v3465_v13, 2  ;;  %v3499_v54 = vrot.slane %v3466_v19, 2  ;;  %v3500_v4 = vrot.slane %v3467_v52, 2  ;;  %v3502_v23 = vrot.slane %v3468_v11, 2 }
 0x224   :  { %v3503_v24 = vrot.slane %v3469_v6, 2  ;;  %v3505_v18 = vrot.slane %v3470_v35, 2  ;;  %v3506_v21 = vrot.slane %v3471_v34, 2  ;;  %v3508_v30 = vrot.slane %v3472_v58, 2 }
 0x225   :  { %v3498_v43 = vsel %vm183_vm1, %v3496_v60, %v3497_v63  ;;  %v3509_v50 = vrot.slane %v3473_v33, 2  ;;  %v3501_v37 = vsel %vm183_vm1, %v3499_v54, %v3500_v4  ;;  %v3511_v53 = vrot.slane %v3474_v26, 2 }
 0x226   :  { %v3504_v17 = vsel %vm183_vm1, %v3502_v23, %v3503_v24  ;;  %v3512_v56 = vrot.slane %v3475_v51, 2  ;;  %v3507_v16 = vsel %vm183_vm1, %v3505_v18, %v3506_v21  ;;  %v3514_v10 = vrot.slane %v3476_v2, 2 }
 0x227   :  { %v3510_v47 = vsel %vm183_vm1, %v3508_v30, %v3509_v50  ;;  %v3515_v9 = vrot.slane %v3477_v48, 2  ;;  %v3461_v15 = vadd.f32 %v3445_v29, %v3387_v49  ;;  %v3517_v40 = vrot.slane %v3478_v31, 2 }
 0x228   :  { %v3513_v55 = vsel %vm183_vm1, %v3511_v53, %v3512_v56  ;;  %v3518_v36 = vrot.slane %v3479_v38, 2  ;;  %v3528_v19 = vadd.f32 %v3498_v43, %v3454_v3  ;;  %v3529_v52 = vadd.f32 %v3501_v37, %v3455_v41 }
 0x229   :  { %v3516_v13 = vsel %vm183_vm1, %v3514_v10, %v3515_v9  ;;  %v3530_v11 = vadd.f32 %v3504_v17, %v3456_v25  ;;  %v3531_v35 = vadd.f32 %v3507_v16, %v3457_v0  ;;  %v3532_v34 = vadd.f32 %v3510_v47, %v3458_v12 }
 0x22a   :  { %v3519_v6 = vsel %vm183_vm1, %v3517_v40, %v3518_v36  ;;  %v3533_v58 = vadd.f32 %v3513_v55, %v3459_v22  ;;  %v3534_v33 = vadd.f32 %v3516_v13, %v3460_v61  ;;  %v3538_v26 = vmul.f32 %v7696_v7, %v9857_v27  ;;  %v7697_v55 = vld [vmem:[%s13347_s2 + $0xe] ss:$0 sm:$0xff] }
 0x22b   :  { %v3539_v51 = vmul.f32 %v7696_v7, %v9909_v57  ;;  %v3540_v49 = vmul.f32 %v7696_v7, %v9866_v32  ;;  %v3541_v29 = vmul.f32 %v7696_v7, %v9918_v5  ;;  %v3542_v2 = vmul.f32 %v7696_v7, %v9871_v45 }
 0x22c   :  { %v3543_v3 = vmul.f32 %v7696_v7, %v9923_v44  ;;  %v3544_v41 = vmul.f32 %v7696_v7, %v9876_v46  ;;  %v3545_v25 = vmul.f32 %v7696_v7, %v9929_v20  ;;  %v3546_v0 = vmul.f32 %v7696_v7, %v9882_v8 }
 0x22d   :  { %v3547_v12 = vmul.f32 %v7696_v7, %v9934_v42  ;;  %v3548_v22 = vmul.f32 %v7696_v7, %v9887_v59  ;;  %v3549_v61 = vmul.f32 %v7696_v7, %v9939_v39  ;;  %v3550_v48 = vmul.f32 %v7696_v7, %v9892_v28 }
 0x22e   :  { %v3551_v31 = vmul.f32 %v7696_v7, %v9944_v14  ;;  %v3552_v38 = vmul.f32 %v7696_v7, %v9898_v1  ;;  %v3553_v60 = vmul.f32 %v7696_v7, %v9952_v62  ;;  %v3570_v63 = vrot.slane %v3538_v26, 3 }
 0x22f   :  { %v3571_v54 = vrot.slane %v3539_v51, 3  ;;  %v3573_v4 = vrot.slane %v3540_v49, 3  ;;  %v3574_v23 = vrot.slane %v3541_v29, 3  ;;  %v3576_v24 = vrot.slane %v3542_v2, 3 }
 0x230   :  { %v3577_v18 = vrot.slane %v3543_v3, 3  ;;  %v3579_v43 = vrot.slane %v3544_v41, 3  ;;  %v3580_v30 = vrot.slane %v3545_v25, 3  ;;  %v3582_v50 = vrot.slane %v3546_v0, 3 }
 0x231   :  { %v3572_v21 = vsel %vm258_vm2, %v3570_v63, %v3571_v54  ;;  %v3583_v37 = vrot.slane %v3547_v12, 3  ;;  %v3575_v17 = vsel %vm258_vm2, %v3573_v4, %v3574_v23  ;;  %v3585_v56 = vrot.slane %v3548_v22, 3 }
 0x232   :  { %v3578_v53 = vsel %vm258_vm2, %v3576_v24, %v3577_v18  ;;  %v3586_v16 = vrot.slane %v3549_v61, 3  ;;  %v3581_v47 = vsel %vm258_vm2, %v3579_v43, %v3580_v30  ;;  %v3588_v9 = vrot.slane %v3550_v48, 3 }
 0x233   :  { %v3584_v10 = vsel %vm258_vm2, %v3582_v50, %v3583_v37  ;;  %v3589_v7 = vrot.slane %v3551_v31, 3  ;;  %v3535_v40 = vadd.f32 %v3519_v6, %v3461_v15  ;;  %v3591_v13 = vrot.slane %v3552_v38, 3 }
 0x234   :  { %v3587_v36 = vsel %vm258_vm2, %v3585_v56, %v3586_v16  ;;  %v3592_v26 = vrot.slane %v3553_v60, 3  ;;  %v3602_v49 = vadd.f32 %v3572_v21, %v3528_v19  ;;  %v3603_v29 = vadd.f32 %v3575_v17, %v3529_v52  ;;  %v7698_v17 = vld [vmem:[%s13347_s2 + $0x11] ss:$0 sm:$0xff] }
 0x235   :  { %v3590_v51 = vsel %vm258_vm2, %v3588_v9, %v3589_v7  ;;  %v3604_v2 = vadd.f32 %v3578_v53, %v3530_v11  ;;  %v3605_v41 = vadd.f32 %v3581_v47, %v3531_v35  ;;  %v3606_v25 = vadd.f32 %v3584_v10, %v3532_v34 }
 0x236   :  { %v3593_v3 = vsel %vm258_vm2, %v3591_v13, %v3592_v26  ;;  %v3607_v0 = vadd.f32 %v3587_v36, %v3533_v58  ;;  %v3608_v12 = vadd.f32 %v3590_v51, %v3534_v33  ;;  %v3612_v22 = vmul.f32 %v7697_v55, %v9857_v27 }
 0x237   :  { %v3613_v61 = vmul.f32 %v7697_v55, %v9909_v57  ;;  %v3614_v15 = vmul.f32 %v7697_v55, %v9866_v32  ;;  %v3615_v6 = vmul.f32 %v7697_v55, %v9918_v5  ;;  %v3616_v48 = vmul.f32 %v7697_v55, %v9871_v45 }
 0x238   :  { %v3617_v19 = vmul.f32 %v7697_v55, %v9923_v44  ;;  %v3618_v52 = vmul.f32 %v7697_v55, %v9876_v46  ;;  %v3619_v11 = vmul.f32 %v7697_v55, %v9929_v20  ;;  %v3620_v35 = vmul.f32 %v7697_v55, %v9882_v8 }
 0x239   :  { %v3621_v34 = vmul.f32 %v7697_v55, %v9934_v42  ;;  %v3622_v27 = vmul.f32 %v7697_v55, %v9887_v59  ;;  %v3623_v57 = vmul.f32 %v7697_v55, %v9939_v39  ;;  %v3624_v58 = vmul.f32 %v7697_v55, %v9892_v28 }
 0x23a   :  { %v3625_v5 = vmul.f32 %v7697_v55, %v9944_v14  ;;  %v3626_v33 = vmul.f32 %v7697_v55, %v9898_v1  ;;  %v3627_v44 = vmul.f32 %v7697_v55, %v9952_v62  ;;  %v3644_v31 = vrot.slane %v3612_v22, 4  ;;  %v10062_v22 = vld [vmem:[%s13346_s0 + $0x200] sm:$0xff] }
 0x23b   :  { %v3645_v38 = vrot.slane %v3613_v61, 4  ;;  %v3647_v60 = vrot.slane %v3614_v15, 4  ;;  %v3648_v20 = vrot.slane %v3615_v6, 4  ;;  %v3650_v63 = vrot.slane %v3616_v48, 4  ;;  %v10082_v6 = vld [vmem:[%s13346_s0 + $0x1a8] sm:$0xf] }
 0x23c   :  { %v3651_v54 = vrot.slane %v3617_v19, 4  ;;  %v3653_v4 = vrot.slane %v3618_v52, 4  ;;  %v3654_v23 = vrot.slane %v3619_v11, 4  ;;  %v3656_v24 = vrot.slane %v3620_v35, 4  ;;  %v10087_v48 = vld [vmem:[%s13346_s0 + $0x1b8] sm:$0xf] }
 0x23d   :  { %v3646_v42 = vsel %vm333_vm3, %v3644_v31, %v3645_v38  ;;  %v3657_v39 = vrot.slane %v3621_v34, 4  ;;  %v3649_v18 = vsel %vm333_vm3, %v3647_v60, %v3648_v20  ;;  %v3659_v43 = vrot.slane %v3622_v27, 4  ;;  %v10093_v35 = vld [vmem:[%s13346_s0 + $0x1c8] sm:$0xf]  ;;  %v10098_v34 = vld [vmem:[%s13346_s0 + $0x1d8] sm:$0xf] }
 0x23e   :  { %v3652_v14 = vsel %vm333_vm3, %v3650_v63, %v3651_v54  ;;  %v3660_v21 = vrot.slane %v3623_v57, 4  ;;  %v3655_v62 = vsel %vm333_vm3, %v3653_v4, %v3654_v23  ;;  %v3662_v50 = vrot.slane %v3624_v58, 4  ;;  %v10116_v63 = vld [vmem:[%s13346_s0 + $0x208] sm:$0xf] }
 0x23f   :  { %v3658_v30 = vsel %vm333_vm3, %v3656_v24, %v3657_v39  ;;  %v3663_v37 = vrot.slane %v3625_v5, 4  ;;  %v3609_v53 = vadd.f32 %v3593_v3, %v3535_v40  ;;  %v3665_v16 = vrot.slane %v3626_v33, 4  ;;  %v10103_v33 = vld [vmem:[%s13346_s0 + $0x1e8] sm:$0xf] }
 0x240   :  { %v3661_v56 = vsel %vm333_vm3, %v3659_v43, %v3660_v21  ;;  %v3666_v47 = vrot.slane %v3627_v44, 4  ;;  %v3676_v9 = vadd.f32 %v3646_v42, %v3602_v49  ;;  %v3677_v7 = vadd.f32 %v3649_v18, %v3603_v29  ;;  %v7699_v49 = vld [vmem:[%s13347_s2 + $0x14] ss:$0 sm:$0xff]  ;;  %v10073_v29 = vld [vmem:[%s13346_s0 + $0x198] sm:$0xf] }
 0x241   :  { %v3664_v10 = vsel %vm333_vm3, %v3662_v50, %v3663_v37  ;;  %v3678_v55 = vadd.f32 %v3652_v14, %v3604_v2  ;;  %v3679_v13 = vadd.f32 %v3655_v62, %v3605_v41  ;;  %v3680_v26 = vadd.f32 %v3658_v30, %v3606_v25  ;;  %v10108_v44 = vld [vmem:[%s13346_s0 + $0x1f8] sm:$0xf] }
 0x242   :  { %v3667_v36 = vsel %vm333_vm3, %v3665_v16, %v3666_v47  ;;  %v3681_v51 = vadd.f32 %v3661_v56, %v3607_v0  ;;  %v3682_v40 = vadd.f32 %v3664_v10, %v3608_v12  ;;  %v3703_v3 = vmul.f32 %v7698_v17, %v9866_v32 }
 0x243   :  { %v3704_v61 = vmul.f32 %v7698_v17, %v9871_v45  ;;  %v3705_v15 = vmul.f32 %v7698_v17, %v9876_v46  ;;  %v3706_v2 = vmul.f32 %v7698_v17, %v9882_v8  ;;  %v3707_v41 = vmul.f32 %v7698_v17, %v9887_v59 }
 0x244   :  { %v3708_v25 = vmul.f32 %v7698_v17, %v9892_v28  ;;  %v3709_v0 = vmul.f32 %v7698_v17, %v9898_v1  ;;  %v3683_v12 = vadd.f32 %v3667_v36, %v3609_v53  ;;  %v3710_v19 = vmul.f32 %v7698_v17, %v10062_v22 }
 0x245   :  { %v3711_v52 = vadd.f32 %v3703_v3, %v3676_v9  ;;  %v3712_v11 = vadd.f32 %v3704_v61, %v3677_v7  ;;  %v3713_v27 = vadd.f32 %v3705_v15, %v3678_v55  ;;  %v3714_v57 = vadd.f32 %v3706_v2, %v3679_v13  ;;  %v7700_v2 = vld [vmem:[%s13347_s2 + $0x17] ss:$0 sm:$0xff] }
 0x246   :  { %v3715_v58 = vadd.f32 %v3707_v41, %v3680_v26  ;;  %v3716_v5 = vadd.f32 %v3708_v25, %v3681_v51  ;;  %v3717_v31 = vadd.f32 %v3709_v0, %v3682_v40  ;;  %v3721_v38 = vmul.f32 %v7699_v49, %v9866_v32 }
 0x247   :  { %v3722_v60 = vmul.f32 %v7699_v49, %v10073_v29  ;;  %v3723_v20 = vmul.f32 %v7699_v49, %v9871_v45  ;;  %v3724_v54 = vmul.f32 %v7699_v49, %v10082_v6  ;;  %v3725_v4 = vmul.f32 %v7699_v49, %v9876_v46 }
 0x248   :  { %v3726_v42 = vmul.f32 %v7699_v49, %v10087_v48  ;;  %v3727_v23 = vmul.f32 %v7699_v49, %v9882_v8  ;;  %v3728_v24 = vmul.f32 %v7699_v49, %v10093_v35  ;;  %v3729_v39 = vmul.f32 %v7699_v49, %v9887_v59 }
 0x249   :  { %v3730_v18 = vmul.f32 %v7699_v49, %v10098_v34  ;;  %v3731_v14 = vmul.f32 %v7699_v49, %v9892_v28  ;;  %v3732_v43 = vmul.f32 %v7699_v49, %v10103_v33  ;;  %v3733_v21 = vmul.f32 %v7699_v49, %v9898_v1 }
 0x24a   :  { %v3734_v62 = vmul.f32 %v7699_v49, %v10108_v44  ;;  %v3735_v30 = vmul.f32 %v7699_v49, %v10062_v22  ;;  %v3736_v50 = vmul.f32 %v7699_v49, %v10116_v63  ;;  %v3753_v37 = vrot.slane %v3721_v38, 1 }
 0x24b   :  { %v3754_v17 = vrot.slane %v3722_v60, 1  ;;  %v3756_v53 = vrot.slane %v3723_v20, 1  ;;  %v3757_v56 = vrot.slane %v3724_v54, 1  ;;  %v3759_v16 = vrot.slane %v3725_v4, 1 }
 0x24c   :  { %v3760_v47 = vrot.slane %v3726_v42, 1  ;;  %v3762_v10 = vrot.slane %v3727_v23, 1  ;;  %v3763_v7 = vrot.slane %v3728_v24, 1  ;;  %v3765_v55 = vrot.slane %v3729_v39, 1 }
 0x24d   :  { %v3755_v9 = vsel %vm108_vm0, %v3753_v37, %v3754_v17  ;;  %v3766_v36 = vrot.slane %v3730_v18, 1  ;;  %v3758_v13 = vsel %vm108_vm0, %v3756_v53, %v3757_v56  ;;  %v3768_v51 = vrot.slane %v3731_v14, 1 }
 0x24e   :  { %v3761_v26 = vsel %vm108_vm0, %v3759_v16, %v3760_v47  ;;  %v3769_v40 = vrot.slane %v3732_v43, 1  ;;  %v3764_v3 = vsel %vm108_vm0, %v3762_v10, %v3763_v7  ;;  %v3771_v15 = vrot.slane %v3733_v21, 1 }
 0x24f   :  { %v3767_v61 = vsel %vm108_vm0, %v3765_v55, %v3766_v36  ;;  %v3772_v49 = vrot.slane %v3734_v62, 1  ;;  %v3718_v41 = vadd.f32 %v3710_v19, %v3683_v12  ;;  %v3774_v0 = vrot.slane %v3735_v30, 1 }
 0x250   :  { %v3770_v25 = vsel %vm108_vm0, %v3768_v51, %v3769_v40  ;;  %v3775_v38 = vrot.slane %v3736_v50, 1  ;;  %v3785_v20 = vadd.f32 %v3755_v9, %v3711_v52  ;;  %v3786_v54 = vadd.f32 %v3758_v13, %v3712_v11 }
 0x251   :  { %v3773_v60 = vsel %vm108_vm0, %v3771_v15, %v3772_v49  ;;  %v3787_v4 = vadd.f32 %v3761_v26, %v3713_v27  ;;  %v3788_v23 = vadd.f32 %v3764_v3, %v3714_v57  ;;  %v3789_v24 = vadd.f32 %v3767_v61, %v3715_v58 }
 0x252   :  { %v3776_v42 = vsel %vm108_vm0, %v3774_v0, %v3775_v38  ;;  %v3790_v39 = vadd.f32 %v3770_v25, %v3716_v5  ;;  %v3791_v18 = vadd.f32 %v3773_v60, %v3717_v31  ;;  %v3795_v14 = vmul.f32 %v7700_v2, %v9866_v32  ;;  %v7701_v25 = vld [vmem:[%s13347_s2 + $0x1a] ss:$0 sm:$0xff] }
 0x253   :  { %v3796_v43 = vmul.f32 %v7700_v2, %v10073_v29  ;;  %v3797_v12 = vmul.f32 %v7700_v2, %v9871_v45  ;;  %v3798_v19 = vmul.f32 %v7700_v2, %v10082_v6  ;;  %v3799_v21 = vmul.f32 %v7700_v2, %v9876_v46 }
 0x254   :  { %v3800_v52 = vmul.f32 %v7700_v2, %v10087_v48  ;;  %v3801_v11 = vmul.f32 %v7700_v2, %v9882_v8  ;;  %v3802_v27 = vmul.f32 %v7700_v2, %v10093_v35  ;;  %v3803_v57 = vmul.f32 %v7700_v2, %v9887_v59 }
 0x255   :  { %v3804_v58 = vmul.f32 %v7700_v2, %v10098_v34  ;;  %v3805_v5 = vmul.f32 %v7700_v2, %v9892_v28  ;;  %v3806_v31 = vmul.f32 %v7700_v2, %v10103_v33  ;;  %v3807_v62 = vmul.f32 %v7700_v2, %v9898_v1 }
 0x256   :  { %v3808_v30 = vmul.f32 %v7700_v2, %v10108_v44  ;;  %v3809_v50 = vmul.f32 %v7700_v2, %v10062_v22  ;;  %v3810_v37 = vmul.f32 %v7700_v2, %v10116_v63  ;;  %v3827_v17 = vrot.slane %v3795_v14, 2 }
 0x257   :  { %v3828_v53 = vrot.slane %v3796_v43, 2  ;;  %v3830_v56 = vrot.slane %v3797_v12, 2  ;;  %v3831_v16 = vrot.slane %v3798_v19, 2  ;;  %v3833_v47 = vrot.slane %v3799_v21, 2 }
 0x258   :  { %v3834_v10 = vrot.slane %v3800_v52, 2  ;;  %v3836_v9 = vrot.slane %v3801_v11, 2  ;;  %v3837_v55 = vrot.slane %v3802_v27, 2  ;;  %v3839_v36 = vrot.slane %v3803_v57, 2 }
 0x259   :  { %v3829_v7 = vsel %vm183_vm1, %v3827_v17, %v3828_v53  ;;  %v3840_v13 = vrot.slane %v3804_v58, 2  ;;  %v3832_v26 = vsel %vm183_vm1, %v3830_v56, %v3831_v16  ;;  %v3842_v40 = vrot.slane %v3805_v5, 2 }
 0x25a   :  { %v3835_v51 = vsel %vm183_vm1, %v3833_v47, %v3834_v10  ;;  %v3843_v3 = vrot.slane %v3806_v31, 2  ;;  %v3838_v61 = vsel %vm183_vm1, %v3836_v9, %v3837_v55  ;;  %v3845_v49 = vrot.slane %v3807_v62, 2 }
 0x25b   :  { %v3841_v15 = vsel %vm183_vm1, %v3839_v36, %v3840_v13  ;;  %v3846_v2 = vrot.slane %v3808_v30, 2  ;;  %v3792_v0 = vadd.f32 %v3776_v42, %v3718_v41  ;;  %v3848_v60 = vrot.slane %v3809_v50, 2 }
 0x25c   :  { %v3844_v38 = vsel %vm183_vm1, %v3842_v40, %v3843_v3  ;;  %v3849_v14 = vrot.slane %v3810_v37, 2  ;;  %v3859_v12 = vadd.f32 %v3829_v7, %v3785_v20  ;;  %v3860_v19 = vadd.f32 %v3832_v26, %v3786_v54 }
 0x25d   :  { %v3847_v43 = vsel %vm183_vm1, %v3845_v49, %v3846_v2  ;;  %v3861_v21 = vadd.f32 %v3835_v51, %v3787_v4  ;;  %v3862_v11 = vadd.f32 %v3838_v61, %v3788_v23  ;;  %v3863_v27 = vadd.f32 %v3841_v15, %v3789_v24 }
 0x25e   :  { %v3850_v52 = vsel %vm183_vm1, %v3848_v60, %v3849_v14  ;;  %v3864_v57 = vadd.f32 %v3844_v38, %v3790_v39  ;;  %v3865_v58 = vadd.f32 %v3847_v43, %v3791_v18  ;;  %v3869_v5 = vmul.f32 %v7701_v25, %v9866_v32  ;;  %v7702_v38 = vld [vmem:[%s13347_s2 + $0x1d] ss:$0 sm:$0xff] }
 0x25f   :  { %v3870_v31 = vmul.f32 %v7701_v25, %v10073_v29  ;;  %v3871_v41 = vmul.f32 %v7701_v25, %v9871_v45  ;;  %v3872_v42 = vmul.f32 %v7701_v25, %v10082_v6  ;;  %v3873_v62 = vmul.f32 %v7701_v25, %v9876_v46 }
 0x260   :  { %v3874_v20 = vmul.f32 %v7701_v25, %v10087_v48  ;;  %v3875_v54 = vmul.f32 %v7701_v25, %v9882_v8  ;;  %v3876_v4 = vmul.f32 %v7701_v25, %v10093_v35  ;;  %v3877_v23 = vmul.f32 %v7701_v25, %v9887_v59 }
 0x261   :  { %v3878_v24 = vmul.f32 %v7701_v25, %v10098_v34  ;;  %v3879_v39 = vmul.f32 %v7701_v25, %v9892_v28  ;;  %v3880_v18 = vmul.f32 %v7701_v25, %v10103_v33  ;;  %v3881_v30 = vmul.f32 %v7701_v25, %v9898_v1 }
 0x262   :  { %v3882_v50 = vmul.f32 %v7701_v25, %v10108_v44  ;;  %v3883_v37 = vmul.f32 %v7701_v25, %v10062_v22  ;;  %v3884_v17 = vmul.f32 %v7701_v25, %v10116_v63  ;;  %v3901_v53 = vrot.slane %v3869_v5, 3 }
 0x263   :  { %v3902_v56 = vrot.slane %v3870_v31, 3  ;;  %v3904_v16 = vrot.slane %v3871_v41, 3  ;;  %v3905_v47 = vrot.slane %v3872_v42, 3  ;;  %v3907_v10 = vrot.slane %v3873_v62, 3 }
 0x264   :  { %v3908_v9 = vrot.slane %v3874_v20, 3  ;;  %v3910_v7 = vrot.slane %v3875_v54, 3  ;;  %v3911_v36 = vrot.slane %v3876_v4, 3  ;;  %v3913_v13 = vrot.slane %v3877_v23, 3 }
 0x265   :  { %v3903_v55 = vsel %vm258_vm2, %v3901_v53, %v3902_v56  ;;  %v3914_v26 = vrot.slane %v3878_v24, 3  ;;  %v3906_v51 = vsel %vm258_vm2, %v3904_v16, %v3905_v47  ;;  %v3916_v3 = vrot.slane %v3879_v39, 3 }
 0x266   :  { %v3909_v40 = vsel %vm258_vm2, %v3907_v10, %v3908_v9  ;;  %v3917_v61 = vrot.slane %v3880_v18, 3  ;;  %v3912_v15 = vsel %vm258_vm2, %v3910_v7, %v3911_v36  ;;  %v3919_v2 = vrot.slane %v3881_v30, 3 }
 0x267   :  { %v3915_v49 = vsel %vm258_vm2, %v3913_v13, %v3914_v26  ;;  %v3920_v25 = vrot.slane %v3882_v50, 3  ;;  %v3866_v60 = vadd.f32 %v3850_v52, %v3792_v0  ;;  %v3922_v43 = vrot.slane %v3883_v37, 3 }
 0x268   :  { %v3918_v14 = vsel %vm258_vm2, %v3916_v3, %v3917_v61  ;;  %v3923_v5 = vrot.slane %v3884_v17, 3  ;;  %v3933_v41 = vadd.f32 %v3903_v55, %v3859_v12  ;;  %v3934_v42 = vadd.f32 %v3906_v51, %v3860_v19  ;;  %v7703_v51 = vld [vmem:[%s13347_s2 + $0x20] ss:$0 sm:$0xff] }
 0x269   :  { %v3921_v31 = vsel %vm258_vm2, %v3919_v2, %v3920_v25  ;;  %v3935_v62 = vadd.f32 %v3909_v40, %v3861_v21  ;;  %v3936_v54 = vadd.f32 %v3912_v15, %v3862_v11  ;;  %v3937_v4 = vadd.f32 %v3915_v49, %v3863_v27 }
 0x26a   :  { %v3924_v20 = vsel %vm258_vm2, %v3922_v43, %v3923_v5  ;;  %v3938_v23 = vadd.f32 %v3918_v14, %v3864_v57  ;;  %v3939_v24 = vadd.f32 %v3921_v31, %v3865_v58  ;;  %v3943_v39 = vmul.f32 %v7702_v38, %v9866_v32 }
 0x26b   :  { %v3944_v18 = vmul.f32 %v7702_v38, %v10073_v29  ;;  %v3945_v0 = vmul.f32 %v7702_v38, %v9871_v45  ;;  %v3946_v52 = vmul.f32 %v7702_v38, %v10082_v6  ;;  %v3947_v30 = vmul.f32 %v7702_v38, %v9876_v46 }
 0x26c   :  { %v3948_v12 = vmul.f32 %v7702_v38, %v10087_v48  ;;  %v3949_v19 = vmul.f32 %v7702_v38, %v9882_v8  ;;  %v3950_v21 = vmul.f32 %v7702_v38, %v10093_v35  ;;  %v3951_v11 = vmul.f32 %v7702_v38, %v9887_v59 }
 0x26d   :  { %v3952_v27 = vmul.f32 %v7702_v38, %v10098_v34  ;;  %v3953_v32 = vmul.f32 %v7702_v38, %v9892_v28  ;;  %v3954_v29 = vmul.f32 %v7702_v38, %v10103_v33  ;;  %v3955_v57 = vmul.f32 %v7702_v38, %v9898_v1 }
 0x26e   :  { %v3956_v6 = vmul.f32 %v7702_v38, %v10108_v44  ;;  %v3957_v58 = vmul.f32 %v7702_v38, %v10062_v22  ;;  %v3958_v48 = vmul.f32 %v7702_v38, %v10116_v63  ;;  %v3975_v50 = vrot.slane %v3943_v39, 4  ;;  %v10226_v39 = vld [vmem:[%s13346_s0 + $0x210] sm:$0xff] }
 0x26f   :  { %v3976_v37 = vrot.slane %v3944_v18, 4  ;;  %v3978_v17 = vrot.slane %v3945_v0, 4  ;;  %v3979_v35 = vrot.slane %v3946_v52, 4  ;;  %v3981_v53 = vrot.slane %v3947_v30, 4  ;;  %v10246_v52 = vld [vmem:[%s13346_s0 + $0x1b8] sm:$0xf] }
 0x270   :  { %v3982_v56 = vrot.slane %v3948_v12, 4  ;;  %v3984_v16 = vrot.slane %v3949_v19, 4  ;;  %v3985_v47 = vrot.slane %v3950_v21, 4  ;;  %v3987_v10 = vrot.slane %v3951_v11, 4  ;;  %v10251_v30 = vld [vmem:[%s13346_s0 + $0x1c8] sm:$0xf] }
 0x271   :  { %v3977_v34 = vsel %vm333_vm3, %v3975_v50, %v3976_v37  ;;  %v3988_v33 = vrot.slane %v3952_v27, 4  ;;  %v3980_v9 = vsel %vm333_vm3, %v3978_v17, %v3979_v35  ;;  %v3990_v7 = vrot.slane %v3953_v32, 4  ;;  %v10257_v11 = vld [vmem:[%s13346_s0 + $0x1d8] sm:$0xf]  ;;  %v10262_v27 = vld [vmem:[%s13346_s0 + $0x1e8] sm:$0xf] }
 0x272   :  { %v3983_v44 = vsel %vm333_vm3, %v3981_v53, %v3982_v56  ;;  %v3991_v55 = vrot.slane %v3954_v29, 4  ;;  %v3986_v63 = vsel %vm333_vm3, %v3984_v16, %v3985_v47  ;;  %v3993_v13 = vrot.slane %v3955_v57, 4  ;;  %v10280_v53 = vld [vmem:[%s13346_s0 + $0x218] sm:$0xf] }
 0x273   :  { %v3989_v36 = vsel %vm333_vm3, %v3987_v10, %v3988_v33  ;;  %v3994_v26 = vrot.slane %v3956_v6, 4  ;;  %v3940_v40 = vadd.f32 %v3924_v20, %v3866_v60  ;;  %v3996_v61 = vrot.slane %v3957_v58, 4  ;;  %v10267_v58 = vld [vmem:[%s13346_s0 + $0x1f8] sm:$0xf] }
 0x274   :  { %v3992_v3 = vsel %vm333_vm3, %v3990_v7, %v3991_v55  ;;  %v3997_v15 = vrot.slane %v3958_v48, 4  ;;  %v4007_v2 = vadd.f32 %v3977_v34, %v3933_v41  ;;  %v4008_v25 = vadd.f32 %v3980_v9, %v3934_v42  ;;  %v7704_v41 = vld [vmem:[%s13347_s2 + $0x23] ss:$0 sm:$0xff]  ;;  %v10237_v42 = vld [vmem:[%s13346_s0 + $0x1a8] sm:$0xf] }
 0x275   :  { %v3995_v49 = vsel %vm333_vm3, %v3993_v13, %v3994_v26  ;;  %v4009_v38 = vadd.f32 %v3983_v44, %v3935_v62  ;;  %v4010_v43 = vadd.f32 %v3986_v63, %v3936_v54  ;;  %v4011_v5 = vadd.f32 %v3989_v36, %v3937_v4  ;;  %v10272_v48 = vld [vmem:[%s13346_s0 + $0x208] sm:$0xf] }
 0x276   :  { %v3998_v14 = vsel %vm333_vm3, %v3996_v61, %v3997_v15  ;;  %v4012_v31 = vadd.f32 %v3992_v3, %v3938_v23  ;;  %v4013_v60 = vadd.f32 %v3995_v49, %v3939_v24  ;;  %v4034_v20 = vmul.f32 %v7703_v51, %v9871_v45 }
 0x277   :  { %v4035_v18 = vmul.f32 %v7703_v51, %v9876_v46  ;;  %v4036_v0 = vmul.f32 %v7703_v51, %v9882_v8  ;;  %v4037_v62 = vmul.f32 %v7703_v51, %v9887_v59  ;;  %v4038_v54 = vmul.f32 %v7703_v51, %v9892_v28 }
 0x278   :  { %v4039_v4 = vmul.f32 %v7703_v51, %v9898_v1  ;;  %v4040_v23 = vmul.f32 %v7703_v51, %v10062_v22  ;;  %v4014_v24 = vadd.f32 %v3998_v14, %v3940_v40  ;;  %v4041_v12 = vmul.f32 %v7703_v51, %v10226_v39 }
 0x279   :  { %v4042_v19 = vadd.f32 %v4034_v20, %v4007_v2  ;;  %v4043_v21 = vadd.f32 %v4035_v18, %v4008_v25  ;;  %v4044_v32 = vadd.f32 %v4036_v0, %v4009_v38  ;;  %v4045_v29 = vadd.f32 %v4037_v62, %v4010_v43 }
 0x27a   :  { %v4046_v57 = vadd.f32 %v4038_v54, %v4011_v5  ;;  %v4047_v6 = vadd.f32 %v4039_v4, %v4012_v31  ;;  %v4048_v50 = vadd.f32 %v4040_v23, %v4013_v60  ;;  %v4052_v37 = vmul.f32 %v7704_v41, %v9871_v45  ;;  %v7705_v31 = vld [vmem:[%s13347_s2 + $0x26] ss:$0 sm:$0xff] }
 0x27b   :  { %v4053_v17 = vmul.f32 %v7704_v41, %v10237_v42  ;;  %v4054_v35 = vmul.f32 %v7704_v41, %v9876_v46  ;;  %v4055_v56 = vmul.f32 %v7704_v41, %v10246_v52  ;;  %v4056_v16 = vmul.f32 %v7704_v41, %v9882_v8 }
 0x27c   :  { %v4057_v34 = vmul.f32 %v7704_v41, %v10251_v30  ;;  %v4058_v47 = vmul.f32 %v7704_v41, %v9887_v59  ;;  %v4059_v10 = vmul.f32 %v7704_v41, %v10257_v11  ;;  %v4060_v45 = vmul.f32 %v7704_v41, %v9892_v28 }
 0x27d   :  { %v4061_v33 = vmul.f32 %v7704_v41, %v10262_v27  ;;  %v4062_v46 = vmul.f32 %v7704_v41, %v9898_v1  ;;  %v4063_v9 = vmul.f32 %v7704_v41, %v10267_v58  ;;  %v4064_v44 = vmul.f32 %v7704_v41, %v10062_v22 }
 0x27e   :  { %v4065_v7 = vmul.f32 %v7704_v41, %v10272_v48  ;;  %v4066_v8 = vmul.f32 %v7704_v41, %v10226_v39  ;;  %v4067_v55 = vmul.f32 %v7704_v41, %v10280_v53  ;;  %v4084_v63 = vrot.slane %v4052_v37, 1 }
 0x27f   :  { %v4085_v59 = vrot.slane %v4053_v17, 1  ;;  %v4087_v36 = vrot.slane %v4054_v35, 1  ;;  %v4088_v13 = vrot.slane %v4055_v56, 1  ;;  %v4090_v26 = vrot.slane %v4056_v16, 1  ;;  %v10309_v16 = vld [vmem:[%s13346_s0 + $0x1a0] sm:$0xff] }
 0x280   :  { %v4091_v28 = vrot.slane %v4057_v34, 1  ;;  %v4093_v51 = vrot.slane %v4058_v47, 1  ;;  %v4094_v1 = vrot.slane %v4059_v10, 1  ;;  %v4096_v3 = vrot.slane %v4060_v45, 1  ;;  %v10337_v10 = vld [vmem:[%s13346_s0 + $0x1e0] sm:$0xff] }
 0x281   :  { %v4086_v40 = vsel %vm108_vm0, %v4084_v63, %v4085_v59  ;;  %v4097_v61 = vrot.slane %v4061_v33, 1  ;;  %v4089_v15 = vsel %vm108_vm0, %v4087_v36, %v4088_v13  ;;  %v4099_v2 = vrot.slane %v4062_v46, 1  ;;  %v10344_v46 = vld [vmem:[%s13346_s0 + $0x1f0] sm:$0xff] }
 0x282   :  { %v4092_v49 = vsel %vm108_vm0, %v4090_v26, %v4091_v28  ;;  %v4100_v25 = vrot.slane %v4063_v9, 1  ;;  %v4095_v38 = vsel %vm108_vm0, %v4093_v51, %v4094_v1  ;;  %v4102_v43 = vrot.slane %v4064_v44, 1 }
 0x283   :  { %v4098_v14 = vsel %vm108_vm0, %v4096_v3, %v4097_v61  ;;  %v4103_v5 = vrot.slane %v4065_v7, 1  ;;  %v4049_v60 = vadd.f32 %v4041_v12, %v4014_v24  ;;  %v4105_v18 = vrot.slane %v4066_v8, 1 }
 0x284   :  { %v4101_v20 = vsel %vm108_vm0, %v4099_v2, %v4100_v25  ;;  %v4106_v0 = vrot.slane %v4067_v55, 1  ;;  %v4116_v62 = vadd.f32 %v4086_v40, %v4042_v19  ;;  %v4117_v54 = vadd.f32 %v4089_v15, %v4043_v21  ;;  %v10316_v19 = vld [vmem:[%s13346_s0 + $0x1b0] sm:$0xff] }
 0x285   :  { %v4104_v41 = vsel %vm108_vm0, %v4102_v43, %v4103_v5  ;;  %v4118_v4 = vadd.f32 %v4092_v49, %v4044_v32  ;;  %v4119_v37 = vadd.f32 %v4095_v38, %v4045_v29  ;;  %v4120_v17 = vadd.f32 %v4098_v14, %v4046_v57  ;;  %v10323_v29 = vld [vmem:[%s13346_s0 + $0x1c0] sm:$0xff] }
 0x286   :  { %v4107_v23 = vsel %vm108_vm0, %v4105_v18, %v4106_v0  ;;  %v4121_v35 = vadd.f32 %v4101_v20, %v4047_v6  ;;  %v4122_v56 = vadd.f32 %v4104_v41, %v4048_v50  ;;  %v4126_v24 = vmul.f32 %v10309_v16, %v7705_v31  ;;  %v10330_v50 = vld [vmem:[%s13346_s0 + $0x1d0] sm:$0xff]  ;;  %v7706_v20 = vld [vmem:[%s13347_s2 + $0x29] ss:$0 sm:$0xff] }
 0x287   :  { %v4127_v12 = vmul.f32 %v7705_v31, %v10237_v42  ;;  %v4128_v21 = vmul.f32 %v10316_v19, %v7705_v31  ;;  %v4129_v32 = vmul.f32 %v7705_v31, %v10246_v52  ;;  %v4130_v57 = vmul.f32 %v10323_v29, %v7705_v31 }
 0x288   :  { %v4131_v6 = vmul.f32 %v7705_v31, %v10251_v30  ;;  %v4132_v34 = vmul.f32 %v10330_v50, %v7705_v31  ;;  %v4133_v47 = vmul.f32 %v7705_v31, %v10257_v11  ;;  %v4134_v45 = vmul.f32 %v10337_v10, %v7705_v31 }
 0x289   :  { %v4135_v33 = vmul.f32 %v7705_v31, %v10262_v27  ;;  %v4136_v9 = vmul.f32 %v10344_v46, %v7705_v31  ;;  %v4137_v44 = vmul.f32 %v7705_v31, %v10267_v58  ;;  %v4138_v7 = vmul.f32 %v7705_v31, %v10062_v22 }
 0x28a   :  { %v4139_v8 = vmul.f32 %v7705_v31, %v10272_v48  ;;  %v4140_v55 = vmul.f32 %v7705_v31, %v10226_v39  ;;  %v4141_v63 = vmul.f32 %v7705_v31, %v10280_v53  ;;  %v4158_v59 = vrot.slane %v4126_v24, 2 }
 0x28b   :  { %v4159_v36 = vrot.slane %v4127_v12, 2  ;;  %v4161_v13 = vrot.slane %v4128_v21, 2  ;;  %v4162_v26 = vrot.slane %v4129_v32, 2  ;;  %v4164_v28 = vrot.slane %v4130_v57, 2 }
 0x28c   :  { %v4165_v51 = vrot.slane %v4131_v6, 2  ;;  %v4167_v40 = vrot.slane %v4132_v34, 2  ;;  %v4168_v3 = vrot.slane %v4133_v47, 2  ;;  %v4170_v61 = vrot.slane %v4134_v45, 2 }
 0x28d   :  { %v4160_v1 = vsel %vm183_vm1, %v4158_v59, %v4159_v36  ;;  %v4171_v15 = vrot.slane %v4135_v33, 2  ;;  %v4163_v49 = vsel %vm183_vm1, %v4161_v13, %v4162_v26  ;;  %v4173_v25 = vrot.slane %v4136_v9, 2 }
 0x28e   :  { %v4166_v2 = vsel %vm183_vm1, %v4164_v28, %v4165_v51  ;;  %v4174_v38 = vrot.slane %v4137_v44, 2  ;;  %v4169_v14 = vsel %vm183_vm1, %v4167_v40, %v4168_v3  ;;  %v4176_v5 = vrot.slane %v4138_v7, 2 }
 0x28f   :  { %v4172_v43 = vsel %vm183_vm1, %v4170_v61, %v4171_v15  ;;  %v4177_v31 = vrot.slane %v4139_v8, 2  ;;  %v4123_v18 = vadd.f32 %v4107_v23, %v4049_v60  ;;  %v4179_v41 = vrot.slane %v4140_v55, 2 }
 0x290   :  { %v4175_v0 = vsel %vm183_vm1, %v4173_v25, %v4174_v38  ;;  %v4180_v24 = vrot.slane %v4141_v63, 2  ;;  %v4190_v21 = vadd.f32 %v4160_v1, %v4116_v62  ;;  %v4191_v32 = vadd.f32 %v4163_v49, %v4117_v54 }
 0x291   :  { %v4178_v12 = vsel %vm183_vm1, %v4176_v5, %v4177_v31  ;;  %v4192_v57 = vadd.f32 %v4166_v2, %v4118_v4  ;;  %v4193_v34 = vadd.f32 %v4169_v14, %v4119_v37  ;;  %v4194_v47 = vadd.f32 %v4172_v43, %v4120_v17 }
 0x292   :  { %v4181_v6 = vsel %vm183_vm1, %v4179_v41, %v4180_v24  ;;  %v4195_v45 = vadd.f32 %v4175_v0, %v4121_v35  ;;  %v4196_v33 = vadd.f32 %v4178_v12, %v4122_v56  ;;  %v4200_v9 = vmul.f32 %v10309_v16, %v7706_v20  ;;  %v7707_v0 = vld [vmem:[%s13347_s2 + $0x2c] ss:$0 sm:$0xff] }
 0x293   :  { %v4201_v44 = vmul.f32 %v7706_v20, %v10237_v42  ;;  %v4202_v60 = vmul.f32 %v10316_v19, %v7706_v20  ;;  %v4203_v23 = vmul.f32 %v7706_v20, %v10246_v52  ;;  %v4204_v7 = vmul.f32 %v10323_v29, %v7706_v20 }
 0x294   :  { %v4205_v62 = vmul.f32 %v7706_v20, %v10251_v30  ;;  %v4206_v54 = vmul.f32 %v10330_v50, %v7706_v20  ;;  %v4207_v4 = vmul.f32 %v7706_v20, %v10257_v11  ;;  %v4208_v37 = vmul.f32 %v10337_v10, %v7706_v20 }
 0x295   :  { %v4209_v17 = vmul.f32 %v7706_v20, %v10262_v27  ;;  %v4210_v35 = vmul.f32 %v10344_v46, %v7706_v20  ;;  %v4211_v56 = vmul.f32 %v7706_v20, %v10267_v58  ;;  %v4212_v8 = vmul.f32 %v7706_v20, %v10062_v22 }
 0x296   :  { %v4213_v55 = vmul.f32 %v7706_v20, %v10272_v48  ;;  %v4214_v63 = vmul.f32 %v7706_v20, %v10226_v39  ;;  %v4215_v59 = vmul.f32 %v7706_v20, %v10280_v53  ;;  %v4232_v36 = vrot.slane %v4200_v9, 3 }
 0x297   :  { %v4233_v13 = vrot.slane %v4201_v44, 3  ;;  %v4235_v26 = vrot.slane %v4202_v60, 3  ;;  %v4236_v28 = vrot.slane %v4203_v23, 3  ;;  %v4238_v51 = vrot.slane %v4204_v7, 3 }
 0x298   :  { %v4239_v40 = vrot.slane %v4205_v62, 3  ;;  %v4241_v1 = vrot.slane %v4206_v54, 3  ;;  %v4242_v61 = vrot.slane %v4207_v4, 3  ;;  %v4244_v15 = vrot.slane %v4208_v37, 3 }
 0x299   :  { %v4234_v3 = vsel %vm258_vm2, %v4232_v36, %v4233_v13  ;;  %v4245_v49 = vrot.slane %v4209_v17, 3  ;;  %v4237_v2 = vsel %vm258_vm2, %v4235_v26, %v4236_v28  ;;  %v4247_v38 = vrot.slane %v4210_v35, 3 }
 0x29a   :  { %v4240_v25 = vsel %vm258_vm2, %v4238_v51, %v4239_v40  ;;  %v4248_v14 = vrot.slane %v4211_v56, 3  ;;  %v4243_v43 = vsel %vm258_vm2, %v4241_v1, %v4242_v61  ;;  %v4250_v31 = vrot.slane %v4212_v8, 3  ;;  %v7708_v1 = vld [vmem:[%s13347_s2 + $0x2f] ss:$0 sm:$0xff] }
 0x29b   :  { %v4246_v5 = vsel %vm258_vm2, %v4244_v15, %v4245_v49  ;;  %v4251_v20 = vrot.slane %v4213_v55, 3  ;;  %v4197_v41 = vadd.f32 %v4181_v6, %v4123_v18  ;;  %v4253_v12 = vrot.slane %v4214_v63, 3 }
 0x29c   :  { %v4249_v24 = vsel %vm258_vm2, %v4247_v38, %v4248_v14  ;;  %v4254_v9 = vrot.slane %v4215_v59, 3  ;;  %v4264_v60 = vadd.f32 %v4234_v3, %v4190_v21  ;;  %v4265_v23 = vadd.f32 %v4237_v2, %v4191_v32  ;;  %v10418_v2 = vld [vmem:[%s13346_s0 + $0x1b0] sm:$0xff] }
 0x29d   :  { %v4252_v44 = vsel %vm258_vm2, %v4250_v31, %v4251_v20  ;;  %v4266_v7 = vadd.f32 %v4240_v25, %v4192_v57  ;;  %v4267_v54 = vadd.f32 %v4243_v43, %v4193_v34  ;;  %v4268_v4 = vadd.f32 %v4246_v5, %v4194_v47  ;;  %v10423_v25 = vld [vmem:[%s13346_s0 + $0x1c0] sm:$0xff]  ;;  %v10428_v38 = vld [vmem:[%s13346_s0 + $0x1d0] sm:$0xff] }
 0x29e   :  { %v4255_v62 = vsel %vm258_vm2, %v4253_v12, %v4254_v9  ;;  %v4269_v37 = vadd.f32 %v4249_v24, %v4195_v45  ;;  %v4270_v17 = vadd.f32 %v4252_v44, %v4196_v33  ;;  %v4274_v35 = vmul.f32 %v10309_v16, %v7707_v0  ;;  %v10434_v20 = vld [vmem:[%s13346_s0 + $0x1e0] sm:$0xff] }
 0x29f   :  { %v4275_v56 = vmul.f32 %v7707_v0, %v10237_v42  ;;  %v4276_v18 = vmul.f32 %v10316_v19, %v7707_v0  ;;  %v4277_v6 = vmul.f32 %v7707_v0, %v10246_v52  ;;  %v4278_v8 = vmul.f32 %v10323_v29, %v7707_v0  ;;  %v10445_v44 = vld [vmem:[%s13346_s0 + $0x220] sm:$0xff] }
 0x2a0   :  { %v4279_v21 = vmul.f32 %v7707_v0, %v10251_v30  ;;  %v4280_v32 = vmul.f32 %v10330_v50, %v7707_v0  ;;  %v4281_v57 = vmul.f32 %v7707_v0, %v10257_v11  ;;  %v4282_v34 = vmul.f32 %v10337_v10, %v7707_v0 }
 0x2a1   :  { %v4283_v47 = vmul.f32 %v7707_v0, %v10262_v27  ;;  %v4284_v16 = vmul.f32 %v10344_v46, %v7707_v0  ;;  %v4285_v42 = vmul.f32 %v7707_v0, %v10267_v58  ;;  %v4286_v19 = vmul.f32 %v7707_v0, %v10062_v22 }
 0x2a2   :  { %v4287_v52 = vmul.f32 %v7707_v0, %v10272_v48  ;;  %v4288_v29 = vmul.f32 %v7707_v0, %v10226_v39  ;;  %v4289_v30 = vmul.f32 %v7707_v0, %v10280_v53  ;;  %v4306_v45 = vrot.slane %v4274_v35, 4  ;;  %v10439_v0 = vld [vmem:[%s13346_s0 + $0x1f0] sm:$0xff] }
 0x2a3   :  { %v4307_v50 = vrot.slane %v4275_v56, 4  ;;  %v4309_v33 = vrot.slane %v4276_v18, 4  ;;  %v4310_v11 = vrot.slane %v4277_v6, 4  ;;  %v4312_v55 = vrot.slane %v4278_v8, 4  ;;  %v7709_v35 = vld [vmem:[%s13347_s2 + $0x32] ss:$0 sm:$0xff] }
 0x2a4   :  { %v4313_v10 = vrot.slane %v4279_v21, 4  ;;  %v4315_v63 = vrot.slane %v4280_v32, 4  ;;  %v4316_v46 = vrot.slane %v4281_v57, 4  ;;  %v4318_v59 = vrot.slane %v4282_v34, 4  ;;  %v10465_v6 = vld [vmem:[%s13346_s0 + $0x1c8] sm:$0xf] }
 0x2a5   :  { %v4308_v27 = vsel %vm333_vm3, %v4306_v45, %v4307_v50  ;;  %v4319_v58 = vrot.slane %v4283_v47, 4  ;;  %v4311_v36 = vsel %vm333_vm3, %v4309_v33, %v4310_v11  ;;  %v4321_v13 = vrot.slane %v4284_v16, 4  ;;  %v10470_v8 = vld [vmem:[%s13346_s0 + $0x1d8] sm:$0xf]  ;;  %v10476_v34 = vld [vmem:[%s13346_s0 + $0x1e8] sm:$0xf] }
 0x2a6   :  { %v4314_v48 = vsel %vm333_vm3, %v4312_v55, %v4313_v10  ;;  %v4322_v26 = vrot.slane %v4285_v42, 4  ;;  %v4317_v53 = vsel %vm333_vm3, %v4315_v63, %v4316_v46  ;;  %v4324_v51 = vrot.slane %v4286_v19, 4  ;;  %v10481_v47 = vld [vmem:[%s13346_s0 + $0x1f8] sm:$0xf]  ;;  %v10499_v55 = vld [vmem:[%s13346_s0 + $0x228] sm:$0xf] }
 0x2a7   :  { %v4320_v28 = vsel %vm333_vm3, %v4318_v59, %v4319_v58  ;;  %v4325_v40 = vrot.slane %v4287_v52, 4  ;;  %v4271_v3 = vadd.f32 %v4255_v62, %v4197_v41  ;;  %v4327_v15 = vrot.slane %v4288_v29, 4  ;;  %v10486_v29 = vld [vmem:[%s13346_s0 + $0x208] sm:$0xf] }
 0x2a8   :  { %v4323_v61 = vsel %vm333_vm3, %v4321_v13, %v4322_v26  ;;  %v4328_v49 = vrot.slane %v4289_v30, 4  ;;  %v4338_v43 = vadd.f32 %v4308_v27, %v4264_v60  ;;  %v4339_v5 = vadd.f32 %v4311_v36, %v4265_v23  ;;  %v10491_v30 = vld [vmem:[%s13346_s0 + $0x218] sm:$0xf] }
 0x2a9   :  { %v4326_v14 = vsel %vm333_vm3, %v4324_v51, %v4325_v40  ;;  %v4340_v31 = vadd.f32 %v4314_v48, %v4266_v7  ;;  %v4341_v24 = vadd.f32 %v4317_v53, %v4267_v54  ;;  %v4342_v12 = vadd.f32 %v4320_v28, %v4268_v4  ;;  %v10456_v54 = vld [vmem:[%s13346_s0 + $0x1b8] sm:$0xf] }
 0x2aa   :  { %v4329_v41 = vsel %vm333_vm3, %v4327_v15, %v4328_v49  ;;  %v4343_v9 = vadd.f32 %v4323_v61, %v4269_v37  ;;  %v4344_v60 = vadd.f32 %v4326_v14, %v4270_v17  ;;  %v4365_v23 = vmul.f32 %v7708_v1, %v10418_v2 }
 0x2ab   :  { %v4366_v7 = vmul.f32 %v7708_v1, %v10423_v25  ;;  %v4367_v62 = vmul.f32 %v7708_v1, %v10428_v38  ;;  %v4368_v4 = vmul.f32 %v7708_v1, %v10434_v20  ;;  %v4369_v37 = vmul.f32 %v7708_v1, %v10439_v0 }
 0x2ac   :  { %v4370_v17 = vmul.f32 %v7708_v1, %v10062_v22  ;;  %v4371_v56 = vmul.f32 %v7708_v1, %v10226_v39  ;;  %v4345_v18 = vadd.f32 %v4329_v41, %v4271_v3  ;;  %v4372_v21 = vmul.f32 %v7708_v1, %v10445_v44 }
 0x2ad   :  { %v4373_v32 = vadd.f32 %v4365_v23, %v4338_v43  ;;  %v4374_v57 = vadd.f32 %v4366_v7, %v4339_v5  ;;  %v4375_v16 = vadd.f32 %v4367_v62, %v4340_v31  ;;  %v4376_v42 = vadd.f32 %v4368_v4, %v4341_v24 }
 0x2ae   :  { %v4377_v19 = vadd.f32 %v4369_v37, %v4342_v12  ;;  %v4378_v52 = vadd.f32 %v4370_v17, %v4343_v9  ;;  %v4379_v45 = vadd.f32 %v4371_v56, %v4344_v60  ;;  %v4383_v50 = vmul.f32 %v7709_v35, %v10418_v2 }
 0x2af   :  { %v4384_v33 = vmul.f32 %v7709_v35, %v10456_v54  ;;  %v4385_v11 = vmul.f32 %v7709_v35, %v10423_v25  ;;  %v4386_v10 = vmul.f32 %v7709_v35, %v10465_v6  ;;  %v4387_v63 = vmul.f32 %v7709_v35, %v10428_v38 }
 0x2b0   :  { %v4388_v27 = vmul.f32 %v7709_v35, %v10470_v8  ;;  %v4389_v46 = vmul.f32 %v7709_v35, %v10434_v20  ;;  %v4390_v59 = vmul.f32 %v7709_v35, %v10476_v34  ;;  %v4391_v58 = vmul.f32 %v7709_v35, %v10439_v0 }
 0x2b1   :  { %v4392_v36 = vmul.f32 %v7709_v35, %v10481_v47  ;;  %v4393_v48 = vmul.f32 %v7709_v35, %v10062_v22  ;;  %v4394_v13 = vmul.f32 %v7709_v35, %v10486_v29  ;;  %v4395_v26 = vmul.f32 %v7709_v35, %v10226_v39 }
 0x2b2   :  { %v4396_v53 = vmul.f32 %v7709_v35, %v10491_v30  ;;  %v4397_v28 = vmul.f32 %v7709_v35, %v10445_v44  ;;  %v4398_v51 = vmul.f32 %v7709_v35, %v10499_v55  ;;  %v4415_v40 = vrot.slane %v4383_v50, 1  ;;  %v7710_v35 = vld [vmem:[%s13347_s2 + $0x35] ss:$0 sm:$0xff] }
 0x2b3   :  { %v4416_v1 = vrot.slane %v4384_v33, 1  ;;  %v4418_v3 = vrot.slane %v4385_v11, 1  ;;  %v4419_v61 = vrot.slane %v4386_v10, 1  ;;  %v4421_v15 = vrot.slane %v4387_v63, 1 }
 0x2b4   :  { %v4422_v49 = vrot.slane %v4388_v27, 1  ;;  %v4424_v14 = vrot.slane %v4389_v46, 1  ;;  %v4425_v22 = vrot.slane %v4390_v59, 1  ;;  %v4427_v5 = vrot.slane %v4391_v58, 1 }
 0x2b5   :  { %v4417_v43 = vsel %vm108_vm0, %v4415_v40, %v4416_v1  ;;  %v4428_v31 = vrot.slane %v4392_v36, 1  ;;  %v4420_v41 = vsel %vm108_vm0, %v4418_v3, %v4419_v61  ;;  %v4430_v12 = vrot.slane %v4393_v48, 1 }
 0x2b6   :  { %v4423_v24 = vsel %vm108_vm0, %v4421_v15, %v4422_v49  ;;  %v4431_v9 = vrot.slane %v4394_v13, 1  ;;  %v4426_v60 = vsel %vm108_vm0, %v4424_v14, %v4425_v22  ;;  %v4433_v7 = vrot.slane %v4395_v26, 1 }
 0x2b7   :  { %v4429_v23 = vsel %vm108_vm0, %v4427_v5, %v4428_v31  ;;  %v4434_v62 = vrot.slane %v4396_v53, 1  ;;  %v4380_v4 = vadd.f32 %v4372_v21, %v4345_v18  ;;  %v4436_v17 = vrot.slane %v4397_v28, 1 }
 0x2b8   :  { %v4432_v37 = vsel %vm108_vm0, %v4430_v12, %v4431_v9  ;;  %v4437_v56 = vrot.slane %v4398_v51, 1  ;;  %v4447_v33 = vadd.f32 %v4417_v43, %v4373_v32  ;;  %v4448_v11 = vadd.f32 %v4420_v41, %v4374_v57 }
 0x2b9   :  { %v4435_v50 = vsel %vm108_vm0, %v4433_v7, %v4434_v62  ;;  %v4449_v10 = vadd.f32 %v4423_v24, %v4375_v16  ;;  %v4450_v27 = vadd.f32 %v4426_v60, %v4376_v42  ;;  %v4451_v46 = vadd.f32 %v4429_v23, %v4377_v19 }
 0x2ba   :  { %v4438_v63 = vsel %vm108_vm0, %v4436_v17, %v4437_v56  ;;  %v4452_v59 = vadd.f32 %v4432_v37, %v4378_v52  ;;  %v4453_v58 = vadd.f32 %v4435_v50, %v4379_v45  ;;  %v4457_v36 = vmul.f32 %v7710_v35, %v10418_v2  ;;  %v10538_v52 = vld [vmem:[%s13346_s0 + $0x200] sm:$0xff]  ;;  %v7711_v37 = vld [vmem:[%s13347_s2 + $0x38] ss:$0 sm:$0xff] }
 0x2bb   :  { %v4458_v48 = vmul.f32 %v7710_v35, %v10456_v54  ;;  %v4459_v18 = vmul.f32 %v7710_v35, %v10423_v25  ;;  %v4460_v21 = vmul.f32 %v7710_v35, %v10465_v6  ;;  %v4461_v13 = vmul.f32 %v7710_v35, %v10428_v38 }
 0x2bc   :  { %v4462_v32 = vmul.f32 %v7710_v35, %v10470_v8  ;;  %v4463_v57 = vmul.f32 %v7710_v35, %v10434_v20  ;;  %v4464_v16 = vmul.f32 %v7710_v35, %v10476_v34  ;;  %v4465_v42 = vmul.f32 %v7710_v35, %v10439_v0 }
 0x2bd   :  { %v4466_v19 = vmul.f32 %v7710_v35, %v10481_v47  ;;  %v4467_v45 = vmul.f32 %v10538_v52, %v7710_v35  ;;  %v4468_v26 = vmul.f32 %v7710_v35, %v10486_v29  ;;  %v4469_v53 = vmul.f32 %v7710_v35, %v10226_v39 }
 0x2be   :  { %v4470_v28 = vmul.f32 %v7710_v35, %v10491_v30  ;;  %v4471_v51 = vmul.f32 %v7710_v35, %v10445_v44  ;;  %v4472_v40 = vmul.f32 %v7710_v35, %v10499_v55  ;;  %v4489_v1 = vrot.slane %v4457_v36, 2 }
 0x2bf   :  { %v4490_v3 = vrot.slane %v4458_v48, 2  ;;  %v4492_v61 = vrot.slane %v4459_v18, 2  ;;  %v4493_v15 = vrot.slane %v4460_v21, 2  ;;  %v4495_v49 = vrot.slane %v4461_v13, 2 }
 0x2c0   :  { %v4496_v14 = vrot.slane %v4462_v32, 2  ;;  %v4498_v43 = vrot.slane %v4463_v57, 2  ;;  %v4499_v5 = vrot.slane %v4464_v16, 2  ;;  %v4501_v31 = vrot.slane %v4465_v42, 2 }
 0x2c1   :  { %v4491_v22 = vsel %vm183_vm1, %v4489_v1, %v4490_v3  ;;  %v4502_v41 = vrot.slane %v4466_v19, 2  ;;  %v4494_v24 = vsel %vm183_vm1, %v4492_v61, %v4493_v15  ;;  %v4504_v9 = vrot.slane %v4467_v45, 2 }
 0x2c2   :  { %v4497_v12 = vsel %vm183_vm1, %v4495_v49, %v4496_v14  ;;  %v4505_v60 = vrot.slane %v4468_v26, 2  ;;  %v4500_v23 = vsel %vm183_vm1, %v4498_v43, %v4499_v5  ;;  %v4507_v62 = vrot.slane %v4469_v53, 2 }
 0x2c3   :  { %v4503_v7 = vsel %vm183_vm1, %v4501_v31, %v4502_v41  ;;  %v4508_v35 = vrot.slane %v4470_v28, 2  ;;  %v4454_v17 = vadd.f32 %v4438_v63, %v4380_v4  ;;  %v4510_v50 = vrot.slane %v4471_v51, 2 }
 0x2c4   :  { %v4506_v56 = vsel %vm183_vm1, %v4504_v9, %v4505_v60  ;;  %v4511_v36 = vrot.slane %v4472_v40, 2  ;;  %v4521_v18 = vadd.f32 %v4491_v22, %v4447_v33  ;;  %v4522_v21 = vadd.f32 %v4494_v24, %v4448_v11 }
 0x2c5   :  { %v4509_v48 = vsel %vm183_vm1, %v4507_v62, %v4508_v35  ;;  %v4523_v13 = vadd.f32 %v4497_v12, %v4449_v10  ;;  %v4524_v57 = vadd.f32 %v4500_v23, %v4450_v27  ;;  %v4525_v16 = vadd.f32 %v4503_v7, %v4451_v46 }
 0x2c6   :  { %v4512_v32 = vsel %vm183_vm1, %v4510_v50, %v4511_v36  ;;  %v4526_v42 = vadd.f32 %v4506_v56, %v4452_v59  ;;  %v4527_v19 = vadd.f32 %v4509_v48, %v4453_v58  ;;  %v4531_v45 = vmul.f32 %v7711_v37, %v10418_v2  ;;  %v7712_v56 = vld [vmem:[%s13347_s2 + $0x3b] ss:$0 sm:$0xff] }
 0x2c7   :  { %v4532_v26 = vmul.f32 %v7711_v37, %v10456_v54  ;;  %v4533_v4 = vmul.f32 %v7711_v37, %v10423_v25  ;;  %v4534_v63 = vmul.f32 %v7711_v37, %v10465_v6  ;;  %v4535_v53 = vmul.f32 %v7711_v37, %v10428_v38 }
 0x2c8   :  { %v4536_v33 = vmul.f32 %v7711_v37, %v10470_v8  ;;  %v4537_v11 = vmul.f32 %v7711_v37, %v10434_v20  ;;  %v4538_v10 = vmul.f32 %v7711_v37, %v10476_v34  ;;  %v4539_v27 = vmul.f32 %v7711_v37, %v10439_v0 }
 0x2c9   :  { %v4540_v46 = vmul.f32 %v7711_v37, %v10481_v47  ;;  %v4541_v59 = vmul.f32 %v10538_v52, %v7711_v37  ;;  %v4542_v58 = vmul.f32 %v7711_v37, %v10486_v29  ;;  %v4543_v28 = vmul.f32 %v7711_v37, %v10226_v39 }
 0x2ca   :  { %v4544_v51 = vmul.f32 %v7711_v37, %v10491_v30  ;;  %v4545_v40 = vmul.f32 %v7711_v37, %v10445_v44  ;;  %v4546_v1 = vmul.f32 %v7711_v37, %v10499_v55  ;;  %v4563_v3 = vrot.slane %v4531_v45, 3 }
 0x2cb   :  { %v4564_v61 = vrot.slane %v4532_v26, 3  ;;  %v4566_v15 = vrot.slane %v4533_v4, 3  ;;  %v4567_v49 = vrot.slane %v4534_v63, 3  ;;  %v4569_v14 = vrot.slane %v4535_v53, 3 }
 0x2cc   :  { %v4570_v43 = vrot.slane %v4536_v33, 3  ;;  %v4572_v22 = vrot.slane %v4537_v11, 3  ;;  %v4573_v31 = vrot.slane %v4538_v10, 3  ;;  %v4575_v41 = vrot.slane %v4539_v27, 3 }
 0x2cd   :  { %v4565_v5 = vsel %vm258_vm2, %v4563_v3, %v4564_v61  ;;  %v4576_v24 = vrot.slane %v4540_v46, 3  ;;  %v4568_v12 = vsel %vm258_vm2, %v4566_v15, %v4567_v49  ;;  %v4578_v60 = vrot.slane %v4541_v59, 3 }
 0x2ce   :  { %v4571_v9 = vsel %vm258_vm2, %v4569_v14, %v4570_v43  ;;  %v4579_v23 = vrot.slane %v4542_v58, 3  ;;  %v4574_v7 = vsel %vm258_vm2, %v4572_v22, %v4573_v31  ;;  %v4581_v35 = vrot.slane %v4543_v28, 3 }
 0x2cf   :  { %v4577_v62 = vsel %vm258_vm2, %v4575_v41, %v4576_v24  ;;  %v4582_v37 = vrot.slane %v4544_v51, 3  ;;  %v4528_v50 = vadd.f32 %v4512_v32, %v4454_v17  ;;  %v4584_v48 = vrot.slane %v4545_v40, 3  ;;  %v7713_v24 = vld [vmem:[%s13347_s2 + $0x3e] ss:$0 sm:$0xff] }
 0x2d0   :  { %v4580_v36 = vsel %vm258_vm2, %v4578_v60, %v4579_v23  ;;  %v4585_v45 = vrot.slane %v4546_v1, 3  ;;  %v4595_v4 = vadd.f32 %v4565_v5, %v4521_v18  ;;  %v4596_v63 = vadd.f32 %v4568_v12, %v4522_v21 }
 0x2d1   :  { %v4583_v26 = vsel %vm258_vm2, %v4581_v35, %v4582_v37  ;;  %v4597_v53 = vadd.f32 %v4571_v9, %v4523_v13  ;;  %v4598_v11 = vadd.f32 %v4574_v7, %v4524_v57  ;;  %v4599_v10 = vadd.f32 %v4577_v62, %v4525_v16 }
 0x2d2   :  { %v4586_v33 = vsel %vm258_vm2, %v4584_v48, %v4585_v45  ;;  %v4600_v27 = vadd.f32 %v4580_v36, %v4526_v42  ;;  %v4601_v46 = vadd.f32 %v4583_v26, %v4527_v19  ;;  %v4605_v59 = vmul.f32 %v7712_v56, %v10418_v2 }
 0x2d3   :  { %v4606_v58 = vmul.f32 %v7712_v56, %v10456_v54  ;;  %v4607_v17 = vmul.f32 %v7712_v56, %v10423_v25  ;;  %v4608_v32 = vmul.f32 %v7712_v56, %v10465_v6  ;;  %v4609_v28 = vmul.f32 %v7712_v56, %v10428_v38 }
 0x2d4   :  { %v4610_v18 = vmul.f32 %v7712_v56, %v10470_v8  ;;  %v4611_v21 = vmul.f32 %v7712_v56, %v10434_v20  ;;  %v4612_v13 = vmul.f32 %v7712_v56, %v10476_v34  ;;  %v4613_v57 = vmul.f32 %v7712_v56, %v10439_v0 }
 0x2d5   :  { %v4614_v16 = vmul.f32 %v7712_v56, %v10481_v47  ;;  %v4615_v2 = vmul.f32 %v10538_v52, %v7712_v56  ;;  %v4616_v54 = vmul.f32 %v7712_v56, %v10486_v29  ;;  %v4617_v42 = vmul.f32 %v7712_v56, %v10226_v39 }
 0x2d6   :  { %v4618_v6 = vmul.f32 %v7712_v56, %v10491_v30  ;;  %v4619_v19 = vmul.f32 %v7712_v56, %v10445_v44  ;;  %v4620_v8 = vmul.f32 %v7712_v56, %v10499_v55  ;;  %v4637_v51 = vrot.slane %v4605_v59, 4  ;;  %v10613_v56 = vld [vmem:[%s13346_s0 + $0x200] sm:$0xff] }
 0x2d7   :  { %v4638_v40 = vrot.slane %v4606_v58, 4  ;;  %v4640_v1 = vrot.slane %v4607_v17, 4  ;;  %v4641_v34 = vrot.slane %v4608_v32, 4  ;;  %v4643_v3 = vrot.slane %v4609_v28, 4  ;;  %v7714_v59 = vld [vmem:[%s13347_s2 + $0x41] ss:$0 sm:$0xff] }
 0x2d8   :  { %v4644_v61 = vrot.slane %v4610_v18, 4  ;;  %v4646_v15 = vrot.slane %v4611_v21, 4  ;;  %v4647_v52 = vrot.slane %v4612_v13, 4  ;;  %v4649_v49 = vrot.slane %v4613_v57, 4  ;;  %v10639_v32 = vld [vmem:[%s13346_s0 + $0x1d8] sm:$0xf] }
 0x2d9   :  { %v4639_v47 = vsel %vm333_vm3, %v4637_v51, %v4638_v40  ;;  %v4650_v29 = vrot.slane %v4614_v16, 4  ;;  %v4642_v14 = vsel %vm333_vm3, %v4640_v1, %v4641_v34  ;;  %v4652_v43 = vrot.slane %v4615_v2, 4  ;;  %v10644_v28 = vld [vmem:[%s13346_s0 + $0x1e8] sm:$0xf]  ;;  %v10650_v57 = vld [vmem:[%s13346_s0 + $0x1f8] sm:$0xf] }
 0x2da   :  { %v4645_v30 = vsel %vm333_vm3, %v4643_v3, %v4644_v61  ;;  %v4653_v22 = vrot.slane %v4616_v54, 4  ;;  %v4648_v55 = vsel %vm333_vm3, %v4646_v15, %v4647_v52  ;;  %v4655_v31 = vrot.slane %v4617_v42, 4  ;;  %v10655_v16 = vld [vmem:[%s13346_s0 + $0x208] sm:$0xf]  ;;  %v10673_v3 = vld [vmem:[%s13346_s0 + $0x238] sm:$0xf] }
 0x2db   :  { %v4651_v5 = vsel %vm333_vm3, %v4649_v49, %v4650_v29  ;;  %v4656_v41 = vrot.slane %v4618_v6, 4  ;;  %v4602_v12 = vadd.f32 %v4586_v33, %v4528_v50  ;;  %v4658_v60 = vrot.slane %v4619_v19, 4  ;;  %v10619_v50 = vld [vmem:[%s13346_s0 + $0x230] sm:$0xff]  ;;  %v10660_v19 = vld [vmem:[%s13346_s0 + $0x218] sm:$0xf] }
 0x2dc   :  { %v4654_v9 = vsel %vm333_vm3, %v4652_v43, %v4653_v22  ;;  %v4659_v23 = vrot.slane %v4620_v8, 4  ;;  %v4669_v62 = vadd.f32 %v4639_v47, %v4595_v4  ;;  %v4670_v35 = vadd.f32 %v4642_v14, %v4596_v63  ;;  %v10665_v8 = vld [vmem:[%s13346_s0 + $0x228] sm:$0xf] }
 0x2dd   :  { %v4657_v7 = vsel %vm333_vm3, %v4655_v31, %v4656_v41  ;;  %v4671_v37 = vadd.f32 %v4645_v30, %v4597_v53  ;;  %v4672_v48 = vadd.f32 %v4648_v55, %v4598_v11  ;;  %v4673_v45 = vadd.f32 %v4651_v5, %v4599_v10  ;;  %v10630_v11 = vld [vmem:[%s13346_s0 + $0x1c8] sm:$0xf] }
 0x2de   :  { %v4660_v36 = vsel %vm333_vm3, %v4658_v60, %v4659_v23  ;;  %v4674_v26 = vadd.f32 %v4654_v9, %v4600_v27  ;;  %v4675_v33 = vadd.f32 %v4657_v7, %v4601_v46  ;;  %v4696_v4 = vmul.f32 %v7713_v24, %v10423_v25 }
 0x2df   :  { %v4697_v63 = vmul.f32 %v7713_v24, %v10428_v38  ;;  %v4698_v53 = vmul.f32 %v7713_v24, %v10434_v20  ;;  %v4699_v10 = vmul.f32 %v7713_v24, %v10439_v0  ;;  %v4700_v27 = vmul.f32 %v7713_v24, %v10613_v56 }
 0x2e0   :  { %v4701_v46 = vmul.f32 %v7713_v24, %v10226_v39  ;;  %v4702_v58 = vmul.f32 %v7713_v24, %v10445_v44  ;;  %v4676_v17 = vadd.f32 %v4660_v36, %v4602_v12  ;;  %v4703_v18 = vmul.f32 %v7713_v24, %v10619_v50 }
 0x2e1   :  { %v4704_v21 = vadd.f32 %v4696_v4, %v4669_v62  ;;  %v4705_v13 = vadd.f32 %v4697_v63, %v4670_v35  ;;  %v4706_v2 = vadd.f32 %v4698_v53, %v4671_v37  ;;  %v4707_v54 = vadd.f32 %v4699_v10, %v4672_v48 }
 0x2e2   :  { %v4708_v42 = vadd.f32 %v4700_v27, %v4673_v45  ;;  %v4709_v6 = vadd.f32 %v4701_v46, %v4674_v26  ;;  %v4710_v51 = vadd.f32 %v4702_v58, %v4675_v33  ;;  %v4714_v40 = vmul.f32 %v7714_v59, %v10423_v25 }
 0x2e3   :  { %v4715_v1 = vmul.f32 %v7714_v59, %v10630_v11  ;;  %v4716_v34 = vmul.f32 %v7714_v59, %v10428_v38  ;;  %v4717_v61 = vmul.f32 %v7714_v59, %v10639_v32  ;;  %v4718_v15 = vmul.f32 %v7714_v59, %v10434_v20 }
 0x2e4   :  { %v4719_v47 = vmul.f32 %v7714_v59, %v10644_v28  ;;  %v4720_v52 = vmul.f32 %v7714_v59, %v10439_v0  ;;  %v4721_v49 = vmul.f32 %v7714_v59, %v10650_v57  ;;  %v4722_v29 = vmul.f32 %v7714_v59, %v10613_v56 }
 0x2e5   :  { %v4723_v14 = vmul.f32 %v7714_v59, %v10655_v16  ;;  %v4724_v30 = vmul.f32 %v7714_v59, %v10226_v39  ;;  %v4725_v43 = vmul.f32 %v7714_v59, %v10660_v19  ;;  %v4726_v22 = vmul.f32 %v7714_v59, %v10445_v44 }
 0x2e6   :  { %v4727_v55 = vmul.f32 %v7714_v59, %v10665_v8  ;;  %v4728_v5 = vmul.f32 %v7714_v59, %v10619_v50  ;;  %v4729_v31 = vmul.f32 %v7714_v59, %v10673_v3  ;;  %v4746_v41 = vrot.slane %v4714_v40, 1  ;;  %v7715_v59 = vld [vmem:[%s13347_s2 + $0x44] ss:$0 sm:$0xff] }
 0x2e7   :  { %v4747_v24 = vrot.slane %v4715_v1, 1  ;;  %v4749_v12 = vrot.slane %v4716_v34, 1  ;;  %v4750_v9 = vrot.slane %v4717_v61, 1  ;;  %v4752_v60 = vrot.slane %v4718_v15, 1 }
 0x2e8   :  { %v4753_v23 = vrot.slane %v4719_v47, 1  ;;  %v4755_v7 = vrot.slane %v4720_v52, 1  ;;  %v4756_v39 = vrot.slane %v4721_v49, 1  ;;  %v4758_v35 = vrot.slane %v4722_v29, 1 }
 0x2e9   :  { %v4748_v62 = vsel %vm108_vm0, %v4746_v41, %v4747_v24  ;;  %v4759_v37 = vrot.slane %v4723_v14, 1  ;;  %v4751_v36 = vsel %vm108_vm0, %v4749_v12, %v4750_v9  ;;  %v4761_v45 = vrot.slane %v4724_v30, 1 }
 0x2ea   :  { %v4754_v48 = vsel %vm108_vm0, %v4752_v60, %v4753_v23  ;;  %v4762_v26 = vrot.slane %v4725_v43, 1  ;;  %v4757_v33 = vsel %vm108_vm0, %v4755_v7, %v4756_v39  ;;  %v4764_v63 = vrot.slane %v4726_v22, 1 }
 0x2eb   :  { %v4760_v4 = vsel %vm108_vm0, %v4758_v35, %v4759_v37  ;;  %v4765_v53 = vrot.slane %v4727_v55, 1  ;;  %v4711_v10 = vadd.f32 %v4703_v18, %v4676_v17  ;;  %v4767_v46 = vrot.slane %v4728_v5, 1 }
 0x2ec   :  { %v4763_v27 = vsel %vm108_vm0, %v4761_v45, %v4762_v26  ;;  %v4768_v58 = vrot.slane %v4729_v31, 1  ;;  %v4778_v1 = vadd.f32 %v4748_v62, %v4704_v21  ;;  %v4779_v34 = vadd.f32 %v4751_v36, %v4705_v13 }
 0x2ed   :  { %v4766_v40 = vsel %vm108_vm0, %v4764_v63, %v4765_v53  ;;  %v4780_v61 = vadd.f32 %v4754_v48, %v4706_v2  ;;  %v4781_v47 = vadd.f32 %v4757_v33, %v4707_v54  ;;  %v4782_v52 = vadd.f32 %v4760_v4, %v4708_v42 }
 0x2ee   :  { %v4769_v15 = vsel %vm108_vm0, %v4767_v46, %v4768_v58  ;;  %v4783_v49 = vadd.f32 %v4763_v27, %v4709_v6  ;;  %v4784_v29 = vadd.f32 %v4766_v40, %v4710_v51  ;;  %v4788_v14 = vmul.f32 %v7715_v59, %v10423_v25  ;;  %v10712_v6 = vld [vmem:[%s13346_s0 + $0x210] sm:$0xff]  ;;  %v7716_v27 = vld [vmem:[%s13347_s2 + $0x47] ss:$0 sm:$0xff] }
 0x2ef   :  { %v4789_v30 = vmul.f32 %v7715_v59, %v10630_v11  ;;  %v4790_v17 = vmul.f32 %v7715_v59, %v10428_v38  ;;  %v4791_v18 = vmul.f32 %v7715_v59, %v10639_v32  ;;  %v4792_v43 = vmul.f32 %v7715_v59, %v10434_v20 }
 0x2f0   :  { %v4793_v21 = vmul.f32 %v7715_v59, %v10644_v28  ;;  %v4794_v13 = vmul.f32 %v7715_v59, %v10439_v0  ;;  %v4795_v2 = vmul.f32 %v7715_v59, %v10650_v57  ;;  %v4796_v54 = vmul.f32 %v7715_v59, %v10613_v56 }
 0x2f1   :  { %v4797_v42 = vmul.f32 %v7715_v59, %v10655_v16  ;;  %v4798_v51 = vmul.f32 %v10712_v6, %v7715_v59  ;;  %v4799_v22 = vmul.f32 %v7715_v59, %v10660_v19  ;;  %v4800_v55 = vmul.f32 %v7715_v59, %v10445_v44 }
 0x2f2   :  { %v4801_v5 = vmul.f32 %v7715_v59, %v10665_v8  ;;  %v4802_v31 = vmul.f32 %v7715_v59, %v10619_v50  ;;  %v4803_v41 = vmul.f32 %v7715_v59, %v10673_v3  ;;  %v4820_v24 = vrot.slane %v4788_v14, 2 }
 0x2f3   :  { %v4821_v12 = vrot.slane %v4789_v30, 2  ;;  %v4823_v9 = vrot.slane %v4790_v17, 2  ;;  %v4824_v60 = vrot.slane %v4791_v18, 2  ;;  %v4826_v23 = vrot.slane %v4792_v43, 2 }
 0x2f4   :  { %v4827_v7 = vrot.slane %v4793_v21, 2  ;;  %v4829_v62 = vrot.slane %v4794_v13, 2  ;;  %v4830_v35 = vrot.slane %v4795_v2, 2  ;;  %v4832_v37 = vrot.slane %v4796_v54, 2 }
 0x2f5   :  { %v4822_v39 = vsel %vm183_vm1, %v4820_v24, %v4821_v12  ;;  %v4833_v36 = vrot.slane %v4797_v42, 2  ;;  %v4825_v48 = vsel %vm183_vm1, %v4823_v9, %v4824_v60  ;;  %v4835_v26 = vrot.slane %v4798_v51, 2 }
 0x2f6   :  { %v4828_v45 = vsel %vm183_vm1, %v4826_v23, %v4827_v7  ;;  %v4836_v33 = vrot.slane %v4799_v22, 2  ;;  %v4831_v4 = vsel %vm183_vm1, %v4829_v62, %v4830_v35  ;;  %v4838_v53 = vrot.slane %v4800_v55, 2 }
 0x2f7   :  { %v4834_v63 = vsel %vm183_vm1, %v4832_v37, %v4833_v36  ;;  %v4839_v59 = vrot.slane %v4801_v5, 2  ;;  %v4785_v46 = vadd.f32 %v4769_v15, %v4711_v10  ;;  %v4841_v40 = vrot.slane %v4802_v31, 2 }
 0x2f8   :  { %v4837_v58 = vsel %vm183_vm1, %v4835_v26, %v4836_v33  ;;  %v4842_v14 = vrot.slane %v4803_v41, 2  ;;  %v4852_v17 = vadd.f32 %v4822_v39, %v4778_v1  ;;  %v4853_v18 = vadd.f32 %v4825_v48, %v4779_v34 }
 0x2f9   :  { %v4840_v30 = vsel %vm183_vm1, %v4838_v53, %v4839_v59  ;;  %v4854_v43 = vadd.f32 %v4828_v45, %v4780_v61  ;;  %v4855_v13 = vadd.f32 %v4831_v4, %v4781_v47  ;;  %v4856_v2 = vadd.f32 %v4834_v63, %v4782_v52 }
 0x2fa   :  { %v4843_v21 = vsel %vm183_vm1, %v4841_v40, %v4842_v14  ;;  %v4857_v54 = vadd.f32 %v4837_v58, %v4783_v49  ;;  %v4858_v42 = vadd.f32 %v4840_v30, %v4784_v29  ;;  %v4862_v51 = vmul.f32 %v7716_v27, %v10423_v25  ;;  %v7717_v58 = vld [vmem:[%s13347_s2 + $0x4a] ss:$0 sm:$0xff] }
 0x2fb   :  { %v4863_v22 = vmul.f32 %v7716_v27, %v10630_v11  ;;  %v4864_v10 = vmul.f32 %v7716_v27, %v10428_v38  ;;  %v4865_v15 = vmul.f32 %v7716_v27, %v10639_v32  ;;  %v4866_v55 = vmul.f32 %v7716_v27, %v10434_v20 }
 0x2fc   :  { %v4867_v1 = vmul.f32 %v7716_v27, %v10644_v28  ;;  %v4868_v34 = vmul.f32 %v7716_v27, %v10439_v0  ;;  %v4869_v61 = vmul.f32 %v7716_v27, %v10650_v57  ;;  %v4870_v47 = vmul.f32 %v7716_v27, %v10613_v56 }
 0x2fd   :  { %v4871_v52 = vmul.f32 %v7716_v27, %v10655_v16  ;;  %v4872_v49 = vmul.f32 %v10712_v6, %v7716_v27  ;;  %v4873_v29 = vmul.f32 %v7716_v27, %v10660_v19  ;;  %v4874_v5 = vmul.f32 %v7716_v27, %v10445_v44 }
 0x2fe   :  { %v4875_v31 = vmul.f32 %v7716_v27, %v10665_v8  ;;  %v4876_v41 = vmul.f32 %v7716_v27, %v10619_v50  ;;  %v4877_v24 = vmul.f32 %v7716_v27, %v10673_v3  ;;  %v4894_v12 = vrot.slane %v4862_v51, 3 }
 0x2ff   :  { %v4895_v9 = vrot.slane %v4863_v22, 3  ;;  %v4897_v60 = vrot.slane %v4864_v10, 3  ;;  %v4898_v23 = vrot.slane %v4865_v15, 3  ;;  %v4900_v7 = vrot.slane %v4866_v55, 3 }
 0x300   :  { %v4901_v62 = vrot.slane %v4867_v1, 3  ;;  %v4903_v39 = vrot.slane %v4868_v34, 3  ;;  %v4904_v37 = vrot.slane %v4869_v61, 3  ;;  %v4906_v36 = vrot.slane %v4870_v47, 3 }
 0x301   :  { %v4896_v35 = vsel %vm258_vm2, %v4894_v12, %v4895_v9  ;;  %v4907_v48 = vrot.slane %v4871_v52, 3  ;;  %v4899_v45 = vsel %vm258_vm2, %v4897_v60, %v4898_v23  ;;  %v4909_v33 = vrot.slane %v4872_v49, 3 }
 0x302   :  { %v4902_v26 = vsel %vm258_vm2, %v4900_v7, %v4901_v62  ;;  %v4910_v4 = vrot.slane %v4873_v29, 3  ;;  %v4905_v63 = vsel %vm258_vm2, %v4903_v39, %v4904_v37  ;;  %v4912_v59 = vrot.slane %v4874_v5, 3  ;;  %v7718_v7 = vld [vmem:[%s13345_s3] ss:$0 sm:$0xff] }
 0x303   :  { %v4908_v53 = vsel %vm258_vm2, %v4906_v36, %v4907_v48  ;;  %v4913_v27 = vrot.slane %v4875_v31, 3  ;;  %v4859_v40 = vadd.f32 %v4843_v21, %v4785_v46  ;;  %v4915_v30 = vrot.slane %v4876_v41, 3 }
 0x304   :  { %v4911_v14 = vsel %vm258_vm2, %v4909_v33, %v4910_v4  ;;  %v4916_v51 = vrot.slane %v4877_v24, 3  ;;  %v4926_v10 = vadd.f32 %v4896_v35, %v4852_v17  ;;  %v4927_v15 = vadd.f32 %v4899_v45, %v4853_v18  ;;  %v7719_v33 = vld [vmem:[%s13345_s3 + $0x1] ss:$0 sm:$0xff] }
 0x305   :  { %v4914_v22 = vsel %vm258_vm2, %v4912_v59, %v4913_v27  ;;  %v4928_v55 = vadd.f32 %v4902_v26, %v4854_v43  ;;  %v4929_v34 = vadd.f32 %v4905_v63, %v4855_v13  ;;  %v4930_v61 = vadd.f32 %v4908_v53, %v4856_v2 }
 0x306   :  { %v4917_v1 = vsel %vm258_vm2, %v4915_v30, %v4916_v51  ;;  %v4931_v47 = vadd.f32 %v4911_v14, %v4857_v54  ;;  %v4932_v52 = vadd.f32 %v4914_v22, %v4858_v42  ;;  %v4936_v49 = vmul.f32 %v7717_v58, %v10423_v25 }
 0x307   :  { %v4937_v29 = vmul.f32 %v7717_v58, %v10630_v11  ;;  %v4938_v46 = vmul.f32 %v7717_v58, %v10428_v38  ;;  %v4939_v21 = vmul.f32 %v7717_v58, %v10639_v32  ;;  %v4940_v5 = vmul.f32 %v7717_v58, %v10434_v20 }
 0x308   :  { %v4941_v17 = vmul.f32 %v7717_v58, %v10644_v28  ;;  %v4942_v18 = vmul.f32 %v7717_v58, %v10439_v0  ;;  %v4943_v43 = vmul.f32 %v7717_v58, %v10650_v57  ;;  %v4944_v13 = vmul.f32 %v7717_v58, %v10613_v56 }
 0x309   :  { %v4945_v2 = vmul.f32 %v7717_v58, %v10655_v16  ;;  %v4946_v25 = vmul.f32 %v10712_v6, %v7717_v58  ;;  %v4947_v11 = vmul.f32 %v7717_v58, %v10660_v19  ;;  %v4948_v38 = vmul.f32 %v7717_v58, %v10445_v44 }
 0x30a   :  { %v4949_v32 = vmul.f32 %v7717_v58, %v10665_v8  ;;  %v4950_v20 = vmul.f32 %v7717_v58, %v10619_v50  ;;  %v4951_v28 = vmul.f32 %v7717_v58, %v10673_v3  ;;  %v4968_v54 = vrot.slane %v4936_v49, 4 }
 0x30b   :  { %v4969_v0 = vrot.slane %v4937_v29, 4  ;;  %v4971_v42 = vrot.slane %v4938_v46, 4  ;;  %v4972_v57 = vrot.slane %v4939_v21, 4  ;;  %v4974_v31 = vrot.slane %v4940_v5, 4 }
 0x30c   :  { %v4975_v56 = vrot.slane %v4941_v17, 4  ;;  %v4977_v41 = vrot.slane %v4942_v18, 4  ;;  %v4978_v6 = vrot.slane %v4943_v43, 4  ;;  %v4980_v24 = vrot.slane %v4944_v13, 4 }
 0x30d   :  { %v4970_v16 = vsel %vm333_vm3, %v4968_v54, %v4969_v0  ;;  %v4981_v19 = vrot.slane %v4945_v2, 4  ;;  %v4973_v44 = vsel %vm333_vm3, %v4971_v42, %v4972_v57  ;;  %v4983_v12 = vrot.slane %v4946_v25, 4  ;;  %v5077_v54 = vld [vmem:[%s13348_s5 + $0x8] sm:$0xff]  ;;  %v5076_v0 = vld [vmem:[%s13348_s5] sm:$0xff] }
 0x30e   :  { %v4976_v8 = vsel %vm333_vm3, %v4974_v31, %v4975_v56  ;;  %v4984_v50 = vrot.slane %v4947_v11, 4  ;;  %v4979_v3 = vsel %vm333_vm3, %v4977_v41, %v4978_v6  ;;  %v4986_v60 = vrot.slane %v4948_v38, 4  ;;  %5096 = vmatpush.msra.mxu1 %v5077_v54  ;;  %v5171_v42 = vld [vmem:[%s13349_s7 + $0x1e0] sm:$0xff]  ;;  %v5172_v57 = vld [vmem:[%s13349_s7 + $0x1e8] sm:$0xff]  ;;  %v5173_v31 = vld [vmem:[%s13349_s7 + $0x1f0] sm:$0xff] }
 0x30f   :  { %v4982_v9 = vsel %vm333_vm3, %v4980_v24, %v4981_v19  ;;  %v4987_v23 = vrot.slane %v4949_v32, 4  ;;  %v4989_v39 = vrot.slane %v4950_v20, 4  ;;  %v4990_v35 = vrot.slane %v4951_v28, 4  ;;  %5185 = vmatpush.msra.mxu2 %v5171_v42  ;;  %5226 = vmatpush.msra.mxu3 %v5172_v57  ;;  %v5174_v56 = vld [vmem:[%s13349_s7 + $0x1f8] sm:$0xff]  ;;  %v5167_v41 = vld [vmem:[%s13349_s7 + $0x1c0] sm:$0xff]  ;;  %v5169_v6 = vld [vmem:[%s13349_s7 + $0x1d0] sm:$0xff] }
 0x310   :  { %v4985_v62 = vsel %vm333_vm3, %v4983_v12, %v4984_v50  ;;  %v5000_v37 = vadd.f32 %v4970_v16, %v4926_v10  ;;  %v5001_v48 = vadd.f32 %v4973_v44, %v4927_v15  ;;  %v5002_v45 = vadd.f32 %v4976_v8, %v4928_v55  ;;  %5097 = vmatpush.msra.mxu1 %v5076_v0  ;;  %v5168_v16 = vld [vmem:[%s13349_s7 + $0x1c8] sm:$0xff]  ;;  %v5170_v24 = vld [vmem:[%s13349_s7 + $0x1d8] sm:$0xff]  ;;  %v5163_v19 = vld [vmem:[%s13349_s7 + $0x1a0] sm:$0xff] }
 0x311   :  { %v4988_v36 = vsel %vm333_vm3, %v4986_v60, %v4987_v23  ;;  %v5003_v26 = vadd.f32 %v4979_v3, %v4929_v34  ;;  %v4933_v4 = vadd.f32 %v4917_v1, %v4859_v40  ;;  %v5004_v63 = vadd.f32 %v4982_v9, %v4930_v61  ;;  %5308 = vmatpush.msrb.mxu0 %v5174_v56  ;;  %v5164_v44 = vld [vmem:[%s13349_s7 + $0x1a8] sm:$0xff]  ;;  %v5165_v8 = vld [vmem:[%s13349_s7 + $0x1b0] sm:$0xff]  ;;  %v5166_v12 = vld [vmem:[%s13349_s7 + $0x1b8] sm:$0xff] }
 0x312   :  { %v5005_v53 = vadd.f32 %v4985_v62, %v4931_v47  ;;  %v5009_v59 = vmul.f32 %v7718_v7, %v5000_v37  ;;  %v5010_v27 = vmul.f32 %v7718_v7, %v5001_v48  ;;  %v5011_v58 = vmul.f32 %v7718_v7, %v5002_v45  ;;  %5267 = vmatpush.msrb.mxu1 %v5173_v31  ;;  %v5159_v50 = vld [vmem:[%s13349_s7 + $0x180] sm:$0xff]  ;;  %v5160_v3 = vld [vmem:[%s13349_s7 + $0x188] sm:$0xff]  ;;  %v5161_v9 = vld [vmem:[%s13349_s7 + $0x190] sm:$0xff] }
 0x313   :  { %v4991_v14 = vsel %vm333_vm3, %v4989_v39, %v4990_v35  ;;  %v5006_v30 = vadd.f32 %v4988_v36, %v4932_v52  ;;  %v5012_v51 = vmul.f32 %v7718_v7, %v5003_v26  ;;  %v5013_v22 = vmul.f32 %v7718_v7, %v5004_v63  ;;  %5186 = vmatpush.msra.mxu2 %v5167_v41  ;;  %v5162_v60 = vld [vmem:[%s13349_s7 + $0x198] sm:$0xff]  ;;  %v5155_v23 = vld [vmem:[%s13349_s7 + $0x160] sm:$0xff]  ;;  %v5157_v62 = vld [vmem:[%s13349_s7 + $0x170] sm:$0xff] }
 0x314   :  { %v10788_v10 = vadd.f32 %v7719_v33, %v5009_v59  ;;  %v10790_v15 = vadd.f32 %v7719_v33, %v5010_v27  ;;  %v10792_v55 = vadd.f32 %v7719_v33, %v5011_v58  ;;  %v5007_v34 = vadd.f32 %v4991_v14, %v4933_v4  ;;  %5227 = vmatpush.msra.mxu3 %v5168_v16  ;;  %v5158_v39 = vld [vmem:[%s13349_s7 + $0x178] sm:$0xff]  ;;  %v5151_v35 = vld [vmem:[%s13349_s7 + $0x140] sm:$0xff]  ;;  %v5152_v37 = vld [vmem:[%s13349_s7 + $0x148] sm:$0xff] }
 0x315   :  { %v5014_v49 = vmul.f32 %v7718_v7, %v5005_v53  ;;  %v10794_v29 = vadd.f32 %v7719_v33, %v5012_v51  ;;  %v5015_v1 = vmul.f32 %v7718_v7, %v5006_v30  ;;  %v10798_v61 = vadd.f32 %v7719_v33, %v5013_v22  ;;  %5268 = vmatpush.msrb.mxu1 %v5169_v6  ;;  %v5153_v36 = vld [vmem:[%s13349_s7 + $0x150] sm:$0xff]  ;;  %v5154_v48 = vld [vmem:[%s13349_s7 + $0x158] sm:$0xff]  ;;  %v5147_v45 = vld [vmem:[%s13349_s7 + $0x120] sm:$0xff] }
 0x316   :  { %v5026_v40 = vadd.f32 %v10790_v15, %v10788_v10  ;;  %v5016_v52 = vmul.f32 %v7718_v7, %v5007_v34  ;;  %5309 = vmatpush.msrb.mxu0 %v5170_v24  ;;  %5187 = vmatpush.msra.mxu2 %v5163_v19  ;;  %v5156_v7 = vld [vmem:[%s13349_s7 + $0x168] sm:$0xff]  ;;  %v5150_v4 = vld [vmem:[%s13349_s7 + $0x138] sm:$0xff]  ;;  %v5143_v63 = vld [vmem:[%s13349_s7 + $0x100] sm:$0xff] }
 0x317   :  { %v10801_v46 = vadd.f32 %v7719_v33, %v5014_v49  ;;  %v10804_v5 = vadd.f32 %v7719_v33, %v5015_v1  ;;  %5228 = vmatpush.msra.mxu3 %v5164_v44  ;;  %5269 = vmatpush.msrb.mxu1 %v5165_v8  ;;  %v5148_v26 = vld [vmem:[%s13349_s7 + $0x128] sm:$0xff]  ;;  %v5145_v59 = vld [vmem:[%s13349_s7 + $0x110] sm:$0xff]  ;;  %v5146_v27 = vld [vmem:[%s13349_s7 + $0x118] sm:$0xff] }
 0x318   :  { %v5027_v47 = vadd.f32 %v5026_v40, %v10792_v55  ;;  %v10807_v18 = vadd.f32 %v7719_v33, %v5016_v52  ;;  %5310 = vmatpush.msrb.mxu0 %v5166_v12  ;;  %5188 = vmatpush.msra.mxu2 %v5159_v50  ;;  %v5149_v33 = vld [vmem:[%s13349_s7 + $0x130] sm:$0xff]  ;;  %v5144_v53 = vld [vmem:[%s13349_s7 + $0x108] sm:$0xff]  ;;  %v5139_v58 = vld [vmem:[%s13349_s7 + $0xe0] sm:$0xff] }
 0x319   :  { %5229 = vmatpush.msra.mxu3 %v5160_v3  ;;  %5270 = vmatpush.msrb.mxu1 %v5161_v9  ;;  %v5140_v14 = vld [vmem:[%s13349_s7 + $0xe8] sm:$0xff]  ;;  %v5141_v30 = vld [vmem:[%s13349_s7 + $0xf0] sm:$0xff]  ;;  %v5142_v51 = vld [vmem:[%s13349_s7 + $0xf8] sm:$0xff] }
 0x31a   :  { %v5028_v21 = vadd.f32 %v5027_v47, %v10794_v29  ;;  %5311 = vmatpush.msrb.mxu0 %v5162_v60  ;;  %5189 = vmatpush.msra.mxu2 %v5155_v23  ;;  %v5135_v22 = vld [vmem:[%s13349_s7 + $0xc0] sm:$0xff]  ;;  %v5136_v34 = vld [vmem:[%s13349_s7 + $0xc8] sm:$0xff]  ;;  %v5137_v49 = vld [vmem:[%s13349_s7 + $0xd0] sm:$0xff] }
 0x31b   :  { %5230 = vmatpush.msra.mxu3 %v5156_v7  ;;  %5271 = vmatpush.msrb.mxu1 %v5157_v62  ;;  %v5138_v40 = vld [vmem:[%s13349_s7 + $0xd8] sm:$0xff]  ;;  %v5131_v1 = vld [vmem:[%s13349_s7 + $0xa0] sm:$0xff]  ;;  %v5132_v47 = vld [vmem:[%s13349_s7 + $0xa8] sm:$0xff] }
 0x31c   :  { %v5029_v17 = vadd.f32 %v5028_v21, %v10798_v61  ;;  %5312 = vmatpush.msrb.mxu0 %v5158_v39  ;;  %5190 = vmatpush.msra.mxu2 %v5151_v35  ;;  %v5133_v52 = vld [vmem:[%s13349_s7 + $0xb0] sm:$0xff]  ;;  %v5134_v21 = vld [vmem:[%s13349_s7 + $0xb8] sm:$0xff]  ;;  %v5119_v42 = vld [vmem:[%s13349_s7 + $0x40] sm:$0xff] }
 0x31d   :  { %5231 = vmatpush.msra.mxu3 %v5152_v37  ;;  %5272 = vmatpush.msrb.mxu1 %v5153_v36  ;;  %v5125_v54 = vld [vmem:[%s13349_s7 + $0x70] sm:$0xff]  ;;  %v5126_v0 = vld [vmem:[%s13349_s7 + $0x78] sm:$0xff]  ;;  %v5120_v57 = vld [vmem:[%s13349_s7 + $0x48] sm:$0xff] }
 0x31e   :  { %v5030_v43 = vadd.f32 %v5029_v17, %v10801_v46  ;;  %5313 = vmatpush.msrb.mxu0 %v5154_v48  ;;  %5191 = vmatpush.msra.mxu2 %v5147_v45  ;;  %v5127_v17 = vld [vmem:[%s13349_s7 + $0x80] sm:$0xff]  ;;  %v5121_v31 = vld [vmem:[%s13349_s7 + $0x50] sm:$0xff]  ;;  %v5122_v56 = vld [vmem:[%s13349_s7 + $0x58] sm:$0xff] }
 0x31f   :  { %5232 = vmatpush.msra.mxu3 %v5148_v26  ;;  %5273 = vmatpush.msrb.mxu1 %v5149_v33  ;;  %v5115_v41 = vld [vmem:[%s13349_s7 + $0x20] sm:$0xff]  ;;  %v5116_v16 = vld [vmem:[%s13349_s7 + $0x28] sm:$0xff]  ;;  %v5117_v6 = vld [vmem:[%s13349_s7 + $0x30] sm:$0xff] }
 0x320   :  { %v5031_v13 = vadd.f32 %v5030_v43, %v10804_v5  ;;  %5314 = vmatpush.msrb.mxu0 %v5150_v4  ;;  %5192 = vmatpush.msra.mxu2 %v5143_v63  ;;  %v5128_v43 = vld [vmem:[%s13349_s7 + $0x88] sm:$0xff]  ;;  %v5118_v24 = vld [vmem:[%s13349_s7 + $0x38] sm:$0xff]  ;;  %v5111_v19 = vld [vmem:[%s13349_s7] sm:$0xff] }
 0x321   :  { %5233 = vmatpush.msra.mxu3 %v5144_v53  ;;  %5274 = vmatpush.msrb.mxu1 %v5145_v59  ;;  %v5112_v44 = vld [vmem:[%s13349_s7 + $0x8] sm:$0xff]  ;;  %v5113_v8 = vld [vmem:[%s13349_s7 + $0x10] sm:$0xff]  ;;  %v5114_v12 = vld [vmem:[%s13349_s7 + $0x18] sm:$0xff] }
 0x322   :  { %v5032_v2 = vadd.f32 %v5031_v13, %v10807_v18  ;;  %5315 = vmatpush.msrb.mxu0 %v5146_v27  ;;  %5193 = vmatpush.msra.mxu2 %v5139_v58  ;;  %v5129_v13 = vld [vmem:[%s13349_s7 + $0x90] sm:$0xff]  ;;  %v37_v50 = vld [vmem:[%s13345_s3 + $0x2] sm:$0x1] }
 0x323   :  { %5234 = vmatpush.msra.mxu3 %v5140_v14  ;;  %5275 = vmatpush.msrb.mxu1 %v5141_v30 }
 0x324   :  { %v5033_v25 = vrot.slane %v5032_v2, 4  ;;  %5316 = vmatpush.msrb.mxu0 %v5142_v51  ;;  %5194 = vmatpush.msra.mxu2 %v5135_v22 }
 0x325   :  { %5235 = vmatpush.msra.mxu3 %v5136_v34  ;;  %5276 = vmatpush.msrb.mxu1 %v5137_v49 }
 0x326   :  { %v5034_v11 = vadd.f32 %v5033_v25, %v5032_v2  ;;  %5317 = vmatpush.msrb.mxu0 %v5138_v40  ;;  %5195 = vmatpush.msra.mxu2 %v5131_v1  ;;  %v5130_v2 = vld [vmem:[%s13349_s7 + $0x98] sm:$0xff]  ;;  %v39_v25 = vld [vmem:[%s13345_s3 + $0x4] sm:$0x1] }
 0x327   :  { %5236 = vmatpush.msra.mxu3 %v5132_v47  ;;  %5277 = vmatpush.msrb.mxu1 %v5133_v52 }
 0x328   :  { %v5035_v38 = vrot.slane %v5034_v11, 2  ;;  %5318 = vmatpush.msrb.mxu0 %v5134_v21  ;;  %5196 = vmatpush.msra.mxu2 %v5127_v17 }
 0x329   :  { %5237 = vmatpush.msra.mxu3 %v5128_v43  ;;  %5278 = vmatpush.msrb.mxu1 %v5129_v13 }
 0x32a   :  { %v5036_v32 = vadd.f32 %v5035_v38, %v5034_v11  ;;  %5319 = vmatpush.msrb.mxu0 %v5130_v2 }
 0x32b   :  { %5279 = vmatpush.msrb.mxu1 %v5125_v54 }
 0x32c   :  { %v5037_v20 = vrot.slane %v5036_v32, 1  ;;  %5320 = vmatpush.msrb.mxu0 %v5126_v0 }
 0x32d   :  { %5280 = vmatpush.msrb.mxu1 %v5121_v31 }
 0x32e   :  { %v5038_v28 = vadd.f32 %v5037_v20, %v5036_v32  ;;  %v5123_v20 = vld [vmem:[%s13349_s7 + $0x60] sm:$0xff]  ;;  %5321 = vmatpush.msrb.mxu0 %v5122_v56 }
 0x32f   :  { %5197 = vmatpush.msra.mxu2 %v5123_v20  ;;  %5281 = vmatpush.msrb.mxu1 %v5117_v6 }
 0x330   :  { %5071 = vmatmul.f32.vlgmr.msra.gmra.mxu0 %v5038_v28  ;;  %v5124_v28 = vld [vmem:[%s13349_s7 + $0x68] sm:$0xff] }
 0x331   :  { %5238 = vmatpush.msra.mxu3 %v5124_v28  ;;  %5198 = vmatpush.msra.mxu2 %v5119_v42 }
 0x332   :  { %5322 = vmatpush.msrb.mxu0 %v5118_v24  ;;  %5282 = vmatpush.msrb.mxu1 %v5113_v8 }
 0x333   :  { %5239 = vmatpush.msra.mxu3 %v5120_v57  ;;  %5199 = vmatpush.msra.mxu2 %v5115_v41 }
 0x334   :  { %5323 = vmatpush.msrb.mxu0 %v5114_v12 }
 0x335   :  { %5240 = vmatpush.msra.mxu3 %v5116_v16  ;;  %5200 = vmatpush.msra.mxu2 %v5111_v19 }
 0x337   :  { %5241 = vmatpush.msra.mxu3 %v5112_v44 }
 0x3ad   :  { %v5072_v11 = vpop.f32.mrf.mxu0 }
 0x3ae   :  { %v5073_v38 = vadd.f32 %v5072_v11, %v39_v25 }
 0x3b0   :  { %v5075_v32 = vmax.f32 %v5073_v38, 0.0 }
 0x3b2   :  { %7623 = vmatmul.msk.f32.vlgmr.msra.gmra.mxu1 %vm5078_vm4, %v5075_v32 }
 0x42f   :  { %v5099_v3 = vpop.f32.mrf.mxu1 }
 0x430   :  { %v5100_v9 = vadd.f32 %v5099_v3, %v37_v50 }
 0x432   :  { %v5102_v60 = vperm.slane %v5100_v9, 0 }
 0x434   :  { %v5103_v23 = vmul.f32 %v5102_v60, %v10788_v10  ;;  %v5104_v7 = vmul.f32 %v5102_v60, %v10790_v15  ;;  %v5105_v62 = vmul.f32 %v5102_v60, %v10792_v55  ;;  %v5106_v39 = vmul.f32 %v5102_v60, %v10794_v29 }
 0x435   :  { %v5107_v10 = vmul.f32 %v5102_v60, %v10798_v61  ;;  %v5108_v15 = vmul.f32 %v5102_v60, %v10801_v46  ;;  %v5109_v55 = vmul.f32 %v5102_v60, %v10804_v5  ;;  %v5110_v29 = vmul.f32 %v5102_v60, %v10807_v18  ;;  %v5175_v61 = vld [vmem:[%s13350_s6] ss:$4 sm:$0xf] }
 0x436   :  { %5201 = vmatmul.f32.vlgmr.msra.gmra.mxu2 %v5103_v23  ;;  %5242 = vmatmul.f32.vlgmr.msra.gmra.mxu3 %v5103_v23  ;;  %v11027_v46 = vperm.slane %v5175_v61, 2  ;;  %v11029_v35 = vperm.slane %v5175_v61, 3  ;;  %v11037_v18 = vperm.slane %v5175_v61, 0  ;;  %v11039_v45 = vperm.slane %v5175_v61, 1 }
 0x437   :  { %5283 = vmatmul.f32.vlgmr.msrb.gmra.mxu1 %v5103_v23  ;;  %5324 = vmatmul.f32.vlgmr.msrb.gmra.mxu0 %v5103_v23 }
 0x43e   :  { %5204 = vmatmul.f32.gmra.mxu2 %v5104_v7  ;;  %5245 = vmatmul.f32.gmra.mxu3 %v5104_v7 }
 0x43f   :  { %5286 = vmatmul.f32.gmra.mxu1 %v5104_v7  ;;  %5327 = vmatmul.f32.gmra.mxu0 %v5104_v7 }
 0x446   :  { %5207 = vmatmul.f32.gmra.mxu2 %v5105_v62  ;;  %5248 = vmatmul.f32.gmra.mxu3 %v5105_v62 }
 0x447   :  { %5289 = vmatmul.f32.gmra.mxu1 %v5105_v62  ;;  %5330 = vmatmul.f32.gmra.mxu0 %v5105_v62 }
 0x44e   :  { %5210 = vmatmul.f32.gmra.mxu2 %v5106_v39  ;;  %5251 = vmatmul.f32.gmra.mxu3 %v5106_v39 }
 0x44f   :  { %5292 = vmatmul.f32.gmra.mxu1 %v5106_v39  ;;  %5333 = vmatmul.f32.gmra.mxu0 %v5106_v39 }
 0x456   :  { %5213 = vmatmul.f32.gmra.mxu2 %v5107_v10  ;;  %5254 = vmatmul.f32.gmra.mxu3 %v5107_v10 }
 0x457   :  { %5295 = vmatmul.f32.gmra.mxu1 %v5107_v10  ;;  %5336 = vmatmul.f32.gmra.mxu0 %v5107_v10 }
 0x45e   :  { %5216 = vmatmul.f32.gmra.mxu2 %v5108_v15  ;;  %5257 = vmatmul.f32.gmra.mxu3 %v5108_v15 }
 0x45f   :  { %5298 = vmatmul.f32.gmra.mxu1 %v5108_v15  ;;  %5339 = vmatmul.f32.gmra.mxu0 %v5108_v15 }
 0x466   :  { %5219 = vmatmul.f32.gmra.mxu2 %v5109_v55  ;;  %5260 = vmatmul.f32.gmra.mxu3 %v5109_v55 }
 0x467   :  { %5301 = vmatmul.f32.gmra.mxu1 %v5109_v55  ;;  %5342 = vmatmul.f32.gmra.mxu0 %v5109_v55 }
 0x46e   :  { %5222 = vmatmul.f32.gmra.mxu2 %v5110_v29  ;;  %5263 = vmatmul.f32.gmra.mxu3 %v5110_v29 }
 0x46f   :  { %5304 = vmatmul.f32.gmra.mxu1 %v5110_v29  ;;  %5345 = vmatmul.f32.gmra.mxu0 %v5110_v29 }
 0x4b4   :  { %v5284_v37 = vpop.f32.mrf.mxu1  ;;  %v5325_v5 = vpop.f32.mrf.mxu0 }
 0x4b5   :  { %v11032_v36 = vadd.f32 %v5284_v37, %v11027_v46  ;;  %v11035_v48 = vadd.f32 %v5325_v5, %v11029_v35 }
 0x4b7   :  { %v5351_v26 = vand.u32 2147483647, %v11032_v36  ;;  %v5352_v33 = vand.u32 2147483647, %v11035_v48  ;;  %vm6087_vm5 = vcmp.ge.f32.partialorder %v11032_v36, 0.0  ;;  %vm6088_vm6 = vcmp.ge.f32.partialorder %v11035_v48, 0.0 }
 0x4b9   :  { %v11043_v4 = vmul.f32 0.70710677, %v5351_v26  ;;  %v11045_v63 = vmul.f32 0.70710677, %v5352_v33  ;;  %v5202_v53 = vpop.f32.mrf.mxu2  ;;  %v5243_v59 = vpop.f32.mrf.mxu3 }
 0x4ba   :  { %v11048_v27 = vadd.f32 %v5202_v53, %v11037_v18  ;;  %v11051_v58 = vadd.f32 %v5243_v59, %v11039_v45 }
 0x4bb   :  { %v5415_v14 = vmul.f32 0.3275911, %v11043_v4  ;;  %v5416_v30 = vmul.f32 0.3275911, %v11045_v63 }
 0x4bc   :  { %v5349_v51 = vand.u32 2147483647, %v11048_v27  ;;  %v5350_v22 = vand.u32 2147483647, %v11051_v58  ;;  %v5287_v34 = vpop.f32.mrf.mxu1  ;;  %v5328_v43 = vpop.f32.mrf.mxu0  ;;  %vm6085_vm7 = vcmp.ge.f32.partialorder %v11048_v27, 0.0  ;;  %vm6086_vm8 = vcmp.ge.f32.partialorder %v11051_v58, 0.0 }
 0x4bd   :  { %v5447_v49 = vadd.f32 1.0, %v5415_v14  ;;  %v5448_v40 = vadd.f32 1.0, %v5416_v30  ;;  %v11062_v52 = vadd.f32 %v5287_v34, %v11027_v46  ;;  %v11070_v38 = vadd.f32 %v5328_v43, %v11029_v35 }
 0x4be   :  { %v11057_v1 = vmul.f32 0.70710677, %v5349_v51  ;;  %v11059_v47 = vmul.f32 0.70710677, %v5350_v22 }
 0x4bf   :  { %7721 = vrcp.f32 %v5447_v49  ;;  %v5355_v13 = vand.u32 2147483647, %v11062_v52  ;;  %v5356_v57 = vand.u32 2147483647, %v11070_v38  ;;  %vm6091_vm9 = vcmp.ge.f32.partialorder %v11062_v52, 0.0 }
 0x4c0   :  { %7723 = vrcp.f32 %v5448_v40  ;;  %v5413_v21 = vmul.f32 0.3275911, %v11057_v1  ;;  %v5414_v17 = vmul.f32 0.3275911, %v11059_v47  ;;  %vm6092_vm10 = vcmp.ge.f32.partialorder %v11070_v38, 0.0 }
 0x4c1   :  { %v5205_v2 = vpop.f32.mrf.mxu2  ;;  %v11067_v11 = vmul.f32 0.70710677, %v5355_v13  ;;  %v11077_v16 = vmul.f32 0.70710677, %v5356_v57  ;;  %v5246_v3 = vpop.f32.mrf.mxu3 }
 0x4c2   :  { %v5445_v25 = vadd.f32 1.0, %v5413_v21  ;;  %v5446_v32 = vadd.f32 1.0, %v5414_v17  ;;  %v11073_v20 = vadd.f32 %v5205_v2, %v11037_v18  ;;  %v11090_v39 = vadd.f32 %v5246_v3, %v11039_v45 }
 0x4c3   :  { %v5419_v54 = vmul.f32 0.3275911, %v11067_v11  ;;  %v5420_v19 = vmul.f32 0.3275911, %v11077_v16 }
 0x4c4   :  { %7725 = vrcp.f32 %v5445_v25  ;;  %v5353_v6 = vand.u32 2147483647, %v11073_v20  ;;  %v5354_v26 = vand.u32 2147483647, %v11090_v39  ;;  %vm6089_vm11 = vcmp.ge.f32.partialorder %v11073_v20, 0.0 }
 0x4c5   :  { %v7722_v28 = vpop.eup %7721  ;;  %v5451_v56 = vadd.f32 1.0, %v5419_v54  ;;  %7727 = vrcp.f32 %v5446_v32  ;;  %v5452_v50 = vadd.f32 1.0, %v5420_v19  ;;  %vm6090_vm12 = vcmp.ge.f32.partialorder %v11090_v39, 0.0 }
 0x4c6   :  { %v7724_v0 = vpop.eup %7723  ;;  %v5511_v42 = vmul.f32 %v7722_v28, %v5447_v49  ;;  %v11081_v44 = vmul.f32 0.70710677, %v5353_v6  ;;  %v11097_v22 = vmul.f32 0.70710677, %v5354_v26 }
 0x4c7   :  { %v5512_v31 = vmul.f32 %v7724_v0, %v5448_v40  ;;  %7729 = vrcp.f32 %v5451_v56 }
 0x4c8   :  { %v5543_v41 = vsub.f32 2.0, %v5511_v42  ;;  %v5417_v9 = vmul.f32 0.3275911, %v11081_v44  ;;  %7731 = vrcp.f32 %v5452_v50  ;;  %v5418_v2 = vmul.f32 0.3275911, %v11097_v22 }
 0x4c9   :  { %v5544_v24 = vsub.f32 2.0, %v5512_v31  ;;  %v5896_v42 = vsub.f32 0.0, %v11045_v63 }
 0x4ca   :  { %v7726_v8 = vpop.eup %7725  ;;  %v11083_v12 = vmul.f32 %v7722_v28, %v5543_v41  ;;  %v5449_v15 = vadd.f32 1.0, %v5417_v9  ;;  %v5450_v41 = vadd.f32 1.0, %v5418_v2 }
 0x4cb   :  { %v7728_v60 = vpop.eup %7727  ;;  %v11086_v23 = vmul.f32 %v7724_v0, %v5544_v24  ;;  %v5509_v7 = vmul.f32 %v7726_v8, %v5445_v25  ;;  %v5895_v25 = vsub.f32 0.0, %v11043_v4  ;;  %v5928_v3 = vmul.f32 %v5896_v42, %v11045_v63 }
 0x4cc   :  { %v5607_v62 = vmul.f32 1.0614054, %v11083_v12  ;;  %v5510_v55 = vmul.f32 %v7728_v60, %v5446_v32  ;;  %7733 = vrcp.f32 %v5449_v15 }
 0x4cd   :  { %v7730_v10 = vpop.eup %7729  ;;  %v5608_v29 = vmul.f32 1.0614054, %v11086_v23  ;;  %v5541_v61 = vsub.f32 2.0, %v5509_v7  ;;  %v5927_v6 = vmul.f32 %v5895_v25, %v11043_v4  ;;  %v5893_v7 = vsub.f32 0.0, %v11057_v1 }
 0x4ce   :  { %v5639_v37 = vadd.f32 -1.4531521, %v5607_v62  ;;  %v5515_v5 = vmul.f32 %v7730_v10, %v5451_v56  ;;  %v7732_v33 = vpop.eup %7731  ;;  %v5542_v53 = vsub.f32 2.0, %v5510_v55  ;;  %7735 = vrcp.f32 %v5450_v41 }
 0x4cf   :  { %v5640_v59 = vadd.f32 -1.4531521, %v5608_v29  ;;  %v11094_v14 = vmul.f32 %v7726_v8, %v5541_v61  ;;  %v5516_v34 = vmul.f32 %v7732_v33, %v5452_v50  ;;  %v11122_v4 = vmul.f32 0.5, %v11035_v48 }
 0x4d0   :  { %v5671_v30 = vmul.f32 %v5639_v37, %v11083_v12  ;;  %v5547_v51 = vsub.f32 2.0, %v5515_v5  ;;  %v11099_v49 = vmul.f32 %v7728_v60, %v5542_v53  ;;  %v11126_v29 = vmul.f32 0.5, %v11048_v27  ;;  %v5290_v5 = vpop.f32.mrf.mxu1 }
 0x4d1   :  { %v5672_v21 = vmul.f32 %v5640_v59, %v11086_v23  ;;  %v5605_v17 = vmul.f32 1.0614054, %v11094_v14  ;;  %v5548_v32 = vsub.f32 2.0, %v5516_v34  ;;  %v5894_v61 = vsub.f32 0.0, %v11059_v47 }
 0x4d2   :  { %v7734_v40 = vpop.eup %7733  ;;  %v5703_v43 = vadd.f32 1.4214138, %v5671_v30  ;;  %v11103_v13 = vmul.f32 %v7730_v10, %v5547_v51  ;;  %v5606_v28 = vmul.f32 1.0614054, %v11099_v49  ;;  %v5961_v10 = vmul.f32 1.442695, %v5927_v6  ;;  %v5331_v6 = vpop.f32.mrf.mxu0 }
 0x4d3   :  { %v5513_v54 = vmul.f32 %v7734_v40, %v5449_v15  ;;  %v5704_v0 = vadd.f32 1.4214138, %v5672_v21  ;;  %v5637_v57 = vadd.f32 -1.4531521, %v5605_v17  ;;  %v11112_v24 = vmul.f32 %v7732_v33, %v5548_v32 }
 0x4d4   :  { %v5735_v31 = vmul.f32 %v5703_v43, %v11083_v12  ;;  %v5611_v56 = vmul.f32 1.0614054, %v11103_v13  ;;  %v5638_v19 = vadd.f32 -1.4531521, %v5606_v28  ;;  %v11119_v15 = vmul.f32 0.5, %v11032_v36  ;;  %v7736_v43 = vpop.eup %7735 }
 0x4d5   :  { %v5545_v8 = vsub.f32 2.0, %v5513_v54  ;;  %v5736_v50 = vmul.f32 %v5704_v0, %v11086_v23  ;;  %v5669_v9 = vmul.f32 %v5637_v57, %v11094_v14  ;;  %v5612_v55 = vmul.f32 1.0614054, %v11112_v24 }
 0x4d6   :  { %v5767_v60 = vadd.f32 -0.28449672, %v5735_v31  ;;  %v5643_v62 = vadd.f32 -1.4531521, %v5611_v56  ;;  %v5670_v63 = vmul.f32 %v5638_v19, %v11099_v49  ;;  %v5963_v33 = vmul.f32 1.442695, %v5928_v3 }
 0x4d7   :  { %v11130_v37 = vmul.f32 %v7734_v40, %v5545_v8  ;;  %v5768_v26 = vadd.f32 -0.28449672, %v5736_v50  ;;  %v5701_v53 = vadd.f32 1.4214138, %v5669_v9  ;;  %v5925_v30 = vmul.f32 %v5893_v7, %v11057_v1 }
 0x4d8   :  { %v5799_v59 = vmul.f32 %v5767_v60, %v11083_v12  ;;  %v5675_v51 = vmul.f32 %v5643_v62, %v11103_v13  ;;  %v5899_v34 = vsub.f32 0.0, %v11067_v11  ;;  %7737 = vpow2.f32 %v5961_v10 }
 0x4d9   :  { %v11137_v21 = vmul.f32 0.5, %v11051_v58  ;;  %v5644_v17 = vadd.f32 -1.4531521, %v5612_v55  ;;  %v11140_v40 = vadd.f32 %v5290_v5, %v11027_v46  ;;  %v5702_v2 = vadd.f32 1.4214138, %v5670_v63 }
 0x4da   :  { %v5926_v25 = vmul.f32 %v5894_v61, %v11059_v47  ;;  %v5900_v32 = vsub.f32 0.0, %v11077_v16  ;;  %v5609_v1 = vmul.f32 1.0614054, %v11130_v37  ;;  %v5800_v28 = vmul.f32 %v5768_v26, %v11086_v23 }
 0x4db   :  { %7739 = vpow2.f32 %v5963_v33  ;;  %v5733_v54 = vmul.f32 %v5701_v53, %v11094_v14  ;;  %v11148_v0 = vmul.f32 0.5, %v11062_v52  ;;  %v5831_v42 = vadd.f32 0.2548296, %v5799_v59 }
 0x4dc   :  { %v5957_v57 = vmul.f32 1.442695, %v5925_v30  ;;  %v5707_v31 = vadd.f32 1.4214138, %v5675_v51  ;;  %v5931_v56 = vmul.f32 %v5899_v34, %v11067_v11  ;;  %v5676_v47 = vmul.f32 %v5644_v17, %v11112_v24 }
 0x4dd   :  { %v5897_v19 = vsub.f32 0.0, %v11081_v44  ;;  %v5514_v8 = vmul.f32 %v7736_v43, %v5450_v41  ;;  %v5359_v50 = vand.u32 2147483647, %v11140_v40  ;;  %v5734_v3 = vmul.f32 %v5702_v2, %v11099_v49 }
 0x4de   :  { %v5959_v9 = vmul.f32 1.442695, %v5926_v25  ;;  %v5932_v60 = vmul.f32 %v5900_v32, %v11077_v16  ;;  %v5641_v7 = vadd.f32 -1.4531521, %v5609_v1  ;;  %v7738_v62 = vpop.eup %7737  ;;  %v5832_v10 = vadd.f32 0.2548296, %v5800_v28  ;;  %v5208_v28 = vpop.f32.mrf.mxu2 }
 0x4df   :  { %v5765_v55 = vadd.f32 -0.28449672, %v5733_v54  ;;  %v11156_v63 = vmul.f32 0.70710677, %v5359_v50  ;;  %v11159_v11 = vadd.f32 %v5331_v6, %v11029_v35  ;;  %v5863_v61 = vmul.f32 %v5831_v42, %v11083_v12 }
 0x4e0   :  { %7741 = vpow2.f32 %v5957_v57  ;;  %v5739_v41 = vmul.f32 %v5707_v31, %v11103_v13  ;;  %v5969_v5 = vmul.f32 1.442695, %v5931_v56  ;;  %v5708_v33 = vadd.f32 1.4214138, %v5676_v47  ;;  %v5249_v31 = vpop.f32.mrf.mxu3 }
 0x4e1   :  { %v7740_v26 = vpop.eup %7739  ;;  %v5929_v53 = vmul.f32 %v5897_v19, %v11081_v44  ;;  %v5546_v16 = vsub.f32 2.0, %v5514_v8  ;;  %v5423_v59 = vmul.f32 0.3275911, %v11156_v63  ;;  %7743 = vpow2.f32 %v5959_v9 }
 0x4e2   :  { %v5971_v30 = vmul.f32 1.442695, %v5932_v60  ;;  %v5673_v51 = vmul.f32 %v5641_v7, %v11130_v37  ;;  %v5360_v34 = vand.u32 2147483647, %v11159_v11  ;;  %v5864_v17 = vmul.f32 %v5832_v10, %v11086_v23 }
 0x4e3   :  { %v5797_v12 = vmul.f32 %v5765_v55, %v11094_v14  ;;  %v5766_v2 = vadd.f32 -0.28449672, %v5734_v3  ;;  %v5455_v25 = vadd.f32 1.0, %v5423_v59  ;;  %v11169_v32 = vmul.f32 %v7738_v62, %v5863_v61 }
 0x4e4   :  { %v5771_v1 = vadd.f32 -0.28449672, %v5739_v41  ;;  %7745 = vpow2.f32 %v5969_v5  ;;  %v11171_v44 = vmul.f32 0.70710677, %v5360_v34  ;;  %v5740_v54 = vmul.f32 %v5708_v33, %v11112_v24  ;;  %v5293_v34 = vpop.f32.mrf.mxu1 }
 0x4e5   :  { %v5965_v42 = vmul.f32 1.442695, %v5929_v53  ;;  %v11174_v57 = vmul.f32 %v7736_v43, %v5546_v16  ;;  %7747 = vrcp.f32 %v5455_v25  ;;  %v5705_v23 = vadd.f32 1.4214138, %v5673_v51 }
 0x4e6   :  { %v7742_v56 = vpop.eup %7741  ;;  %7749 = vpow2.f32 %v5971_v30  ;;  %v5898_v6 = vsub.f32 0.0, %v11097_v22  ;;  %v5424_v47 = vmul.f32 0.3275911, %v11171_v44  ;;  %v11178_v19 = vmul.f32 %v7740_v26, %v5864_v17 }
 0x4e7   :  { %v5829_v8 = vadd.f32 0.2548296, %v5797_v12  ;;  %v5798_v50 = vmul.f32 %v5766_v2, %v11099_v49  ;;  %v11182_v3 = vadd.f32 %v5208_v28, %v11037_v18  ;;  %v7744_v9 = vpop.eup %7743  ;;  %v6055_v43 = vsub.f32 1.0, %v11169_v32 }
 0x4e8   :  { %v5803_v60 = vmul.f32 %v5771_v1, %v11103_v13  ;;  %v5456_v7 = vadd.f32 1.0, %v5424_v47  ;;  %v11187_v62 = vadd.f32 %v5249_v31, %v11039_v45  ;;  %v5772_v10 = vadd.f32 -0.28449672, %v5740_v54 }
 0x4e9   :  { %7751 = vpow2.f32 %v5965_v42  ;;  %v5610_v55 = vmul.f32 1.0614054, %v11174_v57  ;;  %v5357_v61 = vand.u32 2147483647, %v11182_v3  ;;  %v11193_v5 = vmul.f32 0.5, %v11070_v38 }
 0x4ea   :  { %v7746_v41 = vpop.eup %7745  ;;  %v5737_v26 = vmul.f32 %v5705_v23, %v11130_v37  ;;  %v11197_v33 = vmul.f32 0.5, %v11073_v20  ;;  %7753 = vrcp.f32 %v5456_v7  ;;  %v6056_v16 = vsub.f32 1.0, %v11178_v19 }
 0x4eb   :  { %v7748_v53 = vpop.eup %7747  ;;  %v5861_v59 = vmul.f32 %v5829_v8, %v11094_v14  ;;  %v5830_v30 = vadd.f32 0.2548296, %v5798_v50  ;;  %v11202_v51 = vmul.f32 0.70710677, %v5357_v61  ;;  %v5835_v12 = vadd.f32 0.2548296, %v5803_v60 }
 0x4ec   :  { %v11204_v17 = vpop.eup %7749  ;;  %v5930_v2 = vmul.f32 %v5898_v6, %v11097_v22  ;;  %v5519_v32 = vmul.f32 %v7748_v53, %v5455_v25  ;;  %v5358_v1 = vand.u32 2147483647, %v11187_v62  ;;  %v6119_v28 = vsub.f32 0.0, %v6055_v43 }
 0x4ed   :  { %v5804_v54 = vmul.f32 %v5772_v10, %v11112_v24  ;;  %v5642_v42 = vadd.f32 -1.4531521, %v5610_v55  ;;  %v5421_v31 = vmul.f32 0.3275911, %v11202_v51  ;;  %v5769_v23 = vadd.f32 -0.28449672, %v5737_v26 }
 0x4ee   :  { %v5551_v14 = vsub.f32 2.0, %v5519_v32  ;;  %v11210_v47 = vmul.f32 0.70710677, %v5358_v1  ;;  %v11213_v19 = vadd.f32 %v5293_v34, %v11027_v46  ;;  %v6120_v50 = vsub.f32 0.0, %v6056_v16 }
 0x4ef   :  { %v11215_v8 = vpop.eup %7751  ;;  %v11217_v22 = vmul.f32 %v7742_v56, %v5861_v59  ;;  %v5862_v25 = vmul.f32 %v5830_v30, %v11099_v49  ;;  %v5453_v6 = vadd.f32 1.0, %v5421_v31  ;;  %v5867_v10 = vmul.f32 %v5835_v12, %v11103_v13 }
 0x4f0   :  { %13374 = vst [vmem:[#allocation2_spill] sm:$0xff] %v11213_v19  ;;  %v7754_v60 = vpop.eup %7753  ;;  %v11221_v55 = vmul.f32 %v7748_v53, %v5551_v14  ;;  %v5422_v61 = vmul.f32 0.3275911, %v11210_v47  ;;  %v5363_v26 = vand.u32 2147483647, %v11213_v19  ;;  %v5674_v34 = vmul.f32 %v5642_v42, %v11174_v57  ;;  %v5334_v14 = vpop.f32.mrf.mxu0 }
 0x4f1   :  { %v11227_v32 = vmul.f32 0.5, %v11090_v39  ;;  %v5520_v1 = vmul.f32 %v7754_v60, %v5456_v7  ;;  %7755 = vrcp.f32 %v5453_v6  ;;  %v5836_v56 = vadd.f32 0.2548296, %v5804_v54 }
 0x4f2   :  { %v5801_v49 = vmul.f32 %v5769_v23, %v11130_v37  ;;  %v5615_v59 = vmul.f32 1.0614054, %v11221_v55  ;;  %v5454_v30 = vadd.f32 1.0, %v5422_v61  ;;  %v6151_v13 = vsel %vm6087_vm5, %v6055_v43, %v6119_v28 }
 0x4f3   :  { %13375 = vst [vmem:[#allocation3_spill] sm:$0xff] %v11227_v32  ;;  %v5967_v53 = vmul.f32 1.442695, %v5930_v2  ;;  %v5552_v12 = vsub.f32 2.0, %v5520_v1  ;;  %v11233_v31 = vmul.f32 0.70710677, %v5363_v26  ;;  %v6152_v42 = vsel %vm6088_vm6, %v6056_v16, %v6120_v50  ;;  %v5211_v32 = vpop.f32.mrf.mxu2 }
 0x4f4   :  { %v6053_v7 = vsub.f32 1.0, %v11217_v22  ;;  %v6022_v54 = vmul.f32 %v7744_v9, %v5862_v25  ;;  %v6027_v23 = vmul.f32 %v7746_v41, %v5867_v10  ;;  %v5706_v19 = vadd.f32 1.4214138, %v5674_v34 }
 0x4f5   :  { %v11239_v61 = vmul.f32 %v7754_v60, %v5552_v12  ;;  %7757 = vrcp.f32 %v5454_v30  ;;  %v5427_v36 = vmul.f32 0.3275911, %v11233_v31  ;;  %v5868_v43 = vmul.f32 %v5836_v56, %v11112_v24 }
 0x4f6   :  { %v5833_v2 = vadd.f32 0.2548296, %v5801_v49  ;;  %v5647_v28 = vadd.f32 -1.4531521, %v5615_v59  ;;  %v11244_v48 = vadd.f32 %v5334_v14, %v11029_v35  ;;  %7759 = vpow2.f32 %v5967_v53 }
 0x4f7   :  { %v7756_v16 = vpop.eup %7755  ;;  %v5616_v9 = vmul.f32 1.0614054, %v11239_v61  ;;  %v5459_v41 = vadd.f32 1.0, %v5427_v36  ;;  %v11249_v50 = vadd.f32 %v5211_v32, %v11037_v18  ;;  %v6215_v22 = vadd.f32 1.0, %v6151_v13 }
 0x4f8   :  { %v6216_v25 = vadd.f32 1.0, %v6152_v42  ;;  %v6054_v60 = vsub.f32 1.0, %v6022_v54  ;;  %v5517_v24 = vmul.f32 %v7756_v16, %v5453_v6  ;;  %v6117_v10 = vsub.f32 0.0, %v6053_v7 }
 0x4f9   :  { %v6059_v26 = vsub.f32 1.0, %v6027_v23  ;;  %v5738_v34 = vmul.f32 %v5706_v19, %v11174_v57  ;;  %v5364_v1 = vand.u32 2147483647, %v11244_v48  ;;  %v6028_v56 = vmul.f32 %v11204_v17, %v5868_v43 }
 0x4fa   :  { %v5865_v49 = vmul.f32 %v5833_v2, %v11130_v37  ;;  %v5679_v59 = vmul.f32 %v5647_v28, %v11221_v55  ;;  %v5549_v32 = vsub.f32 2.0, %v5517_v24  ;;  %v5648_v13 = vadd.f32 -1.4531521, %v5616_v9 }
 0x4fb   :  { %v7758_v53 = vpop.eup %7757  ;;  %7761 = vrcp.f32 %v5459_v41  ;;  %v11257_v12 = vmul.f32 0.70710677, %v5364_v1  ;;  %v5361_v6 = vand.u32 2147483647, %v11249_v50  ;;  %v11261_v14 = vmul.f32 %v6215_v22, %v11119_v15 }
 0x4fc   :  { %v6118_v19 = vsub.f32 0.0, %v6054_v60  ;;  %v11263_v42 = vmul.f32 %v7756_v16, %v5549_v32  ;;  %v5518_v54 = vmul.f32 %v7758_v53, %v5454_v30  ;;  %v11265_v17 = vpop.eup %7759  ;;  %v6149_v37 = vsel %vm6085_vm7, %v6053_v7, %v6117_v10 }
 0x4fd   :  { %13376 = vst [vmem:[#allocation4_spill] sm:$0xff] %v11261_v14  ;;  %v6123_v23 = vsub.f32 0.0, %v6059_v26  ;;  %v5770_v36 = vadd.f32 -0.28449672, %v5738_v34  ;;  %v5428_v43 = vmul.f32 0.3275911, %v11257_v12  ;;  %v11271_v2 = vmul.f32 %v6216_v25, %v11122_v4 }
 0x4fe   :  { %v6025_v15 = vmul.f32 %v11215_v8, %v5865_v49  ;;  %v5711_v28 = vadd.f32 1.4214138, %v5679_v59  ;;  %v5550_v16 = vsub.f32 2.0, %v5518_v54  ;;  %v6060_v9 = vsub.f32 1.0, %v6028_v56 }
 0x4ff   :  { %13377 = vst [vmem:[#allocation5_spill] sm:$0xff] %v11271_v2  ;;  %v5680_v30 = vmul.f32 %v5648_v13, %v11239_v61  ;;  %v5460_v22 = vadd.f32 1.0, %v5428_v43  ;;  %v11276_v24 = vmul.f32 0.70710677, %v5361_v6  ;;  %v11280_v27 = vmul.f32 %v11261_v14, %v11261_v14 }
 0x500   :  { %v6213_v7 = vadd.f32 1.0, %v6149_v37  ;;  %v6150_v4 = vsel %vm6086_vm8, %v6054_v60, %v6118_v19  ;;  %v5613_v25 = vmul.f32 1.0614054, %v11263_v42  ;;  %v6155_v8 = vsel %vm6091_vm9, %v6059_v26, %v6123_v23  ;;  %v5252_v37 = vpop.f32.mrf.mxu3 }
 0x501   :  { %v7762_v10 = vpop.eup %7761  ;;  %v5802_v34 = vmul.f32 %v5770_v36, %v11174_v57  ;;  %7763 = vrcp.f32 %v5460_v22  ;;  %v5425_v1 = vmul.f32 0.3275911, %v11276_v24  ;;  %v6057_v56 = vsub.f32 1.0, %v6025_v15 }
 0x502   :  { %v5743_v49 = vmul.f32 %v5711_v28, %v11221_v55  ;;  %v5903_v59 = vsub.f32 0.0, %v11156_v63  ;;  %v11292_v58 = vmul.f32 %v7758_v53, %v5550_v16  ;;  %v11296_v60 = vmul.f32 %v11271_v2, %v11271_v2 }
 0x503   :  { %v6124_v52 = vsub.f32 0.0, %v6060_v9  ;;  %v5712_v26 = vadd.f32 1.4214138, %v5680_v30  ;;  %v5457_v32 = vadd.f32 1.0, %v5425_v1  ;;  %v11299_v13 = vmul.f32 %v6213_v7, %v11126_v29 }
 0x504   :  { %v6214_v6 = vadd.f32 1.0, %v6150_v4  ;;  %v5645_v19 = vadd.f32 -1.4531521, %v5613_v25  ;;  %v5523_v54 = vmul.f32 %v7762_v10, %v5459_v41  ;;  %v6219_v23 = vadd.f32 1.0, %v6155_v8 }
 0x505   :  { %13378 = vst [vmem:[#allocation6_spill] sm:$0xff] %v11299_v13  ;;  %v5834_v36 = vadd.f32 0.2548296, %v5802_v34  ;;  %v11302_v43 = vmul.f32 0.5, %v11140_v40  ;;  %7765 = vrcp.f32 %v5457_v32  ;;  %v6121_v53 = vsub.f32 0.0, %v6057_v56 }
 0x506   :  { %v5775_v15 = vadd.f32 -0.28449672, %v5743_v49  ;;  %v5935_v28 = vmul.f32 %v5903_v59, %v11156_v63  ;;  %v5614_v16 = vmul.f32 1.0614054, %v11292_v58  ;;  %v6156_v29 = vsel %vm6092_vm10, %v6060_v9, %v6124_v52 }
 0x507   :  { %v7764_v30 = vpop.eup %7763  ;;  %v5744_v7 = vmul.f32 %v5712_v26, %v11239_v61  ;;  %v5904_v41 = vsub.f32 0.0, %v11171_v44  ;;  %v11311_v4 = vadd.f32 %v5252_v37, %v11039_v45  ;;  %v11314_v25 = vmul.f32 %v6214_v6, %v11137_v21 }
 0x508   :  { %v5677_v8 = vmul.f32 %v5645_v19, %v11263_v42  ;;  %v5555_v34 = vsub.f32 2.0, %v5523_v54  ;;  %v5524_v63 = vmul.f32 %v7764_v30, %v5460_v22  ;;  %v11319_v1 = vmul.f32 %v11299_v13, %v11299_v13 }
 0x509   :  { %13379 = vst [vmem:[#allocation7_spill] sm:$0xff] %v11314_v25  ;;  %v11322_v38 = vmul.f32 %v6219_v23, %v11148_v0  ;;  %v5866_v9 = vmul.f32 %v5834_v36, %v11174_v57  ;;  %v5362_v49 = vand.u32 2147483647, %v11311_v4  ;;  %v6220_v59 = vadd.f32 1.0, %v6156_v29 }
 0x50a   :  { %v6153_v21 = vsel %vm6089_vm11, %v6057_v56, %v6121_v53  ;;  %v5807_v52 = vmul.f32 %v5775_v15, %v11221_v55  ;;  %v5646_v26 = vadd.f32 -1.4531521, %v5614_v16  ;;  %v5977_v22 = vmul.f32 1.442695, %v5935_v28 }
 0x50b   :  { %13380 = vst [vmem:[#allocation8_spill] sm:$0xff] %v11322_v38  ;;  %v7766_v6 = vpop.eup %7765  ;;  %v5776_v19 = vadd.f32 -0.28449672, %v5744_v7  ;;  %v5936_v54 = vmul.f32 %v5904_v41, %v11171_v44  ;;  %v11330_v37 = vmul.f32 0.70710677, %v5362_v49  ;;  %v11332_v23 = vmul.f32 %v7762_v10, %v5555_v34 }
 0x50c   :  { %v5709_v0 = vadd.f32 1.4214138, %v5677_v8  ;;  %v5556_v57 = vsub.f32 2.0, %v5524_v63  ;;  %v5521_v36 = vmul.f32 %v7766_v6, %v5457_v32  ;;  %v11336_v29 = vmul.f32 %v11314_v25, %v11314_v25 }
 0x50d   :  { %v6217_v20 = vadd.f32 1.0, %v6153_v21  ;;  %v6026_v56 = vmul.f32 %v11265_v17, %v5866_v9  ;;  %v5426_v53 = vmul.f32 0.3275911, %v11330_v37  ;;  %v11341_v15 = vmul.f32 %v6220_v59, %v11193_v5 }
 0x50e   :  { %v5839_v44 = vadd.f32 0.2548296, %v5807_v52  ;;  %v5678_v28 = vmul.f32 %v5646_v26, %v11292_v58  ;;  %v5553_v16 = vsub.f32 2.0, %v5521_v36  ;;  %v6283_v10 = vmul.f32 %v11322_v38, %v11322_v38 }
 0x50f   :  { %13381 = vst [vmem:[#allocation9_spill] sm:$0xff] %v11341_v15  ;;  %7767 = vpow2.f32 %v5977_v22  ;;  %v5808_v32 = vmul.f32 %v5776_v19, %v11239_v61  ;;  %v5458_v7 = vadd.f32 1.0, %v5426_v53  ;;  %v5979_v41 = vmul.f32 1.442695, %v5936_v54 }
 0x510   :  { %v5741_v17 = vmul.f32 %v5709_v0, %v11263_v42  ;;  %v5619_v8 = vmul.f32 1.0614054, %v11332_v23  ;;  %v11350_v5 = vmul.f32 %v7764_v30, %v5556_v57  ;;  %v11353_v34 = vmul.f32 %v6217_v20, %v11197_v33  ;;  %v5296_v20 = vpop.f32.mrf.mxu1 }
 0x511   :  { %v6058_v63 = vsub.f32 1.0, %v6026_v56  ;;  %v5901_v9 = vsub.f32 0.0, %v11202_v51  ;;  %v11356_v49 = vmul.f32 %v7766_v6, %v5553_v16  ;;  %v6284_v59 = vmul.f32 %v11341_v15, %v11341_v15 }
 0x512   :  { %13382 = vst [vmem:[#allocation10_spill] sm:$0xff] %v11353_v34  ;;  %v5871_v21 = vmul.f32 %v5839_v44, %v11221_v55  ;;  %v5710_v52 = vadd.f32 1.4214138, %v5678_v28  ;;  %7769 = vrcp.f32 %v5458_v7  ;;  %v11362_v26 = vadd.f32 %v6283_v10, %v11280_v27 }
 0x513   :  { %v5840_v30 = vadd.f32 0.2548296, %v5808_v32  ;;  %v11365_v22 = vmul.f32 0.5, %v11159_v11  ;;  %v5902_v33 = vsub.f32 0.0, %v11210_v47  ;;  %7771 = vpow2.f32 %v5979_v41 }
 0x514   :  { %v5773_v19 = vadd.f32 -0.28449672, %v5741_v17  ;;  %v5651_v6 = vadd.f32 -1.4531521, %v5619_v8  ;;  %v5620_v54 = vmul.f32 1.0614054, %v11350_v5  ;;  %v6281_v55 = vmul.f32 %v11353_v34, %v11353_v34 }
 0x515   :  { %v7768_v0 = vpop.eup %7767  ;;  %v6122_v57 = vsub.f32 0.0, %v6058_v63  ;;  %v5933_v36 = vmul.f32 %v5901_v9, %v11202_v51  ;;  %v5617_v27 = vmul.f32 1.0614054, %v11356_v49  ;;  %v11374_v56 = vadd.f32 %v6284_v59, %v11296_v60 }
 0x516   :  { %v6031_v53 = vmul.f32 %v7768_v0, %v5871_v21  ;;  %v11377_v44 = vmul.f32 0.5, %v11182_v3  ;;  %v5742_v28 = vmul.f32 %v5710_v52, %v11292_v58  ;;  %v5872_v16 = vmul.f32 %v5840_v30, %v11239_v61 }
 0x517   :  { %v5934_v10 = vmul.f32 %v5902_v33, %v11210_v47  ;;  %v11383_v32 = vmul.f32 0.5, %v11187_v62  ;;  %v5907_v51 = vsub.f32 0.0, %v11233_v31  ;;  %v5805_v17 = vmul.f32 %v5773_v19, %v11263_v42 }
 0x518   :  { %v7770_v41 = vpop.eup %7769  ;;  %v5683_v60 = vmul.f32 %v5651_v6, %v11332_v23  ;;  %v5652_v8 = vadd.f32 -1.4531521, %v5620_v54  ;;  %v11389_v9 = vadd.f32 %v5296_v20, %v11027_v46  ;;  %v11392_v59 = vadd.f32 %v6281_v55, %v11319_v1 }
 0x519   :  { %v6154_v47 = vsel %vm6090_vm12, %v6058_v63, %v6122_v57  ;;  %vm6095_vm13 = vcmp.ge.f32.partialorder %v11140_v40, 0.0  ;;  %v5973_v61 = vmul.f32 1.442695, %v5933_v36  ;;  %v5649_v21 = vadd.f32 -1.4531521, %v5617_v27  ;;  %v7772_v52 = vpop.eup %7771  ;;  %v13383_v36 = vld [vmem:[#allocation2_spill] sm:$0xff] }
 0x51a   :  { %v6063_v30 = vsub.f32 1.0, %v6031_v53  ;;  %v5774_v33 = vadd.f32 -0.28449672, %v5742_v28  ;;  %v5908_v19 = vsub.f32 0.0, %v11257_v12  ;;  %v5367_v6 = vand.u32 2147483647, %v11389_v9 }
 0x51b   :  { %v6032_v54 = vmul.f32 %v7772_v52, %v5872_v16  ;;  %v5975_v0 = vmul.f32 1.442695, %v5934_v10  ;;  %v5939_v20 = vmul.f32 %v5907_v51, %v11233_v31  ;;  %v5522_v1 = vmul.f32 %v7770_v41, %v5458_v7  ;;  %v5337_v10 = vpop.f32.mrf.mxu0  ;;  %v13384_v52 = vld [vmem:[#allocation3_spill] sm:$0xff] }
 0x51c   :  { %v5837_v55 = vadd.f32 0.2548296, %v5805_v17  ;;  %v5715_v15 = vadd.f32 1.4214138, %v5683_v60  ;;  %v5684_v39 = vmul.f32 %v5652_v8, %v11350_v5  ;;  %v11401_v63 = vmul.f32 0.70710677, %v5367_v6 }
 0x51d   :  { %v6218_v57 = vadd.f32 1.0, %v6154_v47  ;;  %7773 = vpow2.f32 %v5973_v61  ;;  %v11404_v27 = vmul.f32 0.5, %v13383_v36  ;;  %v5681_v53 = vmul.f32 %v5649_v21, %v11356_v49 }
 0x51e   :  { %v6127_v28 = vsub.f32 0.0, %v6063_v30  ;;  %vm6096_vm14 = vcmp.ge.f32.partialorder %v11159_v11, 0.0  ;;  %v5806_v16 = vmul.f32 %v5774_v33, %v11292_v58  ;;  %v5940_v31 = vmul.f32 %v5908_v19, %v11257_v12 }
 0x51f   :  { %v5431_v7 = vmul.f32 0.3275911, %v11401_v63  ;;  %v6064_v51 = vsub.f32 1.0, %v6032_v54  ;;  %7775 = vpow2.f32 %v5975_v0  ;;  %v5985_v17 = vmul.f32 1.442695, %v5939_v20 }
 0x520   :  { %v5554_v60 = vsub.f32 2.0, %v5522_v1  ;;  %v5869_v8 = vmul.f32 %v5837_v55, %v11263_v42  ;;  %v5747_v47 = vmul.f32 %v5715_v15, %v11332_v23  ;;  %v5716_v61 = vadd.f32 1.4214138, %v5684_v39  ;;  %v5214_v42 = vpop.f32.mrf.mxu2 }
 0x521   :  { %v5463_v21 = vadd.f32 1.0, %v5431_v7  ;;  %v11414_v6 = vmul.f32 %v6218_v57, %v13384_v52  ;;  %v11417_v33 = vmul.f32 0.5, %v11244_v48  ;;  %v5713_v12 = vadd.f32 1.4214138, %v5681_v53  ;;  %v5255_v7 = vpop.f32.mrf.mxu3 }
 0x522   :  { %v11420_v19 = vadd.f32 %v5337_v10, %v11029_v35  ;;  %v6159_v54 = vsel %vm6095_vm13, %v6063_v30, %v6127_v28  ;;  %v5838_v0 = vadd.f32 0.2548296, %v5806_v16  ;;  %v5987_v20 = vmul.f32 1.442695, %v5940_v31 }
 0x523   :  { %13385 = vst [vmem:[#allocation2_spill] sm:$0xff] %v11414_v6  ;;  %7777 = vrcp.f32 %v5463_v21  ;;  %v7774_v15 = vpop.eup %7773  ;;  %v6128_v1 = vsub.f32 0.0, %v6064_v51  ;;  %v5905_v55 = vsub.f32 0.0, %v11276_v24  ;;  %v11425_v39 = vmul.f32 %v7770_v41, %v5554_v60 }
 0x524   :  { %v5368_v57 = vand.u32 2147483647, %v11420_v19  ;;  %v6029_v53 = vmul.f32 %v7774_v15, %v5869_v8  ;;  %v5779_v52 = vadd.f32 -0.28449672, %v5747_v47  ;;  %7779 = vpow2.f32 %v5985_v17 }
 0x525   :  { %v5748_v10 = vmul.f32 %v5716_v61, %v11350_v5  ;;  %v7776_v40 = vpop.eup %7775  ;;  %v6223_v30 = vadd.f32 1.0, %v6159_v54  ;;  %v5745_v28 = vmul.f32 %v5713_v12, %v11356_v49  ;;  %v11433_v31 = vadd.f32 %v5214_v42, %v11037_v18 }
 0x526   :  { %v11430_v16 = vmul.f32 0.70710677, %v5368_v57  ;;  %v6282_v41 = vmul.f32 %v11414_v6, %v11414_v6  ;;  %v5870_v60 = vmul.f32 %v5838_v0, %v11292_v58  ;;  %7781 = vpow2.f32 %v5987_v20 }
 0x527   :  { %v11439_v8 = vadd.f32 %v5255_v7, %v11039_v45  ;;  %v6160_v17 = vsel %vm6096_vm14, %v6064_v51, %v6128_v1  ;;  %vm6093_vm15 = vcmp.ge.f32.partialorder %v11182_v3, 0.0  ;;  %v5937_v47 = vmul.f32 %v5905_v55, %v11276_v24 }
 0x528   :  { %v5618_v61 = vmul.f32 1.0614054, %v11425_v39  ;;  %v5432_v12 = vmul.f32 0.3275911, %v11430_v16  ;;  %v6061_v42 = vsub.f32 1.0, %v6029_v53  ;;  %v5811_v15 = vmul.f32 %v5779_v52, %v11332_v23 }
 0x529   :  { %v7778_v54 = vpop.eup %7777  ;;  %v5780_v58 = vadd.f32 -0.28449672, %v5748_v10  ;;  %v5365_v0 = vand.u32 2147483647, %v11433_v31  ;;  %v11450_v20 = vmul.f32 %v6223_v30, %v11302_v43  ;;  %v5777_v11 = vadd.f32 -0.28449672, %v5745_v28 }
 0x52a   :  { %v5527_v51 = vmul.f32 %v7778_v54, %v5463_v21  ;;  %v5464_v1 = vadd.f32 1.0, %v5432_v12  ;;  %v7780_v57 = vpop.eup %7779  ;;  %v6224_v7 = vadd.f32 1.0, %v6160_v17  ;;  %v6030_v24 = vmul.f32 %v7776_v40, %v5870_v60 }
 0x52b   :  { %13386 = vst [vmem:[#allocation3_spill] sm:$0xff] %v11450_v20  ;;  %v11452_v55 = vmul.f32 0.70710677, %v5365_v0  ;;  %v5366_v38 = vand.u32 2147483647, %v11439_v8  ;;  %v11456_v53 = vadd.f32 %v6282_v41, %v11336_v29  ;;  %v6125_v34 = vsub.f32 0.0, %v6061_v42 }
 0x52c   :  { %v5650_v52 = vadd.f32 -1.4531521, %v5618_v61  ;;  %v5559_v10 = vsub.f32 2.0, %v5527_v51  ;;  %7783 = vrcp.f32 %v5464_v1  ;;  %v7782_v6 = vpop.eup %7781  ;;  %v5843_v43 = vadd.f32 0.2548296, %v5811_v15 }
 0x52d   :  { %13387 = vst [vmem:[#allocation11_spill] sm:$0xff] %v11456_v53  ;;  %v5812_v30 = vmul.f32 %v5780_v58, %v11350_v5  ;;  %v5981_v21 = vmul.f32 1.442695, %v5937_v47  ;;  %v5809_v28 = vmul.f32 %v5777_v11, %v11356_v49  ;;  %v5429_v40 = vmul.f32 0.3275911, %v11452_v55 }
 0x52e   :  { %v11460_v17 = vmul.f32 %v7778_v54, %v5559_v10  ;;  %v11463_v60 = vmul.f32 0.70710677, %v5366_v38  ;;  %v6287_v29 = vmul.f32 %v11450_v20, %v11450_v20  ;;  %v11468_v41 = vmul.f32 %v6224_v7, %v11365_v22  ;;  %v5299_v20 = vpop.f32.mrf.mxu1 }
 0x52f   :  { %v6062_v61 = vsub.f32 1.0, %v6030_v24  ;;  %vm6094_vm0 = vcmp.ge.f32.partialorder %v11187_v62, 0.0  ;;  %v11472_v12 = vmul.f32 0.5, %v11249_v50  ;;  %v5682_v47 = vmul.f32 %v5650_v52, %v11425_v39  ;;  %v5340_v52 = vpop.f32.mrf.mxu0 }
 0x530   :  { %13388 = vst [vmem:[#allocation12_spill] sm:$0xff] %v11468_v41  ;;  %v5623_v54 = vmul.f32 1.0614054, %v11460_v17  ;;  %v5461_v15 = vadd.f32 1.0, %v5429_v40  ;;  %v5430_v38 = vmul.f32 0.3275911, %v11463_v60  ;;  %v6157_v58 = vsel %vm6093_vm15, %v6061_v42, %v6125_v34 }
 0x531   :  { %v5875_v0 = vmul.f32 %v5843_v43, %v11332_v23  ;;  %v5844_v22 = vadd.f32 0.2548296, %v5812_v30  ;;  %v5906_v11 = vsub.f32 0.0, %v11330_v37  ;;  %v5841_v7 = vadd.f32 0.2548296, %v5809_v28 }
 0x532   :  { %v7784_v51 = vpop.eup %7783  ;;  %v5655_v24 = vadd.f32 -1.4531521, %v5623_v54  ;;  %7785 = vrcp.f32 %v5461_v15  ;;  %v5462_v10 = vadd.f32 1.0, %v5430_v38  ;;  %v11482_v2 = vadd.f32 %v11362_v26, %v6287_v29 }
 0x533   :  { %v6288_v40 = vmul.f32 %v11468_v41, %v11468_v41  ;;  %7787 = vpow2.f32 %v5981_v21  ;;  %v5528_v3 = vmul.f32 %v7784_v51, %v5464_v1  ;;  %v6221_v34 = vadd.f32 1.0, %v6157_v58 }
 0x534   :  { %v6126_v23 = vsub.f32 0.0, %v6062_v61  ;;  %v5714_v42 = vadd.f32 1.4214138, %v5682_v47  ;;  %7789 = vrcp.f32 %v5462_v10  ;;  %v11486_v43 = vmul.f32 %v7780_v57, %v5875_v0 }
 0x535   :  { %v5560_v30 = vsub.f32 2.0, %v5528_v3  ;;  %v11489_v28 = vadd.f32 %v5299_v20, %v11027_v46  ;;  %v11492_v54 = vadd.f32 %v5340_v52, %v11029_v35  ;;  %v5876_v26 = vmul.f32 %v5844_v22, %v11350_v5 }
 0x536   :  { %v5873_v29 = vmul.f32 %v5841_v7, %v11356_v49  ;;  %v5938_v21 = vmul.f32 %v5906_v11, %v11330_v37  ;;  %v5687_v1 = vmul.f32 %v5655_v24, %v11460_v17  ;;  %v11499_v47 = vadd.f32 %v11374_v56, %v6288_v40  ;;  %v5217_v24 = vpop.f32.mrf.mxu2 }
 0x537   :  { %v11502_v57 = vmul.f32 0.5, %v11311_v4  ;;  %v11504_v38 = vmul.f32 %v7784_v51, %v5560_v30  ;;  %v5371_v20 = vand.u32 2147483647, %v11489_v28  ;;  %v11508_v0 = vmul.f32 %v6221_v34, %v11377_v44 }
 0x538   :  { %v7786_v58 = vpop.eup %7785  ;;  %v6158_v5 = vsel %vm6094_vm0, %v6062_v61, %v6126_v23  ;;  %v5746_v37 = vmul.f32 %v5714_v42, %v11425_v39  ;;  %v5372_v49 = vand.u32 2147483647, %v11492_v54  ;;  %v6067_v22 = vsub.f32 1.0, %v11486_v43 }
 0x539   :  { %13389 = vst [vmem:[#allocation13_spill] sm:$0xff] %v11508_v0  ;;  %v7788_v56 = vpop.eup %7787  ;;  %v5624_v11 = vmul.f32 1.0614054, %v11504_v38  ;;  %v5525_v51 = vmul.f32 %v7786_v58, %v5461_v15  ;;  %v11516_v7 = vmul.f32 0.70710677, %v5371_v20  ;;  %v6036_v40 = vmul.f32 %v7782_v6, %v5876_v26 }
 0x53a   :  { %v7790_v52 = vpop.eup %7789  ;;  %v6033_v44 = vmul.f32 %v7788_v56, %v5873_v29  ;;  %v5719_v3 = vadd.f32 1.4214138, %v5687_v1  ;;  %v11518_v34 = vmul.f32 0.70710677, %v5372_v49  ;;  %vm6099_vm1 = vcmp.ge.f32.partialorder %v13383_v36, 0.0 }
 0x53b   :  { %v5656_v62 = vadd.f32 -1.4531521, %v5624_v11  ;;  %v5557_v61 = vsub.f32 2.0, %v5525_v51  ;;  %v5526_v23 = vmul.f32 %v7790_v52, %v5462_v10  ;;  %v5435_v42 = vmul.f32 0.3275911, %v11516_v7 }
 0x53c   :  { %v5778_v43 = vadd.f32 -0.28449672, %v5746_v37  ;;  %v5911_v30 = vsub.f32 0.0, %v11401_v63  ;;  %v5436_v15 = vmul.f32 0.3275911, %v11518_v34  ;;  %v11525_v20 = vadd.f32 %v5217_v24, %v11037_v18 }
 0x53d   :  { %vm6100_vm2 = vcmp.ge.f32.partialorder %v11244_v48, 0.0  ;;  %v5688_v6 = vmul.f32 %v5656_v62, %v11504_v38  ;;  %v11529_v26 = vmul.f32 %v7786_v58, %v5557_v61  ;;  %v5558_v29 = vsub.f32 2.0, %v5526_v23  ;;  %v5258_v23 = vpop.f32.mrf.mxu3 }
 0x53e   :  { %v5467_v10 = vadd.f32 1.0, %v5435_v42  ;;  %v6068_v1 = vsub.f32 1.0, %v6036_v40  ;;  %vm6097_vm3 = vcmp.ge.f32.partialorder %v11249_v50, 0.0  ;;  %v5983_v49 = vmul.f32 1.442695, %v5938_v21 }
 0x53f   :  { %v5751_v37 = vmul.f32 %v5719_v3, %v11460_v17  ;;  %v5468_v56 = vadd.f32 1.0, %v5436_v15  ;;  %v6065_v11 = vsub.f32 1.0, %v6033_v44  ;;  %v5720_v51 = vadd.f32 1.4214138, %v5688_v6 }
 0x540   :  { %v5621_v24 = vmul.f32 1.0614054, %v11529_v26  ;;  %7791 = vrcp.f32 %v5467_v10  ;;  %v6285_v41 = vmul.f32 %v11508_v0, %v11508_v0  ;;  %v6222_v62 = vadd.f32 1.0, %v6158_v5 }
 0x541   :  { %v11536_v58 = vmul.f32 %v7790_v52, %v5558_v29  ;;  %7793 = vrcp.f32 %v5468_v56  ;;  %v6131_v61 = vsub.f32 0.0, %v6067_v22  ;;  %v5810_v40 = vmul.f32 %v5778_v43, %v11425_v39 }
 0x542   :  { %v5943_v21 = vmul.f32 %v5911_v30, %v11401_v63  ;;  %v5369_v3 = vand.u32 2147483647, %v11525_v20  ;;  %v6132_v44 = vsub.f32 0.0, %v6068_v1  ;;  %7795 = vpow2.f32 %v5983_v49 }
 0x543   :  { %v5783_v42 = vadd.f32 -0.28449672, %v5751_v37  ;;  %v5912_v15 = vsub.f32 0.0, %v11430_v16  ;;  %v6129_v6 = vsub.f32 0.0, %v6065_v11  ;;  %v5752_v0 = vmul.f32 %v5720_v51, %v11504_v38 }
 0x544   :  { %v5653_v5 = vadd.f32 -1.4531521, %v5621_v24  ;;  %v11543_v52 = vmul.f32 0.70710677, %v5369_v3  ;;  %v11546_v29 = vadd.f32 %v11392_v59, %v6285_v41  ;;  %v11549_v43 = vmul.f32 %v6222_v62, %v11383_v32 }
 0x545   :  { %v5622_v63 = vmul.f32 1.0614054, %v11536_v58  ;;  %v11553_v30 = vadd.f32 %v5258_v23, %v11039_v45  ;;  %v6163_v37 = vsel %vm6099_vm1, %v6067_v22, %v6131_v61  ;;  %v5842_v14 = vadd.f32 0.2548296, %v5810_v40 }
 0x546   :  { %v7792_v49 = vpop.eup %7791  ;;  %v5993_v51 = vmul.f32 1.442695, %v5943_v21  ;;  %v5433_v24 = vmul.f32 0.3275911, %v11543_v52  ;;  %v6164_v59 = vsel %vm6100_vm2, %v6068_v1, %v6132_v44  ;;  %v5815_v32 = vmul.f32 %v5783_v42, %v11460_v17 }
 0x547   :  { %v7794_v3 = vpop.eup %7793  ;;  %v5944_v41 = vmul.f32 %v5912_v15, %v11430_v16  ;;  %v5531_v62 = vmul.f32 %v7792_v49, %v5467_v10  ;;  %v6161_v23 = vsel %vm6097_vm3, %v6065_v11, %v6129_v6  ;;  %v5784_v25 = vadd.f32 -0.28449672, %v5752_v0 }
 0x548   :  { %v5685_v36 = vmul.f32 %v5653_v5, %v11529_v26  ;;  %v5532_v22 = vmul.f32 %v7794_v3, %v5468_v56  ;;  %v7796_v61 = vpop.eup %7795  ;;  %v5654_v40 = vadd.f32 -1.4531521, %v5622_v63  ;;  %v5465_v13 = vadd.f32 1.0, %v5433_v24 }
 0x549   :  { %v5563_v21 = vsub.f32 2.0, %v5531_v62  ;;  %v5370_v53 = vand.u32 2147483647, %v11553_v30  ;;  %v11568_v48 = vmul.f32 %v11549_v43, %v11549_v43  ;;  %v6227_v1 = vadd.f32 1.0, %v6163_v37 }
 0x54a   :  { %v5874_v16 = vmul.f32 %v5842_v14, %v11425_v39  ;;  %7797 = vpow2.f32 %v5993_v51  ;;  %v5847_v50 = vadd.f32 0.2548296, %v5815_v32  ;;  %v5564_v0 = vsub.f32 2.0, %v5532_v22 }
 0x54b   :  { %v11571_v10 = vmul.f32 %v7792_v49, %v5563_v21  ;;  %7799 = vrcp.f32 %v5465_v13  ;;  %v6228_v56 = vadd.f32 1.0, %v6164_v59  ;;  %v6225_v11 = vadd.f32 1.0, %v6161_v23 }
 0x54c   :  { %v5995_v44 = vmul.f32 1.442695, %v5944_v41  ;;  %v5717_v42 = vadd.f32 1.4214138, %v5685_v36  ;;  %v5816_v15 = vmul.f32 %v5784_v25, %v11504_v38  ;;  %v5686_v6 = vmul.f32 %v5654_v40, %v11536_v58 }
 0x54d   :  { %v5627_v5 = vmul.f32 1.0614054, %v11571_v10  ;;  %v11576_v63 = vmul.f32 0.70710677, %v5370_v53  ;;  %v11579_v14 = vmul.f32 %v6227_v1, %v11404_v27  ;;  %v6034_v39 = vmul.f32 %v7796_v61, %v5874_v16  ;;  %v5302_v16 = vpop.f32.mrf.mxu1 }
 0x54e   :  { %v11582_v49 = vmul.f32 0.5, %v11389_v9  ;;  %v11584_v37 = vmul.f32 %v7794_v3, %v5564_v0  ;;  %v5879_v51 = vmul.f32 %v5847_v50, %v11460_v17  ;;  %v5909_v24 = vsub.f32 0.0, %v11452_v55 }
 0x54f   :  { %13390 = vst [vmem:[#allocation14_spill] sm:$0xff] %v11579_v14  ;;  %v5659_v25 = vadd.f32 -1.4531521, %v5627_v5  ;;  %v5434_v59 = vmul.f32 0.3275911, %v11576_v63  ;;  %v11590_v53 = vmul.f32 %v6228_v56, %v11417_v33  ;;  %v11593_v27 = vmul.f32 %v6225_v11, %v11472_v12 }
 0x550   :  { %v7798_v32 = vpop.eup %7797  ;;  %7801 = vpow2.f32 %v5995_v44  ;;  %v5749_v41 = vmul.f32 %v5717_v42, %v11529_v26  ;;  %vm6098_vm4 = vcmp.ge.f32.partialorder %v11311_v4, 0.0  ;;  %v5848_v3 = vadd.f32 0.2548296, %v5816_v15 }
 0x551   :  { %13391 = vst [vmem:[#allocation15_spill] sm:$0xff] %v11590_v53  ;;  %v7800_v62 = vpop.eup %7799  ;;  %v5718_v17 = vadd.f32 1.4214138, %v5686_v6  ;;  %v5910_v23 = vsub.f32 0.0, %v11463_v60  ;;  %v5466_v36 = vadd.f32 1.0, %v5434_v59  ;;  %v6066_v22 = vsub.f32 1.0, %v6034_v39 }
 0x552   :  { %v5691_v61 = vmul.f32 %v5659_v25, %v11571_v10  ;;  %v5628_v33 = vmul.f32 1.0614054, %v11584_v37  ;;  %v5529_v40 = vmul.f32 %v7800_v62, %v5465_v13  ;;  %v6291_v12 = vmul.f32 %v11579_v14, %v11579_v14 }
 0x553   :  { %v6039_v21 = vmul.f32 %v7798_v32, %v5879_v51  ;;  %v5941_v1 = vmul.f32 %v5909_v24, %v11452_v55  ;;  %7803 = vrcp.f32 %v5466_v36  ;;  %v6292_v50 = vmul.f32 %v11590_v53, %v11590_v53 }
 0x554   :  { %v6289_v0 = vmul.f32 %v11593_v27, %v11593_v27  ;;  %v5781_v56 = vadd.f32 -0.28449672, %v5749_v41  ;;  %v5561_v11 = vsub.f32 2.0, %v5529_v40  ;;  %v5880_v44 = vmul.f32 %v5848_v3, %v11504_v38 }
 0x555   :  { %v11609_v13 = vmul.f32 0.5, %v11420_v19  ;;  %v5750_v42 = vmul.f32 %v5718_v17, %v11536_v58  ;;  %v5942_v15 = vmul.f32 %v5910_v23, %v11463_v60  ;;  %v6130_v6 = vsub.f32 0.0, %v6066_v22 }
 0x556   :  { %v7802_v55 = vpop.eup %7801  ;;  %vm6103_vm5 = vcmp.ge.f32.partialorder %v11389_v9, 0.0  ;;  %v5723_v5 = vadd.f32 1.4214138, %v5691_v61  ;;  %v5660_v39 = vadd.f32 -1.4531521, %v5628_v33  ;;  %v11615_v51 = vadd.f32 %v5302_v16, %v11027_v46 }
 0x557   :  { %v11618_v24 = vadd.f32 %v11482_v2, %v6291_v12  ;;  %v6071_v38 = vsub.f32 1.0, %v6039_v21  ;;  %v5989_v25 = vmul.f32 1.442695, %v5941_v1  ;;  %v11621_v59 = vmul.f32 0.5, %v11433_v31 }
 0x558   :  { %v11624_v32 = vadd.f32 %v11499_v47, %v6292_v50  ;;  %v11627_v60 = vadd.f32 %v11546_v29, %v6289_v0  ;;  %v5813_v41 = vmul.f32 %v5781_v56, %v11529_v26  ;;  %v11630_v3 = vmul.f32 %v7800_v62, %v5561_v11 }
 0x559   :  { %v7804_v17 = vpop.eup %7803  ;;  %v6040_v23 = vmul.f32 %v7802_v55, %v5880_v44  ;;  %v5782_v61 = vadd.f32 -0.28449672, %v5750_v42  ;;  %v5991_v2 = vmul.f32 1.442695, %v5942_v15  ;;  %v5915_v33 = vsub.f32 0.0, %v11516_v7 }
 0x55a   :  { %v6162_v40 = vsel %vm6098_vm4, %v6066_v22, %v6130_v6  ;;  %v5755_v12 = vmul.f32 %v5723_v5, %v11571_v10  ;;  %v5692_v47 = vmul.f32 %v5660_v39, %v11584_v37  ;;  %v5375_v29 = vand.u32 2147483647, %v11615_v51 }
 0x55b   :  { %v6135_v21 = vsub.f32 0.0, %v6071_v38  ;;  %7805 = vpow2.f32 %v5989_v25  ;;  %v11639_v62 = vmul.f32 0.5, %v11439_v8  ;;  %v5916_v1 = vsub.f32 0.0, %v11518_v34 }
 0x55c   :  { %vm6104_vm6 = vcmp.ge.f32.partialorder %v11420_v19, 0.0  ;;  %v5845_v16 = vadd.f32 0.2548296, %v5813_v41  ;;  %v5625_v50 = vmul.f32 1.0614054, %v11630_v3  ;;  %v5530_v4 = vmul.f32 %v7804_v17, %v5466_v36 }
 0x55d   :  { %v11644_v22 = vmul.f32 0.70710677, %v5375_v29  ;;  %v6226_v0 = vadd.f32 1.0, %v6162_v40  ;;  %v6072_v56 = vsub.f32 1.0, %v6040_v23  ;;  %v5814_v11 = vmul.f32 %v5782_v61, %v11536_v58  ;;  %v5343_v61 = vpop.f32.mrf.mxu0 }
 0x55e   :  { %v5947_v44 = vmul.f32 %v5915_v33, %v11516_v7  ;;  %7807 = vpow2.f32 %v5991_v2  ;;  %v5787_v42 = vadd.f32 -0.28449672, %v5755_v12  ;;  %v5724_v15 = vadd.f32 1.4214138, %v5692_v47  ;;  %v5220_v2 = vpop.f32.mrf.mxu2 }
 0x55f   :  { %v5439_v55 = vmul.f32 0.3275911, %v11644_v22  ;;  %v6167_v6 = vsel %vm6103_vm5, %v6071_v38, %v6135_v21  ;;  %v11652_v5 = vmul.f32 0.5, %v11489_v28  ;;  %v5948_v36 = vmul.f32 %v5916_v1, %v11518_v34 }
 0x560   :  { %v5913_v39 = vsub.f32 0.0, %v11543_v52  ;;  %v5877_v25 = vmul.f32 %v5845_v16, %v11529_v26  ;;  %v5657_v41 = vadd.f32 -1.4531521, %v5625_v50  ;;  %v5562_v23 = vsub.f32 2.0, %v5530_v4 }
 0x561   :  { %v5471_v7 = vadd.f32 1.0, %v5439_v55  ;;  %v7806_v33 = vpop.eup %7805  ;;  %v11658_v40 = vmul.f32 %v6226_v0, %v11502_v57  ;;  %v6136_v9 = vsub.f32 0.0, %v6072_v56  ;;  %v5846_v38 = vadd.f32 0.2548296, %v5814_v11 }
 0x562   :  { %v6001_v12 = vmul.f32 1.442695, %v5947_v44  ;;  %v6231_v47 = vadd.f32 1.0, %v6167_v6  ;;  %v5819_v29 = vmul.f32 %v5787_v42, %v11571_v10  ;;  %v5756_v34 = vmul.f32 %v5724_v15, %v11584_v37 }
 0x563   :  { %7809 = vrcp.f32 %v5471_v7  ;;  %v6003_v21 = vmul.f32 1.442695, %v5948_v36  ;;  %v5945_v26 = vmul.f32 %v5913_v39, %v11543_v52  ;;  %v11664_v1 = vadd.f32 %v5343_v61, %v11029_v35 }
 0x564   :  { %v11667_v16 = vadd.f32 %v5220_v2, %v11037_v18  ;;  %v7808_v57 = vpop.eup %7807  ;;  %v6037_v50 = vmul.f32 %v7806_v33, %v5877_v25  ;;  %v11670_v4 = vmul.f32 0.5, %v11492_v54  ;;  %v5689_v0 = vmul.f32 %v5657_v41, %v11630_v3 }
 0x565   :  { %v11673_v11 = vmul.f32 %v7804_v17, %v5562_v23  ;;  %v6168_v44 = vsel %vm6104_vm6, %v6072_v56, %v6136_v9  ;;  %v5878_v52 = vmul.f32 %v5846_v38, %v11536_v58  ;;  %7811 = vpow2.f32 %v6001_v12 }
 0x566   :  { %v5376_v42 = vand.u32 2147483647, %v11664_v1  ;;  %v11680_v15 = vmul.f32 %v6231_v47, %v11582_v49  ;;  %v5851_v55 = vadd.f32 0.2548296, %v5819_v29  ;;  %v5788_v6 = vadd.f32 -0.28449672, %v5756_v34  ;;  %v5261_v49 = vpop.f32.mrf.mxu3 }
 0x567   :  { %v5914_v36 = vsub.f32 0.0, %v11576_v63  ;;  %vm6101_vm7 = vcmp.ge.f32.partialorder %v11433_v31, 0.0  ;;  %7813 = vpow2.f32 %v6003_v21  ;;  %v5997_v17 = vmul.f32 1.442695, %v5945_v26 }
 0x568   :  { %13392 = vst [vmem:[#allocation16_spill] sm:$0xff] %v11680_v15  ;;  %v11684_v39 = vmul.f32 0.70710677, %v5376_v42  ;;  %v5373_v19 = vand.u32 2147483647, %v11667_v16  ;;  %v6232_v58 = vadd.f32 1.0, %v6168_v44  ;;  %v6038_v61 = vmul.f32 %v7808_v57, %v5878_v52 }
 0x569   :  { %v7810_v56 = vpop.eup %7809  ;;  %v6069_v25 = vsub.f32 1.0, %v6037_v50  ;;  %v5721_v41 = vadd.f32 1.4214138, %v5689_v0  ;;  %v5626_v23 = vmul.f32 1.0614054, %v11673_v11  ;;  %v6295_v38 = vmul.f32 %v11680_v15, %v11680_v15 }
 0x56a   :  { %v5535_v2 = vmul.f32 %v7810_v56, %v5471_v7  ;;  %v5440_v33 = vmul.f32 0.3275911, %v11684_v39  ;;  %v11689_v9 = vmul.f32 0.70710677, %v5373_v19  ;;  %v5883_v12 = vmul.f32 %v5851_v55, %v11571_v10 }
 0x56b   :  { %v5820_v47 = vmul.f32 %v5788_v6, %v11584_v37  ;;  %v5946_v29 = vmul.f32 %v5914_v36, %v11576_v63  ;;  %v7812_v34 = vpop.eup %7811  ;;  %v11698_v7 = vadd.f32 %v5261_v49, %v11039_v45  ;;  %v11701_v57 = vmul.f32 %v6232_v58, %v11609_v13  ;;  %v5305_v49 = vpop.f32.mrf.mxu1 }
 0x56c   :  { %v5567_v21 = vsub.f32 2.0, %v5535_v2  ;;  %v5472_v26 = vadd.f32 1.0, %v5440_v33  ;;  %v5437_v50 = vmul.f32 0.3275911, %v11689_v9  ;;  %v6133_v0 = vsub.f32 0.0, %v6069_v25 }
 0x56d   :  { %13393 = vst [vmem:[#allocation17_spill] sm:$0xff] %v11701_v57  ;;  %vm6102_vm8 = vcmp.ge.f32.partialorder %v11439_v8, 0.0  ;;  %v5753_v10 = vmul.f32 %v5721_v41, %v11630_v3  ;;  %v5658_v44 = vadd.f32 -1.4531521, %v5626_v23  ;;  %v7814_v52 = vpop.eup %7813  ;;  %v6070_v42 = vsub.f32 1.0, %v6038_v61 }
 0x56e   :  { %v11705_v63 = vmul.f32 %v7810_v56, %v5567_v21  ;;  %7815 = vrcp.f32 %v5472_v26  ;;  %v5469_v55 = vadd.f32 1.0, %v5437_v50  ;;  %v5852_v6 = vadd.f32 0.2548296, %v5820_v47 }
 0x56f   :  { %7817 = vpow2.f32 %v5997_v17  ;;  %v11708_v36 = vmul.f32 0.5, %v11525_v20  ;;  %v5999_v19 = vmul.f32 1.442695, %v5946_v29  ;;  %v11711_v13 = vadd.f32 %v11618_v24, %v6295_v38 }
 0x570   :  { %v11713_v58 = vmul.f32 %v7812_v34, %v5883_v12  ;;  %v5631_v41 = vmul.f32 1.0614054, %v11705_v63  ;;  %v5374_v23 = vand.u32 2147483647, %v11698_v7  ;;  %v6165_v56 = vsel %vm6101_vm7, %v6069_v25, %v6133_v0 }
 0x571   :  { %v5785_v61 = vadd.f32 -0.28449672, %v5753_v10  ;;  %v5690_v17 = vmul.f32 %v5658_v44, %v11673_v11  ;;  %7819 = vrcp.f32 %v5469_v55  ;;  %v6296_v2 = vmul.f32 %v11701_v57, %v11701_v57 }
 0x572   :  { %v6134_v33 = vsub.f32 0.0, %v6070_v42  ;;  %v5663_v24 = vadd.f32 -1.4531521, %v5631_v41  ;;  %v11722_v38 = vmul.f32 0.70710677, %v5374_v23  ;;  %vm6107_vm9 = vcmp.ge.f32.partialorder %v11489_v28, 0.0 }
 0x573   :  { %v5884_v12 = vmul.f32 %v5852_v6, %v11584_v37  ;;  %7821 = vpow2.f32 %v5999_v19  ;;  %v5919_v47 = vsub.f32 0.0, %v11644_v22  ;;  %v11728_v31 = vadd.f32 %v5305_v49, %v11027_v46  ;;  %v6549_v23 = vld [vmem:[%s13351_s8 + $0x5e0] sm:$0xff] }
 0x574   :  { %v7816_v25 = vpop.eup %7815  ;;  %v6229_v29 = vadd.f32 1.0, %v6165_v56  ;;  %v6075_v34 = vsub.f32 1.0, %v11713_v58  ;;  %v5695_v21 = vmul.f32 %v5663_v24, %v11705_v63  ;;  %v5438_v50 = vmul.f32 0.3275911, %v11722_v38  ;;  %v6613_v49 = vld [vmem:[%s13351_s8 + $0x7e0] sm:$0xff]  ;;  %6657 = vmatpush.msra.mxu1 %v6549_v23 }
 0x575   :  { %v11733_v0 = vpop.eup %7817  ;;  %v5817_v10 = vmul.f32 %v5785_v61, %v11630_v3  ;;  %v5722_v44 = vadd.f32 1.4214138, %v5690_v17  ;;  %v5536_v37 = vmul.f32 %v7816_v25, %v5472_v26  ;;  %v5379_v6 = vand.u32 2147483647, %v11728_v31  ;;  %6677 = vmatpush.msra.mxu0 %v6613_v49  ;;  %v6541_v23 = vld [vmem:[%s13351_s8 + $0x5a0] sm:$0xff] }
 0x576   :  { %v11738_v19 = vadd.f32 %v11624_v32, %v6296_v2  ;;  %v6166_v46 = vsel %vm6102_vm8, %v6070_v42, %v6134_v33  ;;  %v5727_v41 = vadd.f32 1.4214138, %v5695_v21  ;;  %v5470_v58 = vadd.f32 1.0, %v5438_v50  ;;  %v6545_v33 = vld [vmem:[%s13351_s8 + $0x5c0] sm:$0xff] }
 0x577   :  { %v7820_v56 = vpop.eup %7819  ;;  %v11748_v26 = vmul.f32 %v7814_v52, %v5884_v12  ;;  %v5951_v61 = vmul.f32 %v5919_v47, %v11644_v22  ;;  %v5568_v32 = vsub.f32 2.0, %v5536_v37  ;;  %v11751_v17 = vmul.f32 0.70710677, %v5379_v6  ;;  %v6609_v52 = vld [vmem:[%s13351_s8 + $0x7c0] sm:$0xff]  ;;  %6658 = vmatpush.msra.mxu1 %v6545_v33 }
 0x578   :  { %v6139_v8 = vsub.f32 0.0, %v6075_v34  ;;  %v5759_v42 = vmul.f32 %v5727_v41, %v11705_v63  ;;  %v5533_v2 = vmul.f32 %v7820_v56, %v5469_v55  ;;  %7823 = vrcp.f32 %v5470_v58  ;;  %6678 = vmatpush.msra.mxu0 %v6609_v52  ;;  %v5346_v41 = vpop.f32.mrf.mxu0  ;;  %v6421_v33 = vld [vmem:[%s13351_s8 + $0x1e0] sm:$0xff] }
 0x579   :  { %v11760_v24 = vpop.eup %7821  ;;  %v11763_v22 = vmul.f32 %v6229_v29, %v11621_v59  ;;  %v5849_v12 = vadd.f32 0.2548296, %v5817_v10  ;;  %v11765_v47 = vmul.f32 %v7816_v25, %v5568_v32  ;;  %v5443_v21 = vmul.f32 0.3275911, %v11751_v17  ;;  %6659 = vmatpush.msra.mxu1 %v6541_v23  ;;  %v6485_v52 = vld [vmem:[%s13351_s8 + $0x3e0] sm:$0xff]  ;;  %6617 = vmatpush.msrb.mxu2 %v6421_v33 }
 0x57a   :  { %v11768_v55 = vadd.f32 1.0, %v6166_v46  ;;  %v5754_v50 = vmul.f32 %v5722_v44, %v11673_v11  ;;  %v5791_v37 = vadd.f32 -0.28449672, %v5759_v42  ;;  %v5565_v6 = vsub.f32 2.0, %v5533_v2  ;;  %v5223_v46 = vpop.f32.mrf.mxu2  ;;  %v6605_v44 = vld [vmem:[%s13351_s8 + $0x7a0] sm:$0xff]  ;;  %6637 = vmatpush.msrb.mxu3 %v6485_v52 }
 0x57b   :  { %13394 = vst [vmem:[#allocation18_spill] sm:$0xff] %v11763_v22  ;;  %v13368_v59 = vsub.f32 1.0, %v11748_v26  ;;  %v11776_v25 = vmul.f32 0.5, %v11615_v51  ;;  %v5632_v29 = vmul.f32 1.0614054, %v11765_v47  ;;  %v11779_v10 = vadd.f32 1.0, %v5443_v21  ;;  %6679 = vmatpush.msra.mxu0 %v6605_v44 }
 0x57c   :  { %v6171_v49 = vsel %vm6107_vm9, %v6075_v34, %v6139_v8  ;;  %v5823_v32 = vmul.f32 %v5791_v37, %v11705_v63  ;;  %v6009_v42 = vmul.f32 1.442695, %v5951_v61  ;;  %v11787_v2 = vmul.f32 %v7820_v56, %v5565_v6  ;;  %v6537_v21 = vld [vmem:[%s13351_s8 + $0x580] sm:$0xff] }
 0x57d   :  { %v5881_v28 = vmul.f32 %v5849_v12, %v11630_v3  ;;  %v5664_v34 = vadd.f32 -1.4531521, %v5632_v29  ;;  %7825 = vrcp.f32 %v11779_v10  ;;  %v11801_v56 = vadd.f32 %v5346_v41, %v11029_v35  ;;  %v6601_v61 = vld [vmem:[%s13351_s8 + $0x780] sm:$0xff]  ;;  %6660 = vmatpush.msra.mxu1 %v6537_v21 }
 0x57e   :  { %v7824_v8 = vpop.eup %7823  ;;  %v11806_v37 = vadd.f32 -0.28449672, %v5754_v50  ;;  %v5855_v6 = vadd.f32 0.2548296, %v5823_v32  ;;  %v5629_v23 = vmul.f32 1.0614054, %v11787_v2  ;;  %v11810_v3 = vadd.f32 %v5223_v46, %v11037_v18  ;;  %6680 = vmatpush.msra.mxu0 %v6601_v61 }
 0x57f   :  { %v11814_v35 = vsub.f32 0.0, %v13368_v59  ;;  %v5696_v12 = vmul.f32 %v5664_v34, %v11765_v47  ;;  %v5534_v41 = vmul.f32 %v7824_v8, %v5470_v58  ;;  %v5380_v29 = vand.u32 2147483647, %v11801_v56  ;;  %v6417_v50 = vld [vmem:[%s13351_s8 + $0x1c0] sm:$0xff] }
 0x580   :  { %v6481_v18 = vld [vmem:[%s13351_s8 + $0x3c0] sm:$0xff]  ;;  %v11829_v44 = vmul.f32 %v11763_v22, %v11763_v22  ;;  %v11831_v32 = vadd.f32 1.0, %v6171_v49  ;;  %vm6108_vm10 = vcmp.ge.f32.partialorder %v11492_v54, 0.0  ;;  %7827 = vpow2.f32 %v6009_v42  ;;  %6618 = vmatpush.msrb.mxu2 %v6417_v50 }
 0x581   :  { %v6533_v46 = vld [vmem:[%s13351_s8 + $0x560] sm:$0xff]  ;;  %v5661_v58 = vadd.f32 -1.4531521, %v5629_v23  ;;  %6638 = vmatpush.msrb.mxu3 %v6481_v18  ;;  %v5728_v49 = vadd.f32 1.4214138, %v5696_v12  ;;  %v5920_v34 = vsub.f32 0.0, %v11684_v39  ;;  %v11847_v23 = vmul.f32 %v11733_v0, %v5881_v28 }
 0x582   :  { %v6597_v33 = vld [vmem:[%s13351_s8 + $0x760] sm:$0xff]  ;;  %v5566_v61 = vsub.f32 2.0, %v5534_v41  ;;  %v11844_v42 = vmul.f32 0.70710677, %v5380_v29  ;;  %6661 = vmatpush.msra.mxu1 %v6533_v46  ;;  %v5917_v18 = vsub.f32 0.0, %v11689_v9  ;;  %v5887_v29 = vmul.f32 %v5855_v6, %v11705_v63 }
 0x583   :  { %v6413_v52 = vld [vmem:[%s13351_s8 + $0x1a0] sm:$0xff]  ;;  %6681 = vmatpush.msra.mxu0 %v6597_v33  ;;  %v5693_v50 = vmul.f32 %v5661_v58, %v11787_v2  ;;  %v5377_v59 = vand.u32 2147483647, %v11810_v3  ;;  %v7826_v28 = vpop.eup %7825  ;;  %v5760_v46 = vmul.f32 %v5728_v49, %v11765_v47  ;;  %v11876_v6 = vmul.f32 0.5, %v11664_v1 }
 0x584   :  { %v6477_v21 = vld [vmem:[%s13351_s8 + $0x3a0] sm:$0xff]  ;;  %6619 = vmatpush.msrb.mxu2 %v6413_v52  ;;  %v11863_v58 = vmul.f32 %v7824_v8, %v5566_v61  ;;  %v5444_v33 = vmul.f32 0.3275911, %v11844_v42  ;;  %v5539_v49 = vmul.f32 %v7826_v28, %v11779_v10  ;;  %v5952_v57 = vmul.f32 %v5920_v34, %v11684_v39 }
 0x585   :  { %6639 = vmatpush.msrb.mxu3 %v6477_v21  ;;  %v6529_v12 = vld [vmem:[%s13351_s8 + $0x540] sm:$0xff]  ;;  %v5725_v8 = vadd.f32 1.4214138, %v5693_v50  ;;  %v11879_v61 = vmul.f32 0.70710677, %v5377_v59  ;;  %v6073_v50 = vsub.f32 1.0, %v11847_v23 }
 0x586   :  { %v6593_v41 = vld [vmem:[%s13351_s8 + $0x740] sm:$0xff]  ;;  %6662 = vmatpush.msra.mxu1 %v6529_v12  ;;  %v5630_v15 = vmul.f32 1.0614054, %v11863_v58  ;;  %v11886_v22 = vadd.f32 1.0, %v5444_v33  ;;  %v7828_v10 = vpop.eup %7827  ;;  %vm6105_vm11 = vcmp.ge.f32.partialorder %v11525_v20, 0.0  ;;  %vm6111_vm12 = vcmp.ge.f32.partialorder %v11615_v51, 0.0 }
 0x587   :  { %v6409_v0 = vld [vmem:[%s13351_s8 + $0x180] sm:$0xff]  ;;  %6682 = vmatpush.msra.mxu0 %v6593_v41  ;;  %v5792_v41 = vadd.f32 -0.28449672, %v5760_v46  ;;  %v5571_v46 = vsub.f32 2.0, %v5539_v49  ;;  %v5441_v39 = vmul.f32 0.3275911, %v11879_v61 }
 0x588   :  { %v6473_v52 = vld [vmem:[%s13351_s8 + $0x380] sm:$0xff]  ;;  %6620 = vmatpush.msrb.mxu2 %v6409_v0  ;;  %v5757_v0 = vmul.f32 %v5725_v8, %v11787_v2  ;;  %7829 = vrcp.f32 %v11886_v22  ;;  %vm6112_vm13 = vcmp.ge.f32.partialorder %v11664_v1, 0.0  ;;  %vm6109_vm14 = vcmp.ge.f32.partialorder %v11667_v16, 0.0 }
 0x589   :  { %v6525_v21 = vld [vmem:[%s13351_s8 + $0x520] sm:$0xff]  ;;  %6640 = vmatpush.msrb.mxu3 %v6473_v52  ;;  %v11901_v52 = vmul.f32 %v7828_v10, %v5887_v29  ;;  %v11912_v29 = vmul.f32 %v7826_v28, %v5571_v46  ;;  %v11914_v10 = vadd.f32 1.0, %v5441_v39  ;;  %v13395_v28 = vsub.f32 1.0, %v11748_v26 }
 0x58a   :  { %v6589_v63 = vld [vmem:[%s13351_s8 + $0x720] sm:$0xff]  ;;  %6663 = vmatpush.msra.mxu1 %v6525_v21  ;;  %v5949_v21 = vmul.f32 %v5917_v18, %v11689_v9  ;;  %v5923_v39 = vsub.f32 0.0, %v11751_v17  ;;  %v5818_v26 = vmul.f32 %v11806_v37, %v11673_v11  ;;  %vm6115_vm15 = vcmp.ge.f32.partialorder %v11728_v31, 0.0 }
 0x58b   :  { %v6405_v12 = vld [vmem:[%s13351_s8 + $0x160] sm:$0xff]  ;;  %6683 = vmatpush.msra.mxu0 %v6589_v63  ;;  %v5662_v63 = vadd.f32 -1.4531521, %v5630_v15  ;;  %7831 = vrcp.f32 %v11914_v10  ;;  %vm6106_vm0 = vcmp.ge.f32.partialorder %v11553_v30, 0.0  ;;  %vm6116_vm1 = vcmp.ge.f32.partialorder %v11801_v56, 0.0 }
 0x58c   :  { %v6469_v59 = vld [vmem:[%s13351_s8 + $0x360] sm:$0xff]  ;;  %6621 = vmatpush.msrb.mxu2 %v6405_v12  ;;  %v5824_v12 = vmul.f32 %v5792_v41, %v11765_v47  ;;  %v6172_v41 = vsel %vm6108_vm10, %v13395_v28, %v11814_v35  ;;  %v5635_v35 = vmul.f32 1.0614054, %v11912_v29  ;;  %v11968_v28 = vadd.f32 %v11627_v60, %v11829_v44 }
 0x58d   :  { %6641 = vmatpush.msrb.mxu3 %v6469_v59  ;;  %v6521_v34 = vld [vmem:[%s13351_s8 + $0x500] sm:$0xff]  ;;  %v5789_v59 = vadd.f32 -0.28449672, %v5757_v0  ;;  %v6011_v0 = vmul.f32 1.442695, %v5952_v57  ;;  %v5694_v46 = vmul.f32 %v5662_v63, %v11863_v58  ;;  %v11943_v57 = vmul.f32 %v11831_v32, %v11652_v5 }
 0x58e   :  { %v6585_v33 = vld [vmem:[%s13351_s8 + $0x700] sm:$0xff]  ;;  %6664 = vmatpush.msra.mxu1 %v6521_v34  ;;  %v5264_v34 = vpop.f32.mrf.mxu3  ;;  %v6137_v32 = vsub.f32 0.0, %v6073_v50  ;;  %v5667_v53 = vadd.f32 -1.4531521, %v5635_v35  ;;  %v5955_v44 = vmul.f32 %v5923_v39, %v11751_v17  ;;  %vm6113_vm2 = vcmp.ge.f32.partialorder %v11810_v3, 0.0 }
 0x58f   :  { %6684 = vmatpush.msra.mxu0 %v6585_v33  ;;  %v6401_v8 = vld [vmem:[%s13351_s8 + $0x140] sm:$0xff]  ;;  %v11971_v14 = vadd.f32 %v5264_v34, %v11039_v45  ;;  %7833 = vpow2.f32 %v6011_v0  ;;  %v5726_v60 = vadd.f32 1.4214138, %v5694_v46  ;;  %v11990_v34 = vmul.f32 %v11943_v57, %v11943_v57 }
 0x590   :  { %v6465_v49 = vld [vmem:[%s13351_s8 + $0x340] sm:$0xff]  ;;  %6622 = vmatpush.msrb.mxu2 %v6401_v8  ;;  %v5699_v0 = vmul.f32 %v5667_v53, %v11912_v29  ;;  %v12009_v53 = vsel %vm6105_vm11, %v6073_v50, %v6137_v32  ;;  %vm6110_vm3 = vcmp.ge.f32.partialorder %v11698_v7, 0.0  ;;  %vm6985_vm8 = vcmask 1040384  }
 0x591   :  { %6642 = vmatpush.msrb.mxu3 %v6465_v49  ;;  %v6517_v15 = vld [vmem:[%s13351_s8 + $0x4e0] sm:$0xff]  ;;  %v6079_v49 = vsub.f32 1.0, %v11901_v52  ;;  %vm6114_vm4 = vcmp.ge.f32.partialorder %v11971_v14, 0.0 }
 0x592   :  { %v6581_v9 = vld [vmem:[%s13351_s8 + $0x6e0] sm:$0xff]  ;;  %6665 = vmatpush.msra.mxu1 %v6517_v15  ;;  %v5821_v15 = vmul.f32 %v5789_v59, %v11787_v2  ;;  %v5731_v23 = vadd.f32 1.4214138, %v5699_v0 }
 0x593   :  { %v6397_v18 = vld [vmem:[%s13351_s8 + $0x120] sm:$0xff]  ;;  %6685 = vmatpush.msra.mxu0 %v6581_v9  ;;  %v6005_v9 = vmul.f32 1.442695, %v5949_v21 }
 0x594   :  { %v6461_v33 = vld [vmem:[%s13351_s8 + $0x320] sm:$0xff]  ;;  %6623 = vmatpush.msrb.mxu2 %v6397_v18 }
 0x595   :  { %v6513_v8 = vld [vmem:[%s13351_s8 + $0x4c0] sm:$0xff]  ;;  %6643 = vmatpush.msrb.mxu3 %v6461_v33  ;;  %v5856_v33 = vadd.f32 0.2548296, %v5824_v12  ;;  %7835 = vpow2.f32 %v6005_v9 }
 0x596   :  { %v6577_v54 = vld [vmem:[%s13351_s8 + $0x6c0] sm:$0xff]  ;;  %6666 = vmatpush.msra.mxu1 %v6513_v8  ;;  %v7830_v8 = vpop.eup %7829 }
 0x597   :  { %v6393_v63 = vld [vmem:[%s13351_s8 + $0x100] sm:$0xff]  ;;  %6686 = vmatpush.msra.mxu0 %v6577_v54  ;;  %v11979_v54 = vadd.f32 1.0, %v6172_v41  ;;  %v11992_v41 = vadd.f32 0.2548296, %v5818_v26  ;;  %v5540_v17 = vmul.f32 %v7830_v8, %v11886_v22  ;;  %v6143_v22 = vsub.f32 0.0, %v6079_v49 }
 0x598   :  { %v6457_v5 = vld [vmem:[%s13351_s8 + $0x300] sm:$0xff]  ;;  %6624 = vmatpush.msrb.mxu2 %v6393_v63  ;;  %v5853_v26 = vadd.f32 0.2548296, %v5821_v15  ;;  %v5378_v63 = vand.u32 2147483647, %v11971_v14 }
 0x599   :  { %v6509_v37 = vld [vmem:[%s13351_s8 + $0x4a0] sm:$0xff]  ;;  %6644 = vmatpush.msrb.mxu3 %v6457_v5  ;;  %v5572_v20 = vsub.f32 2.0, %v5540_v17  ;;  %v5924_v17 = vsub.f32 0.0, %v11844_v42 }
 0x59a   :  { %v6573_v18 = vld [vmem:[%s13351_s8 + $0x6a0] sm:$0xff]  ;;  %6667 = vmatpush.msra.mxu1 %v6509_v37  ;;  %v7832_v37 = vpop.eup %7831 }
 0x59b   :  { %v6389_v21 = vld [vmem:[%s13351_s8 + $0xe0] sm:$0xff]  ;;  %6687 = vmatpush.msra.mxu0 %v6573_v18  ;;  %v5888_v18 = vmul.f32 %v5856_v33, %v11765_v47  ;;  %v6017_v47 = vmul.f32 1.442695, %v5955_v44  ;;  %v5537_v9 = vmul.f32 %v7832_v37, %v11914_v10  ;;  %v12029_v33 = vmul.f32 0.70710677, %v5378_v63 }
 0x59c   :  { %v6453_v59 = vld [vmem:[%s13351_s8 + $0x2e0] sm:$0xff]  ;;  %6625 = vmatpush.msrb.mxu2 %v6389_v21  ;;  %v5758_v21 = vmul.f32 %v5726_v60, %v11863_v58  ;;  %v12036_v0 = vmul.f32 %v7830_v8, %v5572_v20  ;;  %v6175_v8 = vsel %vm6111_vm12, %v6079_v49, %v6143_v22  ;;  %v5885_v20 = vmul.f32 %v5853_v26, %v11787_v2 }
 0x59d   :  { %v6505_v45 = vld [vmem:[%s13351_s8 + $0x480] sm:$0xff]  ;;  %6645 = vmatpush.msrb.mxu3 %v6453_v59  ;;  %v5442_v63 = vmul.f32 0.3275911, %v12029_v33  ;;  %7837 = vpow2.f32 %v6017_v47  ;;  %v5956_v47 = vmul.f32 %v5924_v17, %v11844_v42 }
 0x59e   :  { %v6569_v12 = vld [vmem:[%s13351_s8 + $0x680] sm:$0xff]  ;;  %6668 = vmatpush.msra.mxu1 %v6505_v45  ;;  %v5918_v45 = vsub.f32 0.0, %v11722_v38  ;;  %v5636_v52 = vmul.f32 1.0614054, %v12036_v0  ;;  %v5790_v51 = vadd.f32 -0.28449672, %v5758_v21 }
 0x59f   :  { %v6385_v46 = vld [vmem:[%s13351_s8 + $0xc0] sm:$0xff]  ;;  %6688 = vmatpush.msra.mxu0 %v6569_v12  ;;  %v5763_v12 = vmul.f32 %v5731_v23, %v11912_v29  ;;  %v12063_v22 = vadd.f32 1.0, %v5442_v63 }
 0x5a0   :  { %v6449_v39 = vld [vmem:[%s13351_s8 + $0x2c0] sm:$0xff]  ;;  %6626 = vmatpush.msrb.mxu2 %v6385_v46  ;;  %v7834_v46 = vpop.eup %7833  ;;  %v5668_v21 = vadd.f32 -1.4531521, %v5636_v52 }
 0x5a1   :  { %v6501_v35 = vld [vmem:[%s13351_s8 + $0x460] sm:$0xff]  ;;  %6646 = vmatpush.msrb.mxu3 %v6449_v39  ;;  %v5569_v39 = vsub.f32 2.0, %v5537_v9  ;;  %v12057_v23 = vmul.f32 %v7834_v46, %v5888_v18  ;;  %7839 = vrcp.f32 %v12063_v22 }
 0x5a2   :  { %v6565_v5 = vld [vmem:[%s13351_s8 + $0x660] sm:$0xff]  ;;  %6669 = vmatpush.msra.mxu1 %v6501_v35  ;;  %v5921_v35 = vsub.f32 0.0, %v11879_v61 }
 0x5a3   :  { %v6381_v50 = vld [vmem:[%s13351_s8 + $0xa0] sm:$0xff]  ;;  %6689 = vmatpush.msra.mxu0 %v6565_v5  ;;  %v12061_v49 = vmul.f32 %v7832_v37, %v5569_v39  ;;  %v5950_v37 = vmul.f32 %v5918_v45, %v11722_v38  ;;  %v6239_v38 = vadd.f32 1.0, %v6175_v8  ;;  %v5700_v8 = vmul.f32 %v5668_v21, %v12036_v0  ;;  %v6610_v39 = vld [vmem:[%s13351_s8 + $0x7c8] sm:$0xff] }
 0x5a4   :  { %v6445_v32 = vld [vmem:[%s13351_s8 + $0x2a0] sm:$0xff]  ;;  %6627 = vmatpush.msrb.mxu2 %v6381_v50  ;;  %v5795_v50 = vadd.f32 -0.28449672, %v5763_v12  ;;  %v6614_v12 = vld [vmem:[%s13351_s8 + $0x7e8] sm:$0xff] }
 0x5a5   :  { %v6497_v15 = vld [vmem:[%s13351_s8 + $0x440] sm:$0xff]  ;;  %6647 = vmatpush.msrb.mxu3 %v6445_v32  ;;  %v7836_v32 = vpop.eup %7835  ;;  %v5633_v45 = vmul.f32 1.0614054, %v12061_v49  ;;  %v12136_v21 = vmul.f32 %v6239_v38, %v11776_v25  ;;  %v6538_v38 = vld [vmem:[%s13351_s8 + $0x588] sm:$0xff] }
 0x5a6   :  { %v6561_v59 = vld [vmem:[%s13351_s8 + $0x640] sm:$0xff]  ;;  %6670 = vmatpush.msra.mxu1 %v6497_v15  ;;  %v5827_v15 = vmul.f32 %v5795_v50, %v11912_v29  ;;  %v5822_v50 = vmul.f32 %v5790_v51, %v11863_v58 }
 0x5a7   :  { %v6377_v10 = vld [vmem:[%s13351_s8 + $0x80] sm:$0xff]  ;;  %6690 = vmatpush.msra.mxu0 %v6561_v59  ;;  %v6550_v59 = vld [vmem:[%s13351_s8 + $0x5e8] sm:$0xff]  ;;  %v5665_v52 = vadd.f32 -1.4531521, %v5633_v45 }
 0x5a8   :  { %v6441_v60 = vld [vmem:[%s13351_s8 + $0x280] sm:$0xff]  ;;  %6628 = vmatpush.msrb.mxu2 %v6377_v10  ;;  %v5953_v10 = vmul.f32 %v5921_v35, %v11879_v61  ;;  %v12100_v61 = vmul.f32 %v7836_v32, %v5885_v20  ;;  %v5859_v46 = vadd.f32 0.2548296, %v5827_v15  ;;  %v12117_v20 = vadd.f32 1.0, %v12009_v53  ;;  %v7838_v15 = vpop.eup %7837  ;;  %v6602_v45 = vld [vmem:[%s13351_s8 + $0x788] sm:$0xff] }
 0x5a9   :  { %v6493_v44 = vld [vmem:[%s13351_s8 + $0x420] sm:$0xff]  ;;  %6648 = vmatpush.msrb.mxu3 %v6441_v60  ;;  %v6546_v60 = vld [vmem:[%s13351_s8 + $0x5c8] sm:$0xff] }
 0x5aa   :  { %v6557_v5 = vld [vmem:[%s13351_s8 + $0x620] sm:$0xff]  ;;  %6671 = vmatpush.msra.mxu1 %v6493_v44  ;;  %v6080_v44 = vsub.f32 1.0, %v12057_v23  ;;  %v5891_v53 = vmul.f32 %v5859_v46, %v11912_v29  ;;  %v6422_v29 = vld [vmem:[%s13351_s8 + $0x1e8] sm:$0xff]  ;;  %v6077_v25 = vsub.f32 1.0, %v12100_v61 }
 0x5ab   :  { %6691 = vmatpush.msra.mxu0 %v6557_v5  ;;  %v6373_v18 = vld [vmem:[%s13351_s8 + $0x60] sm:$0xff]  ;;  %v12114_v5 = vmul.f32 %v11979_v54, %v11670_v4  ;;  %v5882_v4 = vmul.f32 %v11992_v41, %v11673_v11  ;;  %v6007_v54 = vmul.f32 1.442695, %v5950_v37  ;;  %v5697_v11 = vmul.f32 %v5665_v52, %v12061_v49  ;;  %v6486_v37 = vld [vmem:[%s13351_s8 + $0x3e8] sm:$0xff] }
 0x5ac   :  { %v6437_v2 = vld [vmem:[%s13351_s8 + $0x260] sm:$0xff]  ;;  %6629 = vmatpush.msrb.mxu2 %v6373_v18  ;;  %v6542_v18 = vld [vmem:[%s13351_s8 + $0x5a8] sm:$0xff]  ;;  %v6013_v41 = vmul.f32 1.442695, %v5953_v10  ;;  %v7840_v10 = vpop.eup %7839 }
 0x5ad   :  { %v6489_v26 = vld [vmem:[%s13351_s8 + $0x400] sm:$0xff]  ;;  %6649 = vmatpush.msrb.mxu3 %v6437_v2  ;;  %v6606_v2 = vld [vmem:[%s13351_s8 + $0x7a8] sm:$0xff]  ;;  %v5729_v46 = vadd.f32 1.4214138, %v5697_v11  ;;  %7841 = vpow2.f32 %v6007_v54  ;;  %v12178_v52 = vmul.f32 %v11760_v24, %v5882_v4  ;;  %v6303_v54 = vmul.f32 %v12136_v21, %v12136_v21 }
 0x5ae   :  { %v6553_v9 = vld [vmem:[%s13351_s8 + $0x600] sm:$0xff]  ;;  %6672 = vmatpush.msra.mxu1 %v6489_v26  ;;  %v5732_v26 = vadd.f32 1.4214138, %v5700_v8  ;;  %v6418_v8 = vld [vmem:[%s13351_s8 + $0x1c8] sm:$0xff] }
 0x5af   :  { %6692 = vmatpush.msra.mxu0 %v6553_v9  ;;  %v6369_v42 = vld [vmem:[%s13351_s8 + $0x40] sm:$0xff]  ;;  %v6019_v9 = vmul.f32 1.442695, %v5956_v47  ;;  %v6051_v47 = vmul.f32 %v7838_v15, %v5891_v53  ;;  %v6141_v15 = vsub.f32 0.0, %v6077_v25  ;;  %v6410_v11 = vld [vmem:[%s13351_s8 + $0x188] sm:$0xff] }
 0x5b0   :  { %v6433_v17 = vld [vmem:[%s13351_s8 + $0x240] sm:$0xff]  ;;  %6737 = vmatpush.msrb.mxu1 %v6550_v59  ;;  %6630 = vmatpush.msrb.mxu2 %v6369_v42  ;;  %v6144_v59 = vsub.f32 0.0, %v6080_v44  ;;  %v12158_v42 = vadd.f32 %v11711_v13, %v11990_v34  ;;  %v5538_v34 = vmul.f32 %v7840_v10, %v12063_v22  ;;  %v6414_v22 = vld [vmem:[%s13351_s8 + $0x1a8] sm:$0xff] }
 0x5b1   :  { %6757 = vmatpush.msrb.mxu0 %v6614_v12  ;;  %v6365_v35 = vld [vmem:[%s13351_s8 + $0x20] sm:$0xff]  ;;  %6650 = vmatpush.msrb.mxu3 %v6433_v17  ;;  %v5764_v12 = vmul.f32 %v5732_v26, %v12036_v0  ;;  %v12162_v17 = vmul.f32 %v12114_v5, %v12114_v5  ;;  %7843 = vpow2.f32 %v6019_v9  ;;  %v6530_v26 = vld [vmem:[%s13351_s8 + $0x548] sm:$0xff] }
 0x5b2   :  { %v6429_v63 = vld [vmem:[%s13351_s8 + $0x220] sm:$0xff]  ;;  %6738 = vmatpush.msrb.mxu1 %v6546_v60  ;;  %6631 = vmatpush.msrb.mxu2 %v6365_v35  ;;  %v5854_v60 = vadd.f32 0.2548296, %v5822_v50  ;;  %v6083_v35 = vsub.f32 1.0, %v6051_v47  ;;  %v6598_v50 = vld [vmem:[%s13351_s8 + $0x768] sm:$0xff]  ;;  %v5570_v53 = vsub.f32 2.0, %v5538_v34  ;;  %7845 = vpow2.f32 %v6013_v41 }
 0x5b3   :  { %6758 = vmatpush.msrb.mxu0 %v6610_v39  ;;  %v6361_v51 = vld [vmem:[%s13351_s8] sm:$0xff]  ;;  %6651 = vmatpush.msrb.mxu3 %v6429_v63  ;;  %v6482_v39 = vld [vmem:[%s13351_s8 + $0x3c8] sm:$0xff]  ;;  %v5796_v13 = vadd.f32 -0.28449672, %v5764_v12  ;;  %v6211_v47 = vmul.f32 0.5, %v11728_v31  ;;  %v6074_v31 = vsub.f32 1.0, %v12178_v52 }
 0x5b4   :  { %v6425_v32 = vld [vmem:[%s13351_s8 + $0x200] sm:$0xff]  ;;  %6739 = vmatpush.msrb.mxu1 %v6542_v18  ;;  %6632 = vmatpush.msrb.mxu2 %v6361_v51  ;;  %v6534_v63 = vld [vmem:[%s13351_s8 + $0x568] sm:$0xff]  ;;  %v5761_v18 = vmul.f32 %v5729_v46, %v12061_v49  ;;  %v6147_v24 = vsub.f32 0.0, %v6083_v35  ;;  %v5886_v23 = vmul.f32 %v5854_v60, %v11863_v58  ;;  %v7842_v60 = vpop.eup %7841  ;;  %v12231_v46 = vmul.f32 %v12117_v20, %v11708_v36 }
 0x5b5   :  { %6759 = vmatpush.msrb.mxu0 %v6606_v2  ;;  %6652 = vmatpush.msrb.mxu3 %v6425_v32  ;;  %v6478_v2 = vld [vmem:[%s13351_s8 + $0x3a8] sm:$0xff]  ;;  %v5828_v4 = vmul.f32 %v5796_v13, %v12036_v0  ;;  %v6176_v32 = vsel %vm6112_vm13, %v6080_v44, %v6144_v59 }
 0x5b6   :  { %6697 = vmatpush.msra.mxu2 %v6422_v29  ;;  %6740 = vmatpush.msrb.mxu1 %v6538_v38  ;;  %v6594_v51 = vld [vmem:[%s13351_s8 + $0x748] sm:$0xff]  ;;  %v5793_v9 = vadd.f32 -0.28449672, %v5761_v18  ;;  %v6179_v1 = vsel %vm6115_vm15, %v6083_v35, %v6147_v24  ;;  %v5922_v38 = vsub.f32 0.0, %v12029_v33  ;;  %v6240_v36 = vadd.f32 1.0, %v6176_v32 }
 0x5b7   :  { %6717 = vmatpush.msra.mxu3 %v6486_v37  ;;  %6760 = vmatpush.msrb.mxu0 %v6602_v45  ;;  %v6474_v29 = vld [vmem:[%s13351_s8 + $0x388] sm:$0xff]  ;;  %v5860_v44 = vadd.f32 0.2548296, %v5828_v4  ;;  %v12212_v37 = vmul.f32 %v7840_v10, %v5570_v53  ;;  %v6243_v12 = vadd.f32 1.0, %v6179_v1  ;;  %v7844_v34 = vpop.eup %7843 }
 0x5b8   :  { %6698 = vmatpush.msra.mxu2 %v6418_v8  ;;  %6741 = vmatpush.msrb.mxu1 %v6534_v63  ;;  %v6526_v41 = vld [vmem:[%s13351_s8 + $0x528] sm:$0xff]  ;;  %v5825_v58 = vmul.f32 %v5793_v9, %v12061_v49  ;;  %v7846_v53 = vpop.eup %7845 }
 0x5b9   :  { %6718 = vmatpush.msra.mxu3 %v6482_v39  ;;  %6761 = vmatpush.msrb.mxu0 %v6598_v50  ;;  %v6590_v59 = vld [vmem:[%s13351_s8 + $0x728] sm:$0xff]  ;;  %v5892_v8 = vmul.f32 %v5860_v44, %v12036_v0  ;;  %v5634_v39 = vmul.f32 1.0614054, %v12212_v37  ;;  %v6173_v0 = vsel %vm6109_vm14, %v6077_v25, %v6141_v15  ;;  %v12247_v20 = vmul.f32 %v6243_v12, %v6211_v47 }
 0x5ba   :  { %6699 = vmatpush.msra.mxu2 %v6414_v22  ;;  %6742 = vmatpush.msrb.mxu1 %v6530_v26  ;;  %v6406_v45 = vld [vmem:[%s13351_s8 + $0x168] sm:$0xff]  ;;  %v5857_v63 = vadd.f32 0.2548296, %v5825_v58  ;;  %v6340_v22 = vadd.f32 %v12158_v42, %v6303_v54  ;;  %v6205_v26 = vmul.f32 0.5, %v11667_v16  ;;  %v6138_v16 = vsub.f32 0.0, %v6074_v31 }
 0x5bb   :  { %6719 = vmatpush.msra.mxu3 %v6478_v2  ;;  %6762 = vmatpush.msrb.mxu0 %v6594_v51  ;;  %v6470_v10 = vld [vmem:[%s13351_s8 + $0x368] sm:$0xff]  ;;  %v12256_v2 = vmul.f32 %v7842_v60, %v5886_v23  ;;  %v6052_v61 = vmul.f32 %v7844_v34, %v5892_v8  ;;  %v5666_v24 = vadd.f32 -1.4531521, %v5634_v39  ;;  %v6307_v42 = vmul.f32 %v12247_v20, %v12247_v20 }
 0x5bc   :  { %6700 = vmatpush.msra.mxu2 %v6410_v11  ;;  %v6522_v35 = vld [vmem:[%s13351_s8 + $0x508] sm:$0xff]  ;;  %6743 = vmatpush.msrb.mxu1 %v6526_v41  ;;  %v5889_v54 = vmul.f32 %v5857_v63, %v12061_v49  ;;  %v5954_v51 = vmul.f32 %v5922_v38, %v12029_v33  ;;  %v6237_v9 = vadd.f32 1.0, %v6173_v0  ;;  %v12285_v23 = vmul.f32 %v6240_v36, %v11876_v6 }
 0x5bd   :  { %6720 = vmatpush.msra.mxu3 %v6474_v29  ;;  %v6586_v13 = vld [vmem:[%s13351_s8 + $0x708] sm:$0xff]  ;;  %6763 = vmatpush.msrb.mxu0 %v6590_v59  ;;  %v6084_v11 = vsub.f32 1.0, %v6052_v61  ;;  %v5698_v29 = vmul.f32 %v5666_v24, %v12212_v37  ;;  %v6341_v1 = vadd.f32 %v6340_v22, %v6307_v42  ;;  %v6352_v47 = vadd.f32 %v11738_v19, %v12162_v17 }
 0x5be   :  { %v6402_v50 = vld [vmem:[%s13351_s8 + $0x148] sm:$0xff]  ;;  %6701 = vmatpush.msra.mxu2 %v6406_v45  ;;  %6744 = vmatpush.msrb.mxu1 %v6522_v35  ;;  %v6049_v44 = vmul.f32 %v7846_v53, %v5889_v54  ;;  %v6078_v6 = vsub.f32 1.0, %v12256_v2  ;;  %v6015_v19 = vmul.f32 1.442695, %v5954_v51  ;;  %v12311_v35 = vmul.f32 %v6237_v9, %v6205_v26 }
 0x5bf   :  { %v6466_v18 = vld [vmem:[%s13351_s8 + $0x348] sm:$0xff]  ;;  %6721 = vmatpush.msra.mxu3 %v6470_v10  ;;  %6764 = vmatpush.msrb.mxu0 %v6586_v13  ;;  %v6148_v12 = vsub.f32 0.0, %v6084_v11  ;;  %v5730_v58 = vadd.f32 1.4214138, %v5698_v29  ;;  %v6297_v10 = vmul.f32 %v12231_v46, %v12231_v46  ;;  %v6342_v60 = vrot.slane %v6341_v1, 4 }
 0x5c0   :  { %v6518_v25 = vld [vmem:[%s13351_s8 + $0x4e8] sm:$0xff]  ;;  %6702 = vmatpush.msra.mxu2 %v6402_v50  ;;  %v6081_v8 = vsub.f32 1.0, %v6049_v44  ;;  %v6212_v34 = vmul.f32 0.5, %v11801_v56  ;;  %v6304_v50 = vmul.f32 %v12285_v23, %v12285_v23  ;;  %7847 = vpow2.f32 %v6015_v19 }
 0x5c1   :  { %v6582_v4 = vld [vmem:[%s13351_s8 + $0x6e8] sm:$0xff]  ;;  %6722 = vmatpush.msra.mxu3 %v6466_v18  ;;  %6745 = vmatpush.msrb.mxu1 %v6518_v25  ;;  %v6180_v13 = vsel %vm6116_vm1, %v6084_v11, %v6148_v12  ;;  %v5762_v36 = vmul.f32 %v5730_v58, %v12212_v37  ;;  %v6343_v24 = vadd.f32 %v6342_v60, %v6341_v1 }
 0x5c2   :  { %v6398_v32 = vld [vmem:[%s13351_s8 + $0x128] sm:$0xff]  ;;  %6765 = vmatpush.msrb.mxu0 %v6582_v4  ;;  %v6244_v18 = vadd.f32 1.0, %v6180_v13  ;;  %v6145_v22 = vsub.f32 0.0, %v6081_v8  ;;  %v6170_v25 = vsel %vm6106_vm0, %v6074_v31, %v6138_v16  ;;  %v6142_v4 = vsub.f32 0.0, %v6078_v6 }
 0x5c3   :  { %v6462_v15 = vld [vmem:[%s13351_s8 + $0x328] sm:$0xff]  ;;  %6703 = vmatpush.msra.mxu2 %v6398_v32  ;;  %v5794_v53 = vadd.f32 -0.28449672, %v5762_v36  ;;  %v6344_v32 = vrot.slane %v6343_v24, 2  ;;  %v6209_v16 = vmul.f32 0.5, %v11810_v3  ;;  %v12384_v60 = vmul.f32 %v11768_v55, %v11639_v62 }
 0x5c4   :  { %v6514_v33 = vld [vmem:[%s13351_s8 + $0x4c8] sm:$0xff]  ;;  %6723 = vmatpush.msra.mxu3 %v6462_v15  ;;  %v12344_v52 = vmul.f32 %v6244_v18, %v6212_v34  ;;  %v6177_v54 = vsel %vm6113_vm2, %v6081_v8, %v6145_v22  ;;  %v6301_v15 = vmul.f32 %v12311_v35, %v12311_v35  ;;  %v6202_v34 = vmul.f32 0.5, %v11553_v30  ;;  %v6551_v30 = vld [vmem:[%s13351_s8 + $0x5f0] sm:$0xff] }
 0x5c5   :  { %v6578_v49 = vld [vmem:[%s13351_s8 + $0x6c8] sm:$0xff]  ;;  %6746 = vmatpush.msrb.mxu1 %v6514_v33  ;;  %v6241_v9 = vadd.f32 1.0, %v6177_v54  ;;  %v5826_v11 = vmul.f32 %v5794_v53, %v12212_v37 }
 0x5c6   :  { %v6394_v41 = vld [vmem:[%s13351_s8 + $0x108] sm:$0xff]  ;;  %6766 = vmatpush.msrb.mxu0 %v6578_v49  ;;  %v6353_v49 = vadd.f32 %v6352_v47, %v6304_v50  ;;  %v6308_v1 = vmul.f32 %v12344_v52, %v12344_v52  ;;  %v6174_v47 = vsel %vm6110_vm3, %v6078_v6, %v6142_v4  ;;  %v7848_v13 = vpop.eup %7847  ;;  %v6290_v50 = vmul.f32 %v11658_v40, %v11658_v40 }
 0x5c7   :  { %v6458_v59 = vld [vmem:[%s13351_s8 + $0x308] sm:$0xff]  ;;  %6704 = vmatpush.msra.mxu2 %v6394_v41  ;;  %v6345_v41 = vadd.f32 %v6344_v32, %v6343_v24  ;;  %v12374_v12 = vmul.f32 %v6241_v9, %v6209_v16  ;;  %v5858_v58 = vadd.f32 0.2548296, %v5826_v11  ;;  %v6238_v36 = vadd.f32 1.0, %v6174_v47  ;;  %v6543_v11 = vld [vmem:[%s13351_s8 + $0x5b0] sm:$0xff] }
 0x5c8   :  { %v6510_v38 = vld [vmem:[%s13351_s8 + $0x4a8] sm:$0xff]  ;;  %6724 = vmatpush.msra.mxu3 %v6458_v59  ;;  %v6313_v59 = vadd.f32 %v11968_v28, %v6297_v10  ;;  %v6234_v28 = vadd.f32 1.0, %v6170_v25  ;;  %v6354_v2 = vadd.f32 %v6353_v49, %v6308_v1  ;;  %v6206_v24 = vmul.f32 0.5, %v11698_v7  ;;  %v6547_v7 = vld [vmem:[%s13351_s8 + $0x5d0] sm:$0xff] }
 0x5c9   :  { %v6574_v45 = vld [vmem:[%s13351_s8 + $0x6a8] sm:$0xff]  ;;  %6747 = vmatpush.msrb.mxu1 %v6510_v38  ;;  %v6346_v8 = vrot.slane %v6345_v41, 1  ;;  %v5890_v62 = vmul.f32 %v5858_v58, %v12212_v37  ;;  %v6210_v58 = vmul.f32 0.5, %v11971_v14 }
 0x5ca   :  { %v6390_v17 = vld [vmem:[%s13351_s8 + $0xe8] sm:$0xff]  ;;  %6767 = vmatpush.msrb.mxu0 %v6574_v45  ;;  %v6314_v19 = vadd.f32 %v6313_v59, %v6301_v15  ;;  %v12432_v32 = vmul.f32 %v6238_v36, %v6206_v24  ;;  %v6539_v59 = vld [vmem:[%s13351_s8 + $0x590] sm:$0xff] }
 0x5cb   :  { %v6454_v39 = vld [vmem:[%s13351_s8 + $0x2e8] sm:$0xff]  ;;  %6705 = vmatpush.msra.mxu2 %v6390_v17  ;;  %v6305_v17 = vmul.f32 %v12374_v12, %v12374_v12  ;;  %v6050_v22 = vmul.f32 %v7848_v13, %v5890_v62  ;;  %v6527_v36 = vld [vmem:[%s13351_s8 + $0x530] sm:$0xff] }
 0x5cc   :  { %v6506_v0 = vld [vmem:[%s13351_s8 + $0x488] sm:$0xff]  ;;  %6725 = vmatpush.msra.mxu3 %v6454_v39  ;;  %v6302_v47 = vmul.f32 %v12432_v32, %v12432_v32 }
 0x5cd   :  { %v6570_v63 = vld [vmem:[%s13351_s8 + $0x688] sm:$0xff]  ;;  %6748 = vmatpush.msrb.mxu1 %v6506_v0  ;;  %v6355_v0 = vrot.slane %v6354_v2, 4  ;;  %v6315_v18 = vadd.f32 %v6314_v19, %v6305_v17  ;;  %v6615_v19 = vld [vmem:[%s13351_s8 + $0x7f0] sm:$0xff] }
 0x5ce   :  { %v6386_v56 = vld [vmem:[%s13351_s8 + $0xc8] sm:$0xff]  ;;  %6768 = vmatpush.msrb.mxu0 %v6570_v63  ;;  %v12402_v63 = vadd.f32 %v6346_v8, %v6345_v41  ;;  %v6531_v17 = vld [vmem:[%s13351_s8 + $0x550] sm:$0xff] }
 0x5cf   :  { %v6450_v61 = vld [vmem:[%s13351_s8 + $0x2c8] sm:$0xff]  ;;  %6706 = vmatpush.msra.mxu2 %v6386_v56  ;;  %v6356_v25 = vadd.f32 %v6355_v0, %v6354_v2  ;;  %v6316_v54 = vrot.slane %v6315_v18, 4  ;;  %v6535_v2 = vld [vmem:[%s13351_s8 + $0x570] sm:$0xff] }
 0x5d0   :  { %v6502_v26 = vld [vmem:[%s13351_s8 + $0x468] sm:$0xff]  ;;  %6726 = vmatpush.msra.mxu3 %v6450_v61  ;;  %v12415_v61 = vmul.f32 %v6234_v28, %v6202_v34  ;;  %6673 = vmatmul.f32.vlgmr.msra.gmra.mxu1 %v12402_v63  ;;  %v6423_v34 = vld [vmem:[%s13351_s8 + $0x1f0] sm:$0xff] }
 0x5d1   :  { %v6566_v42 = vld [vmem:[%s13351_s8 + $0x668] sm:$0xff]  ;;  %6749 = vmatpush.msrb.mxu1 %v6502_v26  ;;  %v6357_v15 = vrot.slane %v6356_v25, 2 }
 0x5d2   :  { %v6382_v31 = vld [vmem:[%s13351_s8 + $0xa8] sm:$0xff]  ;;  %6769 = vmatpush.msrb.mxu0 %v6566_v42  ;;  %v6294_v42 = vmul.f32 %v12384_v60, %v12384_v60  ;;  %v6298_v49 = vmul.f32 %v12415_v61, %v12415_v61 }
 0x5d3   :  { %v6446_v51 = vld [vmem:[%s13351_s8 + $0x2a8] sm:$0xff]  ;;  %6707 = vmatpush.msra.mxu2 %v6382_v31  ;;  %v6082_v31 = vsub.f32 1.0, %v6050_v22  ;;  %v6358_v1 = vadd.f32 %v6357_v15, %v6356_v25  ;;  %v6599_v25 = vld [vmem:[%s13351_s8 + $0x770] sm:$0xff] }
 0x5d4   :  { %v6498_v29 = vld [vmem:[%s13351_s8 + $0x448] sm:$0xff]  ;;  %6727 = vmatpush.msra.mxu3 %v6446_v51  ;;  %v6403_v15 = vld [vmem:[%s13351_s8 + $0x150] sm:$0xff] }
 0x5d5   :  { %v6562_v33 = vld [vmem:[%s13351_s8 + $0x648] sm:$0xff]  ;;  %6750 = vmatpush.msrb.mxu1 %v6498_v29  ;;  %v6146_v9 = vsub.f32 0.0, %v6082_v31 }
 0x5d6   :  { %v6378_v3 = vld [vmem:[%s13351_s8 + $0x88] sm:$0xff]  ;;  %6770 = vmatpush.msrb.mxu0 %v6562_v33  ;;  %v6317_v33 = vadd.f32 %v6316_v54, %v6315_v18  ;;  %v6523_v18 = vld [vmem:[%s13351_s8 + $0x510] sm:$0xff] }
 0x5d7   :  { %v6442_v44 = vld [vmem:[%s13351_s8 + $0x288] sm:$0xff]  ;;  %6708 = vmatpush.msra.mxu2 %v6378_v3  ;;  %v6407_v54 = vld [vmem:[%s13351_s8 + $0x170] sm:$0xff] }
 0x5d8   :  { %v6494_v38 = vld [vmem:[%s13351_s8 + $0x428] sm:$0xff]  ;;  %6728 = vmatpush.msra.mxu3 %v6442_v44  ;;  %v6178_v44 = vsel %vm6114_vm4, %v6082_v31, %v6146_v9  ;;  %v6318_v41 = vrot.slane %v6317_v33, 2  ;;  %v6515_v31 = vld [vmem:[%s13351_s8 + $0x4d0] sm:$0xff] }
 0x5d9   :  { %v6558_v45 = vld [vmem:[%s13351_s8 + $0x628] sm:$0xff]  ;;  %6751 = vmatpush.msrb.mxu1 %v6494_v38  ;;  %v6242_v38 = vadd.f32 1.0, %v6178_v44  ;;  %v6587_v9 = vld [vmem:[%s13351_s8 + $0x710] sm:$0xff] }
 0x5da   :  { %v6374_v6 = vld [vmem:[%s13351_s8 + $0x68] sm:$0xff]  ;;  %6771 = vmatpush.msrb.mxu0 %v6558_v45  ;;  %v6359_v45 = vrot.slane %v6358_v1, 1  ;;  %v6319_v28 = vadd.f32 %v6318_v41, %v6317_v33  ;;  %v6487_v33 = vld [vmem:[%s13351_s8 + $0x3f0] sm:$0xff] }
 0x5db   :  { %v6438_v10 = vld [vmem:[%s13351_s8 + $0x268] sm:$0xff]  ;;  %6709 = vmatpush.msra.mxu2 %v6374_v6  ;;  %v6483_v44 = vld [vmem:[%s13351_s8 + $0x3d0] sm:$0xff] }
 0x5dc   :  { %v6490_v55 = vld [vmem:[%s13351_s8 + $0x408] sm:$0xff]  ;;  %6729 = vmatpush.msra.mxu3 %v6438_v10  ;;  %v12455_v10 = vmul.f32 %v6242_v38, %v6210_v58  ;;  %v12457_v8 = vadd.f32 %v6359_v45, %v6358_v1  ;;  %v6320_v14 = vrot.slane %v6319_v28, 1  ;;  %v6395_v1 = vld [vmem:[%s13351_s8 + $0x110] sm:$0xff] }
 0x5dd   :  { %v6554_v39 = vld [vmem:[%s13351_s8 + $0x608] sm:$0xff]  ;;  %6752 = vmatpush.msrb.mxu1 %v6490_v55  ;;  %v6579_v41 = vld [vmem:[%s13351_s8 + $0x6d0] sm:$0xff] }
 0x5de   :  { %v6370_v37 = vld [vmem:[%s13351_s8 + $0x48] sm:$0xff]  ;;  %6772 = vmatpush.msrb.mxu0 %v6554_v39  ;;  %6753 = vmatmul.f32.vlgmr.msrb.gmra.mxu1 %v12402_v63  ;;  %v6306_v55 = vmul.f32 %v12455_v10, %v12455_v10  ;;  %v6611_v39 = vld [vmem:[%s13351_s8 + $0x7d0] sm:$0xff]  ;;  %v12472_v13 = vadd.f32 %v6320_v14, %v6319_v28 }
 0x5df   :  { %v6434_v56 = vld [vmem:[%s13351_s8 + $0x248] sm:$0xff]  ;;  %6710 = vmatpush.msra.mxu2 %v6370_v37  ;;  %6817 = vmatpush.msra.mxu1 %v6551_v30  ;;  %v6607_v37 = vld [vmem:[%s13351_s8 + $0x7b0] sm:$0xff] }
 0x5e0   :  { %v6366_v4 = vld [vmem:[%s13351_s8 + $0x28] sm:$0xff]  ;;  %6730 = vmatpush.msra.mxu3 %v6434_v56  ;;  %6693 = vmatmul.f32.vlgmr.msra.gmra.mxu0 %v12457_v8  ;;  %v6603_v30 = vld [vmem:[%s13351_s8 + $0x790] sm:$0xff] }
 0x5e1   :  { %v13396_v53 = vld [vmem:[#allocation11_spill] sm:$0xff]  ;;  %6711 = vmatpush.msra.mxu2 %v6366_v4  ;;  %6818 = vmatpush.msra.mxu1 %v6547_v7  ;;  %v6415_v56 = vld [vmem:[%s13351_s8 + $0x1b0] sm:$0xff] }
 0x5e2   :  { %v6323_v26 = vadd.f32 %v13396_v53, %v11568_v48  ;;  %v6430_v51 = vld [vmem:[%s13351_s8 + $0x228] sm:$0xff]  ;;  %6837 = vmatpush.msra.mxu0 %v6615_v19  ;;  %6633 = vmatmul.f32.vlgmr.msrb.gmra.mxu2 %v12472_v13  ;;  %v6519_v4 = vld [vmem:[%s13351_s8 + $0x4f0] sm:$0xff] }
 0x5e3   :  { %v6362_v48 = vld [vmem:[%s13351_s8 + $0x8] sm:$0xff]  ;;  %6731 = vmatpush.msra.mxu3 %v6430_v51  ;;  %6819 = vmatpush.msra.mxu1 %v6543_v11  ;;  %v6411_v53 = vld [vmem:[%s13351_s8 + $0x190] sm:$0xff] }
 0x5e4   :  { %v6324_v16 = vadd.f32 %v6323_v26, %v6290_v50  ;;  %v6426_v29 = vld [vmem:[%s13351_s8 + $0x208] sm:$0xff]  ;;  %6712 = vmatpush.msra.mxu2 %v6362_v48  ;;  %6838 = vmatpush.msra.mxu0 %v6611_v39  ;;  %v6419_v50 = vld [vmem:[%s13351_s8 + $0x1d0] sm:$0xff] }
 0x5e5   :  { %6732 = vmatpush.msra.mxu3 %v6426_v29  ;;  %6820 = vmatpush.msra.mxu1 %v6539_v59  ;;  %v6591_v51 = vld [vmem:[%s13351_s8 + $0x730] sm:$0xff] }
 0x5e6   :  { %v6325_v3 = vadd.f32 %v6324_v16, %v6294_v42  ;;  %6777 = vmatpush.msrb.mxu2 %v6423_v34  ;;  %6839 = vmatpush.msra.mxu0 %v6607_v37  ;;  %v6595_v42 = vld [vmem:[%s13351_s8 + $0x750] sm:$0xff] }
 0x5e7   :  { %6821 = vmatpush.msra.mxu1 %v6535_v2  ;;  %v6511_v48 = vld [vmem:[%s13351_s8 + $0x4b0] sm:$0xff] }
 0x5e8   :  { %v6326_v6 = vadd.f32 %v6325_v3, %v6298_v49  ;;  %6778 = vmatpush.msrb.mxu2 %v6419_v50  ;;  %6840 = vmatpush.msra.mxu0 %v6603_v30  ;;  %v6399_v11 = vld [vmem:[%s13351_s8 + $0x130] sm:$0xff] }
 0x5e9   :  { %6822 = vmatpush.msra.mxu1 %v6531_v17  ;;  %6773 = vmatmul.f32.vlgmr.msrb.gmra.mxu0 %v12457_v8  ;;  %v6583_v49 = vld [vmem:[%s13351_s8 + $0x6f0] sm:$0xff] }
 0x5ea   :  { %v6327_v62 = vadd.f32 %v6326_v6, %v6302_v47  ;;  %6779 = vmatpush.msrb.mxu2 %v6415_v56  ;;  %6841 = vmatpush.msra.mxu0 %v6599_v25  ;;  %v6507_v3 = vld [vmem:[%s13351_s8 + $0x490] sm:$0xff]  ;;  %v6552_v56 = vld [vmem:[%s13351_s8 + $0x5f8] sm:$0xff] }
 0x5eb   :  { %6823 = vmatpush.msra.mxu1 %v6527_v36  ;;  %6713 = vmatmul.f32.vlgmr.msra.gmra.mxu2 %v12472_v13  ;;  %v6391_v59 = vld [vmem:[%s13351_s8 + $0xf0] sm:$0xff]  ;;  %v6616_v25 = vld [vmem:[%s13351_s8 + $0x7f8] sm:$0xff] }
 0x5ec   :  { %v6328_v0 = vadd.f32 %v6327_v62, %v6306_v55  ;;  %6780 = vmatpush.msrb.mxu2 %v6411_v53  ;;  %6842 = vmatpush.msra.mxu0 %v6595_v42  ;;  %v6503_v47 = vld [vmem:[%s13351_s8 + $0x470] sm:$0xff]  ;;  %v6612_v42 = vld [vmem:[%s13351_s8 + $0x7d8] sm:$0xff] }
 0x5ed   :  { %6824 = vmatpush.msra.mxu1 %v6523_v18  ;;  %v6479_v58 = vld [vmem:[%s13351_s8 + $0x3b0] sm:$0xff] }
 0x5ee   :  { %v6329_v22 = vrot.slane %v6328_v0, 4  ;;  %6781 = vmatpush.msrb.mxu2 %v6407_v54  ;;  %6843 = vmatpush.msra.mxu0 %v6591_v51  ;;  %v6575_v38 = vld [vmem:[%s13351_s8 + $0x6b0] sm:$0xff]  ;;  %v6544_v54 = vld [vmem:[%s13351_s8 + $0x5b8] sm:$0xff] }
 0x5ef   :  { %6825 = vmatpush.msra.mxu1 %v6519_v4  ;;  %v6387_v45 = vld [vmem:[%s13351_s8 + $0xd0] sm:$0xff]  ;;  %v6548_v4 = vld [vmem:[%s13351_s8 + $0x5d8] sm:$0xff] }
 0x5f0   :  { %v6330_v24 = vadd.f32 %v6329_v22, %v6328_v0  ;;  %6782 = vmatpush.msrb.mxu2 %v6403_v15  ;;  %6844 = vmatpush.msra.mxu0 %v6587_v9  ;;  %v6499_v28 = vld [vmem:[%s13351_s8 + $0x450] sm:$0xff]  ;;  %v6608_v51 = vld [vmem:[%s13351_s8 + $0x7b8] sm:$0xff] }
 0x5f1   :  { %6826 = vmatpush.msra.mxu1 %v6515_v31  ;;  %v6475_v2 = vld [vmem:[%s13351_s8 + $0x390] sm:$0xff]  ;;  %v6540_v15 = vld [vmem:[%s13351_s8 + $0x598] sm:$0xff] }
 0x5f2   :  { %v6331_v26 = vrot.slane %v6330_v24, 2  ;;  %6783 = vmatpush.msrb.mxu2 %v6399_v11  ;;  %6845 = vmatpush.msra.mxu0 %v6583_v49  ;;  %v6571_v6 = vld [vmem:[%s13351_s8 + $0x690] sm:$0xff]  ;;  %v6604_v9 = vld [vmem:[%s13351_s8 + $0x798] sm:$0xff] }
 0x5f3   :  { %6827 = vmatpush.msra.mxu1 %v6511_v48  ;;  %v6383_v19 = vld [vmem:[%s13351_s8 + $0xb0] sm:$0xff]  ;;  %v6536_v11 = vld [vmem:[%s13351_s8 + $0x578] sm:$0xff] }
 0x5f4   :  { %v6332_v7 = vadd.f32 %v6331_v26, %v6330_v24  ;;  %6784 = vmatpush.msrb.mxu2 %v6395_v1  ;;  %6846 = vmatpush.msra.mxu0 %v6579_v41  ;;  %v6471_v14 = vld [vmem:[%s13351_s8 + $0x370] sm:$0xff]  ;;  %v6420_v49 = vld [vmem:[%s13351_s8 + $0x1d8] sm:$0xff] }
 0x5f5   :  { %6828 = vmatpush.msra.mxu1 %v6507_v3  ;;  %v6567_v17 = vld [vmem:[%s13351_s8 + $0x670] sm:$0xff]  ;;  %v6600_v1 = vld [vmem:[%s13351_s8 + $0x778] sm:$0xff] }
 0x5f6   :  { %v6333_v16 = vrot.slane %v6332_v7, 1  ;;  %6785 = vmatpush.msrb.mxu2 %v6391_v59  ;;  %6847 = vmatpush.msra.mxu0 %v6575_v38  ;;  %v6379_v62 = vld [vmem:[%s13351_s8 + $0x90] sm:$0xff]  ;;  %v6532_v3 = vld [vmem:[%s13351_s8 + $0x558] sm:$0xff] }
 0x5f7   :  { %6829 = vmatpush.msra.mxu1 %v6503_v47  ;;  %v6495_v55 = vld [vmem:[%s13351_s8 + $0x430] sm:$0xff]  ;;  %v6416_v41 = vld [vmem:[%s13351_s8 + $0x1b8] sm:$0xff] }
 0x5f8   :  { %v12531_v29 = vadd.f32 %v6333_v16, %v6332_v7  ;;  %6786 = vmatpush.msrb.mxu2 %v6387_v45  ;;  %6848 = vmatpush.msra.mxu0 %v6571_v6  ;;  %v6467_v39 = vld [vmem:[%s13351_s8 + $0x350] sm:$0xff]  ;;  %v6424_v16 = vld [vmem:[%s13351_s8 + $0x1f8] sm:$0xff] }
 0x5f9   :  { %6830 = vmatpush.msra.mxu1 %v6499_v28  ;;  %v6563_v34 = vld [vmem:[%s13351_s8 + $0x650] sm:$0xff]  ;;  %v6596_v59 = vld [vmem:[%s13351_s8 + $0x758] sm:$0xff] }
 0x5fa   :  { %6653 = vmatmul.f32.vlgmr.msrb.gmra.mxu3 %v12531_v29  ;;  %6787 = vmatpush.msrb.mxu2 %v6383_v19  ;;  %v6375_v36 = vld [vmem:[%s13351_s8 + $0x70] sm:$0xff]  ;;  %v6528_v47 = vld [vmem:[%s13351_s8 + $0x538] sm:$0xff] }
 0x5fb   :  { %6797 = vmatpush.msrb.mxu3 %v6487_v33  ;;  %6849 = vmatpush.msra.mxu0 %v6567_v17  ;;  %v6491_v0 = vld [vmem:[%s13351_s8 + $0x410] sm:$0xff]  ;;  %v6412_v38 = vld [vmem:[%s13351_s8 + $0x198] sm:$0xff] }
 0x5fc   :  { %v6463_v37 = vld [vmem:[%s13351_s8 + $0x330] sm:$0xff]  ;;  %6788 = vmatpush.msrb.mxu2 %v6379_v62  ;;  %6831 = vmatpush.msra.mxu1 %v6495_v55  ;;  %v6592_v45 = vld [vmem:[%s13351_s8 + $0x738] sm:$0xff] }
 0x5fd   :  { %6798 = vmatpush.msrb.mxu3 %v6483_v44  ;;  %v6559_v50 = vld [vmem:[%s13351_s8 + $0x630] sm:$0xff]  ;;  %6850 = vmatpush.msra.mxu0 %v6563_v34  ;;  %v6524_v28 = vld [vmem:[%s13351_s8 + $0x518] sm:$0xff] }
 0x5fe   :  { %v6371_v18 = vld [vmem:[%s13351_s8 + $0x50] sm:$0xff]  ;;  %6789 = vmatpush.msrb.mxu2 %v6375_v36  ;;  %6832 = vmatpush.msra.mxu1 %v6491_v0  ;;  %v6408_v6 = vld [vmem:[%s13351_s8 + $0x178] sm:$0xff] }
 0x5ff   :  { %6799 = vmatpush.msrb.mxu3 %v6479_v58  ;;  %v6459_v22 = vld [vmem:[%s13351_s8 + $0x310] sm:$0xff]  ;;  %6851 = vmatpush.msra.mxu0 %v6559_v50  ;;  %v6588_v19 = vld [vmem:[%s13351_s8 + $0x718] sm:$0xff] }
 0x600   :  { %v6555_v30 = vld [vmem:[%s13351_s8 + $0x610] sm:$0xff]  ;;  %6833 = vmatmul.f32.vlgmr.msra.gmra.mxu1 %v12402_v63  ;;  %6790 = vmatpush.msrb.mxu2 %v6371_v18  ;;  %v6404_v17 = vld [vmem:[%s13351_s8 + $0x158] sm:$0xff] }
 0x601   :  { %6800 = vmatpush.msrb.mxu3 %v6475_v2  ;;  %v6455_v24 = vld [vmem:[%s13351_s8 + $0x2f0] sm:$0xff]  ;;  %6852 = vmatpush.msra.mxu0 %v6555_v30  ;;  %v6520_v62 = vld [vmem:[%s13351_s8 + $0x4f8] sm:$0xff] }
 0x602   :  { %6733 = vmatmul.f32.vlgmr.msra.gmra.mxu3 %v12531_v29  ;;  %v6367_v53 = vld [vmem:[%s13351_s8 + $0x30] sm:$0xff]  ;;  %6853 = vmatmul.f32.vlgmr.msra.gmra.mxu0 %v12457_v8  ;;  %v6584_v55 = vld [vmem:[%s13351_s8 + $0x6f8] sm:$0xff] }
 0x603   :  { %6801 = vmatpush.msrb.mxu3 %v6471_v14  ;;  %v6451_v26 = vld [vmem:[%s13351_s8 + $0x2d0] sm:$0xff]  ;;  %6897 = vmatpush.msrb.mxu1 %v6552_v56  ;;  %v6488_v14 = vld [vmem:[%s13351_s8 + $0x3f8] sm:$0xff] }
 0x604   :  { %6917 = vmatpush.msrb.mxu0 %v6616_v25  ;;  %v6363_v31 = vld [vmem:[%s13351_s8 + $0x10] sm:$0xff]  ;;  %6791 = vmatpush.msrb.mxu2 %v6367_v53  ;;  %v6400_v34 = vld [vmem:[%s13351_s8 + $0x138] sm:$0xff] }
 0x605   :  { %6802 = vmatpush.msrb.mxu3 %v6467_v39  ;;  %v6447_v7 = vld [vmem:[%s13351_s8 + $0x2b0] sm:$0xff]  ;;  %6898 = vmatpush.msrb.mxu1 %v6548_v4  ;;  %v6484_v39 = vld [vmem:[%s13351_s8 + $0x3d8] sm:$0xff] }
 0x606   :  { %6918 = vmatpush.msrb.mxu0 %v6612_v42  ;;  %v6443_v48 = vld [vmem:[%s13351_s8 + $0x290] sm:$0xff]  ;;  %6792 = vmatpush.msrb.mxu2 %v6363_v31  ;;  %v6516_v36 = vld [vmem:[%s13351_s8 + $0x4d8] sm:$0xff] }
 0x607   :  { %6803 = vmatpush.msrb.mxu3 %v6463_v37  ;;  %6899 = vmatpush.msrb.mxu1 %v6544_v54  ;;  %v6439_v33 = vld [vmem:[%s13351_s8 + $0x270] sm:$0xff]  ;;  %v6580_v0 = vld [vmem:[%s13351_s8 + $0x6d8] sm:$0xff] }
 0x608   :  { %6919 = vmatpush.msrb.mxu0 %v6608_v51  ;;  %6793 = vmatmul.f32.vlgmr.msrb.gmra.mxu2 %v12472_v13  ;;  %v6435_v44 = vld [vmem:[%s13351_s8 + $0x250] sm:$0xff]  ;;  %v6480_v37 = vld [vmem:[%s13351_s8 + $0x3b8] sm:$0xff] }
 0x609   :  { %6804 = vmatpush.msrb.mxu3 %v6459_v22  ;;  %6900 = vmatpush.msrb.mxu1 %v6540_v15  ;;  %v6431_v58 = vld [vmem:[%s13351_s8 + $0x230] sm:$0xff]  ;;  %v6396_v50 = vld [vmem:[%s13351_s8 + $0x118] sm:$0xff] }
 0x60a   :  { %6857 = vmatpush.msra.mxu2 %v6424_v16  ;;  %6920 = vmatpush.msrb.mxu0 %v6604_v9  ;;  %v6427_v2 = vld [vmem:[%s13351_s8 + $0x210] sm:$0xff]  ;;  %v6512_v18 = vld [vmem:[%s13351_s8 + $0x4b8] sm:$0xff] }
 0x60b   :  { %6805 = vmatpush.msrb.mxu3 %v6455_v24  ;;  %6901 = vmatpush.msrb.mxu1 %v6536_v11  ;;  %v6576_v22 = vld [vmem:[%s13351_s8 + $0x6b8] sm:$0xff] }
 0x60c   :  { %6858 = vmatpush.msra.mxu2 %v6420_v49  ;;  %6921 = vmatpush.msrb.mxu0 %v6600_v1  ;;  %v6476_v30 = vld [vmem:[%s13351_s8 + $0x398] sm:$0xff] }
 0x60d   :  { %6806 = vmatpush.msrb.mxu3 %v6451_v26  ;;  %6902 = vmatpush.msrb.mxu1 %v6532_v3  ;;  %v6392_v56 = vld [vmem:[%s13351_s8 + $0xf8] sm:$0xff] }
 0x60e   :  { %6859 = vmatpush.msra.mxu2 %v6416_v41  ;;  %6922 = vmatpush.msrb.mxu0 %v6596_v59  ;;  %v6508_v24 = vld [vmem:[%s13351_s8 + $0x498] sm:$0xff] }
 0x60f   :  { %6807 = vmatpush.msrb.mxu3 %v6447_v7  ;;  %6903 = vmatpush.msrb.mxu1 %v6528_v47  ;;  %v6572_v25 = vld [vmem:[%s13351_s8 + $0x698] sm:$0xff] }
 0x610   :  { %6860 = vmatpush.msra.mxu2 %v6412_v38  ;;  %6923 = vmatpush.msrb.mxu0 %v6592_v45  ;;  %v6472_v4 = vld [vmem:[%s13351_s8 + $0x378] sm:$0xff] }
 0x611   :  { %6808 = vmatpush.msrb.mxu3 %v6443_v48  ;;  %6904 = vmatpush.msrb.mxu1 %v6524_v28  ;;  %v6388_v53 = vld [vmem:[%s13351_s8 + $0xd8] sm:$0xff] }
 0x612   :  { %6861 = vmatpush.msra.mxu2 %v6408_v6  ;;  %6924 = vmatpush.msrb.mxu0 %v6588_v19  ;;  %v6504_v26 = vld [vmem:[%s13351_s8 + $0x478] sm:$0xff] }
 0x613   :  { %6809 = vmatpush.msrb.mxu3 %v6439_v33  ;;  %6905 = vmatpush.msrb.mxu1 %v6520_v62  ;;  %v6568_v42 = vld [vmem:[%s13351_s8 + $0x678] sm:$0xff] }
 0x614   :  { %6862 = vmatpush.msra.mxu2 %v6404_v17  ;;  %6925 = vmatpush.msrb.mxu0 %v6584_v55  ;;  %v6468_v54 = vld [vmem:[%s13351_s8 + $0x358] sm:$0xff] }
 0x615   :  { %6810 = vmatpush.msrb.mxu3 %v6435_v44  ;;  %6906 = vmatpush.msrb.mxu1 %v6516_v36  ;;  %v6384_v31 = vld [vmem:[%s13351_s8 + $0xb8] sm:$0xff] }
 0x616   :  { %6863 = vmatpush.msra.mxu2 %v6400_v34  ;;  %6926 = vmatpush.msrb.mxu0 %v6580_v0  ;;  %v6500_v7 = vld [vmem:[%s13351_s8 + $0x458] sm:$0xff] }
 0x617   :  { %6811 = vmatpush.msrb.mxu3 %v6431_v58  ;;  %6907 = vmatpush.msrb.mxu1 %v6512_v18  ;;  %v6564_v51 = vld [vmem:[%s13351_s8 + $0x658] sm:$0xff] }
 0x618   :  { %6864 = vmatpush.msra.mxu2 %v6396_v50  ;;  %6927 = vmatpush.msrb.mxu0 %v6576_v22  ;;  %v6464_v15 = vld [vmem:[%s13351_s8 + $0x338] sm:$0xff] }
 0x619   :  { %6812 = vmatpush.msrb.mxu3 %v6427_v2  ;;  %6908 = vmatpush.msrb.mxu1 %v6508_v24  ;;  %v6380_v48 = vld [vmem:[%s13351_s8 + $0x98] sm:$0xff] }
 0x61a   :  { %6813 = vmatmul.f32.vlgmr.msrb.gmra.mxu3 %v12531_v29  ;;  %6865 = vmatpush.msra.mxu2 %v6392_v56  ;;  %v6496_v16 = vld [vmem:[%s13351_s8 + $0x438] sm:$0xff] }
 0x61b   :  { %6877 = vmatpush.msra.mxu3 %v6488_v14  ;;  %6928 = vmatpush.msrb.mxu0 %v6572_v25  ;;  %v6560_v9 = vld [vmem:[%s13351_s8 + $0x638] sm:$0xff] }
 0x61c   :  { %6866 = vmatpush.msra.mxu2 %v6388_v53  ;;  %6909 = vmatpush.msrb.mxu1 %v6504_v26  ;;  %v6460_v11 = vld [vmem:[%s13351_s8 + $0x318] sm:$0xff] }
 0x61d   :  { %6878 = vmatpush.msra.mxu3 %v6484_v39  ;;  %6929 = vmatpush.msrb.mxu0 %v6568_v42  ;;  %v6376_v33 = vld [vmem:[%s13351_s8 + $0x78] sm:$0xff] }
 0x61e   :  { %6867 = vmatpush.msra.mxu2 %v6384_v31  ;;  %6910 = vmatpush.msrb.mxu1 %v6500_v7  ;;  %v6492_v49 = vld [vmem:[%s13351_s8 + $0x418] sm:$0xff] }
 0x61f   :  { %6879 = vmatpush.msra.mxu3 %v6480_v37  ;;  %6930 = vmatpush.msrb.mxu0 %v6564_v51  ;;  %v6556_v1 = vld [vmem:[%s13351_s8 + $0x618] sm:$0xff] }
 0x620   :  { %6868 = vmatpush.msra.mxu2 %v6380_v48  ;;  %v6456_v3 = vld [vmem:[%s13351_s8 + $0x2f8] sm:$0xff]  ;;  %6911 = vmatpush.msrb.mxu1 %v6496_v16 }
 0x621   :  { %6880 = vmatpush.msra.mxu3 %v6476_v30  ;;  %6931 = vmatpush.msrb.mxu0 %v6560_v9  ;;  %v6372_v44 = vld [vmem:[%s13351_s8 + $0x58] sm:$0xff] }
 0x622   :  { %6869 = vmatpush.msra.mxu2 %v6376_v33  ;;  %v6452_v41 = vld [vmem:[%s13351_s8 + $0x2d8] sm:$0xff]  ;;  %6912 = vmatpush.msrb.mxu1 %v6492_v49 }
 0x623   :  { %6881 = vmatpush.msra.mxu3 %v6472_v4  ;;  %6932 = vmatpush.msrb.mxu0 %v6556_v1  ;;  %v6368_v59 = vld [vmem:[%s13351_s8 + $0x38] sm:$0xff] }
 0x624   :  { %6913 = vmatmul.f32.vlgmr.msrb.gmra.mxu1 %v12402_v63  ;;  %v6448_v47 = vld [vmem:[%s13351_s8 + $0x2b8] sm:$0xff]  ;;  %6933 = vmatmul.f32.vlgmr.msrb.gmra.mxu0 %v12457_v8 }
 0x625   :  { %6882 = vmatpush.msra.mxu3 %v6468_v54  ;;  %6870 = vmatpush.msra.mxu2 %v6372_v44  ;;  %v6364_v58 = vld [vmem:[%s13351_s8 + $0x18] sm:$0xff] }
 0x626   :  { %v6444_v63 = vld [vmem:[%s13351_s8 + $0x298] sm:$0xff] }
 0x627   :  { %6883 = vmatpush.msra.mxu3 %v6464_v15  ;;  %6871 = vmatpush.msra.mxu2 %v6368_v59  ;;  %v6440_v38 = vld [vmem:[%s13351_s8 + $0x278] sm:$0xff] }
 0x628   :  { %v6436_v8 = vld [vmem:[%s13351_s8 + $0x258] sm:$0xff] }
 0x629   :  { %6884 = vmatpush.msra.mxu3 %v6460_v11  ;;  %6872 = vmatpush.msra.mxu2 %v6364_v58  ;;  %v6432_v45 = vld [vmem:[%s13351_s8 + $0x238] sm:$0xff] }
 0x62a   :  { %6873 = vmatmul.f32.vlgmr.msra.gmra.mxu2 %v12472_v13  ;;  %v6428_v28 = vld [vmem:[%s13351_s8 + $0x218] sm:$0xff] }
 0x62b   :  { %6885 = vmatpush.msra.mxu3 %v6456_v3 }
 0x62d   :  { %6886 = vmatpush.msra.mxu3 %v6452_v41 }
 0x62f   :  { %6887 = vmatpush.msra.mxu3 %v6448_v47 }
 0x631   :  { %6888 = vmatpush.msra.mxu3 %v6444_v63 }
 0x633   :  { %6889 = vmatpush.msra.mxu3 %v6440_v38 }
 0x635   :  { %6890 = vmatpush.msra.mxu3 %v6436_v8 }
 0x637   :  { %6891 = vmatpush.msra.mxu3 %v6432_v45 }
 0x639   :  { %6892 = vmatpush.msra.mxu3 %v6428_v28 }
 0x63a   :  { %6893 = vmatmul.f32.vlgmr.msra.gmra.mxu3 %v12531_v29 }
 0x64d   :  { %v6674_v13 = vpop.f32.mrf.mxu1 }
 0x65b   :  { %v6754_v36 = vpop.f32.mrf.mxu1 }
 0x65d   :  { %v6694_v14 = vpop.f32.mrf.mxu0 }
 0x665   :  { %v6634_v2 = vpop.f32.mrf.mxu2 }
 0x666   :  { %v6774_v37 = vpop.f32.mrf.mxu0 }
 0x66e   :  { %v6714_v55 = vpop.f32.mrf.mxu2 }
 0x67d   :  { %v6654_v6 = vpop.f32.mrf.mxu3  ;;  %v6834_v59 = vpop.f32.mrf.mxu1 }
 0x67e   :  { %v6655_v19 = vadd.f32 %v6654_v6, %v6634_v2 }
 0x67f   :  { %v6854_v58 = vpop.f32.mrf.mxu0 }
 0x680   :  { %v6675_v17 = vadd.f32 %v6674_v13, %v6655_v19 }
 0x682   :  { %v6695_v62 = vadd.f32 %v6694_v14, %v6675_v17 }
 0x684   :  { %7849 = vrsqrt.f32 %v6695_v62  ;;  %vm6944_vm5 = vcmp.eq.f32.partialorder %v6695_v62, inf  ;;  %v6947_v51 = vand.u32 2147483648, %v6695_v62  ;;  %vm6946_vm6 = vcmp.eq.f32.partialorder %v6695_v62, 0.0 }
 0x685   :  { %v6734_v39 = vpop.f32.mrf.mxu3 }
 0x686   :  { %v6735_v34 = vadd.f32 %v6734_v39, %v6714_v55 }
 0x688   :  { %v6755_v0 = vadd.f32 %v6754_v36, %v6735_v34 }
 0x68a   :  { %v7850_v50 = vpop.eup %7849  ;;  %v6775_v18 = vadd.f32 %v6774_v37, %v6755_v0 }
 0x68b   :  { %v6938_v22 = vmul.f32 %v7850_v50, %v6695_v62  ;;  %v6794_v3 = vpop.f32.mrf.mxu2 }
 0x68c   :  { %7851 = vrsqrt.f32 %v6775_v18  ;;  %vm6956_vm7 = vcmp.eq.f32.partialorder %v6775_v18, inf  ;;  %v6959_v16 = vand.u32 2147483648, %v6775_v18  ;;  %vm6958_vm9 = vcmp.eq.f32.partialorder %v6775_v18, 0.0 }
 0x68d   :  { %v6939_v30 = vmul.f32 %v7850_v50, %v6938_v22 }
 0x68f   :  { %v6940_v29 = vmul.f32 0.5, %v6939_v30 }
 0x691   :  { %v6941_v56 = vsub.f32 1.5, %v6940_v29 }
 0x692   :  { %v7852_v24 = vpop.eup %7851 }
 0x693   :  { %v6942_v25 = vmul.f32 %v7850_v50, %v6941_v56  ;;  %v6950_v4 = vmul.f32 %v7852_v24, %v6775_v18 }
 0x695   :  { %v6951_v53 = vmul.f32 %v7852_v24, %v6950_v4  ;;  %v6943_v26 = vmul.f32 %v6942_v25, %v6695_v62 }
 0x697   :  { %v6952_v42 = vmul.f32 0.5, %v6951_v53  ;;  %v6945_v31 = vsel %vm6944_vm5, %v6695_v62, %v6943_v26 }
 0x698   :  { %v12849_v48 = vsel %vm6946_vm6, %v6947_v51, %v6945_v31  ;;  %v7887_v31 = vmov 256.0  }
 0x699   :  { %v6953_v54 = vsub.f32 1.5, %v6952_v42  ;;  %v6986_v33 = vsel %vm6985_vm8, %v12849_v48, 0.0 }
 0x69b   :  { %v6954_v7 = vmul.f32 %v7852_v24, %v6953_v54 }
 0x69d   :  { %v6955_v15 = vmul.f32 %v6954_v7, %v6775_v18  ;;  %v6814_v44 = vpop.f32.mrf.mxu3 }
 0x69e   :  { %v6815_v41 = vadd.f32 %v6814_v44, %v6794_v3  ;;  %v7157_v3 = vld [vmem:[%s13352_s9 + $0x78] sm:$0xff] }
 0x69f   :  { %v6957_v9 = vsel %vm6956_vm7, %v6775_v18, %v6955_v15  ;;  %v7173_v44 = vld [vmem:[%s13352_s9 + $0xf8] sm:$0xff]  ;;  %7207 = vmatpush.msrb.mxu2 %v7157_v3  ;;  %v7180_v3 = vld [vmem:[%s13352_s9 + $0x130] sm:$0xff]  ;;  %vm7051_vm7 = vcmask 1042434  }
 0x6a0   :  { %v12851_v11 = vsel %vm6958_vm9, %v6959_v16, %v6957_v9  ;;  %v6835_v47 = vadd.f32 %v6834_v59, %v6815_v41  ;;  %v7189_v41 = vld [vmem:[%s13352_s9 + $0x178] sm:$0xff]  ;;  %7248 = vmatpush.msrb.mxu3 %v7173_v44  ;;  %vm7053_vm9 = vcmask 1041408  }
 0x6a1   :  { %v6987_v49 = vsel %vm6985_vm8, %v12851_v11, 0.0  ;;  %v6914_v13 = vpop.f32.mrf.mxu1  ;;  %v6934_v14 = vpop.f32.mrf.mxu0  ;;  %7289 = vmatpush.msra.mxu1 %v7189_v41  ;;  %v13023_v41 = vld [vmem:[%s13352_s9 + $0x1b0] sm:$0xff] }
 0x6a2   :  { %v6988_v1 = vadd.f32 %v6987_v49, %v6986_v33  ;;  %v6855_v63 = vadd.f32 %v6854_v58, %v6835_v47  ;;  %v12882_v47 = vld [vmem:[%s13352_s9 + $0x1f8] sm:$0xff]  ;;  %v7156_v58 = vld [vmem:[%s13352_s9 + $0x70] sm:$0xff] }
 0x6a3   :  { %7330 = vmatpush.msra.mxu0 %v12882_v47  ;;  %7208 = vmatpush.msrb.mxu2 %v7156_v58  ;;  %v7147_v58 = vld [vmem:[%s13352_s9 + $0x28] sm:$0xff] }
 0x6a4   :  { %6989 = vadd.xlane.f32.xlu0 %v6988_v1  ;;  %7853 = vrsqrt.f32 %v6855_v63  ;;  %vm6968_vm10 = vcmp.eq.f32.partialorder %v6855_v63, inf  ;;  %v6971_v29 = vand.u32 2147483648, %v6855_v63  ;;  %vm6970_vm11 = vcmp.eq.f32.partialorder %v6855_v63, 0.0 }
 0x6aa   :  { %v7854_v38 = vpop.eup %7853 }
 0x6ab   :  { %v6962_v45 = vmul.f32 %v7854_v38, %v6855_v63 }
 0x6ad   :  { %v6874_v8 = vpop.f32.mrf.mxu2  ;;  %v6963_v6 = vmul.f32 %v7854_v38, %v6962_v45  ;;  %v7155_v45 = vld [vmem:[%s13352_s9 + $0x68] sm:$0xff] }
 0x6ae   :  { %7209 = vmatpush.msrb.mxu2 %v7155_v45  ;;  %v7146_v45 = vld [vmem:[%s13352_s9 + $0x20] sm:$0xff] }
 0x6af   :  { %v6964_v62 = vmul.f32 0.5, %v6963_v6  ;;  %v7154_v6 = vld [vmem:[%s13352_s9 + $0x60] sm:$0xff] }
 0x6b0   :  { %7210 = vmatpush.msrb.mxu2 %v7154_v6  ;;  %v7178_v6 = vld [vmem:[%s13352_s9 + $0x120] sm:$0xff] }
 0x6b1   :  { %v6965_v55 = vsub.f32 1.5, %v6964_v62  ;;  %v7153_v62 = vld [vmem:[%s13352_s9 + $0x58] sm:$0xff] }
 0x6b2   :  { %7211 = vmatpush.msrb.mxu2 %v7153_v62  ;;  %v7145_v62 = vld [vmem:[%s13352_s9 + $0x18] sm:$0xff] }
 0x6b3   :  { %v6966_v34 = vmul.f32 %v7854_v38, %v6965_v55  ;;  %v7188_v38 = vld [vmem:[%s13352_s9 + $0x170] sm:$0xff]  ;;  %v7169_v55 = vld [vmem:[%s13352_s9 + $0xd8] sm:$0xff] }
 0x6b4   :  { %7290 = vmatpush.msra.mxu1 %v7188_v38  ;;  %v13038_v38 = vld [vmem:[%s13352_s9 + $0x1a8] sm:$0xff] }
 0x6b5   :  { %v6967_v37 = vmul.f32 %v6966_v34, %v6855_v63  ;;  %v12943_v34 = vld [vmem:[%s13352_s9 + $0x1d8] sm:$0xff] }
 0x6b7   :  { %v6969_v22 = vsel %vm6968_vm10, %v6855_v63, %v6967_v37  ;;  %v7172_v63 = vld [vmem:[%s13352_s9 + $0xf0] sm:$0xff] }
 0x6b8   :  { %v12857_v24 = vsel %vm6970_vm11, %v6971_v29, %v6969_v22  ;;  %7249 = vmatpush.msrb.mxu3 %v7172_v63  ;;  %v7184_v37 = vld [vmem:[%s13352_s9 + $0x150] sm:$0xff]  ;;  %v7151_v22 = vld [vmem:[%s13352_s9 + $0x48] sm:$0xff] }
 0x6b9   :  { %v7017_v26 = vsel %vm6985_vm8, %v12857_v24, 0.0  ;;  %v7183_v29 = vld [vmem:[%s13352_s9 + $0x148] sm:$0xff] }
 0x6ba   :  { %v7163_v63 = vld [vmem:[%s13352_s9 + $0xa8] sm:$0xff] }
 0x6bd   :  { %v6894_v28 = vpop.f32.mrf.mxu3 }
 0x6be   :  { %v6895_v2 = vadd.f32 %v6894_v28, %v6874_v8  ;;  %v12897_v8 = vld [vmem:[%s13352_s9 + $0x1f0] sm:$0xff]  ;;  %v7171_v28 = vld [vmem:[%s13352_s9 + $0xe8] sm:$0xff] }
 0x6bf   :  { %7331 = vmatpush.msra.mxu0 %v12897_v8  ;;  %7250 = vmatpush.msrb.mxu3 %v7171_v28 }
 0x6c0   :  { %v6915_v19 = vadd.f32 %v6914_v13, %v6895_v2  ;;  %v7187_v2 = vld [vmem:[%s13352_s9 + $0x168] sm:$0xff] }
 0x6c1   :  { %v12913_v13 = vld [vmem:[%s13352_s9 + $0x1e8] sm:$0xff]  ;;  %7291 = vmatpush.msra.mxu1 %v7187_v2  ;;  %v7162_v2 = vld [vmem:[%s13352_s9 + $0xa0] sm:$0xff] }
 0x6c2   :  { %v6935_v17 = vadd.f32 %v6934_v14, %v6915_v19  ;;  %7332 = vmatpush.msra.mxu0 %v12913_v13  ;;  %v7170_v19 = vld [vmem:[%s13352_s9 + $0xe0] sm:$0xff] }
 0x6c3   :  { %v7186_v14 = vld [vmem:[%s13352_s9 + $0x160] sm:$0xff]  ;;  %7251 = vmatpush.msrb.mxu3 %v7170_v19 }
 0x6c4   :  { %7855 = vrsqrt.f32 %v6935_v17  ;;  %vm6980_vm12 = vcmp.eq.f32.partialorder %v6935_v17, inf  ;;  %v6983_v25 = vand.u32 2147483648, %v6935_v17  ;;  %vm6982_vm13 = vcmp.eq.f32.partialorder %v6935_v17, 0.0  ;;  %7292 = vmatpush.msra.mxu1 %v7186_v14  ;;  %v13054_v19 = vld [vmem:[%s13352_s9 + $0x1a0] sm:$0xff] }
 0x6c5   :  { %7857 = vrcp.f32 %v7887_v31  ;;  %7252 = vmatpush.msrb.mxu3 %v7169_v55  ;;  %v7149_v31 = vld [vmem:[%s13352_s9 + $0x38] sm:$0xff] }
 0x6c6   :  { %v7161_v55 = vld [vmem:[%s13352_s9 + $0x98] sm:$0xff] }
 0x6ca   :  { %v7856_v39 = vpop.eup %7855 }
 0x6cb   :  { %v6974_v36 = vmul.f32 %v7856_v39, %v6935_v17  ;;  %v7858_v7 = vpop.eup %7857 }
 0x6cc   :  { %v6992_v51 = vmul.f32 256.0, %v7858_v7  ;;  %vm6996_vm14 = vweird.f32 %v7858_v7 }
 0x6cd   :  { %v6975_v0 = vmul.f32 %v7856_v39, %v6974_v36  ;;  %v7152_v36 = vld [vmem:[%s13352_s9 + $0x50] sm:$0xff] }
 0x6ce   :  { %v6993_v15 = vsub.f32 1.0, %v6992_v51  ;;  %7212 = vmatpush.msrb.mxu2 %v7152_v36  ;;  %v7181_v51 = vld [vmem:[%s13352_s9 + $0x138] sm:$0xff] }
 0x6cf   :  { %v6976_v50 = vmul.f32 0.5, %v6975_v0  ;;  %v7168_v0 = vld [vmem:[%s13352_s9 + $0xd0] sm:$0xff]  ;;  %v13071_v36 = vld [vmem:[%s13352_s9 + $0x198] sm:$0xff] }
 0x6d0   :  { %v6994_v16 = vmul.f32 %v7858_v7, %v6993_v15  ;;  %7253 = vmatpush.msrb.mxu3 %v7168_v0  ;;  %7213 = vmatpush.msrb.mxu2 %v7151_v22  ;;  %v13007_v15 = vld [vmem:[%s13352_s9 + $0x1b8] sm:$0xff]  ;;  %v7144_v0 = vld [vmem:[%s13352_s9 + $0x10] sm:$0xff] }
 0x6d1   :  { %v6977_v18 = vsub.f32 1.5, %v6976_v50  ;;  %v7176_v22 = vld [vmem:[%s13352_s9 + $0x110] sm:$0xff] }
 0x6d2   :  { %v6995_v9 = vadd.f32 %v7858_v7, %v6994_v16 }
 0x6d3   :  { %v6978_v30 = vmul.f32 %v7856_v39, %v6977_v18  ;;  %v7185_v39 = vld [vmem:[%s13352_s9 + $0x158] sm:$0xff]  ;;  %v12960_v18 = vld [vmem:[%s13352_s9 + $0x1d0] sm:$0xff] }
 0x6d4   :  { %v12865_v33 = vsel %vm6996_vm14, %v7858_v7, %v6995_v9  ;;  %7293 = vmatpush.msra.mxu1 %v7185_v39  ;;  %v7165_v7 = vld [vmem:[%s13352_s9 + $0xb8] sm:$0xff] }
 0x6d5   :  { %v6979_v56 = vmul.f32 %v6978_v30, %v6935_v17  ;;  %v7167_v30 = vld [vmem:[%s13352_s9 + $0xc8] sm:$0xff]  ;;  %v7177_v39 = vld [vmem:[%s13352_s9 + $0x118] sm:$0xff] }
 0x6d6   :  { %7294 = vmatpush.msra.mxu1 %v7184_v37  ;;  %7254 = vmatpush.msrb.mxu3 %v7167_v30  ;;  %v7160_v37 = vld [vmem:[%s13352_s9 + $0x90] sm:$0xff] }
 0x6d7   :  { %v6981_v4 = vsel %vm6980_vm12, %v6935_v17, %v6979_v56  ;;  %v12928_v17 = vld [vmem:[%s13352_s9 + $0x1e0] sm:$0xff]  ;;  %v12975_v56 = vld [vmem:[%s13352_s9 + $0x1c8] sm:$0xff]  ;;  %v13086_v30 = vld [vmem:[%s13352_s9 + $0x190] sm:$0xff] }
 0x6d8   :  { %v12859_v53 = vsel %vm6982_vm13, %v6983_v25, %v6981_v4  ;;  %7333 = vmatpush.msra.mxu0 %v12928_v17  ;;  %7295 = vmatpush.msra.mxu1 %v7183_v29  ;;  %v7150_v4 = vld [vmem:[%s13352_s9 + $0x40] sm:$0xff] }
 0x6d9   :  { %v7018_v42 = vsel %vm6985_vm8, %v12859_v53, 0.0  ;;  %7214 = vmatpush.msrb.mxu2 %v7150_v4  ;;  %v7159_v4 = vld [vmem:[%s13352_s9 + $0x88] sm:$0xff] }
 0x6da   :  { %v7019_v54 = vadd.f32 %v7018_v42, %v7017_v26  ;;  %7334 = vmatpush.msra.mxu0 %v12943_v34  ;;  %v7166_v26 = vld [vmem:[%s13352_s9 + $0xc0] sm:$0xff] }
 0x6db   :  { %v7182_v42 = vld [vmem:[%s13352_s9 + $0x140] sm:$0xff]  ;;  %7255 = vmatpush.msrb.mxu3 %v7166_v26  ;;  %7215 = vmatpush.msrb.mxu2 %v7149_v31  ;;  %v13104_v31 = vld [vmem:[%s13352_s9 + $0x188] sm:$0xff] }
 0x6dc   :  { %7020 = vadd.xlane.f32.xlu0 %v7019_v54  ;;  %7335 = vmatpush.msra.mxu0 %v12960_v18  ;;  %v12992_v54 = vld [vmem:[%s13352_s9 + $0x1c0] sm:$0xff] }
 0x6dd   :  { %7296 = vmatpush.msra.mxu1 %v7182_v42  ;;  %7256 = vmatpush.msrb.mxu3 %v7165_v7  ;;  %v7175_v42 = vld [vmem:[%s13352_s9 + $0x108] sm:$0xff] }
 0x6de   :  { %7336 = vmatpush.msra.mxu0 %v12975_v56 }
 0x6df   :  { %7297 = vmatpush.msra.mxu1 %v7181_v51  ;;  %v7142_v51 = vld [vmem:[%s13352_s9] sm:$0xff] }
 0x6e0   :  { %7337 = vmatpush.msra.mxu0 %v12992_v54 }
 0x6e1   :  { %7298 = vmatpush.msra.mxu1 %v7180_v3 }
 0x6e2   :  { %7338 = vmatpush.msra.mxu0 %v13007_v15 }
 0x6e4   :  { %7339 = vmatpush.msra.mxu0 %v13023_v41 }
 0x6e6   :  { %7340 = vmatpush.msra.mxu0 %v13038_v38 }
 0x6e8   :  { %7341 = vmatpush.msra.mxu0 %v13054_v19 }
 0x6ea   :  { %7342 = vmatpush.msra.mxu0 %v13071_v36 }
 0x6ec   :  { %7343 = vmatpush.msra.mxu0 %v13086_v30 }
 0x6ee   :  { %7344 = vmatpush.msra.mxu0 %v13104_v31 }
 0x717   :  { %v6990_v49 = vpop.xlane.xlu0 %6989 }
 0x718   :  { %v6998_v1 = vmul.f32 %v12865_v33, %v6990_v49  ;;  %v7148_v49 = vld [vmem:[%s13352_s9 + $0x30] sm:$0xff] }
 0x719   :  { %7216 = vmatpush.msrb.mxu2 %v7148_v49  ;;  %v13401_v49 = vld [vmem:[#allocation4_spill] sm:$0xff] }
 0x71a   :  { %v12877_v59 = vadd.f32 1e-06, %v6998_v1  ;;  %v7164_v1 = vld [vmem:[%s13352_s9 + $0xb0] sm:$0xff] }
 0x71b   :  { %7257 = vmatpush.msrb.mxu3 %v7164_v1  ;;  %7217 = vmatpush.msrb.mxu2 %v7147_v58  ;;  %v13127_v1 = vld [vmem:[%s13352_s9 + $0x180] sm:$0xff] }
 0x71c   :  { %7859 = vrcp.f32 %v12877_v59  ;;  %v7011_v26 = vand.u32 2147483648, %v12877_v59  ;;  %vm7005_vm0 = vweird.f32 %v12877_v59  ;;  %v7009_v7 = vand.u32 2147483647, %v12877_v59  ;;  %7345 = vmatpush.msra.mxu0 %v13127_v1 }
 0x71d   :  { %7258 = vmatpush.msrb.mxu3 %v7163_v63  ;;  %7218 = vmatpush.msrb.mxu2 %v7146_v45 }
 0x71e   :  { %v7012_v58 = vor.u32 1.1754944e-38, %v7011_v26  ;;  %vm7010_vm2 = vcmp.eq.f32.partialorder %v7009_v7, 8.507059e+37 }
 0x71f   :  { %7259 = vmatpush.msrb.mxu3 %v7162_v2  ;;  %7219 = vmatpush.msrb.mxu2 %v7145_v62 }
 0x721   :  { %7260 = vmatpush.msrb.mxu3 %v7161_v55  ;;  %7220 = vmatpush.msrb.mxu2 %v7144_v0 }
 0x722   :  { %v12955_v50 = vpop.eup %7859 }
 0x723   :  { %v7001_v25 = vmul.f32 %v12955_v50, %v12877_v59  ;;  %vm7006_vm15 = vweird.f32 %v12955_v50  ;;  %7261 = vmatpush.msrb.mxu3 %v7160_v37  ;;  %v7174_v59 = vld [vmem:[%s13352_s9 + $0x100] sm:$0xff] }
 0x724   :  { %vm13117_vm1 = vmor %vm7005_vm0, %vm7006_vm15 }
 0x725   :  { %v7002_v16 = vsub.f32 1.0, %v7001_v25  ;;  %v7143_v25 = vld [vmem:[%s13352_s9 + $0x8] sm:$0xff]  ;;  %7262 = vmatpush.msrb.mxu3 %v7159_v4 }
 0x726   :  { %7221 = vmatpush.msrb.mxu2 %v7143_v25 }
 0x727   :  { %v7003_v14 = vmul.f32 %v12955_v50, %v7002_v16  ;;  %v7158_v16 = vld [vmem:[%s13352_s9 + $0x80] sm:$0xff] }
 0x728   :  { %7222 = vmatpush.msrb.mxu2 %v7142_v51  ;;  %7263 = vmatpush.msrb.mxu3 %v7158_v16  ;;  %v13400_v16 = vld [vmem:[#allocation7_spill] sm:$0xff] }
 0x729   :  { %v7004_v29 = vadd.f32 %v12955_v50, %v7003_v14 }
 0x72a   :  { %7626 = vmatpush.msra.mxu2 %v12882_v47 }
 0x72b   :  { %v7008_v3 = vsel %vm13117_vm1, %v12955_v50, %v7004_v29 }
 0x72c   :  { %7627 = vmatpush.msra.mxu2 %v12897_v8 }
 0x72e   :  { %7628 = vmatpush.msra.mxu2 %v12913_v13  ;;  %v7624_v13 = vld [vmem:[%s13350_s6 + $0x1] ss:$4 sm:$0xf] }
 0x730   :  { %7629 = vmatpush.msra.mxu2 %v12928_v17 }
 0x732   :  { %7630 = vmatpush.msra.mxu2 %v12943_v34 }
 0x734   :  { %7631 = vmatpush.msra.mxu2 %v12960_v18 }
 0x736   :  { %7632 = vmatpush.msra.mxu2 %v12975_v56 }
 0x738   :  { %7633 = vmatpush.msra.mxu2 %v12992_v54  ;;  %v13399_v54 = vld [vmem:[#allocation6_spill] sm:$0xff] }
 0x73a   :  { %7634 = vmatpush.msra.mxu2 %v13007_v15  ;;  %v13402_v15 = vld [vmem:[#allocation5_spill] sm:$0xff] }
 0x73c   :  { %7635 = vmatpush.msra.mxu2 %v13023_v41 }
 0x73e   :  { %7636 = vmatpush.msra.mxu2 %v13038_v38 }
 0x740   :  { %7637 = vmatpush.msra.mxu2 %v13054_v19 }
 0x742   :  { %7638 = vmatpush.msra.mxu2 %v13071_v36  ;;  %v13407_v36 = vld [vmem:[#allocation13_spill] sm:$0xff] }
 0x744   :  { %7639 = vmatpush.msra.mxu2 %v13086_v30 }
 0x746   :  { %7640 = vmatpush.msra.mxu2 %v13104_v31  ;;  %v13409_v31 = vld [vmem:[#allocation12_spill] sm:$0xff] }
 0x748   :  { %7641 = vmatpush.msra.mxu2 %v13127_v1 }
 0x74f   :  { %v7021_v9 = vpop.xlane.xlu0 %7020 }
 0x750   :  { %v7022_v44 = vmul.f32 %v7021_v9, %v12865_v33  ;;  %v7179_v33 = vld [vmem:[%s13352_s9 + $0x128] sm:$0xff] }
 0x751   :  { %7299 = vmatpush.msra.mxu1 %v7179_v33  ;;  %v7013_v33 = vsel %vm7010_vm2, %v7012_v58, %v7008_v3 }
 0x752   :  { %v13043_v28 = vadd.f32 1e-06, %v7022_v44 }
 0x753   :  { %7300 = vmatpush.msra.mxu1 %v7178_v6  ;;  %v7016_v6 = vmul.f32 %v7013_v33, %v12851_v11  ;;  %v7015_v11 = vmul.f32 %v7013_v33, %v12849_v48  ;;  %v13403_v33 = vld [vmem:[#allocation10_spill] sm:$0xff] }
 0x754   :  { %7861 = vrcp.f32 %v13043_v28  ;;  %v7035_v45 = vand.u32 2147483648, %v13043_v28  ;;  %v7033_v50 = vand.u32 2147483647, %v13043_v28  ;;  %vm7029_vm4 = vweird.f32 %v13043_v28 }
 0x755   :  { %7301 = vmatpush.msra.mxu1 %v7177_v39  ;;  %v7047_v47 = vrot.slane %v7016_v6, 7 }
 0x756   :  { %v7036_v62 = vor.u32 1.1754944e-38, %v7035_v45  ;;  %vm7034_vm6 = vcmp.eq.f32.partialorder %v7033_v50, 8.507059e+37  ;;  %v13405_v50 = vld [vmem:[#allocation8_spill] sm:$0xff] }
 0x757   :  { %7302 = vmatpush.msra.mxu1 %v7176_v22  ;;  %v7050_v17 = vsel %vm6985_vm8, %v7015_v11, %v7047_v47 }
 0x759   :  { %7303 = vmatpush.msra.mxu1 %v7175_v42 }
 0x75a   :  { %v7862_v9 = vpop.eup %7861 }
 0x75b   :  { %v7025_v44 = vmul.f32 %v7862_v9, %v13043_v28  ;;  %7304 = vmatpush.msra.mxu1 %v7174_v59  ;;  %vm7030_vm3 = vweird.f32 %v7862_v9 }
 0x75c   :  { %vm7031_vm5 = vmor %vm7029_vm4, %vm7030_vm3 }
 0x75d   :  { %v7026_v63 = vsub.f32 1.0, %v7025_v44 }
 0x75f   :  { %v7027_v2 = vmul.f32 %v7862_v9, %v7026_v63 }
 0x761   :  { %v7028_v14 = vadd.f32 %v7862_v9, %v7027_v2  ;;  %v13404_v2 = vld [vmem:[#allocation2_spill] sm:$0xff] }
 0x763   :  { %v7032_v55 = vsel %vm7031_vm5, %v7862_v9, %v7028_v14  ;;  %v13406_v14 = vld [vmem:[#allocation9_spill] sm:$0xff] }
 0x764   :  { %v7037_v39 = vsel %vm7034_vm6, %v7036_v62, %v7032_v55 }
 0x765   :  { %v7039_v0 = vmul.f32 %v7037_v39, %v12857_v24  ;;  %v7040_v37 = vmul.f32 %v7037_v39, %v12859_v53  ;;  %v7625_v53 = vld [vmem:[%s13350_s6 + $0x2] ss:$4 sm:$0xf] }
 0x766   :  { %v13157_v29 = vperm.slane %v7625_v53, 0  ;;  %v13159_v25 = vperm.slane %v7625_v53, 1  ;;  %v13161_v4 = vperm.slane %v7625_v53, 2  ;;  %v13163_v18 = vperm.slane %v7625_v53, 3 }
 0x767   :  { %v7048_v8 = vrot.slane %v7039_v0, 6  ;;  %v7049_v28 = vrot.slane %v7040_v37, 5  ;;  %v13408_v37 = vld [vmem:[#allocation3_spill] sm:$0xff] }
 0x769   :  { %v7052_v22 = vsel %vm7051_vm7, %v7048_v8, %v7049_v28 }
 0x76a   :  { %v7054_v24 = vsel %vm7053_vm9, %v7050_v17, %v7052_v22 }
 0x76b   :  { %v7056_v48 = vmul.f32 %v7624_v13, %v7054_v24 }
 0x76d   :  { %v7057_v34 = vadd.f32 1.0, %v7056_v48  ;;  %v13410_v48 = vld [vmem:[#allocation14_spill] sm:$0xff] }
 0x76f   :  { %v13166_v26 = vperm.slane %v7057_v34, 0  ;;  %v13168_v56 = vperm.slane %v7057_v34, 1  ;;  %v13170_v42 = vperm.slane %v7057_v34, 2  ;;  %v13172_v7 = vperm.slane %v7057_v34, 3 }
 0x771   :  { %v7067_v51 = vmul.f32 %v13166_v26, %v13399_v54  ;;  %v7068_v9 = vmul.f32 %v13168_v56, %v13400_v16  ;;  %v7069_v59 = vmul.f32 %v13170_v42, %v13401_v49  ;;  %v7070_v3 = vmul.f32 %v13172_v7, %v13402_v15  ;;  %v13411_v54 = vld [vmem:[#allocation15_spill] sm:$0xff] }
 0x772   :  { %v7071_v45 = vmul.f32 %v13166_v26, %v13403_v33  ;;  %v7072_v38 = vmul.f32 %v13168_v56, %v13404_v2  ;;  %v7073_v6 = vmul.f32 %v13170_v42, %v13405_v50  ;;  %v7074_v62 = vmul.f32 %v13172_v7, %v13406_v14 }
 0x773   :  { %v7110_v44 = vadd.f32 %v13157_v29, %v7067_v51  ;;  %v7111_v58 = vadd.f32 %v13159_v25, %v7068_v9  ;;  %v7112_v41 = vadd.f32 %v13161_v4, %v7069_v59  ;;  %v7113_v63 = vadd.f32 %v13163_v18, %v7070_v3  ;;  %v13413_v3 = vld [vmem:[#allocation16_spill] sm:$0xff] }
 0x774   :  { %v7114_v19 = vadd.f32 %v13157_v29, %v7071_v45  ;;  %v7115_v55 = vadd.f32 %v13159_v25, %v7072_v38  ;;  %v7116_v39 = vadd.f32 %v13161_v4, %v7073_v6  ;;  %v7117_v47 = vadd.f32 %v13163_v18, %v7074_v62 }
 0x775   :  { %7223 = vmatmul.f32.vlgmr.msrb.gmra.mxu2 %v7110_v44  ;;  %7264 = vmatmul.f32.vlgmr.msrb.gmra.mxu3 %v7111_v58  ;;  %v7075_v0 = vmul.f32 %v13166_v26, %v13407_v36  ;;  %v7076_v30 = vmul.f32 %v13168_v56, %v11549_v43  ;;  %v7077_v11 = vmul.f32 %v13170_v42, %v13408_v37  ;;  %v13414_v58 = vld [vmem:[#allocation17_spill] sm:$0xff] }
 0x776   :  { %7305 = vmatmul.f32.vlgmr.msra.gmra.mxu1 %v7112_v41  ;;  %7346 = vmatmul.f32.vlgmr.msra.gmra.mxu0 %v7113_v63  ;;  %v7078_v8 = vmul.f32 %v13172_v7, %v13409_v31  ;;  %v7094_v28 = vmul.f32 %v13172_v7, %v12285_v23  ;;  %v7098_v13 = vmul.f32 %v13172_v7, %v12344_v52 }
 0x777   :  { %v7118_v43 = vadd.f32 %v13157_v29, %v7075_v0  ;;  %v7119_v1 = vadd.f32 %v13159_v25, %v7076_v30  ;;  %v7120_v24 = vadd.f32 %v13161_v4, %v7077_v11  ;;  %v7079_v23 = vmul.f32 %v13166_v26, %v11593_v27  ;;  %v13412_v27 = vld [vmem:[#allocation18_spill] sm:$0xff] }
 0x778   :  { %v13218_v17 = vadd.f32 %v13163_v18, %v7094_v28  ;;  %v13221_v22 = vadd.f32 %v13163_v18, %v7098_v13  ;;  %v7121_v53 = vadd.f32 %v13163_v18, %v7078_v8  ;;  %v7080_v52 = vmul.f32 %v13168_v56, %v11658_v40  ;;  %v7371_v30 = vld [vmem:[%s13353_s1] sm:$0xff] }
 0x779   :  { %v7081_v34 = vmul.f32 %v13170_v42, %v13410_v48  ;;  %v7082_v51 = vmul.f32 %v13172_v7, %v13411_v54  ;;  %v7122_v16 = vadd.f32 %v13157_v29, %v7079_v23  ;;  %v7083_v40 = vmul.f32 %v13166_v26, %v13412_v27 }
 0x77a   :  { %v7123_v9 = vadd.f32 %v13159_v25, %v7080_v52  ;;  %v7084_v15 = vmul.f32 %v13168_v56, %v12384_v60  ;;  %v7085_v44 = vmul.f32 %v13170_v42, %v13413_v3  ;;  %v7086_v41 = vmul.f32 %v13172_v7, %v13414_v58  ;;  %v7374_v58 = vld [vmem:[%s13353_s1 + $0x18] sm:$0xff] }
 0x77b   :  { %v7124_v49 = vadd.f32 %v13161_v4, %v7081_v34  ;;  %v7125_v59 = vadd.f32 %v13163_v18, %v7082_v51  ;;  %v7126_v63 = vadd.f32 %v13157_v29, %v7083_v40  ;;  %v7087_v60 = vmul.f32 %v13166_v26, %v12231_v46  ;;  %v7373_v51 = vld [vmem:[%s13353_s1 + $0x10] sm:$0xff] }
 0x77c   :  { %v7127_v33 = vadd.f32 %v13159_v25, %v7084_v15  ;;  %v7128_v45 = vadd.f32 %v13161_v4, %v7085_v44  ;;  %v7129_v2 = vadd.f32 %v13163_v18, %v7086_v41  ;;  %v7088_v38 = vmul.f32 %v13168_v56, %v12415_v61 }
 0x77d   :  { %7226 = vmatmul.f32.gmra.mxu2 %v7114_v19  ;;  %7267 = vmatmul.f32.gmra.mxu3 %v7115_v55  ;;  %v7089_v50 = vmul.f32 %v13170_v42, %v11943_v57  ;;  %v7090_v6 = vmul.f32 %v13172_v7, %v12114_v5  ;;  %v7130_v14 = vadd.f32 %v13157_v29, %v7087_v60 }
 0x77e   :  { %7308 = vmatmul.f32.gmra.mxu1 %v7116_v39  ;;  %7349 = vmatmul.f32.gmra.mxu0 %v7117_v47  ;;  %v7131_v62 = vadd.f32 %v13159_v25, %v7088_v38  ;;  %v7091_v46 = vmul.f32 %v13166_v26, %v12311_v35  ;;  %v7092_v57 = vmul.f32 %v13168_v56, %v12432_v32 }
 0x77f   :  { %v7132_v19 = vadd.f32 %v13161_v4, %v7089_v50  ;;  %v7133_v55 = vadd.f32 %v13163_v18, %v7090_v6  ;;  %v7093_v5 = vmul.f32 %v13170_v42, %v12136_v21  ;;  %v7095_v18 = vmul.f32 %v13166_v26, %v12374_v12 }
 0x780   :  { %v7134_v61 = vadd.f32 %v13157_v29, %v7091_v46  ;;  %v7135_v7 = vadd.f32 %v13159_v25, %v7092_v57  ;;  %v7096_v35 = vmul.f32 %v13168_v56, %v12455_v10  ;;  %v7097_v32 = vmul.f32 %v13170_v42, %v12247_v20  ;;  %v13286_v10 = vld [vmem:[%s13345_s3 + $0x3] ss:$0 sm:$0xff] }
 0x781   :  { %v7136_v39 = vadd.f32 %v13161_v4, %v7093_v5  ;;  %v7138_v21 = vadd.f32 %v13157_v29, %v7095_v18  ;;  %v7376_v18 = vld [vmem:[%s13353_s1 + $0x28] sm:$0xff] }
 0x782   :  { %v7139_v47 = vadd.f32 %v13159_v25, %v7096_v35  ;;  %v7140_v36 = vadd.f32 %v13161_v4, %v7097_v32 }
 0x785   :  { %7229 = vmatmul.f32.gmra.mxu2 %v7118_v43  ;;  %7270 = vmatmul.f32.gmra.mxu3 %v7119_v1  ;;  %v7372_v43 = vld [vmem:[%s13353_s1 + $0x8] sm:$0xff] }
 0x786   :  { %7311 = vmatmul.f32.gmra.mxu1 %v7120_v24  ;;  %7352 = vmatmul.f32.gmra.mxu0 %v7121_v53 }
 0x78d   :  { %7232 = vmatmul.f32.gmra.mxu2 %v7122_v16  ;;  %7273 = vmatmul.f32.gmra.mxu3 %v7123_v9 }
 0x78e   :  { %7314 = vmatmul.f32.gmra.mxu1 %v7124_v49  ;;  %7355 = vmatmul.f32.gmra.mxu0 %v7125_v59 }
 0x795   :  { %7235 = vmatmul.f32.gmra.mxu2 %v7126_v63  ;;  %7276 = vmatmul.f32.gmra.mxu3 %v7127_v33 }
 0x796   :  { %7317 = vmatmul.f32.gmra.mxu1 %v7128_v45  ;;  %7358 = vmatmul.f32.gmra.mxu0 %v7129_v2 }
 0x79d   :  { %7238 = vmatmul.f32.gmra.mxu2 %v7130_v14  ;;  %7279 = vmatmul.f32.gmra.mxu3 %v7131_v62  ;;  %v7375_v14 = vld [vmem:[%s13353_s1 + $0x20] sm:$0xff] }
 0x79e   :  { %7320 = vmatmul.f32.gmra.mxu1 %v7132_v19  ;;  %7361 = vmatmul.f32.gmra.mxu0 %v7133_v55 }
 0x7a5   :  { %7241 = vmatmul.f32.gmra.mxu2 %v7134_v61  ;;  %7282 = vmatmul.f32.gmra.mxu3 %v7135_v7 }
 0x7a6   :  { %7323 = vmatmul.f32.gmra.mxu1 %v7136_v39 }
 0x7ad   :  { %7244 = vmatmul.f32.gmra.mxu2 %v7138_v21  ;;  %7285 = vmatmul.f32.gmra.mxu3 %v7139_v47 }
 0x7ae   :  { %7326 = vmatmul.f32.gmra.mxu1 %v7140_v36 }
 0x7b5   :  { %7364 = vmatmul.f32.vlgmr.msra.gmra.mxu2 %v13218_v17 }
 0x7bd   :  { %7367 = vmatmul.f32.gmra.mxu2 %v13221_v22 }
 0x7f3   :  { %v7306_v12 = vpop.f32.mrf.mxu1  ;;  %v7347_v26 = vpop.f32.mrf.mxu0 }
 0x7f8   :  { %v7224_v20 = vpop.f32.mrf.mxu2  ;;  %v7265_v29 = vpop.f32.mrf.mxu3 }
 0x7f9   :  { %v7225_v25 = vadd.f32 %v13286_v10, %v7224_v20 }
 0x7fb   :  { %v7266_v56 = vadd.f32 %v7265_v29, %v7225_v25  ;;  %v7309_v4 = vpop.f32.mrf.mxu1  ;;  %v7350_v0 = vpop.f32.mrf.mxu0 }
 0x7fd   :  { %v7307_v42 = vadd.f32 %v7306_v12, %v7266_v56 }
 0x7ff   :  { %v7348_v37 = vadd.f32 %v7347_v26, %v7307_v42 }
 0x800   :  { %v7227_v11 = vpop.f32.mrf.mxu2  ;;  %v7268_v31 = vpop.f32.mrf.mxu3 }
 0x801   :  { %v7379_v8 = vadd.f32 %v7371_v30, %v7348_v37  ;;  %v7228_v28 = vadd.f32 %v13286_v10, %v7227_v11 }
 0x803   :  { %7387 = vst [vmem:[%s13354_s10] sm:$0xff] %v7379_v8  ;;  %v7269_v13 = vadd.f32 %v7268_v31, %v7228_v28  ;;  %v7312_v22 = vpop.f32.mrf.mxu1  ;;  %v7353_v24 = vpop.f32.mrf.mxu0 }
 0x805   :  { %v7310_v17 = vadd.f32 %v7309_v4, %v7269_v13  ;;  %v7377_v4 = vld [vmem:[%s13353_s1 + $0x30] sm:$0xff] }
 0x807   :  { %v7351_v1 = vadd.f32 %v7350_v0, %v7310_v17 }
 0x808   :  { %v7230_v53 = vpop.f32.mrf.mxu2  ;;  %v7271_v23 = vpop.f32.mrf.mxu3 }
 0x809   :  { %v7380_v52 = vadd.f32 %v7372_v43, %v7351_v1  ;;  %v7231_v48 = vadd.f32 %v13286_v10, %v7230_v53 }
 0x80b   :  { %7388 = vst [vmem:[%s13354_s10 + $0x8] sm:$0xff] %v7380_v52  ;;  %v7272_v34 = vadd.f32 %v7271_v23, %v7231_v48  ;;  %v7315_v9 = vpop.f32.mrf.mxu1  ;;  %v7356_v15 = vpop.f32.mrf.mxu0 }
 0x80d   :  { %v7313_v54 = vadd.f32 %v7312_v22, %v7272_v34 }
 0x80f   :  { %v7354_v16 = vadd.f32 %v7353_v24, %v7313_v54 }
 0x810   :  { %v7233_v49 = vpop.f32.mrf.mxu2  ;;  %v7274_v59 = vpop.f32.mrf.mxu3 }
 0x811   :  { %v7381_v27 = vadd.f32 %v7373_v51, %v7354_v16  ;;  %v7234_v40 = vadd.f32 %v13286_v10, %v7233_v49 }
 0x813   :  { %7389 = vst [vmem:[%s13354_s10 + $0x10] sm:$0xff] %v7381_v27  ;;  %v7275_v3 = vadd.f32 %v7274_v59, %v7234_v40  ;;  %v7318_v60 = vpop.f32.mrf.mxu1  ;;  %v7359_v50 = vpop.f32.mrf.mxu0 }
 0x815   :  { %v7316_v44 = vadd.f32 %v7315_v9, %v7275_v3 }
 0x817   :  { %v7357_v41 = vadd.f32 %v7356_v15, %v7316_v44 }
 0x818   :  { %v7236_v63 = vpop.f32.mrf.mxu2  ;;  %v7277_v33 = vpop.f32.mrf.mxu3 }
 0x819   :  { %v7382_v45 = vadd.f32 %v7374_v58, %v7357_v41  ;;  %v7237_v2 = vadd.f32 %v13286_v10, %v7236_v63 }
 0x81b   :  { %7390 = vst [vmem:[%s13354_s10 + $0x18] sm:$0xff] %v7382_v45  ;;  %v7278_v38 = vadd.f32 %v7277_v33, %v7237_v2  ;;  %v7321_v61 = vpop.f32.mrf.mxu1  ;;  %v7362_v39 = vpop.f32.mrf.mxu0 }
 0x81d   :  { %v7319_v6 = vadd.f32 %v7318_v60, %v7278_v38 }
 0x81f   :  { %v7360_v62 = vadd.f32 %v7359_v50, %v7319_v6 }
 0x820   :  { %v7239_v19 = vpop.f32.mrf.mxu2  ;;  %v7280_v57 = vpop.f32.mrf.mxu3 }
 0x821   :  { %v7383_v55 = vadd.f32 %v7375_v14, %v7360_v62  ;;  %v7240_v46 = vadd.f32 %v13286_v10, %v7239_v19 }
 0x823   :  { %7391 = vst [vmem:[%s13354_s10 + $0x20] sm:$0xff] %v7383_v55  ;;  %v7281_v5 = vadd.f32 %v7280_v57, %v7240_v46  ;;  %v7324_v20 = vpop.f32.mrf.mxu1 }
 0x825   :  { %v7322_v7 = vadd.f32 %v7321_v61, %v7281_v5 }
 0x827   :  { %v7363_v35 = vadd.f32 %v7362_v39, %v7322_v7 }
 0x828   :  { %v7242_v32 = vpop.f32.mrf.mxu2  ;;  %v7283_v36 = vpop.f32.mrf.mxu3 }
 0x829   :  { %v7384_v21 = vadd.f32 %v7376_v18, %v7363_v35  ;;  %v7243_v47 = vadd.f32 %v13286_v10, %v7242_v32 }
 0x82b   :  { %7392 = vst [vmem:[%s13354_s10 + $0x28] sm:$0xff] %v7384_v21  ;;  %v7284_v26 = vadd.f32 %v7283_v36, %v7243_v47  ;;  %v7327_v11 = vpop.f32.mrf.mxu1 }
 0x82d   :  { %v7325_v25 = vadd.f32 %v7324_v20, %v7284_v26 }
 0x830   :  { %v7245_v12 = vpop.f32.mrf.mxu2  ;;  %v7286_v0 = vpop.f32.mrf.mxu3 }
 0x831   :  { %v7246_v29 = vadd.f32 %v13286_v10, %v7245_v12  ;;  %v7378_v10 = vld [vmem:[%s13353_s1 + $0x38] sm:$0xff] }
 0x833   :  { %v7287_v30 = vadd.f32 %v7286_v0, %v7246_v29 }
 0x835   :  { %v7328_v31 = vadd.f32 %v7327_v11, %v7287_v30 }
 0x838   :  { %v7365_v56 = vpop.f32.mrf.mxu2 }
 0x839   :  { %v7366_v42 = vadd.f32 %v7365_v56, %v7325_v25 }
 0x83b   :  { %v7385_v37 = vadd.f32 %v7377_v4, %v7366_v42 }
 0x83d   :  { %7393 = vst [vmem:[%s13354_s10 + $0x30] sm:$0xff] %v7385_v37 }
 0x840   :  { %v7368_v8 = vpop.f32.mrf.mxu2 }
 0x841   :  { %v7369_v28 = vadd.f32 %v7368_v8, %v7328_v31 }
 0x843   :  { %v7386_v13 = vadd.f32 %v7378_v10, %v7369_v28 }
 0x845   :  { %7394 = vst [vmem:[%s13354_s10 + $0x38] sm:$0xff] %v7386_v13 }

</bundles_post_ra>
